<compile_context>
chip_gen: v7x
topology: tpu7x:2x2x1
jax: 0.10.0
libtpu: 0.0.40
codegen_flags: <defaults>
</compile_context>

<pallas_src>
import functools

import jax
import jax.numpy as jnp
from jax.experimental import pallas as pl
from jax.experimental.pallas import tpu as pltpu


# ---------------------------------------------------------------------------
# helpers
# ---------------------------------------------------------------------------
def _round_up(x, m):
    return ((x + m - 1) // m) * m


def _cparams(dimension_semantics):
    return pltpu.CompilerParams(
        dimension_semantics=dimension_semantics,
        vmem_limit_bytes=48 * 1024 * 1024,   # headroom even on v7x (64 MiB)
    )


# ---------------------------------------------------------------------------
# Tiled MXU matmul (+ bias): bf16 operands, f32 VMEM accumulator
# ---------------------------------------------------------------------------
def _matmul_kernel(a_ref, b_ref, bias_ref, o_ref, acc_ref):
    @pl.when(pl.program_id(2) == 0)
    def _init():
        acc_ref[...] = jnp.zeros_like(acc_ref)

    acc_ref[...] += jnp.dot(a_ref[...], b_ref[...],
                            preferred_element_type=jnp.float32)

    @pl.when(pl.program_id(2) == pl.num_programs(2) - 1)
    def _finalize():
        o_ref[...] = acc_ref[...] + bias_ref[...]


def pallas_matmul(a, b, bias=None):
    """(M,K) @ (K,N) + bias -> f32 (M,N); MXU inputs cast to bf16."""
    M, K = a.shape
    K2, N = b.shape
    assert K == K2

    # K: pad to a multiple of 128, pick the largest tile (<=1024) dividing it
    # exactly so no K work is wasted.
    Kp = _round_up(K, 128)
    qk = Kp // 128
    tk = 128 * max(d for d in range(1, qk + 1) if qk % d == 0 and 128 * d <= 1024)
    # M: bf16 sublanes want multiples of 16; tile at 256 rows.
    if M > 256:
        Mp = _round_up(M, 256)
        tm = 256
    else:
        Mp = _round_up(M, 16)
        tm = Mp
    # N: lane-dense multiples of 128 (unmasked vector stores).
    Np = _round_up(N, 128)
    qn = Np // 128
    tn = 128 * max(d for d in range(1, qn + 1) if qn % d == 0 and 128 * d <= 512)

    a_p = jnp.pad(a, ((0, Mp - M), (0, Kp - K))).astype(jnp.bfloat16)
    b_p = jnp.pad(b, ((0, Kp - K), (0, Np - N))).astype(jnp.bfloat16)
    if bias is None:
        bias_p = jnp.zeros((1, Np), jnp.float32)
    else:
        bias_p = jnp.pad(bias.astype(jnp.float32), (0, Np - N)).reshape(1, Np)

    grid = (Mp // tm, Np // tn, Kp // tk)
    out = pl.pallas_call(
        _matmul_kernel,
        out_shape=jax.ShapeDtypeStruct((Mp, Np), jnp.float32),
        grid_spec=pltpu.PrefetchScalarGridSpec(
            num_scalar_prefetch=0,
            grid=grid,
            in_specs=[
                pl.BlockSpec((tm, tk), lambda i, j, k: (i, k)),
                pl.BlockSpec((tk, tn), lambda i, j, k: (k, j)),
                pl.BlockSpec((1, tn), lambda i, j, k: (0, j)),
            ],
            out_specs=pl.BlockSpec((tm, tn), lambda i, j, k: (i, j)),
            scratch_shapes=[pltpu.VMEM((tm, tn), jnp.float32)],
        ),
        compiler_params=_cparams(("parallel", "parallel", "arbitrary")),
    )(a_p, b_p, bias_p)
    return out[:M, :N]


# ---------------------------------------------------------------------------
# BatchNorm (batch statistics) fused with ReLU / residual add
# ---------------------------------------------------------------------------
def _bn_stats_kernel(x_ref, sum_ref, sq_ref):
    @pl.when(pl.program_id(0) == 0)
    def _init():
        sum_ref[...] = jnp.zeros_like(sum_ref)
        sq_ref[...] = jnp.zeros_like(sq_ref)

    x = x_ref[...].astype(jnp.float32)
    sum_ref[...] += jnp.sum(x, axis=0, keepdims=True)
    sq_ref[...] += jnp.sum(x * x, axis=0, keepdims=True)


def _bn_apply_kernel(x_ref, scale_ref, shift_ref, o_ref, *, relu):
    y = x_ref[...].astype(jnp.float32) * scale_ref[...] + shift_ref[...]
    if relu:
        y = jnp.maximum(y, 0.0)
    o_ref[...] = y.astype(o_ref.dtype)


def _bn_apply_res_kernel(x_ref, res_ref, scale_ref, shift_ref, o_ref):
    y = (x_ref[...].astype(jnp.float32) * scale_ref[...] + shift_ref[...]
         + res_ref[...].astype(jnp.float32))
    o_ref[...] = jnp.maximum(y, 0.0).astype(o_ref.dtype)


def _row_tiles(R):
    if R > 512:
        Rp = _round_up(R, 512)
        return Rp, 512
    Rp = _round_up(R, 16)
    return Rp, Rp


def pallas_batchnorm(x2d, gamma, beta, *, relu, residual=None,
                     out_dtype=jnp.bfloat16, eps=1e-5):
    """Training-mode BatchNorm2d on the flattened (N*H*W, C) view.

    Fuses ReLU and (optionally) the residual add of a BasicBlock into the
    normalization kernel.  Outputs bf16 (feeds the next conv's MXU matmul).
    """
    R, C = x2d.shape
    Rp, tr = _row_tiles(R)
    xp = jnp.pad(x2d, ((0, Rp - R), (0, 0)))

    # pass 1: per-channel sum / sum-of-squares (single read of the activation)
    s, sq = pl.pallas_call(
        _bn_stats_kernel,
        out_shape=(jax.ShapeDtypeStruct((1, C), jnp.float32),
                   jax.ShapeDtypeStruct((1, C), jnp.float32)),
        grid_spec=pltpu.PrefetchScalarGridSpec(
            num_scalar_prefetch=0,
            grid=(Rp // tr,),
            in_specs=[pl.BlockSpec((tr, C), lambda i: (i, 0))],
            out_specs=(pl.BlockSpec((1, C), lambda i: (0, 0)),
                       pl.BlockSpec((1, C), lambda i: (0, 0))),
        ),
        compiler_params=_cparams(("arbitrary",)),
    )(xp)

    mean = s / R
    var = jnp.maximum(sq / R - mean * mean, 0.0)     # biased variance, one pass
    scale = gamma.reshape(1, C).astype(jnp.float32) * jax.lax.rsqrt(var + eps)
    shift = beta.reshape(1, C).astype(jnp.float32) - mean * scale

    # pass 2: normalize (+ residual) (+ ReLU)
    if residual is None:
        kernel = functools.partial(_bn_apply_kernel, relu=relu)
        operands = (xp, scale, shift)
        in_specs = [pl.BlockSpec((tr, C), lambda i: (i, 0)),
                    pl.BlockSpec((1, C), lambda i: (0, 0)),
                    pl.BlockSpec((1, C), lambda i: (0, 0))]
    else:
        resp = jnp.pad(residual, ((0, Rp - R), (0, 0)))
        kernel = _bn_apply_res_kernel
        operands = (xp, resp, scale, shift)
        in_specs = [pl.BlockSpec((tr, C), lambda i: (i, 0)),
                    pl.BlockSpec((tr, C), lambda i: (i, 0)),
                    pl.BlockSpec((1, C), lambda i: (0, 0)),
                    pl.BlockSpec((1, C), lambda i: (0, 0))]

    out = pl.pallas_call(
        kernel,
        out_shape=jax.ShapeDtypeStruct((Rp, C), out_dtype),
        grid_spec=pltpu.PrefetchScalarGridSpec(
            num_scalar_prefetch=0,
            grid=(Rp // tr,),
            in_specs=in_specs,
            out_specs=pl.BlockSpec((tr, C), lambda i: (i, 0)),
        ),
        compiler_params=_cparams(("parallel",)),
    )(*operands)
    return out[:R]


# ---------------------------------------------------------------------------
# 3x3 / stride-2 / pad-1 max pool: single kernel on an even/odd packed view
# ---------------------------------------------------------------------------
def _maxpool_kernel(x_ref, o_ref):
    _, OH, OW, C = o_ref.shape
    x = x_ref[0]                       # (OH+1, 2, OW+1, 2*C)
    he = x[:, 0]                       # even padded rows   (OH+1, OW+1, 2C)
    ho = x[:, 1]                       # odd  padded rows   (OH+1, OW+1, 2C)

    def wmax(rows):                    # rows: (OH, OW+1, 2C) -> (OH, OW, C)
        e = rows[:, :, :C]             # even padded cols
        o = rows[:, :, C:]             # odd  padded cols
        return jnp.maximum(jnp.maximum(e[:, :OW, :], o[:, :OW, :]),
                           e[:, 1:OW + 1, :])

    m = jnp.maximum(jnp.maximum(wmax(he[:OH]), wmax(ho[:OH])),
                    wmax(he[1:OH + 1]))
    o_ref[0] = m


def maxpool2d_3x3_s2(x):
    """Max pool k=3, stride=2, pad=1 on NHWC (H, W even)."""
    N, H, W, C = x.shape
    OH, OW = H // 2, W // 2
    neg = jnp.finfo(x.dtype).min
    xp = jnp.pad(x, ((0, 0), (1, 1), (1, 1), (0, 0)), constant_values=neg)
    # free (row-major) repack: parity of H -> dim 2, parity of W -> lanes
    xp = xp.reshape(N, OH + 1, 2, OW + 1, 2 * C)
    return pl.pallas_call(
        _maxpool_kernel,
        out_shape=jax.ShapeDtypeStruct((N, OH, OW, C), x.dtype),
        grid_spec=pltpu.PrefetchScalarGridSpec(
            num_scalar_prefetch=0,
            grid=(N,),
            in_specs=[pl.BlockSpec((1, OH + 1, 2, OW + 1, 2 * C),
                                   lambda n: (n, 0, 0, 0, 0))],
            out_specs=pl.BlockSpec((1, OH, OW, C), lambda n: (n, 0, 0, 0)),
        ),
        compiler_params=_cparams(("parallel",)),
    )(xp)


# ---------------------------------------------------------------------------
# Global average pool
# ---------------------------------------------------------------------------
def _avgpool_kernel(x_ref, o_ref):
    x = x_ref[...].astype(jnp.float32)               # (1, HW, C)
    o_ref[...] = jnp.mean(x, axis=1, keepdims=True)  # (1, 1, C)


def pallas_global_avgpool(x_nhwc):
    N, H, W, C = x_nhwc.shape
    x = x_nhwc.reshape(N, H * W, C)
    out = pl.pallas_call(
        _avgpool_kernel,
        out_shape=jax.ShapeDtypeStruct((N, 1, C), jnp.float32),
        grid_spec=pltpu.PrefetchScalarGridSpec(
            num_scalar_prefetch=0,
            grid=(N,),
            in_specs=[pl.BlockSpec((1, H * W, C), lambda n: (n, 0, 0))],
            out_specs=pl.BlockSpec((1, 1, C), lambda n: (n, 0, 0)),
        ),
        compiler_params=_cparams(("parallel",)),
    )(x)
    return out.reshape(N, C)


# ---------------------------------------------------------------------------
# Convolutions (im2col in bf16 + tiled MXU matmul; 1x1 convs skip im2col)
# ---------------------------------------------------------------------------
def extract_patches(x, kh, kw, stride, pad):
    # x: (N, H, W, C) -> (N*OH*OW, KH*KW*C) ordered (kh, kw, cin) like weights
    N, H, W, C = x.shape
    xp = jnp.pad(x, ((0, 0), (pad, pad), (pad, pad), (0, 0)))
    OH = (H + 2 * pad - kh) // stride + 1
    OW = (W + 2 * pad - kw) // stride + 1
    cols = []
    for i in range(kh):
        for j in range(kw):
            cols.append(jax.lax.slice(
                xp, (0, i, j, 0),
                (N, i + (OH - 1) * stride + 1, j + (OW - 1) * stride + 1, C),
                (1, stride, stride, 1)))
    p = jnp.stack(cols, axis=3)                      # (N, OH, OW, KH*KW, C)
    return p.reshape(N * OH * OW, kh * kw * C), OH, OW


def conv2d(x, w, stride, pad):
    """x: (N,H,W,Cin); w: (KH,KW,Cin,Cout) -> f32 (N,OH,OW,Cout)."""
    KH, KW, Cin, Cout = w.shape
    N = x.shape[0]
    xb = x.astype(jnp.bfloat16)          # bf16 patches: half the im2col traffic
    if KH == 1 and KW == 1 and pad == 0:
        if stride > 1:
            xb = xb[:, ::stride, ::stride, :]
        OH, OW = xb.shape[1], xb.shape[2]
        a = xb.reshape(N * OH * OW, Cin)
    else:
        # TODO(synk): replace im2col with a direct tap-accumulating conv kernel
        # (K-taps as a grid axis over the padded NHWC activation) to remove the
        # remaining KxK patch materialization in HBM.
        a, OH, OW = extract_patches(xb, KH, KW, stride, pad)
    out = pallas_matmul(a, w.reshape(KH * KW * Cin, Cout))
    return out.reshape(N, OH, OW, Cout)


# ---------------------------------------------------------------------------
# ResNet-18 wiring
# ---------------------------------------------------------------------------
def basic_block(x, blk):
    stride = blk["stride"]
    cin = x.shape[-1]
    out = conv2d(x, blk["conv1_w"], stride, 1)                    # f32
    N, OH, OW, Cout = out.shape
    h = pallas_batchnorm(out.reshape(-1, Cout), blk["bn1_g"], blk["bn1_b"],
                         relu=True)                               # bf16
    out = conv2d(h.reshape(N, OH, OW, Cout), blk["conv2_w"], 1, 1)
    if "down_w" in blk:
        idn = conv2d(x, blk["down_w"], stride, 0)
        idn2d = pallas_batchnorm(idn.reshape(-1, Cout), blk["down_bn_g"],
                                 blk["down_bn_b"], relu=False)    # bf16
    else:
        idn2d = x.reshape(-1, cin)                                # bf16
    # bn2 + residual add + ReLU fused in a single kernel
    y2d = pallas_batchnorm(out.reshape(-1, Cout), blk["bn2_g"], blk["bn2_b"],
                           relu=True, residual=idn2d)
    return y2d.reshape(N, OH, OW, Cout)


def classification_forward(x_nchw, params):
    """Classification.forward == resnet18(x). Input: NCHW float32."""
    x = jnp.transpose(x_nchw, (0, 2, 3, 1)).astype(jnp.float32)   # -> NHWC
    # stem: conv7x7/s2 + BN + ReLU + maxpool3x3/s2
    x = conv2d(x, params["conv1_w"], stride=2, pad=3)
    N, H, W, C = x.shape
    x = pallas_batchnorm(x.reshape(-1, C), params["bn1_g"], params["bn1_b"],
                         relu=True).reshape(N, H, W, C)           # bf16
    x = maxpool2d_3x3_s2(x)
    # 4 stages x 2 basic blocks
    for stage in params["layers"]:
        for blk in stage:
            x = basic_block(x, blk)
    # global average pool + fc
    pooled = pallas_global_avgpool(x)                             # (N, 512) f32
    logits = pallas_matmul(pooled, params["fc_w"], bias=params["fc_b"])
    return logits


# ---------------------------------------------------------------------------
# Deterministic parameter init (ResNet-18 shapes)
# ---------------------------------------------------------------------------
def init_params(key, num_classes=10):
    keys = iter(jax.random.split(key, 64))

    def conv_init(k, kh, kw, cin, cout):
        fan_in = kh * kw * cin
        return jax.random.normal(k, (kh, kw, cin, cout), jnp.float32) * jnp.sqrt(
            2.0 / fan_in)

    params = {
        "conv1_w": conv_init(next(keys), 7, 7, 3, 64),
        "bn1_g": jnp.ones((64,), jnp.float32),
        "bn1_b": jnp.zeros((64,), jnp.float32),
    }
    stage_defs = [(64, 64, 1), (64, 128, 2), (128, 256, 2), (256, 512, 2)]
    layers = []
    for cin, cout, stride in stage_defs:
        blocks = []
        for b in range(2):
            s = stride if b == 0 else 1
            in_c = cin if b == 0 else cout
            blk = {
                "stride": s,
                "conv1_w": conv_init(next(keys), 3, 3, in_c, cout),
                "bn1_g": jnp.ones((cout,), jnp.float32),
                "bn1_b": jnp.zeros((cout,), jnp.float32),
                "conv2_w": conv_init(next(keys), 3, 3, cout, cout),
                "bn2_g": jnp.ones((cout,), jnp.float32),
                "bn2_b": jnp.zeros((cout,), jnp.float32),
            }
            if s != 1 or in_c != cout:
                blk["down_w"] = conv_init(next(keys), 1, 1, in_c, cout)
                blk["down_bn_g"] = jnp.ones((cout,), jnp.float32)
                blk["down_bn_b"] = jnp.zeros((cout,), jnp.float32)
            blocks.append(blk)
        layers.append(blocks)
    params["layers"] = layers
    params["fc_w"] = jax.random.normal(next(keys), (512, num_classes),
                                       jnp.float32) * 0.02
    params["fc_b"] = jnp.zeros((num_classes,), jnp.float32)
    return params


if __name__ == "__main__":
    key = jax.random.PRNGKey(0)
    pkey, xkey = jax.random.split(key)
    params = init_params(pkey, num_classes=10)
    # Small ResNet-compatible input: batch=2, 3 channels, 32x32 spatial (NCHW).
    x = jax.random.normal(xkey, (2, 3, 32, 32), jnp.float32)

    fwd = jax.jit(lambda inp: classification_forward(inp, params))
    logits = jax.block_until_ready(fwd(x))
    assert logits.shape == (2, 10) and bool(jnp.all(jnp.isfinite(logits)))
    print("KERNEL_OK")
</pallas_src>

<mosaic_0001>
module attributes {stable_mosaic.version = 11 : i64} {
  func.func @_bn_stats_kernel(%arg0: i32, %arg1: memref<512x64xf32, #tpu.memory_space<vmem>>, %arg2: memref<1x64xf32, #tpu.memory_space<vmem>>, %arg3: memref<1x64xf32, #tpu.memory_space<vmem>>) attributes {dimension_semantics = [#tpu.dimension_semantics<arbitrary>], iteration_bounds = array<i64: 1>, scalar_prefetch = 0 : i64, scratch_operands = 0 : i64, tpu.core_type = #tpu.core_type<tc>, window_params = [{transform_indices = @transform_0, window_bounds = array<i64: 512, 64>}, {pipeline_mode = #tpu.pipeline_mode<synchronous>, transform_indices = @transform_1, window_bounds = array<i64: 1, 64>}, {pipeline_mode = #tpu.pipeline_mode<synchronous>, transform_indices = @transform_2, window_bounds = array<i64: 1, 64>}]} {
    %c0_i32 = arith.constant 0 : i32
    %0 = arith.cmpi eq, %arg0, %c0_i32 : i32
    %1 = arith.extui %0 : i1 to i32
    %c0_i32_0 = arith.constant 0 : i32
    %2 = arith.cmpi ne, %1, %c0_i32_0 : i32
    scf.if %2 {
      %cst_11 = arith.constant 0.000000e+00 : f32
      %15 = vector.broadcast %cst_11 : f32 to vector<1x64xf32>
      %c0_12 = arith.constant 0 : index
      %c0_13 = arith.constant 0 : index
      %16 = vector.load %arg2[%c0_12, %c0_13] : memref<1x64xf32, #tpu.memory_space<vmem>>, vector<1x64xf32>
      tpu.vector_store %arg2[%c0_12, %c0_13], %15 {strides = array<i32>} : memref<1x64xf32, #tpu.memory_space<vmem>>, vector<1x64xf32>,
      %cst_14 = arith.constant 0.000000e+00 : f32
      %17 = vector.broadcast %cst_14 : f32 to vector<1x64xf32>
      %c0_15 = arith.constant 0 : index
      %c0_16 = arith.constant 0 : index
      %18 = vector.load %arg3[%c0_15, %c0_16] : memref<1x64xf32, #tpu.memory_space<vmem>>, vector<1x64xf32>
      tpu.vector_store %arg3[%c0_15, %c0_16], %17 {strides = array<i32>} : memref<1x64xf32, #tpu.memory_space<vmem>>, vector<1x64xf32>,
    } else {
    }
    %c0 = arith.constant 0 : index
    %c0_1 = arith.constant 0 : index
    %3 = vector.load %arg1[%c0, %c0_1] : memref<512x64xf32, #tpu.memory_space<vmem>>, vector<512x64xf32>
    %c0_2 = arith.constant 0 : index
    %c0_3 = arith.constant 0 : index
    %4 = vector.load %arg2[%c0_2, %c0_3] : memref<1x64xf32, #tpu.memory_space<vmem>>, vector<1x64xf32>
    %cst = arith.constant dense<0.000000e+00> : vector<64xf32>
    %5 = vector.multi_reduction <add>, %3, %cst [0] : vector<512x64xf32> to vector<64xf32>
    %6 = vector.shape_cast %5 : vector<64xf32> to vector<1x64xf32>
    %7 = arith.addf %4, %6 : vector<1x64xf32>
    %c0_4 = arith.constant 0 : index
    %c0_5 = arith.constant 0 : index
    %8 = vector.load %arg2[%c0_4, %c0_5] : memref<1x64xf32, #tpu.memory_space<vmem>>, vector<1x64xf32>
    tpu.vector_store %arg2[%c0_4, %c0_5], %7 {strides = array<i32>} : memref<1x64xf32, #tpu.memory_space<vmem>>, vector<1x64xf32>,
    %c0_6 = arith.constant 0 : index
    %c0_7 = arith.constant 0 : index
    %9 = vector.load %arg3[%c0_6, %c0_7] : memref<1x64xf32, #tpu.memory_space<vmem>>, vector<1x64xf32>
    %10 = arith.mulf %3, %3 : vector<512x64xf32>
    %cst_8 = arith.constant dense<0.000000e+00> : vector<64xf32>
    %11 = vector.multi_reduction <add>, %10, %cst_8 [0] : vector<512x64xf32> to vector<64xf32>
    %12 = vector.shape_cast %11 : vector<64xf32> to vector<1x64xf32>
    %13 = arith.addf %9, %12 : vector<1x64xf32>
    %c0_9 = arith.constant 0 : index
    %c0_10 = arith.constant 0 : index
    %14 = vector.load %arg3[%c0_9, %c0_10] : memref<1x64xf32, #tpu.memory_space<vmem>>, vector<1x64xf32>
    tpu.vector_store %arg3[%c0_9, %c0_10], %13 {strides = array<i32>} : memref<1x64xf32, #tpu.memory_space<vmem>>, vector<1x64xf32>,
    return
  }
  func.func @transform_0(%arg0: i32) -> (i32, i32) {
    %c0_i32 = arith.constant 0 : i32
    %c0_i32_0 = arith.constant 0 : i32
    return %arg0, %c0_i32 : i32, i32
  }
  func.func @transform_1(%arg0: i32) -> (i32, i32) {
    %c0_i32 = arith.constant 0 : i32
    %c0_i32_0 = arith.constant 0 : i32
    %c0_i32_1 = arith.constant 0 : i32
    return %c0_i32, %c0_i32_0 : i32, i32
  }
  func.func @transform_2(%arg0: i32) -> (i32, i32) {
    %c0_i32 = arith.constant 0 : i32
    %c0_i32_0 = arith.constant 0 : i32
    %c0_i32_1 = arith.constant 0 : i32
    return %c0_i32, %c0_i32_0 : i32, i32
  }
}

module attributes {stable_mosaic.version = 11 : i64} {
  func.func @_matmul_kernel(%arg0: i32, %arg1: i32, %arg2: i32, %arg3: memref<256x256xbf16, #tpu.memory_space<vmem>>, %arg4: memref<256x128xbf16, #tpu.memory_space<vmem>>, %arg5: memref<1x128xf32, #tpu.memory_space<vmem>>, %arg6: memref<256x128xf32, #tpu.memory_space<vmem>>, %arg7: memref<256x128xf32, #tpu.memory_space<vmem>>) attributes {dimension_semantics = [#tpu.dimension_semantics<parallel>, #tpu.dimension_semantics<parallel>, #tpu.dimension_semantics<arbitrary>], iteration_bounds = array<i64: 2, 1, 1>, scalar_prefetch = 0 : i64, scratch_operands = 1 : i64, tpu.core_type = #tpu.core_type<tc>, window_params = [{transform_indices = @transform_0, window_bounds = array<i64: 256, 256>}, {transform_indices = @transform_1, window_bounds = array<i64: 256, 128>}, {transform_indices = @transform_2, window_bounds = array<i64: 1, 128>}, {transform_indices = @transform_3, window_bounds = array<i64: 256, 128>}]} {
    %c0_i32 = arith.constant 0 : i32
    %0 = arith.cmpi eq, %arg2, %c0_i32 : i32
    %1 = arith.extui %0 : i1 to i32
    %c0_i32_0 = arith.constant 0 : i32
    %2 = arith.cmpi ne, %1, %c0_i32_0 : i32
    scf.if %2 {
      %cst_10 = arith.constant 0.000000e+00 : f32
      %12 = vector.broadcast %cst_10 : f32 to vector<256x128xf32>
      %c0_11 = arith.constant 0 : index
      %c0_12 = arith.constant 0 : index
      %13 = vector.load %arg7[%c0_11, %c0_12] : memref<256x128xf32, #tpu.memory_space<vmem>>, vector<256x128xf32>
      tpu.vector_store %arg7[%c0_11, %c0_12], %12 {strides = array<i32>} : memref<256x128xf32, #tpu.memory_space<vmem>>, vector<256x128xf32>,
    } else {
    }
    %c0 = arith.constant 0 : index
    %c0_1 = arith.constant 0 : index
    %3 = vector.load %arg7[%c0, %c0_1] : memref<256x128xf32, #tpu.memory_space<vmem>>, vector<256x128xf32>
    %c0_2 = arith.constant 0 : index
    %c0_3 = arith.constant 0 : index
    %4 = vector.load %arg3[%c0_2, %c0_3] : memref<256x256xbf16, #tpu.memory_space<vmem>>, vector<256x256xbf16>
    %c0_4 = arith.constant 0 : index
    %c0_5 = arith.constant 0 : index
    %5 = vector.load %arg4[%c0_4, %c0_5] : memref<256x128xbf16, #tpu.memory_space<vmem>>, vector<256x128xbf16>
    %cst = arith.constant dense<0.000000e+00> : vector<256x128xf32>
    %6 = tpu.matmul %4, %5, %cst {dimension_numbers = #tpu.dot_dimension_numbers<[1], [0], [0], [1], [0, 0, 1, 1], [], []>} : vector<256x256xbf16>, vector<256x128xbf16>, vector<256x128xf32> -> vector<256x128xf32>
    %7 = arith.addf %3, %6 : vector<256x128xf32>
    %c0_6 = arith.constant 0 : index
    %c0_7 = arith.constant 0 : index
    %8 = vector.load %arg7[%c0_6, %c0_7] : memref<256x128xf32, #tpu.memory_space<vmem>>, vector<256x128xf32>
    tpu.vector_store %arg7[%c0_6, %c0_7], %7 {strides = array<i32>} : memref<256x128xf32, #tpu.memory_space<vmem>>, vector<256x128xf32>,
    %c0_i32_8 = arith.constant 0 : i32
    %9 = arith.cmpi eq, %arg2, %c0_i32_8 : i32
    %10 = arith.extui %9 : i1 to i32
    %c0_i32_9 = arith.constant 0 : i32
    %11 = arith.cmpi ne, %10, %c0_i32_9 : i32
    scf.if %11 {
      %c0_10 = arith.constant 0 : index
      %c0_11 = arith.constant 0 : index
      %12 = vector.load %arg7[%c0_10, %c0_11] : memref<256x128xf32, #tpu.memory_space<vmem>>, vector<256x128xf32>
      %c0_12 = arith.constant 0 : index
      %c0_13 = arith.constant 0 : index
      %13 = vector.load %arg5[%c0_12, %c0_13] : memref<1x128xf32, #tpu.memory_space<vmem>>, vector<1x128xf32>
      %14 = vector.broadcast %13 : vector<1x128xf32> to vector<256x128xf32>
      %15 = arith.addf %12, %14 : vector<256x128xf32>
      %c0_14 = arith.constant 0 : index
      %c0_15 = arith.constant 0 : index
      %16 = vector.load %arg6[%c0_14, %c0_15] : memref<256x128xf32, #tpu.memory_space<vmem>>, vector<256x128xf32>
      tpu.vector_store %arg6[%c0_14, %c0_15], %15 {strides = array<i32>} : memref<256x128xf32, #tpu.memory_space<vmem>>, vector<256x128xf32>,
    } else {
    }
    return
  }
  func.func @transform_0(%arg0: i32, %arg1: i32, %arg2: i32) -> (i32, i32) {
    %c0_i32 = arith.constant 0 : i32
    return %arg0, %arg2 : i32, i32
  }
  func.func @transform_1(%arg0: i32, %arg1: i32, %arg2: i32) -> (i32, i32) {
    %c0_i32 = arith.constant 0 : i32
    return %arg2, %arg1 : i32, i32
  }
  func.func @transform_2(%arg0: i32, %arg1: i32, %arg2: i32) -> (i32, i32) {
    %c0_i32 = arith.constant 0 : i32
    %c0_i32_0 = arith.constant 0 : i32
    return %c0_i32, %arg1 : i32, i32
  }
  func.func @transform_3(%arg0: i32, %arg1: i32, %arg2: i32) -> (i32, i32) {
    %c0_i32 = arith.constant 0 : i32
    return %arg0, %arg1 : i32, i32
  }
}

module attributes {stable_mosaic.version = 11 : i64} {
  func.func @_bn_apply_kernel(%arg0: i32, %arg1: memref<512x64xf32, #tpu.memory_space<vmem>>, %arg2: memref<1x64xf32, #tpu.memory_space<vmem>>, %arg3: memref<1x64xf32, #tpu.memory_space<vmem>>, %arg4: memref<512x64xbf16, #tpu.memory_space<vmem>>) attributes {dimension_semantics = [#tpu.dimension_semantics<parallel>], iteration_bounds = array<i64: 1>, scalar_prefetch = 0 : i64, scratch_operands = 0 : i64, tpu.core_type = #tpu.core_type<tc>, window_params = [{transform_indices = @transform_0, window_bounds = array<i64: 512, 64>}, {pipeline_mode = #tpu.pipeline_mode<synchronous>, transform_indices = @transform_1, window_bounds = array<i64: 1, 64>}, {pipeline_mode = #tpu.pipeline_mode<synchronous>, transform_indices = @transform_2, window_bounds = array<i64: 1, 64>}, {transform_indices = @transform_3, window_bounds = array<i64: 512, 64>}]} {
    %c0 = arith.constant 0 : index
    %c0_0 = arith.constant 0 : index
    %0 = vector.load %arg1[%c0, %c0_0] : memref<512x64xf32, #tpu.memory_space<vmem>>, vector<512x64xf32>
    %c0_1 = arith.constant 0 : index
    %c0_2 = arith.constant 0 : index
    %1 = vector.load %arg2[%c0_1, %c0_2] : memref<1x64xf32, #tpu.memory_space<vmem>>, vector<1x64xf32>
    %2 = vector.broadcast %1 : vector<1x64xf32> to vector<512x64xf32>
    %3 = arith.mulf %0, %2 : vector<512x64xf32>
    %c0_3 = arith.constant 0 : index
    %c0_4 = arith.constant 0 : index
    %4 = vector.load %arg3[%c0_3, %c0_4] : memref<1x64xf32, #tpu.memory_space<vmem>>, vector<1x64xf32>
    %5 = vector.broadcast %4 : vector<1x64xf32> to vector<512x64xf32>
    %6 = arith.addf %3, %5 : vector<512x64xf32>
    %cst = arith.constant 0.000000e+00 : f32
    %7 = vector.broadcast %cst : f32 to vector<512x64xf32>
    %8 = arith.maximumf %6, %7 : vector<512x64xf32>
    %9 = arith.truncf %8 : vector<512x64xf32> to vector<512x64xbf16>
    %c0_5 = arith.constant 0 : index
    %c0_6 = arith.constant 0 : index
    %10 = vector.load %arg4[%c0_5, %c0_6] : memref<512x64xbf16, #tpu.memory_space<vmem>>, vector<512x64xbf16>
    tpu.vector_store %arg4[%c0_5, %c0_6], %9 {strides = array<i32>} : memref<512x64xbf16, #tpu.memory_space<vmem>>, vector<512x64xbf16>,
    return
  }
  func.func @transform_0(%arg0: i32) -> (i32, i32) {
    %c0_i32 = arith.constant 0 : i32
    %c0_i32_0 = arith.constant 0 : i32
    return %arg0, %c0_i32 : i32, i32
  }
  func.func @transform_1(%arg0: i32) -> (i32, i32) {
    %c0_i32 = arith.constant 0 : i32
    %c0_i32_0 = arith.constant 0 : i32
    %c0_i32_1 = arith.constant 0 : i32
    return %c0_i32, %c0_i32_0 : i32, i32
  }
  func.func @transform_2(%arg0: i32) -> (i32, i32) {
    %c0_i32 = arith.constant 0 : i32
    %c0_i32_0 = arith.constant 0 : i32
    %c0_i32_1 = arith.constant 0 : i32
    return %c0_i32, %c0_i32_0 : i32, i32
  }
  func.func @transform_3(%arg0: i32) -> (i32, i32) {
    %c0_i32 = arith.constant 0 : i32
    %c0_i32_0 = arith.constant 0 : i32
    return %arg0, %c0_i32 : i32, i32
  }
}

module attributes {stable_mosaic.version = 11 : i64} {
  func.func @_maxpool_kernel(%arg0: i32, %arg1: memref<1x9x2x9x128xbf16, #tpu.memory_space<vmem>>, %arg2: memref<1x8x8x64xbf16, #tpu.memory_space<vmem>>) attributes {dimension_semantics = [#tpu.dimension_semantics<parallel>], iteration_bounds = array<i64: 2>, scalar_prefetch = 0 : i64, scratch_operands = 0 : i64, tpu.core_type = #tpu.core_type<tc>, window_params = [{transform_indices = @transform_0, window_bounds = array<i64: 1, 9, 2, 9, 128>}, {transform_indices = @transform_1, window_bounds = array<i64: 1, 8, 8, 64>}]} {
    %c0 = arith.constant 0 : index
    %c0_0 = arith.constant 0 : index
    %c0_1 = arith.constant 0 : index
    %c0_2 = arith.constant 0 : index
    %c0_3 = arith.constant 0 : index
    %0 = vector.load %arg1[%c0, %c0_0, %c0_1, %c0_2, %c0_3] : memref<1x9x2x9x128xbf16, #tpu.memory_space<vmem>>, vector<1x9x2x9x128xbf16>
    %1 = vector.shape_cast %0 : vector<1x9x2x9x128xbf16> to vector<9x2x9x128xbf16>
    %2 = vector.extract_strided_slice %1 {offsets = [0, 0, 0, 0], sizes = [9, 1, 9, 128], strides = [1, 1, 1, 1]} : vector<9x2x9x128xbf16> to vector<9x1x9x128xbf16>
    %3 = vector.shape_cast %2 : vector<9x1x9x128xbf16> to vector<9x9x128xbf16>
    %4 = vector.extract_strided_slice %1 {offsets = [0, 1, 0, 0], sizes = [9, 1, 9, 128], strides = [1, 1, 1, 1]} : vector<9x2x9x128xbf16> to vector<9x1x9x128xbf16>
    %5 = vector.shape_cast %4 : vector<9x1x9x128xbf16> to vector<9x9x128xbf16>
    %6 = vector.extract_strided_slice %3 {offsets = [0, 0, 0], sizes = [8, 9, 128], strides = [1, 1, 1]} : vector<9x9x128xbf16> to vector<8x9x128xbf16>
    %7 = vector.extract_strided_slice %6 {offsets = [0, 0, 0], sizes = [8, 9, 64], strides = [1, 1, 1]} : vector<8x9x128xbf16> to vector<8x9x64xbf16>
    %8 = vector.extract_strided_slice %6 {offsets = [0, 0, 64], sizes = [8, 9, 64], strides = [1, 1, 1]} : vector<8x9x128xbf16> to vector<8x9x64xbf16>
    %9 = vector.extract_strided_slice %7 {offsets = [0, 0, 0], sizes = [8, 8, 64], strides = [1, 1, 1]} : vector<8x9x64xbf16> to vector<8x8x64xbf16>
    %10 = vector.extract_strided_slice %8 {offsets = [0, 0, 0], sizes = [8, 8, 64], strides = [1, 1, 1]} : vector<8x9x64xbf16> to vector<8x8x64xbf16>
    %11 = arith.maximumf %9, %10 : vector<8x8x64xbf16>
    %12 = vector.extract_strided_slice %7 {offsets = [0, 1, 0], sizes = [8, 8, 64], strides = [1, 1, 1]} : vector<8x9x64xbf16> to vector<8x8x64xbf16>
    %13 = arith.maximumf %11, %12 : vector<8x8x64xbf16>
    %14 = vector.extract_strided_slice %5 {offsets = [0, 0, 0], sizes = [8, 9, 128], strides = [1, 1, 1]} : vector<9x9x128xbf16> to vector<8x9x128xbf16>
    %15 = vector.extract_strided_slice %14 {offsets = [0, 0, 0], sizes = [8, 9, 64], strides = [1, 1, 1]} : vector<8x9x128xbf16> to vector<8x9x64xbf16>
    %16 = vector.extract_strided_slice %14 {offsets = [0, 0, 64], sizes = [8, 9, 64], strides = [1, 1, 1]} : vector<8x9x128xbf16> to vector<8x9x64xbf16>
    %17 = vector.extract_strided_slice %15 {offsets = [0, 0, 0], sizes = [8, 8, 64], strides = [1, 1, 1]} : vector<8x9x64xbf16> to vector<8x8x64xbf16>
    %18 = vector.extract_strided_slice %16 {offsets = [0, 0, 0], sizes = [8, 8, 64], strides = [1, 1, 1]} : vector<8x9x64xbf16> to vector<8x8x64xbf16>
    %19 = arith.maximumf %17, %18 : vector<8x8x64xbf16>
    %20 = vector.extract_strided_slice %15 {offsets = [0, 1, 0], sizes = [8, 8, 64], strides = [1, 1, 1]} : vector<8x9x64xbf16> to vector<8x8x64xbf16>
    %21 = arith.maximumf %19, %20 : vector<8x8x64xbf16>
    %22 = arith.maximumf %13, %21 : vector<8x8x64xbf16>
    %23 = vector.extract_strided_slice %3 {offsets = [1, 0, 0], sizes = [8, 9, 128], strides = [1, 1, 1]} : vector<9x9x128xbf16> to vector<8x9x128xbf16>
    %24 = vector.extract_strided_slice %23 {offsets = [0, 0, 0], sizes = [8, 9, 64], strides = [1, 1, 1]} : vector<8x9x128xbf16> to vector<8x9x64xbf16>
    %25 = vector.extract_strided_slice %23 {offsets = [0, 0, 64], sizes = [8, 9, 64], strides = [1, 1, 1]} : vector<8x9x128xbf16> to vector<8x9x64xbf16>
    %26 = vector.extract_strided_slice %24 {offsets = [0, 0, 0], sizes = [8, 8, 64], strides = [1, 1, 1]} : vector<8x9x64xbf16> to vector<8x8x64xbf16>
    %27 = vector.extract_strided_slice %25 {offsets = [0, 0, 0], sizes = [8, 8, 64], strides = [1, 1, 1]} : vector<8x9x64xbf16> to vector<8x8x64xbf16>
    %28 = arith.maximumf %26, %27 : vector<8x8x64xbf16>
    %29 = vector.extract_strided_slice %24 {offsets = [0, 1, 0], sizes = [8, 8, 64], strides = [1, 1, 1]} : vector<8x9x64xbf16> to vector<8x8x64xbf16>
    %30 = arith.maximumf %28, %29 : vector<8x8x64xbf16>
    %31 = arith.maximumf %22, %30 : vector<8x8x64xbf16>
    %c0_4 = arith.constant 0 : index
    %c0_5 = arith.constant 0 : index
    %c0_6 = arith.constant 0 : index
    %c0_7 = arith.constant 0 : index
    %32 = vector.load %arg2[%c0_4, %c0_5, %c0_6, %c0_7] : memref<1x8x8x64xbf16, #tpu.memory_space<vmem>>, vector<1x8x8x64xbf16>
    %33 = vector.shape_cast %32 : vector<1x8x8x64xbf16> to vector<8x8x64xbf16>
    %34 = vector.shape_cast %31 : vector<8x8x64xbf16> to vector<1x8x8x64xbf16>
    tpu.vector_store %arg2[%c0_4, %c0_5, %c0_6, %c0_7], %34 {strides = array<i32>} : memref<1x8x8x64xbf16, #tpu.memory_space<vmem>>, vector<1x8x8x64xbf16>,
    return
  }
  func.func @transform_0(%arg0: i32) -> (i32, i32, i32, i32, i32) {
    %c0_i32 = arith.constant 0 : i32
    %c0_i32_0 = arith.constant 0 : i32
    %c0_i32_1 = arith.constant 0 : i32
    %c0_i32_2 = arith.constant 0 : i32
    %c0_i32_3 = arith.constant 0 : i32
    return %arg0, %c0_i32, %c0_i32_0, %c0_i32_1, %c0_i32_2 : i32, i32, i32, i32, i32
  }
  func.func @transform_1(%arg0: i32) -> (i32, i32, i32, i32) {
    %c0_i32 = arith.constant 0 : i32
    %c0_i32_0 = arith.constant 0 : i32
    %c0_i32_1 = arith.constant 0 : i32
    %c0_i32_2 = arith.constant 0 : i32
    return %arg0, %c0_i32, %c0_i32_0, %c0_i32_1 : i32, i32, i32, i32
  }
}

module attributes {stable_mosaic.version = 11 : i64} {
  func.func @_matmul_kernel(%arg0: i32, %arg1: i32, %arg2: i32, %arg3: memref<128x640xbf16, #tpu.memory_space<vmem>>, %arg4: memref<640x128xbf16, #tpu.memory_space<vmem>>, %arg5: memref<1x128xf32, #tpu.memory_space<vmem>>, %arg6: memref<128x128xf32, #tpu.memory_space<vmem>>, %arg7: memref<128x128xf32, #tpu.memory_space<vmem>>) attributes {dimension_semantics = [#tpu.dimension_semantics<parallel>, #tpu.dimension_semantics<parallel>, #tpu.dimension_semantics<arbitrary>], iteration_bounds = array<i64: 1, 1, 1>, scalar_prefetch = 0 : i64, scratch_operands = 1 : i64, tpu.core_type = #tpu.core_type<tc>, window_params = [{transform_indices = @transform_0, window_bounds = array<i64: 128, 640>}, {transform_indices = @transform_1, window_bounds = array<i64: 640, 128>}, {transform_indices = @transform_2, window_bounds = array<i64: 1, 128>}, {transform_indices = @transform_3, window_bounds = array<i64: 128, 128>}]} {
    %c0_i32 = arith.constant 0 : i32
    %0 = arith.cmpi eq, %arg2, %c0_i32 : i32
    %1 = arith.extui %0 : i1 to i32
    %c0_i32_0 = arith.constant 0 : i32
    %2 = arith.cmpi ne, %1, %c0_i32_0 : i32
    scf.if %2 {
      %cst_10 = arith.constant 0.000000e+00 : f32
      %12 = vector.broadcast %cst_10 : f32 to vector<128x128xf32>
      %c0_11 = arith.constant 0 : index
      %c0_12 = arith.constant 0 : index
      %13 = vector.load %arg7[%c0_11, %c0_12] : memref<128x128xf32, #tpu.memory_space<vmem>>, vector<128x128xf32>
      tpu.vector_store %arg7[%c0_11, %c0_12], %12 {strides = array<i32>} : memref<128x128xf32, #tpu.memory_space<vmem>>, vector<128x128xf32>,
    } else {
    }
    %c0 = arith.constant 0 : index
    %c0_1 = arith.constant 0 : index
    %3 = vector.load %arg7[%c0, %c0_1] : memref<128x128xf32, #tpu.memory_space<vmem>>, vector<128x128xf32>
    %c0_2 = arith.constant 0 : index
    %c0_3 = arith.constant 0 : index
    %4 = vector.load %arg3[%c0_2, %c0_3] : memref<128x640xbf16, #tpu.memory_space<vmem>>, vector<128x640xbf16>
    %c0_4 = arith.constant 0 : index
    %c0_5 = arith.constant 0 : index
    %5 = vector.load %arg4[%c0_4, %c0_5] : memref<640x128xbf16, #tpu.memory_space<vmem>>, vector<640x128xbf16>
    %cst = arith.constant dense<0.000000e+00> : vector<128x128xf32>
    %6 = tpu.matmul %4, %5, %cst {dimension_numbers = #tpu.dot_dimension_numbers<[1], [0], [0], [1], [0, 0, 1, 1], [], []>} : vector<128x640xbf16>, vector<640x128xbf16>, vector<128x128xf32> -> vector<128x128xf32>
    %7 = arith.addf %3, %6 : vector<128x128xf32>
    %c0_6 = arith.constant 0 : index
    %c0_7 = arith.constant 0 : index
    %8 = vector.load %arg7[%c0_6, %c0_7] : memref<128x128xf32, #tpu.memory_space<vmem>>, vector<128x128xf32>
    tpu.vector_store %arg7[%c0_6, %c0_7], %7 {strides = array<i32>} : memref<128x128xf32, #tpu.memory_space<vmem>>, vector<128x128xf32>,
    %c0_i32_8 = arith.constant 0 : i32
    %9 = arith.cmpi eq, %arg2, %c0_i32_8 : i32
    %10 = arith.extui %9 : i1 to i32
    %c0_i32_9 = arith.constant 0 : i32
    %11 = arith.cmpi ne, %10, %c0_i32_9 : i32
    scf.if %11 {
      %c0_10 = arith.constant 0 : index
      %c0_11 = arith.constant 0 : index
      %12 = vector.load %arg7[%c0_10, %c0_11] : memref<128x128xf32, #tpu.memory_space<vmem>>, vector<128x128xf32>
      %c0_12 = arith.constant 0 : index
      %c0_13 = arith.constant 0 : index
      %13 = vector.load %arg5[%c0_12, %c0_13] : memref<1x128xf32, #tpu.memory_space<vmem>>, vector<1x128xf32>
      %14 = vector.broadcast %13 : vector<1x128xf32> to vector<128x128xf32>
      %15 = arith.addf %12, %14 : vector<128x128xf32>
      %c0_14 = arith.constant 0 : index
      %c0_15 = arith.constant 0 : index
      %16 = vector.load %arg6[%c0_14, %c0_15] : memref<128x128xf32, #tpu.memory_space<vmem>>, vector<128x128xf32>
      tpu.vector_store %arg6[%c0_14, %c0_15], %15 {strides = array<i32>} : memref<128x128xf32, #tpu.memory_space<vmem>>, vector<128x128xf32>,
    } else {
    }
    return
  }
  func.func @transform_0(%arg0: i32, %arg1: i32, %arg2: i32) -> (i32, i32) {
    %c0_i32 = arith.constant 0 : i32
    return %arg0, %arg2 : i32, i32
  }
  func.func @transform_1(%arg0: i32, %arg1: i32, %arg2: i32) -> (i32, i32) {
    %c0_i32 = arith.constant 0 : i32
    return %arg2, %arg1 : i32, i32
  }
  func.func @transform_2(%arg0: i32, %arg1: i32, %arg2: i32) -> (i32, i32) {
    %c0_i32 = arith.constant 0 : i32
    %c0_i32_0 = arith.constant 0 : i32
    return %c0_i32, %arg1 : i32, i32
  }
  func.func @transform_3(%arg0: i32, %arg1: i32, %arg2: i32) -> (i32, i32) {
    %c0_i32 = arith.constant 0 : i32
    return %arg0, %arg1 : i32, i32
  }
}

module attributes {stable_mosaic.version = 11 : i64} {
  func.func @_bn_stats_kernel(%arg0: i32, %arg1: memref<128x64xf32, #tpu.memory_space<vmem>>, %arg2: memref<1x64xf32, #tpu.memory_space<vmem>>, %arg3: memref<1x64xf32, #tpu.memory_space<vmem>>) attributes {dimension_semantics = [#tpu.dimension_semantics<arbitrary>], iteration_bounds = array<i64: 1>, scalar_prefetch = 0 : i64, scratch_operands = 0 : i64, tpu.core_type = #tpu.core_type<tc>, window_params = [{transform_indices = @transform_0, window_bounds = array<i64: 128, 64>}, {pipeline_mode = #tpu.pipeline_mode<synchronous>, transform_indices = @transform_1, window_bounds = array<i64: 1, 64>}, {pipeline_mode = #tpu.pipeline_mode<synchronous>, transform_indices = @transform_2, window_bounds = array<i64: 1, 64>}]} {
    %c0_i32 = arith.constant 0 : i32
    %0 = arith.cmpi eq, %arg0, %c0_i32 : i32
    %1 = arith.extui %0 : i1 to i32
    %c0_i32_0 = arith.constant 0 : i32
    %2 = arith.cmpi ne, %1, %c0_i32_0 : i32
    scf.if %2 {
      %cst_11 = arith.constant 0.000000e+00 : f32
      %15 = vector.broadcast %cst_11 : f32 to vector<1x64xf32>
      %c0_12 = arith.constant 0 : index
      %c0_13 = arith.constant 0 : index
      %16 = vector.load %arg2[%c0_12, %c0_13] : memref<1x64xf32, #tpu.memory_space<vmem>>, vector<1x64xf32>
      tpu.vector_store %arg2[%c0_12, %c0_13], %15 {strides = array<i32>} : memref<1x64xf32, #tpu.memory_space<vmem>>, vector<1x64xf32>,
      %cst_14 = arith.constant 0.000000e+00 : f32
      %17 = vector.broadcast %cst_14 : f32 to vector<1x64xf32>
      %c0_15 = arith.constant 0 : index
      %c0_16 = arith.constant 0 : index
      %18 = vector.load %arg3[%c0_15, %c0_16] : memref<1x64xf32, #tpu.memory_space<vmem>>, vector<1x64xf32>
      tpu.vector_store %arg3[%c0_15, %c0_16], %17 {strides = array<i32>} : memref<1x64xf32, #tpu.memory_space<vmem>>, vector<1x64xf32>,
    } else {
    }
    %c0 = arith.constant 0 : index
    %c0_1 = arith.constant 0 : index
    %3 = vector.load %arg1[%c0, %c0_1] : memref<128x64xf32, #tpu.memory_space<vmem>>, vector<128x64xf32>
    %c0_2 = arith.constant 0 : index
    %c0_3 = arith.constant 0 : index
    %4 = vector.load %arg2[%c0_2, %c0_3] : memref<1x64xf32, #tpu.memory_space<vmem>>, vector<1x64xf32>
    %cst = arith.constant dense<0.000000e+00> : vector<64xf32>
    %5 = vector.multi_reduction <add>, %3, %cst [0] : vector<128x64xf32> to vector<64xf32>
    %6 = vector.shape_cast %5 : vector<64xf32> to vector<1x64xf32>
    %7 = arith.addf %4, %6 : vector<1x64xf32>
    %c0_4 = arith.constant 0 : index
    %c0_5 = arith.constant 0 : index
    %8 = vector.load %arg2[%c0_4, %c0_5] : memref<1x64xf32, #tpu.memory_space<vmem>>, vector<1x64xf32>
    tpu.vector_store %arg2[%c0_4, %c0_5], %7 {strides = array<i32>} : memref<1x64xf32, #tpu.memory_space<vmem>>, vector<1x64xf32>,
    %c0_6 = arith.constant 0 : index
    %c0_7 = arith.constant 0 : index
    %9 = vector.load %arg3[%c0_6, %c0_7] : memref<1x64xf32, #tpu.memory_space<vmem>>, vector<1x64xf32>
    %10 = arith.mulf %3, %3 : vector<128x64xf32>
    %cst_8 = arith.constant dense<0.000000e+00> : vector<64xf32>
    %11 = vector.multi_reduction <add>, %10, %cst_8 [0] : vector<128x64xf32> to vector<64xf32>
    %12 = vector.shape_cast %11 : vector<64xf32> to vector<1x64xf32>
    %13 = arith.addf %9, %12 : vector<1x64xf32>
    %c0_9 = arith.constant 0 : index
    %c0_10 = arith.constant 0 : index
    %14 = vector.load %arg3[%c0_9, %c0_10] : memref<1x64xf32, #tpu.memory_space<vmem>>, vector<1x64xf32>
    tpu.vector_store %arg3[%c0_9, %c0_10], %13 {strides = array<i32>} : memref<1x64xf32, #tpu.memory_space<vmem>>, vector<1x64xf32>,
    return
  }
  func.func @transform_0(%arg0: i32) -> (i32, i32) {
    %c0_i32 = arith.constant 0 : i32
    %c0_i32_0 = arith.constant 0 : i32
    return %arg0, %c0_i32 : i32, i32
  }
  func.func @transform_1(%arg0: i32) -> (i32, i32) {
    %c0_i32 = arith.constant 0 : i32
    %c0_i32_0 = arith.constant 0 : i32
    %c0_i32_1 = arith.constant 0 : i32
    return %c0_i32, %c0_i32_0 : i32, i32
  }
  func.func @transform_2(%arg0: i32) -> (i32, i32) {
    %c0_i32 = arith.constant 0 : i32
    %c0_i32_0 = arith.constant 0 : i32
    %c0_i32_1 = arith.constant 0 : i32
    return %c0_i32, %c0_i32_0 : i32, i32
  }
}

module attributes {stable_mosaic.version = 11 : i64} {
  func.func @_bn_apply_kernel(%arg0: i32, %arg1: memref<128x64xf32, #tpu.memory_space<vmem>>, %arg2: memref<1x64xf32, #tpu.memory_space<vmem>>, %arg3: memref<1x64xf32, #tpu.memory_space<vmem>>, %arg4: memref<128x64xbf16, #tpu.memory_space<vmem>>) attributes {dimension_semantics = [#tpu.dimension_semantics<parallel>], iteration_bounds = array<i64: 1>, scalar_prefetch = 0 : i64, scratch_operands = 0 : i64, tpu.core_type = #tpu.core_type<tc>, window_params = [{transform_indices = @transform_0, window_bounds = array<i64: 128, 64>}, {pipeline_mode = #tpu.pipeline_mode<synchronous>, transform_indices = @transform_1, window_bounds = array<i64: 1, 64>}, {pipeline_mode = #tpu.pipeline_mode<synchronous>, transform_indices = @transform_2, window_bounds = array<i64: 1, 64>}, {transform_indices = @transform_3, window_bounds = array<i64: 128, 64>}]} {
    %c0 = arith.constant 0 : index
    %c0_0 = arith.constant 0 : index
    %0 = vector.load %arg1[%c0, %c0_0] : memref<128x64xf32, #tpu.memory_space<vmem>>, vector<128x64xf32>
    %c0_1 = arith.constant 0 : index
    %c0_2 = arith.constant 0 : index
    %1 = vector.load %arg2[%c0_1, %c0_2] : memref<1x64xf32, #tpu.memory_space<vmem>>, vector<1x64xf32>
    %2 = vector.broadcast %1 : vector<1x64xf32> to vector<128x64xf32>
    %3 = arith.mulf %0, %2 : vector<128x64xf32>
    %c0_3 = arith.constant 0 : index
    %c0_4 = arith.constant 0 : index
    %4 = vector.load %arg3[%c0_3, %c0_4] : memref<1x64xf32, #tpu.memory_space<vmem>>, vector<1x64xf32>
    %5 = vector.broadcast %4 : vector<1x64xf32> to vector<128x64xf32>
    %6 = arith.addf %3, %5 : vector<128x64xf32>
    %cst = arith.constant 0.000000e+00 : f32
    %7 = vector.broadcast %cst : f32 to vector<128x64xf32>
    %8 = arith.maximumf %6, %7 : vector<128x64xf32>
    %9 = arith.truncf %8 : vector<128x64xf32> to vector<128x64xbf16>
    %c0_5 = arith.constant 0 : index
    %c0_6 = arith.constant 0 : index
    %10 = vector.load %arg4[%c0_5, %c0_6] : memref<128x64xbf16, #tpu.memory_space<vmem>>, vector<128x64xbf16>
    tpu.vector_store %arg4[%c0_5, %c0_6], %9 {strides = array<i32>} : memref<128x64xbf16, #tpu.memory_space<vmem>>, vector<128x64xbf16>,
    return
  }
  func.func @transform_0(%arg0: i32) -> (i32, i32) {
    %c0_i32 = arith.constant 0 : i32
    %c0_i32_0 = arith.constant 0 : i32
    return %arg0, %c0_i32 : i32, i32
  }
  func.func @transform_1(%arg0: i32) -> (i32, i32) {
    %c0_i32 = arith.constant 0 : i32
    %c0_i32_0 = arith.constant 0 : i32
    %c0_i32_1 = arith.constant 0 : i32
    return %c0_i32, %c0_i32_0 : i32, i32
  }
  func.func @transform_2(%arg0: i32) -> (i32, i32) {
    %c0_i32 = arith.constant 0 : i32
    %c0_i32_0 = arith.constant 0 : i32
    %c0_i32_1 = arith.constant 0 : i32
    return %c0_i32, %c0_i32_0 : i32, i32
  }
  func.func @transform_3(%arg0: i32) -> (i32, i32) {
    %c0_i32 = arith.constant 0 : i32
    %c0_i32_0 = arith.constant 0 : i32
    return %arg0, %c0_i32 : i32, i32
  }
}

module attributes {stable_mosaic.version = 11 : i64} {
  func.func @_bn_apply_res_kernel(%arg0: i32, %arg1: memref<128x64xf32, #tpu.memory_space<vmem>>, %arg2: memref<128x64xbf16, #tpu.memory_space<vmem>>, %arg3: memref<1x64xf32, #tpu.memory_space<vmem>>, %arg4: memref<1x64xf32, #tpu.memory_space<vmem>>, %arg5: memref<128x64xbf16, #tpu.memory_space<vmem>>) attributes {dimension_semantics = [#tpu.dimension_semantics<parallel>], iteration_bounds = array<i64: 1>, scalar_prefetch = 0 : i64, scratch_operands = 0 : i64, tpu.core_type = #tpu.core_type<tc>, window_params = [{transform_indices = @transform_0, window_bounds = array<i64: 128, 64>}, {transform_indices = @transform_1, window_bounds = array<i64: 128, 64>}, {pipeline_mode = #tpu.pipeline_mode<synchronous>, transform_indices = @transform_2, window_bounds = array<i64: 1, 64>}, {pipeline_mode = #tpu.pipeline_mode<synchronous>, transform_indices = @transform_3, window_bounds = array<i64: 1, 64>}, {transform_indices = @transform_4, window_bounds = array<i64: 128, 64>}]} {
    %c0 = arith.constant 0 : index
    %c0_0 = arith.constant 0 : index
    %0 = vector.load %arg1[%c0, %c0_0] : memref<128x64xf32, #tpu.memory_space<vmem>>, vector<128x64xf32>
    %c0_1 = arith.constant 0 : index
    %c0_2 = arith.constant 0 : index
    %1 = vector.load %arg3[%c0_1, %c0_2] : memref<1x64xf32, #tpu.memory_space<vmem>>, vector<1x64xf32>
    %2 = vector.broadcast %1 : vector<1x64xf32> to vector<128x64xf32>
    %3 = arith.mulf %0, %2 : vector<128x64xf32>
    %c0_3 = arith.constant 0 : index
    %c0_4 = arith.constant 0 : index
    %4 = vector.load %arg4[%c0_3, %c0_4] : memref<1x64xf32, #tpu.memory_space<vmem>>, vector<1x64xf32>
    %5 = vector.broadcast %4 : vector<1x64xf32> to vector<128x64xf32>
    %6 = arith.addf %3, %5 : vector<128x64xf32>
    %c0_5 = arith.constant 0 : index
    %c0_6 = arith.constant 0 : index
    %7 = vector.load %arg2[%c0_5, %c0_6] : memref<128x64xbf16, #tpu.memory_space<vmem>>, vector<128x64xbf16>
    %8 = arith.extf %7 : vector<128x64xbf16> to vector<128x64xf32>
    %9 = arith.addf %6, %8 : vector<128x64xf32>
    %cst = arith.constant 0.000000e+00 : f32
    %10 = vector.broadcast %cst : f32 to vector<128x64xf32>
    %11 = arith.maximumf %9, %10 : vector<128x64xf32>
    %12 = arith.truncf %11 : vector<128x64xf32> to vector<128x64xbf16>
    %c0_7 = arith.constant 0 : index
    %c0_8 = arith.constant 0 : index
    %13 = vector.load %arg5[%c0_7, %c0_8] : memref<128x64xbf16, #tpu.memory_space<vmem>>, vector<128x64xbf16>
    tpu.vector_store %arg5[%c0_7, %c0_8], %12 {strides = array<i32>} : memref<128x64xbf16, #tpu.memory_space<vmem>>, vector<128x64xbf16>,
    return
  }
  func.func @transform_0(%arg0: i32) -> (i32, i32) {
    %c0_i32 = arith.constant 0 : i32
    %c0_i32_0 = arith.constant 0 : i32
    return %arg0, %c0_i32 : i32, i32
  }
  func.func @transform_1(%arg0: i32) -> (i32, i32) {
    %c0_i32 = arith.constant 0 : i32
    %c0_i32_0 = arith.constant 0 : i32
    return %arg0, %c0_i32 : i32, i32
  }
  func.func @transform_2(%arg0: i32) -> (i32, i32) {
    %c0_i32 = arith.constant 0 : i32
    %c0_i32_0 = arith.constant 0 : i32
    %c0_i32_1 = arith.constant 0 : i32
    return %c0_i32, %c0_i32_0 : i32, i32
  }
  func.func @transform_3(%arg0: i32) -> (i32, i32) {
    %c0_i32 = arith.constant 0 : i32
    %c0_i32_0 = arith.constant 0 : i32
    %c0_i32_1 = arith.constant 0 : i32
    return %c0_i32, %c0_i32_0 : i32, i32
  }
  func.func @transform_4(%arg0: i32) -> (i32, i32) {
    %c0_i32 = arith.constant 0 : i32
    %c0_i32_0 = arith.constant 0 : i32
    return %arg0, %c0_i32 : i32, i32
  }
}

module attributes {stable_mosaic.version = 11 : i64} {
  func.func @_matmul_kernel(%arg0: i32, %arg1: i32, %arg2: i32, %arg3: memref<32x640xbf16, #tpu.memory_space<vmem>>, %arg4: memref<640x128xbf16, #tpu.memory_space<vmem>>, %arg5: memref<1x128xf32, #tpu.memory_space<vmem>>, %arg6: memref<32x128xf32, #tpu.memory_space<vmem>>, %arg7: memref<32x128xf32, #tpu.memory_space<vmem>>) attributes {dimension_semantics = [#tpu.dimension_semantics<parallel>, #tpu.dimension_semantics<parallel>, #tpu.dimension_semantics<arbitrary>], iteration_bounds = array<i64: 1, 1, 1>, scalar_prefetch = 0 : i64, scratch_operands = 1 : i64, tpu.core_type = #tpu.core_type<tc>, window_params = [{transform_indices = @transform_0, window_bounds = array<i64: 32, 640>}, {transform_indices = @transform_1, window_bounds = array<i64: 640, 128>}, {transform_indices = @transform_2, window_bounds = array<i64: 1, 128>}, {transform_indices = @transform_3, window_bounds = array<i64: 32, 128>}]} {
    %c0_i32 = arith.constant 0 : i32
    %0 = arith.cmpi eq, %arg2, %c0_i32 : i32
    %1 = arith.extui %0 : i1 to i32
    %c0_i32_0 = arith.constant 0 : i32
    %2 = arith.cmpi ne, %1, %c0_i32_0 : i32
    scf.if %2 {
      %cst_10 = arith.constant 0.000000e+00 : f32
      %12 = vector.broadcast %cst_10 : f32 to vector<32x128xf32>
      %c0_11 = arith.constant 0 : index
      %c0_12 = arith.constant 0 : index
      %13 = vector.load %arg7[%c0_11, %c0_12] : memref<32x128xf32, #tpu.memory_space<vmem>>, vector<32x128xf32>
      tpu.vector_store %arg7[%c0_11, %c0_12], %12 {strides = array<i32>} : memref<32x128xf32, #tpu.memory_space<vmem>>, vector<32x128xf32>,
    } else {
    }
    %c0 = arith.constant 0 : index
    %c0_1 = arith.constant 0 : index
    %3 = vector.load %arg7[%c0, %c0_1] : memref<32x128xf32, #tpu.memory_space<vmem>>, vector<32x128xf32>
    %c0_2 = arith.constant 0 : index
    %c0_3 = arith.constant 0 : index
    %4 = vector.load %arg3[%c0_2, %c0_3] : memref<32x640xbf16, #tpu.memory_space<vmem>>, vector<32x640xbf16>
    %c0_4 = arith.constant 0 : index
    %c0_5 = arith.constant 0 : index
    %5 = vector.load %arg4[%c0_4, %c0_5] : memref<640x128xbf16, #tpu.memory_space<vmem>>, vector<640x128xbf16>
    %cst = arith.constant dense<0.000000e+00> : vector<32x128xf32>
    %6 = tpu.matmul %4, %5, %cst {dimension_numbers = #tpu.dot_dimension_numbers<[1], [0], [0], [1], [0, 0, 1, 1], [], []>} : vector<32x640xbf16>, vector<640x128xbf16>, vector<32x128xf32> -> vector<32x128xf32>
    %7 = arith.addf %3, %6 : vector<32x128xf32>
    %c0_6 = arith.constant 0 : index
    %c0_7 = arith.constant 0 : index
    %8 = vector.load %arg7[%c0_6, %c0_7] : memref<32x128xf32, #tpu.memory_space<vmem>>, vector<32x128xf32>
    tpu.vector_store %arg7[%c0_6, %c0_7], %7 {strides = array<i32>} : memref<32x128xf32, #tpu.memory_space<vmem>>, vector<32x128xf32>,
    %c0_i32_8 = arith.constant 0 : i32
    %9 = arith.cmpi eq, %arg2, %c0_i32_8 : i32
    %10 = arith.extui %9 : i1 to i32
    %c0_i32_9 = arith.constant 0 : i32
    %11 = arith.cmpi ne, %10, %c0_i32_9 : i32
    scf.if %11 {
      %c0_10 = arith.constant 0 : index
      %c0_11 = arith.constant 0 : index
      %12 = vector.load %arg7[%c0_10, %c0_11] : memref<32x128xf32, #tpu.memory_space<vmem>>, vector<32x128xf32>
      %c0_12 = arith.constant 0 : index
      %c0_13 = arith.constant 0 : index
      %13 = vector.load %arg5[%c0_12, %c0_13] : memref<1x128xf32, #tpu.memory_space<vmem>>, vector<1x128xf32>
      %14 = vector.broadcast %13 : vector<1x128xf32> to vector<32x128xf32>
      %15 = arith.addf %12, %14 : vector<32x128xf32>
      %c0_14 = arith.constant 0 : index
      %c0_15 = arith.constant 0 : index
      %16 = vector.load %arg6[%c0_14, %c0_15] : memref<32x128xf32, #tpu.memory_space<vmem>>, vector<32x128xf32>
      tpu.vector_store %arg6[%c0_14, %c0_15], %15 {strides = array<i32>} : memref<32x128xf32, #tpu.memory_space<vmem>>, vector<32x128xf32>,
    } else {
    }
    return
  }
  func.func @transform_0(%arg0: i32, %arg1: i32, %arg2: i32) -> (i32, i32) {
    %c0_i32 = arith.constant 0 : i32
    return %arg0, %arg2 : i32, i32
  }
  func.func @transform_1(%arg0: i32, %arg1: i32, %arg2: i32) -> (i32, i32) {
    %c0_i32 = arith.constant 0 : i32
    return %arg2, %arg1 : i32, i32
  }
  func.func @transform_2(%arg0: i32, %arg1: i32, %arg2: i32) -> (i32, i32) {
    %c0_i32 = arith.constant 0 : i32
    %c0_i32_0 = arith.constant 0 : i32
    return %c0_i32, %arg1 : i32, i32
  }
  func.func @transform_3(%arg0: i32, %arg1: i32, %arg2: i32) -> (i32, i32) {
    %c0_i32 = arith.constant 0 : i32
    return %arg0, %arg1 : i32, i32
  }
}

module attributes {stable_mosaic.version = 11 : i64} {
  func.func @_bn_stats_kernel(%arg0: i32, %arg1: memref<32x128xf32, #tpu.memory_space<vmem>>, %arg2: memref<1x128xf32, #tpu.memory_space<vmem>>, %arg3: memref<1x128xf32, #tpu.memory_space<vmem>>) attributes {dimension_semantics = [#tpu.dimension_semantics<arbitrary>], iteration_bounds = array<i64: 1>, scalar_prefetch = 0 : i64, scratch_operands = 0 : i64, tpu.core_type = #tpu.core_type<tc>, window_params = [{transform_indices = @transform_0, window_bounds = array<i64: 32, 128>}, {pipeline_mode = #tpu.pipeline_mode<synchronous>, transform_indices = @transform_1, window_bounds = array<i64: 1, 128>}, {pipeline_mode = #tpu.pipeline_mode<synchronous>, transform_indices = @transform_2, window_bounds = array<i64: 1, 128>}]} {
    %c0_i32 = arith.constant 0 : i32
    %0 = arith.cmpi eq, %arg0, %c0_i32 : i32
    %1 = arith.extui %0 : i1 to i32
    %c0_i32_0 = arith.constant 0 : i32
    %2 = arith.cmpi ne, %1, %c0_i32_0 : i32
    scf.if %2 {
      %cst_11 = arith.constant 0.000000e+00 : f32
      %15 = vector.broadcast %cst_11 : f32 to vector<1x128xf32>
      %c0_12 = arith.constant 0 : index
      %c0_13 = arith.constant 0 : index
      %16 = vector.load %arg2[%c0_12, %c0_13] : memref<1x128xf32, #tpu.memory_space<vmem>>, vector<1x128xf32>
      tpu.vector_store %arg2[%c0_12, %c0_13], %15 {strides = array<i32>} : memref<1x128xf32, #tpu.memory_space<vmem>>, vector<1x128xf32>,
      %cst_14 = arith.constant 0.000000e+00 : f32
      %17 = vector.broadcast %cst_14 : f32 to vector<1x128xf32>
      %c0_15 = arith.constant 0 : index
      %c0_16 = arith.constant 0 : index
      %18 = vector.load %arg3[%c0_15, %c0_16] : memref<1x128xf32, #tpu.memory_space<vmem>>, vector<1x128xf32>
      tpu.vector_store %arg3[%c0_15, %c0_16], %17 {strides = array<i32>} : memref<1x128xf32, #tpu.memory_space<vmem>>, vector<1x128xf32>,
    } else {
    }
    %c0 = arith.constant 0 : index
    %c0_1 = arith.constant 0 : index
    %3 = vector.load %arg1[%c0, %c0_1] : memref<32x128xf32, #tpu.memory_space<vmem>>, vector<32x128xf32>
    %c0_2 = arith.constant 0 : index
    %c0_3 = arith.constant 0 : index
    %4 = vector.load %arg2[%c0_2, %c0_3] : memref<1x128xf32, #tpu.memory_space<vmem>>, vector<1x128xf32>
    %cst = arith.constant dense<0.000000e+00> : vector<128xf32>
    %5 = vector.multi_reduction <add>, %3, %cst [0] : vector<32x128xf32> to vector<128xf32>
    %6 = vector.shape_cast %5 : vector<128xf32> to vector<1x128xf32>
    %7 = arith.addf %4, %6 : vector<1x128xf32>
    %c0_4 = arith.constant 0 : index
    %c0_5 = arith.constant 0 : index
    %8 = vector.load %arg2[%c0_4, %c0_5] : memref<1x128xf32, #tpu.memory_space<vmem>>, vector<1x128xf32>
    tpu.vector_store %arg2[%c0_4, %c0_5], %7 {strides = array<i32>} : memref<1x128xf32, #tpu.memory_space<vmem>>, vector<1x128xf32>,
    %c0_6 = arith.constant 0 : index
    %c0_7 = arith.constant 0 : index
    %9 = vector.load %arg3[%c0_6, %c0_7] : memref<1x128xf32, #tpu.memory_space<vmem>>, vector<1x128xf32>
    %10 = arith.mulf %3, %3 : vector<32x128xf32>
    %cst_8 = arith.constant dense<0.000000e+00> : vector<128xf32>
    %11 = vector.multi_reduction <add>, %10, %cst_8 [0] : vector<32x128xf32> to vector<128xf32>
    %12 = vector.shape_cast %11 : vector<128xf32> to vector<1x128xf32>
    %13 = arith.addf %9, %12 : vector<1x128xf32>
    %c0_9 = arith.constant 0 : index
    %c0_10 = arith.constant 0 : index
    %14 = vector.load %arg3[%c0_9, %c0_10] : memref<1x128xf32, #tpu.memory_space<vmem>>, vector<1x128xf32>
    tpu.vector_store %arg3[%c0_9, %c0_10], %13 {strides = array<i32>} : memref<1x128xf32, #tpu.memory_space<vmem>>, vector<1x128xf32>,
    return
  }
  func.func @transform_0(%arg0: i32) -> (i32, i32) {
    %c0_i32 = arith.constant 0 : i32
    %c0_i32_0 = arith.constant 0 : i32
    return %arg0, %c0_i32 : i32, i32
  }
  func.func @transform_1(%arg0: i32) -> (i32, i32) {
    %c0_i32 = arith.constant 0 : i32
    %c0_i32_0 = arith.constant 0 : i32
    %c0_i32_1 = arith.constant 0 : i32
    return %c0_i32, %c0_i32_0 : i32, i32
  }
  func.func @transform_2(%arg0: i32) -> (i32, i32) {
    %c0_i32 = arith.constant 0 : i32
    %c0_i32_0 = arith.constant 0 : i32
    %c0_i32_1 = arith.constant 0 : i32
    return %c0_i32, %c0_i32_0 : i32, i32
  }
}

module attributes {stable_mosaic.version = 11 : i64} {
  func.func @_bn_apply_kernel(%arg0: i32, %arg1: memref<32x128xf32, #tpu.memory_space<vmem>>, %arg2: memref<1x128xf32, #tpu.memory_space<vmem>>, %arg3: memref<1x128xf32, #tpu.memory_space<vmem>>, %arg4: memref<32x128xbf16, #tpu.memory_space<vmem>>) attributes {dimension_semantics = [#tpu.dimension_semantics<parallel>], iteration_bounds = array<i64: 1>, scalar_prefetch = 0 : i64, scratch_operands = 0 : i64, tpu.core_type = #tpu.core_type<tc>, window_params = [{transform_indices = @transform_0, window_bounds = array<i64: 32, 128>}, {pipeline_mode = #tpu.pipeline_mode<synchronous>, transform_indices = @transform_1, window_bounds = array<i64: 1, 128>}, {pipeline_mode = #tpu.pipeline_mode<synchronous>, transform_indices = @transform_2, window_bounds = array<i64: 1, 128>}, {transform_indices = @transform_3, window_bounds = array<i64: 32, 128>}]} {
    %c0 = arith.constant 0 : index
    %c0_0 = arith.constant 0 : index
    %0 = vector.load %arg1[%c0, %c0_0] : memref<32x128xf32, #tpu.memory_space<vmem>>, vector<32x128xf32>
    %c0_1 = arith.constant 0 : index
    %c0_2 = arith.constant 0 : index
    %1 = vector.load %arg2[%c0_1, %c0_2] : memref<1x128xf32, #tpu.memory_space<vmem>>, vector<1x128xf32>
    %2 = vector.broadcast %1 : vector<1x128xf32> to vector<32x128xf32>
    %3 = arith.mulf %0, %2 : vector<32x128xf32>
    %c0_3 = arith.constant 0 : index
    %c0_4 = arith.constant 0 : index
    %4 = vector.load %arg3[%c0_3, %c0_4] : memref<1x128xf32, #tpu.memory_space<vmem>>, vector<1x128xf32>
    %5 = vector.broadcast %4 : vector<1x128xf32> to vector<32x128xf32>
    %6 = arith.addf %3, %5 : vector<32x128xf32>
    %cst = arith.constant 0.000000e+00 : f32
    %7 = vector.broadcast %cst : f32 to vector<32x128xf32>
    %8 = arith.maximumf %6, %7 : vector<32x128xf32>
    %9 = arith.truncf %8 : vector<32x128xf32> to vector<32x128xbf16>
    %c0_5 = arith.constant 0 : index
    %c0_6 = arith.constant 0 : index
    %10 = vector.load %arg4[%c0_5, %c0_6] : memref<32x128xbf16, #tpu.memory_space<vmem>>, vector<32x128xbf16>
    tpu.vector_store %arg4[%c0_5, %c0_6], %9 {strides = array<i32>} : memref<32x128xbf16, #tpu.memory_space<vmem>>, vector<32x128xbf16>,
    return
  }
  func.func @transform_0(%arg0: i32) -> (i32, i32) {
    %c0_i32 = arith.constant 0 : i32
    %c0_i32_0 = arith.constant 0 : i32
    return %arg0, %c0_i32 : i32, i32
  }
  func.func @transform_1(%arg0: i32) -> (i32, i32) {
    %c0_i32 = arith.constant 0 : i32
    %c0_i32_0 = arith.constant 0 : i32
    %c0_i32_1 = arith.constant 0 : i32
    return %c0_i32, %c0_i32_0 : i32, i32
  }
  func.func @transform_2(%arg0: i32) -> (i32, i32) {
    %c0_i32 = arith.constant 0 : i32
    %c0_i32_0 = arith.constant 0 : i32
    %c0_i32_1 = arith.constant 0 : i32
    return %c0_i32, %c0_i32_0 : i32, i32
  }
  func.func @transform_3(%arg0: i32) -> (i32, i32) {
    %c0_i32 = arith.constant 0 : i32
    %c0_i32_0 = arith.constant 0 : i32
    return %arg0, %c0_i32 : i32, i32
  }
}

module attributes {stable_mosaic.version = 11 : i64} {
  func.func @_matmul_kernel(%arg0: i32, %arg1: i32, %arg2: i32, %arg3: memref<32x384xbf16, #tpu.memory_space<vmem>>, %arg4: memref<384x128xbf16, #tpu.memory_space<vmem>>, %arg5: memref<1x128xf32, #tpu.memory_space<vmem>>, %arg6: memref<32x128xf32, #tpu.memory_space<vmem>>, %arg7: memref<32x128xf32, #tpu.memory_space<vmem>>) attributes {dimension_semantics = [#tpu.dimension_semantics<parallel>, #tpu.dimension_semantics<parallel>, #tpu.dimension_semantics<arbitrary>], iteration_bounds = array<i64: 1, 1, 3>, scalar_prefetch = 0 : i64, scratch_operands = 1 : i64, tpu.core_type = #tpu.core_type<tc>, window_params = [{transform_indices = @transform_0, window_bounds = array<i64: 32, 384>}, {transform_indices = @transform_1, window_bounds = array<i64: 384, 128>}, {transform_indices = @transform_2, window_bounds = array<i64: 1, 128>}, {transform_indices = @transform_3, window_bounds = array<i64: 32, 128>}]} {
    %c0_i32 = arith.constant 0 : i32
    %0 = arith.cmpi eq, %arg2, %c0_i32 : i32
    %1 = arith.extui %0 : i1 to i32
    %c0_i32_0 = arith.constant 0 : i32
    %2 = arith.cmpi ne, %1, %c0_i32_0 : i32
    scf.if %2 {
      %cst_9 = arith.constant 0.000000e+00 : f32
      %12 = vector.broadcast %cst_9 : f32 to vector<32x128xf32>
      %c0_10 = arith.constant 0 : index
      %c0_11 = arith.constant 0 : index
      %13 = vector.load %arg7[%c0_10, %c0_11] : memref<32x128xf32, #tpu.memory_space<vmem>>, vector<32x128xf32>
      tpu.vector_store %arg7[%c0_10, %c0_11], %12 {strides = array<i32>} : memref<32x128xf32, #tpu.memory_space<vmem>>, vector<32x128xf32>,
    } else {
    }
    %c0 = arith.constant 0 : index
    %c0_1 = arith.constant 0 : index
    %3 = vector.load %arg7[%c0, %c0_1] : memref<32x128xf32, #tpu.memory_space<vmem>>, vector<32x128xf32>
    %c0_2 = arith.constant 0 : index
    %c0_3 = arith.constant 0 : index
    %4 = vector.load %arg3[%c0_2, %c0_3] : memref<32x384xbf16, #tpu.memory_space<vmem>>, vector<32x384xbf16>
    %c0_4 = arith.constant 0 : index
    %c0_5 = arith.constant 0 : index
    %5 = vector.load %arg4[%c0_4, %c0_5] : memref<384x128xbf16, #tpu.memory_space<vmem>>, vector<384x128xbf16>
    %cst = arith.constant dense<0.000000e+00> : vector<32x128xf32>
    %6 = tpu.matmul %4, %5, %cst {dimension_numbers = #tpu.dot_dimension_numbers<[1], [0], [0], [1], [0, 0, 1, 1], [], []>} : vector<32x384xbf16>, vector<384x128xbf16>, vector<32x128xf32> -> vector<32x128xf32>
    %7 = arith.addf %3, %6 : vector<32x128xf32>
    %c0_6 = arith.constant 0 : index
    %c0_7 = arith.constant 0 : index
    %8 = vector.load %arg7[%c0_6, %c0_7] : memref<32x128xf32, #tpu.memory_space<vmem>>, vector<32x128xf32>
    tpu.vector_store %arg7[%c0_6, %c0_7], %7 {strides = array<i32>} : memref<32x128xf32, #tpu.memory_space<vmem>>, vector<32x128xf32>,
    %c2_i32 = arith.constant 2 : i32
    %9 = arith.cmpi eq, %arg2, %c2_i32 : i32
    %10 = arith.extui %9 : i1 to i32
    %c0_i32_8 = arith.constant 0 : i32
    %11 = arith.cmpi ne, %10, %c0_i32_8 : i32
    scf.if %11 {
      %c0_9 = arith.constant 0 : index
      %c0_10 = arith.constant 0 : index
      %12 = vector.load %arg7[%c0_9, %c0_10] : memref<32x128xf32, #tpu.memory_space<vmem>>, vector<32x128xf32>
      %c0_11 = arith.constant 0 : index
      %c0_12 = arith.constant 0 : index
      %13 = vector.load %arg5[%c0_11, %c0_12] : memref<1x128xf32, #tpu.memory_space<vmem>>, vector<1x128xf32>
      %14 = vector.broadcast %13 : vector<1x128xf32> to vector<32x128xf32>
      %15 = arith.addf %12, %14 : vector<32x128xf32>
      %c0_13 = arith.constant 0 : index
      %c0_14 = arith.constant 0 : index
      %16 = vector.load %arg6[%c0_13, %c0_14] : memref<32x128xf32, #tpu.memory_space<vmem>>, vector<32x128xf32>
      tpu.vector_store %arg6[%c0_13, %c0_14], %15 {strides = array<i32>} : memref<32x128xf32, #tpu.memory_space<vmem>>, vector<32x128xf32>,
    } else {
    }
    return
  }
  func.func @transform_0(%arg0: i32, %arg1: i32, %arg2: i32) -> (i32, i32) {
    %c0_i32 = arith.constant 0 : i32
    return %arg0, %arg2 : i32, i32
  }
  func.func @transform_1(%arg0: i32, %arg1: i32, %arg2: i32) -> (i32, i32) {
    %c0_i32 = arith.constant 0 : i32
    return %arg2, %arg1 : i32, i32
  }
  func.func @transform_2(%arg0: i32, %arg1: i32, %arg2: i32) -> (i32, i32) {
    %c0_i32 = arith.constant 0 : i32
    %c0_i32_0 = arith.constant 0 : i32
    return %c0_i32, %arg1 : i32, i32
  }
  func.func @transform_3(%arg0: i32, %arg1: i32, %arg2: i32) -> (i32, i32) {
    %c0_i32 = arith.constant 0 : i32
    return %arg0, %arg1 : i32, i32
  }
}

module attributes {stable_mosaic.version = 11 : i64} {
  func.func @_matmul_kernel(%arg0: i32, %arg1: i32, %arg2: i32, %arg3: memref<32x128xbf16, #tpu.memory_space<vmem>>, %arg4: memref<128x128xbf16, #tpu.memory_space<vmem>>, %arg5: memref<1x128xf32, #tpu.memory_space<vmem>>, %arg6: memref<32x128xf32, #tpu.memory_space<vmem>>, %arg7: memref<32x128xf32, #tpu.memory_space<vmem>>) attributes {dimension_semantics = [#tpu.dimension_semantics<parallel>, #tpu.dimension_semantics<parallel>, #tpu.dimension_semantics<arbitrary>], iteration_bounds = array<i64: 1, 1, 1>, scalar_prefetch = 0 : i64, scratch_operands = 1 : i64, tpu.core_type = #tpu.core_type<tc>, window_params = [{transform_indices = @transform_0, window_bounds = array<i64: 32, 128>}, {transform_indices = @transform_1, window_bounds = array<i64: 128, 128>}, {transform_indices = @transform_2, window_bounds = array<i64: 1, 128>}, {transform_indices = @transform_3, window_bounds = array<i64: 32, 128>}]} {
    %c0_i32 = arith.constant 0 : i32
    %0 = arith.cmpi eq, %arg2, %c0_i32 : i32
    %1 = arith.extui %0 : i1 to i32
    %c0_i32_0 = arith.constant 0 : i32
    %2 = arith.cmpi ne, %1, %c0_i32_0 : i32
    scf.if %2 {
      %cst_10 = arith.constant 0.000000e+00 : f32
      %12 = vector.broadcast %cst_10 : f32 to vector<32x128xf32>
      %c0_11 = arith.constant 0 : index
      %c0_12 = arith.constant 0 : index
      %13 = vector.load %arg7[%c0_11, %c0_12] : memref<32x128xf32, #tpu.memory_space<vmem>>, vector<32x128xf32>
      tpu.vector_store %arg7[%c0_11, %c0_12], %12 {strides = array<i32>} : memref<32x128xf32, #tpu.memory_space<vmem>>, vector<32x128xf32>,
    } else {
    }
    %c0 = arith.constant 0 : index
    %c0_1 = arith.constant 0 : index
    %3 = vector.load %arg7[%c0, %c0_1] : memref<32x128xf32, #tpu.memory_space<vmem>>, vector<32x128xf32>
    %c0_2 = arith.constant 0 : index
    %c0_3 = arith.constant 0 : index
    %4 = vector.load %arg3[%c0_2, %c0_3] : memref<32x128xbf16, #tpu.memory_space<vmem>>, vector<32x128xbf16>
    %c0_4 = arith.constant 0 : index
    %c0_5 = arith.constant 0 : index
    %5 = vector.load %arg4[%c0_4, %c0_5] : memref<128x128xbf16, #tpu.memory_space<vmem>>, vector<128x128xbf16>
    %cst = arith.constant dense<0.000000e+00> : vector<32x128xf32>
    %6 = tpu.matmul %4, %5, %cst {dimension_numbers = #tpu.dot_dimension_numbers<[1], [0], [0], [1], [0, 0, 1, 1], [], []>} : vector<32x128xbf16>, vector<128x128xbf16>, vector<32x128xf32> -> vector<32x128xf32>
    %7 = arith.addf %3, %6 : vector<32x128xf32>
    %c0_6 = arith.constant 0 : index
    %c0_7 = arith.constant 0 : index
    %8 = vector.load %arg7[%c0_6, %c0_7] : memref<32x128xf32, #tpu.memory_space<vmem>>, vector<32x128xf32>
    tpu.vector_store %arg7[%c0_6, %c0_7], %7 {strides = array<i32>} : memref<32x128xf32, #tpu.memory_space<vmem>>, vector<32x128xf32>,
    %c0_i32_8 = arith.constant 0 : i32
    %9 = arith.cmpi eq, %arg2, %c0_i32_8 : i32
    %10 = arith.extui %9 : i1 to i32
    %c0_i32_9 = arith.constant 0 : i32
    %11 = arith.cmpi ne, %10, %c0_i32_9 : i32
    scf.if %11 {
      %c0_10 = arith.constant 0 : index
      %c0_11 = arith.constant 0 : index
      %12 = vector.load %arg7[%c0_10, %c0_11] : memref<32x128xf32, #tpu.memory_space<vmem>>, vector<32x128xf32>
      %c0_12 = arith.constant 0 : index
      %c0_13 = arith.constant 0 : index
      %13 = vector.load %arg5[%c0_12, %c0_13] : memref<1x128xf32, #tpu.memory_space<vmem>>, vector<1x128xf32>
      %14 = vector.broadcast %13 : vector<1x128xf32> to vector<32x128xf32>
      %15 = arith.addf %12, %14 : vector<32x128xf32>
      %c0_14 = arith.constant 0 : index
      %c0_15 = arith.constant 0 : index
      %16 = vector.load %arg6[%c0_14, %c0_15] : memref<32x128xf32, #tpu.memory_space<vmem>>, vector<32x128xf32>
      tpu.vector_store %arg6[%c0_14, %c0_15], %15 {strides = array<i32>} : memref<32x128xf32, #tpu.memory_space<vmem>>, vector<32x128xf32>,
    } else {
    }
    return
  }
  func.func @transform_0(%arg0: i32, %arg1: i32, %arg2: i32) -> (i32, i32) {
    %c0_i32 = arith.constant 0 : i32
    return %arg0, %arg2 : i32, i32
  }
  func.func @transform_1(%arg0: i32, %arg1: i32, %arg2: i32) -> (i32, i32) {
    %c0_i32 = arith.constant 0 : i32
    return %arg2, %arg1 : i32, i32
  }
  func.func @transform_2(%arg0: i32, %arg1: i32, %arg2: i32) -> (i32, i32) {
    %c0_i32 = arith.constant 0 : i32
    %c0_i32_0 = arith.constant 0 : i32
    return %c0_i32, %arg1 : i32, i32
  }
  func.func @transform_3(%arg0: i32, %arg1: i32, %arg2: i32) -> (i32, i32) {
    %c0_i32 = arith.constant 0 : i32
    return %arg0, %arg1 : i32, i32
  }
}

module attributes {stable_mosaic.version = 11 : i64} {
  func.func @_bn_apply_kernel(%arg0: i32, %arg1: memref<32x128xf32, #tpu.memory_space<vmem>>, %arg2: memref<1x128xf32, #tpu.memory_space<vmem>>, %arg3: memref<1x128xf32, #tpu.memory_space<vmem>>, %arg4: memref<32x128xbf16, #tpu.memory_space<vmem>>) attributes {dimension_semantics = [#tpu.dimension_semantics<parallel>], iteration_bounds = array<i64: 1>, scalar_prefetch = 0 : i64, scratch_operands = 0 : i64, tpu.core_type = #tpu.core_type<tc>, window_params = [{transform_indices = @transform_0, window_bounds = array<i64: 32, 128>}, {pipeline_mode = #tpu.pipeline_mode<synchronous>, transform_indices = @transform_1, window_bounds = array<i64: 1, 128>}, {pipeline_mode = #tpu.pipeline_mode<synchronous>, transform_indices = @transform_2, window_bounds = array<i64: 1, 128>}, {transform_indices = @transform_3, window_bounds = array<i64: 32, 128>}]} {
    %c0 = arith.constant 0 : index
    %c0_0 = arith.constant 0 : index
    %0 = vector.load %arg1[%c0, %c0_0] : memref<32x128xf32, #tpu.memory_space<vmem>>, vector<32x128xf32>
    %c0_1 = arith.constant 0 : index
    %c0_2 = arith.constant 0 : index
    %1 = vector.load %arg2[%c0_1, %c0_2] : memref<1x128xf32, #tpu.memory_space<vmem>>, vector<1x128xf32>
    %2 = vector.broadcast %1 : vector<1x128xf32> to vector<32x128xf32>
    %3 = arith.mulf %0, %2 : vector<32x128xf32>
    %c0_3 = arith.constant 0 : index
    %c0_4 = arith.constant 0 : index
    %4 = vector.load %arg3[%c0_3, %c0_4] : memref<1x128xf32, #tpu.memory_space<vmem>>, vector<1x128xf32>
    %5 = vector.broadcast %4 : vector<1x128xf32> to vector<32x128xf32>
    %6 = arith.addf %3, %5 : vector<32x128xf32>
    %7 = arith.truncf %6 : vector<32x128xf32> to vector<32x128xbf16>
    %c0_5 = arith.constant 0 : index
    %c0_6 = arith.constant 0 : index
    %8 = vector.load %arg4[%c0_5, %c0_6] : memref<32x128xbf16, #tpu.memory_space<vmem>>, vector<32x128xbf16>
    tpu.vector_store %arg4[%c0_5, %c0_6], %7 {strides = array<i32>} : memref<32x128xbf16, #tpu.memory_space<vmem>>, vector<32x128xbf16>,
    return
  }
  func.func @transform_0(%arg0: i32) -> (i32, i32) {
    %c0_i32 = arith.constant 0 : i32
    %c0_i32_0 = arith.constant 0 : i32
    return %arg0, %c0_i32 : i32, i32
  }
  func.func @transform_1(%arg0: i32) -> (i32, i32) {
    %c0_i32 = arith.constant 0 : i32
    %c0_i32_0 = arith.constant 0 : i32
    %c0_i32_1 = arith.constant 0 : i32
    return %c0_i32, %c0_i32_0 : i32, i32
  }
  func.func @transform_2(%arg0: i32) -> (i32, i32) {
    %c0_i32 = arith.constant 0 : i32
    %c0_i32_0 = arith.constant 0 : i32
    %c0_i32_1 = arith.constant 0 : i32
    return %c0_i32, %c0_i32_0 : i32, i32
  }
  func.func @transform_3(%arg0: i32) -> (i32, i32) {
    %c0_i32 = arith.constant 0 : i32
    %c0_i32_0 = arith.constant 0 : i32
    return %arg0, %c0_i32 : i32, i32
  }
}

module attributes {stable_mosaic.version = 11 : i64} {
  func.func @_bn_apply_res_kernel(%arg0: i32, %arg1: memref<32x128xf32, #tpu.memory_space<vmem>>, %arg2: memref<32x128xbf16, #tpu.memory_space<vmem>>, %arg3: memref<1x128xf32, #tpu.memory_space<vmem>>, %arg4: memref<1x128xf32, #tpu.memory_space<vmem>>, %arg5: memref<32x128xbf16, #tpu.memory_space<vmem>>) attributes {dimension_semantics = [#tpu.dimension_semantics<parallel>], iteration_bounds = array<i64: 1>, scalar_prefetch = 0 : i64, scratch_operands = 0 : i64, tpu.core_type = #tpu.core_type<tc>, window_params = [{transform_indices = @transform_0, window_bounds = array<i64: 32, 128>}, {transform_indices = @transform_1, window_bounds = array<i64: 32, 128>}, {pipeline_mode = #tpu.pipeline_mode<synchronous>, transform_indices = @transform_2, window_bounds = array<i64: 1, 128>}, {pipeline_mode = #tpu.pipeline_mode<synchronous>, transform_indices = @transform_3, window_bounds = array<i64: 1, 128>}, {transform_indices = @transform_4, window_bounds = array<i64: 32, 128>}]} {
    %c0 = arith.constant 0 : index
    %c0_0 = arith.constant 0 : index
    %0 = vector.load %arg1[%c0, %c0_0] : memref<32x128xf32, #tpu.memory_space<vmem>>, vector<32x128xf32>
    %c0_1 = arith.constant 0 : index
    %c0_2 = arith.constant 0 : index
    %1 = vector.load %arg3[%c0_1, %c0_2] : memref<1x128xf32, #tpu.memory_space<vmem>>, vector<1x128xf32>
    %2 = vector.broadcast %1 : vector<1x128xf32> to vector<32x128xf32>
    %3 = arith.mulf %0, %2 : vector<32x128xf32>
    %c0_3 = arith.constant 0 : index
    %c0_4 = arith.constant 0 : index
    %4 = vector.load %arg4[%c0_3, %c0_4] : memref<1x128xf32, #tpu.memory_space<vmem>>, vector<1x128xf32>
    %5 = vector.broadcast %4 : vector<1x128xf32> to vector<32x128xf32>
    %6 = arith.addf %3, %5 : vector<32x128xf32>
    %c0_5 = arith.constant 0 : index
    %c0_6 = arith.constant 0 : index
    %7 = vector.load %arg2[%c0_5, %c0_6] : memref<32x128xbf16, #tpu.memory_space<vmem>>, vector<32x128xbf16>
    %8 = arith.extf %7 : vector<32x128xbf16> to vector<32x128xf32>
    %9 = arith.addf %6, %8 : vector<32x128xf32>
    %cst = arith.constant 0.000000e+00 : f32
    %10 = vector.broadcast %cst : f32 to vector<32x128xf32>
    %11 = arith.maximumf %9, %10 : vector<32x128xf32>
    %12 = arith.truncf %11 : vector<32x128xf32> to vector<32x128xbf16>
    %c0_7 = arith.constant 0 : index
    %c0_8 = arith.constant 0 : index
    %13 = vector.load %arg5[%c0_7, %c0_8] : memref<32x128xbf16, #tpu.memory_space<vmem>>, vector<32x128xbf16>
    tpu.vector_store %arg5[%c0_7, %c0_8], %12 {strides = array<i32>} : memref<32x128xbf16, #tpu.memory_space<vmem>>, vector<32x128xbf16>,
    return
  }
  func.func @transform_0(%arg0: i32) -> (i32, i32) {
    %c0_i32 = arith.constant 0 : i32
    %c0_i32_0 = arith.constant 0 : i32
    return %arg0, %c0_i32 : i32, i32
  }
  func.func @transform_1(%arg0: i32) -> (i32, i32) {
    %c0_i32 = arith.constant 0 : i32
    %c0_i32_0 = arith.constant 0 : i32
    return %arg0, %c0_i32 : i32, i32
  }
  func.func @transform_2(%arg0: i32) -> (i32, i32) {
    %c0_i32 = arith.constant 0 : i32
    %c0_i32_0 = arith.constant 0 : i32
    %c0_i32_1 = arith.constant 0 : i32
    return %c0_i32, %c0_i32_0 : i32, i32
  }
  func.func @transform_3(%arg0: i32) -> (i32, i32) {
    %c0_i32 = arith.constant 0 : i32
    %c0_i32_0 = arith.constant 0 : i32
    %c0_i32_1 = arith.constant 0 : i32
    return %c0_i32, %c0_i32_0 : i32, i32
  }
  func.func @transform_4(%arg0: i32) -> (i32, i32) {
    %c0_i32 = arith.constant 0 : i32
    %c0_i32_0 = arith.constant 0 : i32
    return %arg0, %c0_i32 : i32, i32
  }
}

module attributes {stable_mosaic.version = 11 : i64} {
  func.func @_matmul_kernel(%arg0: i32, %arg1: i32, %arg2: i32, %arg3: memref<16x384xbf16, #tpu.memory_space<vmem>>, %arg4: memref<384x256xbf16, #tpu.memory_space<vmem>>, %arg5: memref<1x256xf32, #tpu.memory_space<vmem>>, %arg6: memref<16x256xf32, #tpu.memory_space<vmem>>, %arg7: memref<16x256xf32, #tpu.memory_space<vmem>>) attributes {dimension_semantics = [#tpu.dimension_semantics<parallel>, #tpu.dimension_semantics<parallel>, #tpu.dimension_semantics<arbitrary>], iteration_bounds = array<i64: 1, 1, 3>, scalar_prefetch = 0 : i64, scratch_operands = 1 : i64, tpu.core_type = #tpu.core_type<tc>, window_params = [{transform_indices = @transform_0, window_bounds = array<i64: 16, 384>}, {transform_indices = @transform_1, window_bounds = array<i64: 384, 256>}, {transform_indices = @transform_2, window_bounds = array<i64: 1, 256>}, {transform_indices = @transform_3, window_bounds = array<i64: 16, 256>}]} {
    %c0_i32 = arith.constant 0 : i32
    %0 = arith.cmpi eq, %arg2, %c0_i32 : i32
    %1 = arith.extui %0 : i1 to i32
    %c0_i32_0 = arith.constant 0 : i32
    %2 = arith.cmpi ne, %1, %c0_i32_0 : i32
    scf.if %2 {
      %cst_9 = arith.constant 0.000000e+00 : f32
      %12 = vector.broadcast %cst_9 : f32 to vector<16x256xf32>
      %c0_10 = arith.constant 0 : index
      %c0_11 = arith.constant 0 : index
      %13 = vector.load %arg7[%c0_10, %c0_11] : memref<16x256xf32, #tpu.memory_space<vmem>>, vector<16x256xf32>
      tpu.vector_store %arg7[%c0_10, %c0_11], %12 {strides = array<i32>} : memref<16x256xf32, #tpu.memory_space<vmem>>, vector<16x256xf32>,
    } else {
    }
    %c0 = arith.constant 0 : index
    %c0_1 = arith.constant 0 : index
    %3 = vector.load %arg7[%c0, %c0_1] : memref<16x256xf32, #tpu.memory_space<vmem>>, vector<16x256xf32>
    %c0_2 = arith.constant 0 : index
    %c0_3 = arith.constant 0 : index
    %4 = vector.load %arg3[%c0_2, %c0_3] : memref<16x384xbf16, #tpu.memory_space<vmem>>, vector<16x384xbf16>
    %c0_4 = arith.constant 0 : index
    %c0_5 = arith.constant 0 : index
    %5 = vector.load %arg4[%c0_4, %c0_5] : memref<384x256xbf16, #tpu.memory_space<vmem>>, vector<384x256xbf16>
    %cst = arith.constant dense<0.000000e+00> : vector<16x256xf32>
    %6 = tpu.matmul %4, %5, %cst {dimension_numbers = #tpu.dot_dimension_numbers<[1], [0], [0], [1], [0, 0, 1, 1], [], []>} : vector<16x384xbf16>, vector<384x256xbf16>, vector<16x256xf32> -> vector<16x256xf32>
    %7 = arith.addf %3, %6 : vector<16x256xf32>
    %c0_6 = arith.constant 0 : index
    %c0_7 = arith.constant 0 : index
    %8 = vector.load %arg7[%c0_6, %c0_7] : memref<16x256xf32, #tpu.memory_space<vmem>>, vector<16x256xf32>
    tpu.vector_store %arg7[%c0_6, %c0_7], %7 {strides = array<i32>} : memref<16x256xf32, #tpu.memory_space<vmem>>, vector<16x256xf32>,
    %c2_i32 = arith.constant 2 : i32
    %9 = arith.cmpi eq, %arg2, %c2_i32 : i32
    %10 = arith.extui %9 : i1 to i32
    %c0_i32_8 = arith.constant 0 : i32
    %11 = arith.cmpi ne, %10, %c0_i32_8 : i32
    scf.if %11 {
      %c0_9 = arith.constant 0 : index
      %c0_10 = arith.constant 0 : index
      %12 = vector.load %arg7[%c0_9, %c0_10] : memref<16x256xf32, #tpu.memory_space<vmem>>, vector<16x256xf32>
      %c0_11 = arith.constant 0 : index
      %c0_12 = arith.constant 0 : index
      %13 = vector.load %arg5[%c0_11, %c0_12] : memref<1x256xf32, #tpu.memory_space<vmem>>, vector<1x256xf32>
      %14 = vector.broadcast %13 : vector<1x256xf32> to vector<16x256xf32>
      %15 = arith.addf %12, %14 : vector<16x256xf32>
      %c0_13 = arith.constant 0 : index
      %c0_14 = arith.constant 0 : index
      %16 = vector.load %arg6[%c0_13, %c0_14] : memref<16x256xf32, #tpu.memory_space<vmem>>, vector<16x256xf32>
      tpu.vector_store %arg6[%c0_13, %c0_14], %15 {strides = array<i32>} : memref<16x256xf32, #tpu.memory_space<vmem>>, vector<16x256xf32>,
    } else {
    }
    return
  }
  func.func @transform_0(%arg0: i32, %arg1: i32, %arg2: i32) -> (i32, i32) {
    %c0_i32 = arith.constant 0 : i32
    return %arg0, %arg2 : i32, i32
  }
  func.func @transform_1(%arg0: i32, %arg1: i32, %arg2: i32) -> (i32, i32) {
    %c0_i32 = arith.constant 0 : i32
    return %arg2, %arg1 : i32, i32
  }
  func.func @transform_2(%arg0: i32, %arg1: i32, %arg2: i32) -> (i32, i32) {
    %c0_i32 = arith.constant 0 : i32
    %c0_i32_0 = arith.constant 0 : i32
    return %c0_i32, %arg1 : i32, i32
  }
  func.func @transform_3(%arg0: i32, %arg1: i32, %arg2: i32) -> (i32, i32) {
    %c0_i32 = arith.constant 0 : i32
    return %arg0, %arg1 : i32, i32
  }
}

module attributes {stable_mosaic.version = 11 : i64} {
  func.func @_bn_stats_kernel(%arg0: i32, %arg1: memref<16x256xf32, #tpu.memory_space<vmem>>, %arg2: memref<1x256xf32, #tpu.memory_space<vmem>>, %arg3: memref<1x256xf32, #tpu.memory_space<vmem>>) attributes {dimension_semantics = [#tpu.dimension_semantics<arbitrary>], iteration_bounds = array<i64: 1>, scalar_prefetch = 0 : i64, scratch_operands = 0 : i64, tpu.core_type = #tpu.core_type<tc>, window_params = [{transform_indices = @transform_0, window_bounds = array<i64: 16, 256>}, {pipeline_mode = #tpu.pipeline_mode<synchronous>, transform_indices = @transform_1, window_bounds = array<i64: 1, 256>}, {pipeline_mode = #tpu.pipeline_mode<synchronous>, transform_indices = @transform_2, window_bounds = array<i64: 1, 256>}]} {
    %c0_i32 = arith.constant 0 : i32
    %0 = arith.cmpi eq, %arg0, %c0_i32 : i32
    %1 = arith.extui %0 : i1 to i32
    %c0_i32_0 = arith.constant 0 : i32
    %2 = arith.cmpi ne, %1, %c0_i32_0 : i32
    scf.if %2 {
      %cst_11 = arith.constant 0.000000e+00 : f32
      %15 = vector.broadcast %cst_11 : f32 to vector<1x256xf32>
      %c0_12 = arith.constant 0 : index
      %c0_13 = arith.constant 0 : index
      %16 = vector.load %arg2[%c0_12, %c0_13] : memref<1x256xf32, #tpu.memory_space<vmem>>, vector<1x256xf32>
      tpu.vector_store %arg2[%c0_12, %c0_13], %15 {strides = array<i32>} : memref<1x256xf32, #tpu.memory_space<vmem>>, vector<1x256xf32>,
      %cst_14 = arith.constant 0.000000e+00 : f32
      %17 = vector.broadcast %cst_14 : f32 to vector<1x256xf32>
      %c0_15 = arith.constant 0 : index
      %c0_16 = arith.constant 0 : index
      %18 = vector.load %arg3[%c0_15, %c0_16] : memref<1x256xf32, #tpu.memory_space<vmem>>, vector<1x256xf32>
      tpu.vector_store %arg3[%c0_15, %c0_16], %17 {strides = array<i32>} : memref<1x256xf32, #tpu.memory_space<vmem>>, vector<1x256xf32>,
    } else {
    }
    %c0 = arith.constant 0 : index
    %c0_1 = arith.constant 0 : index
    %3 = vector.load %arg1[%c0, %c0_1] : memref<16x256xf32, #tpu.memory_space<vmem>>, vector<16x256xf32>
    %c0_2 = arith.constant 0 : index
    %c0_3 = arith.constant 0 : index
    %4 = vector.load %arg2[%c0_2, %c0_3] : memref<1x256xf32, #tpu.memory_space<vmem>>, vector<1x256xf32>
    %cst = arith.constant dense<0.000000e+00> : vector<256xf32>
    %5 = vector.multi_reduction <add>, %3, %cst [0] : vector<16x256xf32> to vector<256xf32>
    %6 = vector.shape_cast %5 : vector<256xf32> to vector<1x256xf32>
    %7 = arith.addf %4, %6 : vector<1x256xf32>
    %c0_4 = arith.constant 0 : index
    %c0_5 = arith.constant 0 : index
    %8 = vector.load %arg2[%c0_4, %c0_5] : memref<1x256xf32, #tpu.memory_space<vmem>>, vector<1x256xf32>
    tpu.vector_store %arg2[%c0_4, %c0_5], %7 {strides = array<i32>} : memref<1x256xf32, #tpu.memory_space<vmem>>, vector<1x256xf32>,
    %c0_6 = arith.constant 0 : index
    %c0_7 = arith.constant 0 : index
    %9 = vector.load %arg3[%c0_6, %c0_7] : memref<1x256xf32, #tpu.memory_space<vmem>>, vector<1x256xf32>
    %10 = arith.mulf %3, %3 : vector<16x256xf32>
    %cst_8 = arith.constant dense<0.000000e+00> : vector<256xf32>
    %11 = vector.multi_reduction <add>, %10, %cst_8 [0] : vector<16x256xf32> to vector<256xf32>
    %12 = vector.shape_cast %11 : vector<256xf32> to vector<1x256xf32>
    %13 = arith.addf %9, %12 : vector<1x256xf32>
    %c0_9 = arith.constant 0 : index
    %c0_10 = arith.constant 0 : index
    %14 = vector.load %arg3[%c0_9, %c0_10] : memref<1x256xf32, #tpu.memory_space<vmem>>, vector<1x256xf32>
    tpu.vector_store %arg3[%c0_9, %c0_10], %13 {strides = array<i32>} : memref<1x256xf32, #tpu.memory_space<vmem>>, vector<1x256xf32>,
    return
  }
  func.func @transform_0(%arg0: i32) -> (i32, i32) {
    %c0_i32 = arith.constant 0 : i32
    %c0_i32_0 = arith.constant 0 : i32
    return %arg0, %c0_i32 : i32, i32
  }
  func.func @transform_1(%arg0: i32) -> (i32, i32) {
    %c0_i32 = arith.constant 0 : i32
    %c0_i32_0 = arith.constant 0 : i32
    %c0_i32_1 = arith.constant 0 : i32
    return %c0_i32, %c0_i32_0 : i32, i32
  }
  func.func @transform_2(%arg0: i32) -> (i32, i32) {
    %c0_i32 = arith.constant 0 : i32
    %c0_i32_0 = arith.constant 0 : i32
    %c0_i32_1 = arith.constant 0 : i32
    return %c0_i32, %c0_i32_0 : i32, i32
  }
}

module attributes {stable_mosaic.version = 11 : i64} {
  func.func @_bn_apply_kernel(%arg0: i32, %arg1: memref<16x256xf32, #tpu.memory_space<vmem>>, %arg2: memref<1x256xf32, #tpu.memory_space<vmem>>, %arg3: memref<1x256xf32, #tpu.memory_space<vmem>>, %arg4: memref<16x256xbf16, #tpu.memory_space<vmem>>) attributes {dimension_semantics = [#tpu.dimension_semantics<parallel>], iteration_bounds = array<i64: 1>, scalar_prefetch = 0 : i64, scratch_operands = 0 : i64, tpu.core_type = #tpu.core_type<tc>, window_params = [{transform_indices = @transform_0, window_bounds = array<i64: 16, 256>}, {pipeline_mode = #tpu.pipeline_mode<synchronous>, transform_indices = @transform_1, window_bounds = array<i64: 1, 256>}, {pipeline_mode = #tpu.pipeline_mode<synchronous>, transform_indices = @transform_2, window_bounds = array<i64: 1, 256>}, {transform_indices = @transform_3, window_bounds = array<i64: 16, 256>}]} {
    %c0 = arith.constant 0 : index
    %c0_0 = arith.constant 0 : index
    %0 = vector.load %arg1[%c0, %c0_0] : memref<16x256xf32, #tpu.memory_space<vmem>>, vector<16x256xf32>
    %c0_1 = arith.constant 0 : index
    %c0_2 = arith.constant 0 : index
    %1 = vector.load %arg2[%c0_1, %c0_2] : memref<1x256xf32, #tpu.memory_space<vmem>>, vector<1x256xf32>
    %2 = vector.broadcast %1 : vector<1x256xf32> to vector<16x256xf32>
    %3 = arith.mulf %0, %2 : vector<16x256xf32>
    %c0_3 = arith.constant 0 : index
    %c0_4 = arith.constant 0 : index
    %4 = vector.load %arg3[%c0_3, %c0_4] : memref<1x256xf32, #tpu.memory_space<vmem>>, vector<1x256xf32>
    %5 = vector.broadcast %4 : vector<1x256xf32> to vector<16x256xf32>
    %6 = arith.addf %3, %5 : vector<16x256xf32>
    %cst = arith.constant 0.000000e+00 : f32
    %7 = vector.broadcast %cst : f32 to vector<16x256xf32>
    %8 = arith.maximumf %6, %7 : vector<16x256xf32>
    %9 = arith.truncf %8 : vector<16x256xf32> to vector<16x256xbf16>
    %c0_5 = arith.constant 0 : index
    %c0_6 = arith.constant 0 : index
    %10 = vector.load %arg4[%c0_5, %c0_6] : memref<16x256xbf16, #tpu.memory_space<vmem>>, vector<16x256xbf16>
    tpu.vector_store %arg4[%c0_5, %c0_6], %9 {strides = array<i32>} : memref<16x256xbf16, #tpu.memory_space<vmem>>, vector<16x256xbf16>,
    return
  }
  func.func @transform_0(%arg0: i32) -> (i32, i32) {
    %c0_i32 = arith.constant 0 : i32
    %c0_i32_0 = arith.constant 0 : i32
    return %arg0, %c0_i32 : i32, i32
  }
  func.func @transform_1(%arg0: i32) -> (i32, i32) {
    %c0_i32 = arith.constant 0 : i32
    %c0_i32_0 = arith.constant 0 : i32
    %c0_i32_1 = arith.constant 0 : i32
    return %c0_i32, %c0_i32_0 : i32, i32
  }
  func.func @transform_2(%arg0: i32) -> (i32, i32) {
    %c0_i32 = arith.constant 0 : i32
    %c0_i32_0 = arith.constant 0 : i32
    %c0_i32_1 = arith.constant 0 : i32
    return %c0_i32, %c0_i32_0 : i32, i32
  }
  func.func @transform_3(%arg0: i32) -> (i32, i32) {
    %c0_i32 = arith.constant 0 : i32
    %c0_i32_0 = arith.constant 0 : i32
    return %arg0, %c0_i32 : i32, i32
  }
}

module attributes {stable_mosaic.version = 11 : i64} {
  func.func @_matmul_kernel(%arg0: i32, %arg1: i32, %arg2: i32, %arg3: memref<16x768xbf16, #tpu.memory_space<vmem>>, %arg4: memref<768x256xbf16, #tpu.memory_space<vmem>>, %arg5: memref<1x256xf32, #tpu.memory_space<vmem>>, %arg6: memref<16x256xf32, #tpu.memory_space<vmem>>, %arg7: memref<16x256xf32, #tpu.memory_space<vmem>>) attributes {dimension_semantics = [#tpu.dimension_semantics<parallel>, #tpu.dimension_semantics<parallel>, #tpu.dimension_semantics<arbitrary>], iteration_bounds = array<i64: 1, 1, 3>, scalar_prefetch = 0 : i64, scratch_operands = 1 : i64, tpu.core_type = #tpu.core_type<tc>, window_params = [{transform_indices = @transform_0, window_bounds = array<i64: 16, 768>}, {transform_indices = @transform_1, window_bounds = array<i64: 768, 256>}, {transform_indices = @transform_2, window_bounds = array<i64: 1, 256>}, {transform_indices = @transform_3, window_bounds = array<i64: 16, 256>}]} {
    %c0_i32 = arith.constant 0 : i32
    %0 = arith.cmpi eq, %arg2, %c0_i32 : i32
    %1 = arith.extui %0 : i1 to i32
    %c0_i32_0 = arith.constant 0 : i32
    %2 = arith.cmpi ne, %1, %c0_i32_0 : i32
    scf.if %2 {
      %cst_9 = arith.constant 0.000000e+00 : f32
      %12 = vector.broadcast %cst_9 : f32 to vector<16x256xf32>
      %c0_10 = arith.constant 0 : index
      %c0_11 = arith.constant 0 : index
      %13 = vector.load %arg7[%c0_10, %c0_11] : memref<16x256xf32, #tpu.memory_space<vmem>>, vector<16x256xf32>
      tpu.vector_store %arg7[%c0_10, %c0_11], %12 {strides = array<i32>} : memref<16x256xf32, #tpu.memory_space<vmem>>, vector<16x256xf32>,
    } else {
    }
    %c0 = arith.constant 0 : index
    %c0_1 = arith.constant 0 : index
    %3 = vector.load %arg7[%c0, %c0_1] : memref<16x256xf32, #tpu.memory_space<vmem>>, vector<16x256xf32>
    %c0_2 = arith.constant 0 : index
    %c0_3 = arith.constant 0 : index
    %4 = vector.load %arg3[%c0_2, %c0_3] : memref<16x768xbf16, #tpu.memory_space<vmem>>, vector<16x768xbf16>
    %c0_4 = arith.constant 0 : index
    %c0_5 = arith.constant 0 : index
    %5 = vector.load %arg4[%c0_4, %c0_5] : memref<768x256xbf16, #tpu.memory_space<vmem>>, vector<768x256xbf16>
    %cst = arith.constant dense<0.000000e+00> : vector<16x256xf32>
    %6 = tpu.matmul %4, %5, %cst {dimension_numbers = #tpu.dot_dimension_numbers<[1], [0], [0], [1], [0, 0, 1, 1], [], []>} : vector<16x768xbf16>, vector<768x256xbf16>, vector<16x256xf32> -> vector<16x256xf32>
    %7 = arith.addf %3, %6 : vector<16x256xf32>
    %c0_6 = arith.constant 0 : index
    %c0_7 = arith.constant 0 : index
    %8 = vector.load %arg7[%c0_6, %c0_7] : memref<16x256xf32, #tpu.memory_space<vmem>>, vector<16x256xf32>
    tpu.vector_store %arg7[%c0_6, %c0_7], %7 {strides = array<i32>} : memref<16x256xf32, #tpu.memory_space<vmem>>, vector<16x256xf32>,
    %c2_i32 = arith.constant 2 : i32
    %9 = arith.cmpi eq, %arg2, %c2_i32 : i32
    %10 = arith.extui %9 : i1 to i32
    %c0_i32_8 = arith.constant 0 : i32
    %11 = arith.cmpi ne, %10, %c0_i32_8 : i32
    scf.if %11 {
      %c0_9 = arith.constant 0 : index
      %c0_10 = arith.constant 0 : index
      %12 = vector.load %arg7[%c0_9, %c0_10] : memref<16x256xf32, #tpu.memory_space<vmem>>, vector<16x256xf32>
      %c0_11 = arith.constant 0 : index
      %c0_12 = arith.constant 0 : index
      %13 = vector.load %arg5[%c0_11, %c0_12] : memref<1x256xf32, #tpu.memory_space<vmem>>, vector<1x256xf32>
      %14 = vector.broadcast %13 : vector<1x256xf32> to vector<16x256xf32>
      %15 = arith.addf %12, %14 : vector<16x256xf32>
      %c0_13 = arith.constant 0 : index
      %c0_14 = arith.constant 0 : index
      %16 = vector.load %arg6[%c0_13, %c0_14] : memref<16x256xf32, #tpu.memory_space<vmem>>, vector<16x256xf32>
      tpu.vector_store %arg6[%c0_13, %c0_14], %15 {strides = array<i32>} : memref<16x256xf32, #tpu.memory_space<vmem>>, vector<16x256xf32>,
    } else {
    }
    return
  }
  func.func @transform_0(%arg0: i32, %arg1: i32, %arg2: i32) -> (i32, i32) {
    %c0_i32 = arith.constant 0 : i32
    return %arg0, %arg2 : i32, i32
  }
  func.func @transform_1(%arg0: i32, %arg1: i32, %arg2: i32) -> (i32, i32) {
    %c0_i32 = arith.constant 0 : i32
    return %arg2, %arg1 : i32, i32
  }
  func.func @transform_2(%arg0: i32, %arg1: i32, %arg2: i32) -> (i32, i32) {
    %c0_i32 = arith.constant 0 : i32
    %c0_i32_0 = arith.constant 0 : i32
    return %c0_i32, %arg1 : i32, i32
  }
  func.func @transform_3(%arg0: i32, %arg1: i32, %arg2: i32) -> (i32, i32) {
    %c0_i32 = arith.constant 0 : i32
    return %arg0, %arg1 : i32, i32
  }
}

module attributes {stable_mosaic.version = 11 : i64} {
  func.func @_matmul_kernel(%arg0: i32, %arg1: i32, %arg2: i32, %arg3: memref<16x128xbf16, #tpu.memory_space<vmem>>, %arg4: memref<128x256xbf16, #tpu.memory_space<vmem>>, %arg5: memref<1x256xf32, #tpu.memory_space<vmem>>, %arg6: memref<16x256xf32, #tpu.memory_space<vmem>>, %arg7: memref<16x256xf32, #tpu.memory_space<vmem>>) attributes {dimension_semantics = [#tpu.dimension_semantics<parallel>, #tpu.dimension_semantics<parallel>, #tpu.dimension_semantics<arbitrary>], iteration_bounds = array<i64: 1, 1, 1>, scalar_prefetch = 0 : i64, scratch_operands = 1 : i64, tpu.core_type = #tpu.core_type<tc>, window_params = [{transform_indices = @transform_0, window_bounds = array<i64: 16, 128>}, {transform_indices = @transform_1, window_bounds = array<i64: 128, 256>}, {transform_indices = @transform_2, window_bounds = array<i64: 1, 256>}, {transform_indices = @transform_3, window_bounds = array<i64: 16, 256>}]} {
    %c0_i32 = arith.constant 0 : i32
    %0 = arith.cmpi eq, %arg2, %c0_i32 : i32
    %1 = arith.extui %0 : i1 to i32
    %c0_i32_0 = arith.constant 0 : i32
    %2 = arith.cmpi ne, %1, %c0_i32_0 : i32
    scf.if %2 {
      %cst_10 = arith.constant 0.000000e+00 : f32
      %12 = vector.broadcast %cst_10 : f32 to vector<16x256xf32>
      %c0_11 = arith.constant 0 : index
      %c0_12 = arith.constant 0 : index
      %13 = vector.load %arg7[%c0_11, %c0_12] : memref<16x256xf32, #tpu.memory_space<vmem>>, vector<16x256xf32>
      tpu.vector_store %arg7[%c0_11, %c0_12], %12 {strides = array<i32>} : memref<16x256xf32, #tpu.memory_space<vmem>>, vector<16x256xf32>,
    } else {
    }
    %c0 = arith.constant 0 : index
    %c0_1 = arith.constant 0 : index
    %3 = vector.load %arg7[%c0, %c0_1] : memref<16x256xf32, #tpu.memory_space<vmem>>, vector<16x256xf32>
    %c0_2 = arith.constant 0 : index
    %c0_3 = arith.constant 0 : index
    %4 = vector.load %arg3[%c0_2, %c0_3] : memref<16x128xbf16, #tpu.memory_space<vmem>>, vector<16x128xbf16>
    %c0_4 = arith.constant 0 : index
    %c0_5 = arith.constant 0 : index
    %5 = vector.load %arg4[%c0_4, %c0_5] : memref<128x256xbf16, #tpu.memory_space<vmem>>, vector<128x256xbf16>
    %cst = arith.constant dense<0.000000e+00> : vector<16x256xf32>
    %6 = tpu.matmul %4, %5, %cst {dimension_numbers = #tpu.dot_dimension_numbers<[1], [0], [0], [1], [0, 0, 1, 1], [], []>} : vector<16x128xbf16>, vector<128x256xbf16>, vector<16x256xf32> -> vector<16x256xf32>
    %7 = arith.addf %3, %6 : vector<16x256xf32>
    %c0_6 = arith.constant 0 : index
    %c0_7 = arith.constant 0 : index
    %8 = vector.load %arg7[%c0_6, %c0_7] : memref<16x256xf32, #tpu.memory_space<vmem>>, vector<16x256xf32>
    tpu.vector_store %arg7[%c0_6, %c0_7], %7 {strides = array<i32>} : memref<16x256xf32, #tpu.memory_space<vmem>>, vector<16x256xf32>,
    %c0_i32_8 = arith.constant 0 : i32
    %9 = arith.cmpi eq, %arg2, %c0_i32_8 : i32
    %10 = arith.extui %9 : i1 to i32
    %c0_i32_9 = arith.constant 0 : i32
    %11 = arith.cmpi ne, %10, %c0_i32_9 : i32
    scf.if %11 {
      %c0_10 = arith.constant 0 : index
      %c0_11 = arith.constant 0 : index
      %12 = vector.load %arg7[%c0_10, %c0_11] : memref<16x256xf32, #tpu.memory_space<vmem>>, vector<16x256xf32>
      %c0_12 = arith.constant 0 : index
      %c0_13 = arith.constant 0 : index
      %13 = vector.load %arg5[%c0_12, %c0_13] : memref<1x256xf32, #tpu.memory_space<vmem>>, vector<1x256xf32>
      %14 = vector.broadcast %13 : vector<1x256xf32> to vector<16x256xf32>
      %15 = arith.addf %12, %14 : vector<16x256xf32>
      %c0_14 = arith.constant 0 : index
      %c0_15 = arith.constant 0 : index
      %16 = vector.load %arg6[%c0_14, %c0_15] : memref<16x256xf32, #tpu.memory_space<vmem>>, vector<16x256xf32>
      tpu.vector_store %arg6[%c0_14, %c0_15], %15 {strides = array<i32>} : memref<16x256xf32, #tpu.memory_space<vmem>>, vector<16x256xf32>,
    } else {
    }
    return
  }
  func.func @transform_0(%arg0: i32, %arg1: i32, %arg2: i32) -> (i32, i32) {
    %c0_i32 = arith.constant 0 : i32
    return %arg0, %arg2 : i32, i32
  }
  func.func @transform_1(%arg0: i32, %arg1: i32, %arg2: i32) -> (i32, i32) {
    %c0_i32 = arith.constant 0 : i32
    return %arg2, %arg1 : i32, i32
  }
  func.func @transform_2(%arg0: i32, %arg1: i32, %arg2: i32) -> (i32, i32) {
    %c0_i32 = arith.constant 0 : i32
    %c0_i32_0 = arith.constant 0 : i32
    return %c0_i32, %arg1 : i32, i32
  }
  func.func @transform_3(%arg0: i32, %arg1: i32, %arg2: i32) -> (i32, i32) {
    %c0_i32 = arith.constant 0 : i32
    return %arg0, %arg1 : i32, i32
  }
}

module attributes {stable_mosaic.version = 11 : i64} {
  func.func @_bn_apply_kernel(%arg0: i32, %arg1: memref<16x256xf32, #tpu.memory_space<vmem>>, %arg2: memref<1x256xf32, #tpu.memory_space<vmem>>, %arg3: memref<1x256xf32, #tpu.memory_space<vmem>>, %arg4: memref<16x256xbf16, #tpu.memory_space<vmem>>) attributes {dimension_semantics = [#tpu.dimension_semantics<parallel>], iteration_bounds = array<i64: 1>, scalar_prefetch = 0 : i64, scratch_operands = 0 : i64, tpu.core_type = #tpu.core_type<tc>, window_params = [{transform_indices = @transform_0, window_bounds = array<i64: 16, 256>}, {pipeline_mode = #tpu.pipeline_mode<synchronous>, transform_indices = @transform_1, window_bounds = array<i64: 1, 256>}, {pipeline_mode = #tpu.pipeline_mode<synchronous>, transform_indices = @transform_2, window_bounds = array<i64: 1, 256>}, {transform_indices = @transform_3, window_bounds = array<i64: 16, 256>}]} {
    %c0 = arith.constant 0 : index
    %c0_0 = arith.constant 0 : index
    %0 = vector.load %arg1[%c0, %c0_0] : memref<16x256xf32, #tpu.memory_space<vmem>>, vector<16x256xf32>
    %c0_1 = arith.constant 0 : index
    %c0_2 = arith.constant 0 : index
    %1 = vector.load %arg2[%c0_1, %c0_2] : memref<1x256xf32, #tpu.memory_space<vmem>>, vector<1x256xf32>
    %2 = vector.broadcast %1 : vector<1x256xf32> to vector<16x256xf32>
    %3 = arith.mulf %0, %2 : vector<16x256xf32>
    %c0_3 = arith.constant 0 : index
    %c0_4 = arith.constant 0 : index
    %4 = vector.load %arg3[%c0_3, %c0_4] : memref<1x256xf32, #tpu.memory_space<vmem>>, vector<1x256xf32>
    %5 = vector.broadcast %4 : vector<1x256xf32> to vector<16x256xf32>
    %6 = arith.addf %3, %5 : vector<16x256xf32>
    %7 = arith.truncf %6 : vector<16x256xf32> to vector<16x256xbf16>
    %c0_5 = arith.constant 0 : index
    %c0_6 = arith.constant 0 : index
    %8 = vector.load %arg4[%c0_5, %c0_6] : memref<16x256xbf16, #tpu.memory_space<vmem>>, vector<16x256xbf16>
    tpu.vector_store %arg4[%c0_5, %c0_6], %7 {strides = array<i32>} : memref<16x256xbf16, #tpu.memory_space<vmem>>, vector<16x256xbf16>,
    return
  }
  func.func @transform_0(%arg0: i32) -> (i32, i32) {
    %c0_i32 = arith.constant 0 : i32
    %c0_i32_0 = arith.constant 0 : i32
    return %arg0, %c0_i32 : i32, i32
  }
  func.func @transform_1(%arg0: i32) -> (i32, i32) {
    %c0_i32 = arith.constant 0 : i32
    %c0_i32_0 = arith.constant 0 : i32
    %c0_i32_1 = arith.constant 0 : i32
    return %c0_i32, %c0_i32_0 : i32, i32
  }
  func.func @transform_2(%arg0: i32) -> (i32, i32) {
    %c0_i32 = arith.constant 0 : i32
    %c0_i32_0 = arith.constant 0 : i32
    %c0_i32_1 = arith.constant 0 : i32
    return %c0_i32, %c0_i32_0 : i32, i32
  }
  func.func @transform_3(%arg0: i32) -> (i32, i32) {
    %c0_i32 = arith.constant 0 : i32
    %c0_i32_0 = arith.constant 0 : i32
    return %arg0, %c0_i32 : i32, i32
  }
}

module attributes {stable_mosaic.version = 11 : i64} {
  func.func @_bn_apply_res_kernel(%arg0: i32, %arg1: memref<16x256xf32, #tpu.memory_space<vmem>>, %arg2: memref<16x256xbf16, #tpu.memory_space<vmem>>, %arg3: memref<1x256xf32, #tpu.memory_space<vmem>>, %arg4: memref<1x256xf32, #tpu.memory_space<vmem>>, %arg5: memref<16x256xbf16, #tpu.memory_space<vmem>>) attributes {dimension_semantics = [#tpu.dimension_semantics<parallel>], iteration_bounds = array<i64: 1>, scalar_prefetch = 0 : i64, scratch_operands = 0 : i64, tpu.core_type = #tpu.core_type<tc>, window_params = [{transform_indices = @transform_0, window_bounds = array<i64: 16, 256>}, {transform_indices = @transform_1, window_bounds = array<i64: 16, 256>}, {pipeline_mode = #tpu.pipeline_mode<synchronous>, transform_indices = @transform_2, window_bounds = array<i64: 1, 256>}, {pipeline_mode = #tpu.pipeline_mode<synchronous>, transform_indices = @transform_3, window_bounds = array<i64: 1, 256>}, {transform_indices = @transform_4, window_bounds = array<i64: 16, 256>}]} {
    %c0 = arith.constant 0 : index
    %c0_0 = arith.constant 0 : index
    %0 = vector.load %arg1[%c0, %c0_0] : memref<16x256xf32, #tpu.memory_space<vmem>>, vector<16x256xf32>
    %c0_1 = arith.constant 0 : index
    %c0_2 = arith.constant 0 : index
    %1 = vector.load %arg3[%c0_1, %c0_2] : memref<1x256xf32, #tpu.memory_space<vmem>>, vector<1x256xf32>
    %2 = vector.broadcast %1 : vector<1x256xf32> to vector<16x256xf32>
    %3 = arith.mulf %0, %2 : vector<16x256xf32>
    %c0_3 = arith.constant 0 : index
    %c0_4 = arith.constant 0 : index
    %4 = vector.load %arg4[%c0_3, %c0_4] : memref<1x256xf32, #tpu.memory_space<vmem>>, vector<1x256xf32>
    %5 = vector.broadcast %4 : vector<1x256xf32> to vector<16x256xf32>
    %6 = arith.addf %3, %5 : vector<16x256xf32>
    %c0_5 = arith.constant 0 : index
    %c0_6 = arith.constant 0 : index
    %7 = vector.load %arg2[%c0_5, %c0_6] : memref<16x256xbf16, #tpu.memory_space<vmem>>, vector<16x256xbf16>
    %8 = arith.extf %7 : vector<16x256xbf16> to vector<16x256xf32>
    %9 = arith.addf %6, %8 : vector<16x256xf32>
    %cst = arith.constant 0.000000e+00 : f32
    %10 = vector.broadcast %cst : f32 to vector<16x256xf32>
    %11 = arith.maximumf %9, %10 : vector<16x256xf32>
    %12 = arith.truncf %11 : vector<16x256xf32> to vector<16x256xbf16>
    %c0_7 = arith.constant 0 : index
    %c0_8 = arith.constant 0 : index
    %13 = vector.load %arg5[%c0_7, %c0_8] : memref<16x256xbf16, #tpu.memory_space<vmem>>, vector<16x256xbf16>
    tpu.vector_store %arg5[%c0_7, %c0_8], %12 {strides = array<i32>} : memref<16x256xbf16, #tpu.memory_space<vmem>>, vector<16x256xbf16>,
    return
  }
  func.func @transform_0(%arg0: i32) -> (i32, i32) {
    %c0_i32 = arith.constant 0 : i32
    %c0_i32_0 = arith.constant 0 : i32
    return %arg0, %c0_i32 : i32, i32
  }
  func.func @transform_1(%arg0: i32) -> (i32, i32) {
    %c0_i32 = arith.constant 0 : i32
    %c0_i32_0 = arith.constant 0 : i32
    return %arg0, %c0_i32 : i32, i32
  }
  func.func @transform_2(%arg0: i32) -> (i32, i32) {
    %c0_i32 = arith.constant 0 : i32
    %c0_i32_0 = arith.constant 0 : i32
    %c0_i32_1 = arith.constant 0 : i32
    return %c0_i32, %c0_i32_0 : i32, i32
  }
  func.func @transform_3(%arg0: i32) -> (i32, i32) {
    %c0_i32 = arith.constant 0 : i32
    %c0_i32_0 = arith.constant 0 : i32
    %c0_i32_1 = arith.constant 0 : i32
    return %c0_i32, %c0_i32_0 : i32, i32
  }
  func.func @transform_4(%arg0: i32) -> (i32, i32) {
    %c0_i32 = arith.constant 0 : i32
    %c0_i32_0 = arith.constant 0 : i32
    return %arg0, %c0_i32 : i32, i32
  }
}

module attributes {stable_mosaic.version = 11 : i64} {
  func.func @_matmul_kernel(%arg0: i32, %arg1: i32, %arg2: i32, %arg3: memref<16x768xbf16, #tpu.memory_space<vmem>>, %arg4: memref<768x512xbf16, #tpu.memory_space<vmem>>, %arg5: memref<1x512xf32, #tpu.memory_space<vmem>>, %arg6: memref<16x512xf32, #tpu.memory_space<vmem>>, %arg7: memref<16x512xf32, #tpu.memory_space<vmem>>) attributes {dimension_semantics = [#tpu.dimension_semantics<parallel>, #tpu.dimension_semantics<parallel>, #tpu.dimension_semantics<arbitrary>], iteration_bounds = array<i64: 1, 1, 3>, scalar_prefetch = 0 : i64, scratch_operands = 1 : i64, tpu.core_type = #tpu.core_type<tc>, window_params = [{transform_indices = @transform_0, window_bounds = array<i64: 16, 768>}, {transform_indices = @transform_1, window_bounds = array<i64: 768, 512>}, {transform_indices = @transform_2, window_bounds = array<i64: 1, 512>}, {transform_indices = @transform_3, window_bounds = array<i64: 16, 512>}]} {
    %c0_i32 = arith.constant 0 : i32
    %0 = arith.cmpi eq, %arg2, %c0_i32 : i32
    %1 = arith.extui %0 : i1 to i32
    %c0_i32_0 = arith.constant 0 : i32
    %2 = arith.cmpi ne, %1, %c0_i32_0 : i32
    scf.if %2 {
      %cst_9 = arith.constant 0.000000e+00 : f32
      %12 = vector.broadcast %cst_9 : f32 to vector<16x512xf32>
      %c0_10 = arith.constant 0 : index
      %c0_11 = arith.constant 0 : index
      %13 = vector.load %arg7[%c0_10, %c0_11] : memref<16x512xf32, #tpu.memory_space<vmem>>, vector<16x512xf32>
      tpu.vector_store %arg7[%c0_10, %c0_11], %12 {strides = array<i32>} : memref<16x512xf32, #tpu.memory_space<vmem>>, vector<16x512xf32>,
    } else {
    }
    %c0 = arith.constant 0 : index
    %c0_1 = arith.constant 0 : index
    %3 = vector.load %arg7[%c0, %c0_1] : memref<16x512xf32, #tpu.memory_space<vmem>>, vector<16x512xf32>
    %c0_2 = arith.constant 0 : index
    %c0_3 = arith.constant 0 : index
    %4 = vector.load %arg3[%c0_2, %c0_3] : memref<16x768xbf16, #tpu.memory_space<vmem>>, vector<16x768xbf16>
    %c0_4 = arith.constant 0 : index
    %c0_5 = arith.constant 0 : index
    %5 = vector.load %arg4[%c0_4, %c0_5] : memref<768x512xbf16, #tpu.memory_space<vmem>>, vector<768x512xbf16>
    %cst = arith.constant dense<0.000000e+00> : vector<16x512xf32>
    %6 = tpu.matmul %4, %5, %cst {dimension_numbers = #tpu.dot_dimension_numbers<[1], [0], [0], [1], [0, 0, 1, 1], [], []>} : vector<16x768xbf16>, vector<768x512xbf16>, vector<16x512xf32> -> vector<16x512xf32>
    %7 = arith.addf %3, %6 : vector<16x512xf32>
    %c0_6 = arith.constant 0 : index
    %c0_7 = arith.constant 0 : index
    %8 = vector.load %arg7[%c0_6, %c0_7] : memref<16x512xf32, #tpu.memory_space<vmem>>, vector<16x512xf32>
    tpu.vector_store %arg7[%c0_6, %c0_7], %7 {strides = array<i32>} : memref<16x512xf32, #tpu.memory_space<vmem>>, vector<16x512xf32>,
    %c2_i32 = arith.constant 2 : i32
    %9 = arith.cmpi eq, %arg2, %c2_i32 : i32
    %10 = arith.extui %9 : i1 to i32
    %c0_i32_8 = arith.constant 0 : i32
    %11 = arith.cmpi ne, %10, %c0_i32_8 : i32
    scf.if %11 {
      %c0_9 = arith.constant 0 : index
      %c0_10 = arith.constant 0 : index
      %12 = vector.load %arg7[%c0_9, %c0_10] : memref<16x512xf32, #tpu.memory_space<vmem>>, vector<16x512xf32>
      %c0_11 = arith.constant 0 : index
      %c0_12 = arith.constant 0 : index
      %13 = vector.load %arg5[%c0_11, %c0_12] : memref<1x512xf32, #tpu.memory_space<vmem>>, vector<1x512xf32>
      %14 = vector.broadcast %13 : vector<1x512xf32> to vector<16x512xf32>
      %15 = arith.addf %12, %14 : vector<16x512xf32>
      %c0_13 = arith.constant 0 : index
      %c0_14 = arith.constant 0 : index
      %16 = vector.load %arg6[%c0_13, %c0_14] : memref<16x512xf32, #tpu.memory_space<vmem>>, vector<16x512xf32>
      tpu.vector_store %arg6[%c0_13, %c0_14], %15 {strides = array<i32>} : memref<16x512xf32, #tpu.memory_space<vmem>>, vector<16x512xf32>,
    } else {
    }
    return
  }
  func.func @transform_0(%arg0: i32, %arg1: i32, %arg2: i32) -> (i32, i32) {
    %c0_i32 = arith.constant 0 : i32
    return %arg0, %arg2 : i32, i32
  }
  func.func @transform_1(%arg0: i32, %arg1: i32, %arg2: i32) -> (i32, i32) {
    %c0_i32 = arith.constant 0 : i32
    return %arg2, %arg1 : i32, i32
  }
  func.func @transform_2(%arg0: i32, %arg1: i32, %arg2: i32) -> (i32, i32) {
    %c0_i32 = arith.constant 0 : i32
    %c0_i32_0 = arith.constant 0 : i32
    return %c0_i32, %arg1 : i32, i32
  }
  func.func @transform_3(%arg0: i32, %arg1: i32, %arg2: i32) -> (i32, i32) {
    %c0_i32 = arith.constant 0 : i32
    return %arg0, %arg1 : i32, i32
  }
}

module attributes {stable_mosaic.version = 11 : i64} {
  func.func @_bn_stats_kernel(%arg0: i32, %arg1: memref<16x512xf32, #tpu.memory_space<vmem>>, %arg2: memref<1x512xf32, #tpu.memory_space<vmem>>, %arg3: memref<1x512xf32, #tpu.memory_space<vmem>>) attributes {dimension_semantics = [#tpu.dimension_semantics<arbitrary>], iteration_bounds = array<i64: 1>, scalar_prefetch = 0 : i64, scratch_operands = 0 : i64, tpu.core_type = #tpu.core_type<tc>, window_params = [{transform_indices = @transform_0, window_bounds = array<i64: 16, 512>}, {pipeline_mode = #tpu.pipeline_mode<synchronous>, transform_indices = @transform_1, window_bounds = array<i64: 1, 512>}, {pipeline_mode = #tpu.pipeline_mode<synchronous>, transform_indices = @transform_2, window_bounds = array<i64: 1, 512>}]} {
    %c0_i32 = arith.constant 0 : i32
    %0 = arith.cmpi eq, %arg0, %c0_i32 : i32
    %1 = arith.extui %0 : i1 to i32
    %c0_i32_0 = arith.constant 0 : i32
    %2 = arith.cmpi ne, %1, %c0_i32_0 : i32
    scf.if %2 {
      %cst_11 = arith.constant 0.000000e+00 : f32
      %15 = vector.broadcast %cst_11 : f32 to vector<1x512xf32>
      %c0_12 = arith.constant 0 : index
      %c0_13 = arith.constant 0 : index
      %16 = vector.load %arg2[%c0_12, %c0_13] : memref<1x512xf32, #tpu.memory_space<vmem>>, vector<1x512xf32>
      tpu.vector_store %arg2[%c0_12, %c0_13], %15 {strides = array<i32>} : memref<1x512xf32, #tpu.memory_space<vmem>>, vector<1x512xf32>,
      %cst_14 = arith.constant 0.000000e+00 : f32
      %17 = vector.broadcast %cst_14 : f32 to vector<1x512xf32>
      %c0_15 = arith.constant 0 : index
      %c0_16 = arith.constant 0 : index
      %18 = vector.load %arg3[%c0_15, %c0_16] : memref<1x512xf32, #tpu.memory_space<vmem>>, vector<1x512xf32>
      tpu.vector_store %arg3[%c0_15, %c0_16], %17 {strides = array<i32>} : memref<1x512xf32, #tpu.memory_space<vmem>>, vector<1x512xf32>,
    } else {
    }
    %c0 = arith.constant 0 : index
    %c0_1 = arith.constant 0 : index
    %3 = vector.load %arg1[%c0, %c0_1] : memref<16x512xf32, #tpu.memory_space<vmem>>, vector<16x512xf32>
    %c0_2 = arith.constant 0 : index
    %c0_3 = arith.constant 0 : index
    %4 = vector.load %arg2[%c0_2, %c0_3] : memref<1x512xf32, #tpu.memory_space<vmem>>, vector<1x512xf32>
    %cst = arith.constant dense<0.000000e+00> : vector<512xf32>
    %5 = vector.multi_reduction <add>, %3, %cst [0] : vector<16x512xf32> to vector<512xf32>
    %6 = vector.shape_cast %5 : vector<512xf32> to vector<1x512xf32>
    %7 = arith.addf %4, %6 : vector<1x512xf32>
    %c0_4 = arith.constant 0 : index
    %c0_5 = arith.constant 0 : index
    %8 = vector.load %arg2[%c0_4, %c0_5] : memref<1x512xf32, #tpu.memory_space<vmem>>, vector<1x512xf32>
    tpu.vector_store %arg2[%c0_4, %c0_5], %7 {strides = array<i32>} : memref<1x512xf32, #tpu.memory_space<vmem>>, vector<1x512xf32>,
    %c0_6 = arith.constant 0 : index
    %c0_7 = arith.constant 0 : index
    %9 = vector.load %arg3[%c0_6, %c0_7] : memref<1x512xf32, #tpu.memory_space<vmem>>, vector<1x512xf32>
    %10 = arith.mulf %3, %3 : vector<16x512xf32>
    %cst_8 = arith.constant dense<0.000000e+00> : vector<512xf32>
    %11 = vector.multi_reduction <add>, %10, %cst_8 [0] : vector<16x512xf32> to vector<512xf32>
    %12 = vector.shape_cast %11 : vector<512xf32> to vector<1x512xf32>
    %13 = arith.addf %9, %12 : vector<1x512xf32>
    %c0_9 = arith.constant 0 : index
    %c0_10 = arith.constant 0 : index
    %14 = vector.load %arg3[%c0_9, %c0_10] : memref<1x512xf32, #tpu.memory_space<vmem>>, vector<1x512xf32>
    tpu.vector_store %arg3[%c0_9, %c0_10], %13 {strides = array<i32>} : memref<1x512xf32, #tpu.memory_space<vmem>>, vector<1x512xf32>,
    return
  }
  func.func @transform_0(%arg0: i32) -> (i32, i32) {
    %c0_i32 = arith.constant 0 : i32
    %c0_i32_0 = arith.constant 0 : i32
    return %arg0, %c0_i32 : i32, i32
  }
  func.func @transform_1(%arg0: i32) -> (i32, i32) {
    %c0_i32 = arith.constant 0 : i32
    %c0_i32_0 = arith.constant 0 : i32
    %c0_i32_1 = arith.constant 0 : i32
    return %c0_i32, %c0_i32_0 : i32, i32
  }
  func.func @transform_2(%arg0: i32) -> (i32, i32) {
    %c0_i32 = arith.constant 0 : i32
    %c0_i32_0 = arith.constant 0 : i32
    %c0_i32_1 = arith.constant 0 : i32
    return %c0_i32, %c0_i32_0 : i32, i32
  }
}

module attributes {stable_mosaic.version = 11 : i64} {
  func.func @_bn_apply_kernel(%arg0: i32, %arg1: memref<16x512xf32, #tpu.memory_space<vmem>>, %arg2: memref<1x512xf32, #tpu.memory_space<vmem>>, %arg3: memref<1x512xf32, #tpu.memory_space<vmem>>, %arg4: memref<16x512xbf16, #tpu.memory_space<vmem>>) attributes {dimension_semantics = [#tpu.dimension_semantics<parallel>], iteration_bounds = array<i64: 1>, scalar_prefetch = 0 : i64, scratch_operands = 0 : i64, tpu.core_type = #tpu.core_type<tc>, window_params = [{transform_indices = @transform_0, window_bounds = array<i64: 16, 512>}, {pipeline_mode = #tpu.pipeline_mode<synchronous>, transform_indices = @transform_1, window_bounds = array<i64: 1, 512>}, {pipeline_mode = #tpu.pipeline_mode<synchronous>, transform_indices = @transform_2, window_bounds = array<i64: 1, 512>}, {transform_indices = @transform_3, window_bounds = array<i64: 16, 512>}]} {
    %c0 = arith.constant 0 : index
    %c0_0 = arith.constant 0 : index
    %0 = vector.load %arg1[%c0, %c0_0] : memref<16x512xf32, #tpu.memory_space<vmem>>, vector<16x512xf32>
    %c0_1 = arith.constant 0 : index
    %c0_2 = arith.constant 0 : index
    %1 = vector.load %arg2[%c0_1, %c0_2] : memref<1x512xf32, #tpu.memory_space<vmem>>, vector<1x512xf32>
    %2 = vector.broadcast %1 : vector<1x512xf32> to vector<16x512xf32>
    %3 = arith.mulf %0, %2 : vector<16x512xf32>
    %c0_3 = arith.constant 0 : index
    %c0_4 = arith.constant 0 : index
    %4 = vector.load %arg3[%c0_3, %c0_4] : memref<1x512xf32, #tpu.memory_space<vmem>>, vector<1x512xf32>
    %5 = vector.broadcast %4 : vector<1x512xf32> to vector<16x512xf32>
    %6 = arith.addf %3, %5 : vector<16x512xf32>
    %cst = arith.constant 0.000000e+00 : f32
    %7 = vector.broadcast %cst : f32 to vector<16x512xf32>
    %8 = arith.maximumf %6, %7 : vector<16x512xf32>
    %9 = arith.truncf %8 : vector<16x512xf32> to vector<16x512xbf16>
    %c0_5 = arith.constant 0 : index
    %c0_6 = arith.constant 0 : index
    %10 = vector.load %arg4[%c0_5, %c0_6] : memref<16x512xbf16, #tpu.memory_space<vmem>>, vector<16x512xbf16>
    tpu.vector_store %arg4[%c0_5, %c0_6], %9 {strides = array<i32>} : memref<16x512xbf16, #tpu.memory_space<vmem>>, vector<16x512xbf16>,
    return
  }
  func.func @transform_0(%arg0: i32) -> (i32, i32) {
    %c0_i32 = arith.constant 0 : i32
    %c0_i32_0 = arith.constant 0 : i32
    return %arg0, %c0_i32 : i32, i32
  }
  func.func @transform_1(%arg0: i32) -> (i32, i32) {
    %c0_i32 = arith.constant 0 : i32
    %c0_i32_0 = arith.constant 0 : i32
    %c0_i32_1 = arith.constant 0 : i32
    return %c0_i32, %c0_i32_0 : i32, i32
  }
  func.func @transform_2(%arg0: i32) -> (i32, i32) {
    %c0_i32 = arith.constant 0 : i32
    %c0_i32_0 = arith.constant 0 : i32
    %c0_i32_1 = arith.constant 0 : i32
    return %c0_i32, %c0_i32_0 : i32, i32
  }
  func.func @transform_3(%arg0: i32) -> (i32, i32) {
    %c0_i32 = arith.constant 0 : i32
    %c0_i32_0 = arith.constant 0 : i32
    return %arg0, %c0_i32 : i32, i32
  }
}

module attributes {stable_mosaic.version = 11 : i64} {
  func.func @_matmul_kernel(%arg0: i32, %arg1: i32, %arg2: i32, %arg3: memref<16x768xbf16, #tpu.memory_space<vmem>>, %arg4: memref<768x512xbf16, #tpu.memory_space<vmem>>, %arg5: memref<1x512xf32, #tpu.memory_space<vmem>>, %arg6: memref<16x512xf32, #tpu.memory_space<vmem>>, %arg7: memref<16x512xf32, #tpu.memory_space<vmem>>) attributes {dimension_semantics = [#tpu.dimension_semantics<parallel>, #tpu.dimension_semantics<parallel>, #tpu.dimension_semantics<arbitrary>], iteration_bounds = array<i64: 1, 1, 6>, scalar_prefetch = 0 : i64, scratch_operands = 1 : i64, tpu.core_type = #tpu.core_type<tc>, window_params = [{transform_indices = @transform_0, window_bounds = array<i64: 16, 768>}, {transform_indices = @transform_1, window_bounds = array<i64: 768, 512>}, {transform_indices = @transform_2, window_bounds = array<i64: 1, 512>}, {transform_indices = @transform_3, window_bounds = array<i64: 16, 512>}]} {
    %c0_i32 = arith.constant 0 : i32
    %0 = arith.cmpi eq, %arg2, %c0_i32 : i32
    %1 = arith.extui %0 : i1 to i32
    %c0_i32_0 = arith.constant 0 : i32
    %2 = arith.cmpi ne, %1, %c0_i32_0 : i32
    scf.if %2 {
      %cst_9 = arith.constant 0.000000e+00 : f32
      %12 = vector.broadcast %cst_9 : f32 to vector<16x512xf32>
      %c0_10 = arith.constant 0 : index
      %c0_11 = arith.constant 0 : index
      %13 = vector.load %arg7[%c0_10, %c0_11] : memref<16x512xf32, #tpu.memory_space<vmem>>, vector<16x512xf32>
      tpu.vector_store %arg7[%c0_10, %c0_11], %12 {strides = array<i32>} : memref<16x512xf32, #tpu.memory_space<vmem>>, vector<16x512xf32>,
    } else {
    }
    %c0 = arith.constant 0 : index
    %c0_1 = arith.constant 0 : index
    %3 = vector.load %arg7[%c0, %c0_1] : memref<16x512xf32, #tpu.memory_space<vmem>>, vector<16x512xf32>
    %c0_2 = arith.constant 0 : index
    %c0_3 = arith.constant 0 : index
    %4 = vector.load %arg3[%c0_2, %c0_3] : memref<16x768xbf16, #tpu.memory_space<vmem>>, vector<16x768xbf16>
    %c0_4 = arith.constant 0 : index
    %c0_5 = arith.constant 0 : index
    %5 = vector.load %arg4[%c0_4, %c0_5] : memref<768x512xbf16, #tpu.memory_space<vmem>>, vector<768x512xbf16>
    %cst = arith.constant dense<0.000000e+00> : vector<16x512xf32>
    %6 = tpu.matmul %4, %5, %cst {dimension_numbers = #tpu.dot_dimension_numbers<[1], [0], [0], [1], [0, 0, 1, 1], [], []>} : vector<16x768xbf16>, vector<768x512xbf16>, vector<16x512xf32> -> vector<16x512xf32>
    %7 = arith.addf %3, %6 : vector<16x512xf32>
    %c0_6 = arith.constant 0 : index
    %c0_7 = arith.constant 0 : index
    %8 = vector.load %arg7[%c0_6, %c0_7] : memref<16x512xf32, #tpu.memory_space<vmem>>, vector<16x512xf32>
    tpu.vector_store %arg7[%c0_6, %c0_7], %7 {strides = array<i32>} : memref<16x512xf32, #tpu.memory_space<vmem>>, vector<16x512xf32>,
    %c5_i32 = arith.constant 5 : i32
    %9 = arith.cmpi eq, %arg2, %c5_i32 : i32
    %10 = arith.extui %9 : i1 to i32
    %c0_i32_8 = arith.constant 0 : i32
    %11 = arith.cmpi ne, %10, %c0_i32_8 : i32
    scf.if %11 {
      %c0_9 = arith.constant 0 : index
      %c0_10 = arith.constant 0 : index
      %12 = vector.load %arg7[%c0_9, %c0_10] : memref<16x512xf32, #tpu.memory_space<vmem>>, vector<16x512xf32>
      %c0_11 = arith.constant 0 : index
      %c0_12 = arith.constant 0 : index
      %13 = vector.load %arg5[%c0_11, %c0_12] : memref<1x512xf32, #tpu.memory_space<vmem>>, vector<1x512xf32>
      %14 = vector.broadcast %13 : vector<1x512xf32> to vector<16x512xf32>
      %15 = arith.addf %12, %14 : vector<16x512xf32>
      %c0_13 = arith.constant 0 : index
      %c0_14 = arith.constant 0 : index
      %16 = vector.load %arg6[%c0_13, %c0_14] : memref<16x512xf32, #tpu.memory_space<vmem>>, vector<16x512xf32>
      tpu.vector_store %arg6[%c0_13, %c0_14], %15 {strides = array<i32>} : memref<16x512xf32, #tpu.memory_space<vmem>>, vector<16x512xf32>,
    } else {
    }
    return
  }
  func.func @transform_0(%arg0: i32, %arg1: i32, %arg2: i32) -> (i32, i32) {
    %c0_i32 = arith.constant 0 : i32
    return %arg0, %arg2 : i32, i32
  }
  func.func @transform_1(%arg0: i32, %arg1: i32, %arg2: i32) -> (i32, i32) {
    %c0_i32 = arith.constant 0 : i32
    return %arg2, %arg1 : i32, i32
  }
  func.func @transform_2(%arg0: i32, %arg1: i32, %arg2: i32) -> (i32, i32) {
    %c0_i32 = arith.constant 0 : i32
    %c0_i32_0 = arith.constant 0 : i32
    return %c0_i32, %arg1 : i32, i32
  }
  func.func @transform_3(%arg0: i32, %arg1: i32, %arg2: i32) -> (i32, i32) {
    %c0_i32 = arith.constant 0 : i32
    return %arg0, %arg1 : i32, i32
  }
}

module attributes {stable_mosaic.version = 11 : i64} {
  func.func @_matmul_kernel(%arg0: i32, %arg1: i32, %arg2: i32, %arg3: memref<16x256xbf16, #tpu.memory_space<vmem>>, %arg4: memref<256x512xbf16, #tpu.memory_space<vmem>>, %arg5: memref<1x512xf32, #tpu.memory_space<vmem>>, %arg6: memref<16x512xf32, #tpu.memory_space<vmem>>, %arg7: memref<16x512xf32, #tpu.memory_space<vmem>>) attributes {dimension_semantics = [#tpu.dimension_semantics<parallel>, #tpu.dimension_semantics<parallel>, #tpu.dimension_semantics<arbitrary>], iteration_bounds = array<i64: 1, 1, 1>, scalar_prefetch = 0 : i64, scratch_operands = 1 : i64, tpu.core_type = #tpu.core_type<tc>, window_params = [{transform_indices = @transform_0, window_bounds = array<i64: 16, 256>}, {transform_indices = @transform_1, window_bounds = array<i64: 256, 512>}, {transform_indices = @transform_2, window_bounds = array<i64: 1, 512>}, {transform_indices = @transform_3, window_bounds = array<i64: 16, 512>}]} {
    %c0_i32 = arith.constant 0 : i32
    %0 = arith.cmpi eq, %arg2, %c0_i32 : i32
    %1 = arith.extui %0 : i1 to i32
    %c0_i32_0 = arith.constant 0 : i32
    %2 = arith.cmpi ne, %1, %c0_i32_0 : i32
    scf.if %2 {
      %cst_10 = arith.constant 0.000000e+00 : f32
      %12 = vector.broadcast %cst_10 : f32 to vector<16x512xf32>
      %c0_11 = arith.constant 0 : index
      %c0_12 = arith.constant 0 : index
      %13 = vector.load %arg7[%c0_11, %c0_12] : memref<16x512xf32, #tpu.memory_space<vmem>>, vector<16x512xf32>
      tpu.vector_store %arg7[%c0_11, %c0_12], %12 {strides = array<i32>} : memref<16x512xf32, #tpu.memory_space<vmem>>, vector<16x512xf32>,
    } else {
    }
    %c0 = arith.constant 0 : index
    %c0_1 = arith.constant 0 : index
    %3 = vector.load %arg7[%c0, %c0_1] : memref<16x512xf32, #tpu.memory_space<vmem>>, vector<16x512xf32>
    %c0_2 = arith.constant 0 : index
    %c0_3 = arith.constant 0 : index
    %4 = vector.load %arg3[%c0_2, %c0_3] : memref<16x256xbf16, #tpu.memory_space<vmem>>, vector<16x256xbf16>
    %c0_4 = arith.constant 0 : index
    %c0_5 = arith.constant 0 : index
    %5 = vector.load %arg4[%c0_4, %c0_5] : memref<256x512xbf16, #tpu.memory_space<vmem>>, vector<256x512xbf16>
    %cst = arith.constant dense<0.000000e+00> : vector<16x512xf32>
    %6 = tpu.matmul %4, %5, %cst {dimension_numbers = #tpu.dot_dimension_numbers<[1], [0], [0], [1], [0, 0, 1, 1], [], []>} : vector<16x256xbf16>, vector<256x512xbf16>, vector<16x512xf32> -> vector<16x512xf32>
    %7 = arith.addf %3, %6 : vector<16x512xf32>
    %c0_6 = arith.constant 0 : index
    %c0_7 = arith.constant 0 : index
    %8 = vector.load %arg7[%c0_6, %c0_7] : memref<16x512xf32, #tpu.memory_space<vmem>>, vector<16x512xf32>
    tpu.vector_store %arg7[%c0_6, %c0_7], %7 {strides = array<i32>} : memref<16x512xf32, #tpu.memory_space<vmem>>, vector<16x512xf32>,
    %c0_i32_8 = arith.constant 0 : i32
    %9 = arith.cmpi eq, %arg2, %c0_i32_8 : i32
    %10 = arith.extui %9 : i1 to i32
    %c0_i32_9 = arith.constant 0 : i32
    %11 = arith.cmpi ne, %10, %c0_i32_9 : i32
    scf.if %11 {
      %c0_10 = arith.constant 0 : index
      %c0_11 = arith.constant 0 : index
      %12 = vector.load %arg7[%c0_10, %c0_11] : memref<16x512xf32, #tpu.memory_space<vmem>>, vector<16x512xf32>
      %c0_12 = arith.constant 0 : index
      %c0_13 = arith.constant 0 : index
      %13 = vector.load %arg5[%c0_12, %c0_13] : memref<1x512xf32, #tpu.memory_space<vmem>>, vector<1x512xf32>
      %14 = vector.broadcast %13 : vector<1x512xf32> to vector<16x512xf32>
      %15 = arith.addf %12, %14 : vector<16x512xf32>
      %c0_14 = arith.constant 0 : index
      %c0_15 = arith.constant 0 : index
      %16 = vector.load %arg6[%c0_14, %c0_15] : memref<16x512xf32, #tpu.memory_space<vmem>>, vector<16x512xf32>
      tpu.vector_store %arg6[%c0_14, %c0_15], %15 {strides = array<i32>} : memref<16x512xf32, #tpu.memory_space<vmem>>, vector<16x512xf32>,
    } else {
    }
    return
  }
  func.func @transform_0(%arg0: i32, %arg1: i32, %arg2: i32) -> (i32, i32) {
    %c0_i32 = arith.constant 0 : i32
    return %arg0, %arg2 : i32, i32
  }
  func.func @transform_1(%arg0: i32, %arg1: i32, %arg2: i32) -> (i32, i32) {
    %c0_i32 = arith.constant 0 : i32
    return %arg2, %arg1 : i32, i32
  }
  func.func @transform_2(%arg0: i32, %arg1: i32, %arg2: i32) -> (i32, i32) {
    %c0_i32 = arith.constant 0 : i32
    %c0_i32_0 = arith.constant 0 : i32
    return %c0_i32, %arg1 : i32, i32
  }
  func.func @transform_3(%arg0: i32, %arg1: i32, %arg2: i32) -> (i32, i32) {
    %c0_i32 = arith.constant 0 : i32
    return %arg0, %arg1 : i32, i32
  }
}

module attributes {stable_mosaic.version = 11 : i64} {
  func.func @_bn_apply_kernel(%arg0: i32, %arg1: memref<16x512xf32, #tpu.memory_space<vmem>>, %arg2: memref<1x512xf32, #tpu.memory_space<vmem>>, %arg3: memref<1x512xf32, #tpu.memory_space<vmem>>, %arg4: memref<16x512xbf16, #tpu.memory_space<vmem>>) attributes {dimension_semantics = [#tpu.dimension_semantics<parallel>], iteration_bounds = array<i64: 1>, scalar_prefetch = 0 : i64, scratch_operands = 0 : i64, tpu.core_type = #tpu.core_type<tc>, window_params = [{transform_indices = @transform_0, window_bounds = array<i64: 16, 512>}, {pipeline_mode = #tpu.pipeline_mode<synchronous>, transform_indices = @transform_1, window_bounds = array<i64: 1, 512>}, {pipeline_mode = #tpu.pipeline_mode<synchronous>, transform_indices = @transform_2, window_bounds = array<i64: 1, 512>}, {transform_indices = @transform_3, window_bounds = array<i64: 16, 512>}]} {
    %c0 = arith.constant 0 : index
    %c0_0 = arith.constant 0 : index
    %0 = vector.load %arg1[%c0, %c0_0] : memref<16x512xf32, #tpu.memory_space<vmem>>, vector<16x512xf32>
    %c0_1 = arith.constant 0 : index
    %c0_2 = arith.constant 0 : index
    %1 = vector.load %arg2[%c0_1, %c0_2] : memref<1x512xf32, #tpu.memory_space<vmem>>, vector<1x512xf32>
    %2 = vector.broadcast %1 : vector<1x512xf32> to vector<16x512xf32>
    %3 = arith.mulf %0, %2 : vector<16x512xf32>
    %c0_3 = arith.constant 0 : index
    %c0_4 = arith.constant 0 : index
    %4 = vector.load %arg3[%c0_3, %c0_4] : memref<1x512xf32, #tpu.memory_space<vmem>>, vector<1x512xf32>
    %5 = vector.broadcast %4 : vector<1x512xf32> to vector<16x512xf32>
    %6 = arith.addf %3, %5 : vector<16x512xf32>
    %7 = arith.truncf %6 : vector<16x512xf32> to vector<16x512xbf16>
    %c0_5 = arith.constant 0 : index
    %c0_6 = arith.constant 0 : index
    %8 = vector.load %arg4[%c0_5, %c0_6] : memref<16x512xbf16, #tpu.memory_space<vmem>>, vector<16x512xbf16>
    tpu.vector_store %arg4[%c0_5, %c0_6], %7 {strides = array<i32>} : memref<16x512xbf16, #tpu.memory_space<vmem>>, vector<16x512xbf16>,
    return
  }
  func.func @transform_0(%arg0: i32) -> (i32, i32) {
    %c0_i32 = arith.constant 0 : i32
    %c0_i32_0 = arith.constant 0 : i32
    return %arg0, %c0_i32 : i32, i32
  }
  func.func @transform_1(%arg0: i32) -> (i32, i32) {
    %c0_i32 = arith.constant 0 : i32
    %c0_i32_0 = arith.constant 0 : i32
    %c0_i32_1 = arith.constant 0 : i32
    return %c0_i32, %c0_i32_0 : i32, i32
  }
  func.func @transform_2(%arg0: i32) -> (i32, i32) {
    %c0_i32 = arith.constant 0 : i32
    %c0_i32_0 = arith.constant 0 : i32
    %c0_i32_1 = arith.constant 0 : i32
    return %c0_i32, %c0_i32_0 : i32, i32
  }
  func.func @transform_3(%arg0: i32) -> (i32, i32) {
    %c0_i32 = arith.constant 0 : i32
    %c0_i32_0 = arith.constant 0 : i32
    return %arg0, %c0_i32 : i32, i32
  }
}

module attributes {stable_mosaic.version = 11 : i64} {
  func.func @_bn_apply_res_kernel(%arg0: i32, %arg1: memref<16x512xf32, #tpu.memory_space<vmem>>, %arg2: memref<16x512xbf16, #tpu.memory_space<vmem>>, %arg3: memref<1x512xf32, #tpu.memory_space<vmem>>, %arg4: memref<1x512xf32, #tpu.memory_space<vmem>>, %arg5: memref<16x512xbf16, #tpu.memory_space<vmem>>) attributes {dimension_semantics = [#tpu.dimension_semantics<parallel>], iteration_bounds = array<i64: 1>, scalar_prefetch = 0 : i64, scratch_operands = 0 : i64, tpu.core_type = #tpu.core_type<tc>, window_params = [{transform_indices = @transform_0, window_bounds = array<i64: 16, 512>}, {transform_indices = @transform_1, window_bounds = array<i64: 16, 512>}, {pipeline_mode = #tpu.pipeline_mode<synchronous>, transform_indices = @transform_2, window_bounds = array<i64: 1, 512>}, {pipeline_mode = #tpu.pipeline_mode<synchronous>, transform_indices = @transform_3, window_bounds = array<i64: 1, 512>}, {transform_indices = @transform_4, window_bounds = array<i64: 16, 512>}]} {
    %c0 = arith.constant 0 : index
    %c0_0 = arith.constant 0 : index
    %0 = vector.load %arg1[%c0, %c0_0] : memref<16x512xf32, #tpu.memory_space<vmem>>, vector<16x512xf32>
    %c0_1 = arith.constant 0 : index
    %c0_2 = arith.constant 0 : index
    %1 = vector.load %arg3[%c0_1, %c0_2] : memref<1x512xf32, #tpu.memory_space<vmem>>, vector<1x512xf32>
    %2 = vector.broadcast %1 : vector<1x512xf32> to vector<16x512xf32>
    %3 = arith.mulf %0, %2 : vector<16x512xf32>
    %c0_3 = arith.constant 0 : index
    %c0_4 = arith.constant 0 : index
    %4 = vector.load %arg4[%c0_3, %c0_4] : memref<1x512xf32, #tpu.memory_space<vmem>>, vector<1x512xf32>
    %5 = vector.broadcast %4 : vector<1x512xf32> to vector<16x512xf32>
    %6 = arith.addf %3, %5 : vector<16x512xf32>
    %c0_5 = arith.constant 0 : index
    %c0_6 = arith.constant 0 : index
    %7 = vector.load %arg2[%c0_5, %c0_6] : memref<16x512xbf16, #tpu.memory_space<vmem>>, vector<16x512xbf16>
    %8 = arith.extf %7 : vector<16x512xbf16> to vector<16x512xf32>
    %9 = arith.addf %6, %8 : vector<16x512xf32>
    %cst = arith.constant 0.000000e+00 : f32
    %10 = vector.broadcast %cst : f32 to vector<16x512xf32>
    %11 = arith.maximumf %9, %10 : vector<16x512xf32>
    %12 = arith.truncf %11 : vector<16x512xf32> to vector<16x512xbf16>
    %c0_7 = arith.constant 0 : index
    %c0_8 = arith.constant 0 : index
    %13 = vector.load %arg5[%c0_7, %c0_8] : memref<16x512xbf16, #tpu.memory_space<vmem>>, vector<16x512xbf16>
    tpu.vector_store %arg5[%c0_7, %c0_8], %12 {strides = array<i32>} : memref<16x512xbf16, #tpu.memory_space<vmem>>, vector<16x512xbf16>,
    return
  }
  func.func @transform_0(%arg0: i32) -> (i32, i32) {
    %c0_i32 = arith.constant 0 : i32
    %c0_i32_0 = arith.constant 0 : i32
    return %arg0, %c0_i32 : i32, i32
  }
  func.func @transform_1(%arg0: i32) -> (i32, i32) {
    %c0_i32 = arith.constant 0 : i32
    %c0_i32_0 = arith.constant 0 : i32
    return %arg0, %c0_i32 : i32, i32
  }
  func.func @transform_2(%arg0: i32) -> (i32, i32) {
    %c0_i32 = arith.constant 0 : i32
    %c0_i32_0 = arith.constant 0 : i32
    %c0_i32_1 = arith.constant 0 : i32
    return %c0_i32, %c0_i32_0 : i32, i32
  }
  func.func @transform_3(%arg0: i32) -> (i32, i32) {
    %c0_i32 = arith.constant 0 : i32
    %c0_i32_0 = arith.constant 0 : i32
    %c0_i32_1 = arith.constant 0 : i32
    return %c0_i32, %c0_i32_0 : i32, i32
  }
  func.func @transform_4(%arg0: i32) -> (i32, i32) {
    %c0_i32 = arith.constant 0 : i32
    %c0_i32_0 = arith.constant 0 : i32
    return %arg0, %c0_i32 : i32, i32
  }
}

module attributes {stable_mosaic.version = 11 : i64} {
  func.func @_avgpool_kernel(%arg0: i32, %arg1: memref<1x1x512xbf16, #tpu.memory_space<vmem>>, %arg2: memref<1x1x512xf32, #tpu.memory_space<vmem>>) attributes {dimension_semantics = [#tpu.dimension_semantics<parallel>], iteration_bounds = array<i64: 2>, scalar_prefetch = 0 : i64, scratch_operands = 0 : i64, tpu.core_type = #tpu.core_type<tc>, window_params = [{transform_indices = @transform_0, window_bounds = array<i64: 1, 1, 512>}, {transform_indices = @transform_1, window_bounds = array<i64: 1, 1, 512>}]} {
    %c0 = arith.constant 0 : index
    %c0_0 = arith.constant 0 : index
    %c0_1 = arith.constant 0 : index
    %0 = vector.load %arg1[%c0, %c0_0, %c0_1] : memref<1x1x512xbf16, #tpu.memory_space<vmem>>, vector<1x1x512xbf16>
    %1 = arith.extf %0 : vector<1x1x512xbf16> to vector<1x1x512xf32>
    %cst = arith.constant dense<0.000000e+00> : vector<1x512xf32>
    %2 = vector.multi_reduction <add>, %1, %cst [1] : vector<1x1x512xf32> to vector<1x512xf32>
    %3 = vector.shape_cast %2 : vector<1x512xf32> to vector<1x1x512xf32>
    %cst_2 = arith.constant 1.000000e+00 : f32
    %4 = vector.broadcast %cst_2 : f32 to vector<1x1x512xf32>
    %5 = arith.divf %3, %4 : vector<1x1x512xf32>
    %c0_3 = arith.constant 0 : index
    %c0_4 = arith.constant 0 : index
    %c0_5 = arith.constant 0 : index
    %6 = vector.load %arg2[%c0_3, %c0_4, %c0_5] : memref<1x1x512xf32, #tpu.memory_space<vmem>>, vector<1x1x512xf32>
    tpu.vector_store %arg2[%c0_3, %c0_4, %c0_5], %5 {strides = array<i32>} : memref<1x1x512xf32, #tpu.memory_space<vmem>>, vector<1x1x512xf32>,
    return
  }
  func.func @transform_0(%arg0: i32) -> (i32, i32, i32) {
    %c0_i32 = arith.constant 0 : i32
    %c0_i32_0 = arith.constant 0 : i32
    %c0_i32_1 = arith.constant 0 : i32
    return %arg0, %c0_i32, %c0_i32_0 : i32, i32, i32
  }
  func.func @transform_1(%arg0: i32) -> (i32, i32, i32) {
    %c0_i32 = arith.constant 0 : i32
    %c0_i32_0 = arith.constant 0 : i32
    %c0_i32_1 = arith.constant 0 : i32
    return %arg0, %c0_i32, %c0_i32_0 : i32, i32, i32
  }
}

module attributes {stable_mosaic.version = 11 : i64} {
  func.func @_matmul_kernel(%arg0: i32, %arg1: i32, %arg2: i32, %arg3: memref<16x512xbf16, #tpu.memory_space<vmem>>, %arg4: memref<512x128xbf16, #tpu.memory_space<vmem>>, %arg5: memref<1x128xf32, #tpu.memory_space<vmem>>, %arg6: memref<16x128xf32, #tpu.memory_space<vmem>>, %arg7: memref<16x128xf32, #tpu.memory_space<vmem>>) attributes {dimension_semantics = [#tpu.dimension_semantics<parallel>, #tpu.dimension_semantics<parallel>, #tpu.dimension_semantics<arbitrary>], iteration_bounds = array<i64: 1, 1, 1>, scalar_prefetch = 0 : i64, scratch_operands = 1 : i64, tpu.core_type = #tpu.core_type<tc>, window_params = [{transform_indices = @transform_0, window_bounds = array<i64: 16, 512>}, {transform_indices = @transform_1, window_bounds = array<i64: 512, 128>}, {transform_indices = @transform_2, window_bounds = array<i64: 1, 128>}, {transform_indices = @transform_3, window_bounds = array<i64: 16, 128>}]} {
    %c0_i32 = arith.constant 0 : i32
    %0 = arith.cmpi eq, %arg2, %c0_i32 : i32
    %1 = arith.extui %0 : i1 to i32
    %c0_i32_0 = arith.constant 0 : i32
    %2 = arith.cmpi ne, %1, %c0_i32_0 : i32
    scf.if %2 {
      %cst_10 = arith.constant 0.000000e+00 : f32
      %12 = vector.broadcast %cst_10 : f32 to vector<16x128xf32>
      %c0_11 = arith.constant 0 : index
      %c0_12 = arith.constant 0 : index
      %13 = vector.load %arg7[%c0_11, %c0_12] : memref<16x128xf32, #tpu.memory_space<vmem>>, vector<16x128xf32>
      tpu.vector_store %arg7[%c0_11, %c0_12], %12 {strides = array<i32>} : memref<16x128xf32, #tpu.memory_space<vmem>>, vector<16x128xf32>,
    } else {
    }
    %c0 = arith.constant 0 : index
    %c0_1 = arith.constant 0 : index
    %3 = vector.load %arg7[%c0, %c0_1] : memref<16x128xf32, #tpu.memory_space<vmem>>, vector<16x128xf32>
    %c0_2 = arith.constant 0 : index
    %c0_3 = arith.constant 0 : index
    %4 = vector.load %arg3[%c0_2, %c0_3] : memref<16x512xbf16, #tpu.memory_space<vmem>>, vector<16x512xbf16>
    %c0_4 = arith.constant 0 : index
    %c0_5 = arith.constant 0 : index
    %5 = vector.load %arg4[%c0_4, %c0_5] : memref<512x128xbf16, #tpu.memory_space<vmem>>, vector<512x128xbf16>
    %cst = arith.constant dense<0.000000e+00> : vector<16x128xf32>
    %6 = tpu.matmul %4, %5, %cst {dimension_numbers = #tpu.dot_dimension_numbers<[1], [0], [0], [1], [0, 0, 1, 1], [], []>} : vector<16x512xbf16>, vector<512x128xbf16>, vector<16x128xf32> -> vector<16x128xf32>
    %7 = arith.addf %3, %6 : vector<16x128xf32>
    %c0_6 = arith.constant 0 : index
    %c0_7 = arith.constant 0 : index
    %8 = vector.load %arg7[%c0_6, %c0_7] : memref<16x128xf32, #tpu.memory_space<vmem>>, vector<16x128xf32>
    tpu.vector_store %arg7[%c0_6, %c0_7], %7 {strides = array<i32>} : memref<16x128xf32, #tpu.memory_space<vmem>>, vector<16x128xf32>,
    %c0_i32_8 = arith.constant 0 : i32
    %9 = arith.cmpi eq, %arg2, %c0_i32_8 : i32
    %10 = arith.extui %9 : i1 to i32
    %c0_i32_9 = arith.constant 0 : i32
    %11 = arith.cmpi ne, %10, %c0_i32_9 : i32
    scf.if %11 {
      %c0_10 = arith.constant 0 : index
      %c0_11 = arith.constant 0 : index
      %12 = vector.load %arg7[%c0_10, %c0_11] : memref<16x128xf32, #tpu.memory_space<vmem>>, vector<16x128xf32>
      %c0_12 = arith.constant 0 : index
      %c0_13 = arith.constant 0 : index
      %13 = vector.load %arg5[%c0_12, %c0_13] : memref<1x128xf32, #tpu.memory_space<vmem>>, vector<1x128xf32>
      %14 = vector.broadcast %13 : vector<1x128xf32> to vector<16x128xf32>
      %15 = arith.addf %12, %14 : vector<16x128xf32>
      %c0_14 = arith.constant 0 : index
      %c0_15 = arith.constant 0 : index
      %16 = vector.load %arg6[%c0_14, %c0_15] : memref<16x128xf32, #tpu.memory_space<vmem>>, vector<16x128xf32>
      tpu.vector_store %arg6[%c0_14, %c0_15], %15 {strides = array<i32>} : memref<16x128xf32, #tpu.memory_space<vmem>>, vector<16x128xf32>,
    } else {
    }
    return
  }
  func.func @transform_0(%arg0: i32, %arg1: i32, %arg2: i32) -> (i32, i32) {
    %c0_i32 = arith.constant 0 : i32
    return %arg0, %arg2 : i32, i32
  }
  func.func @transform_1(%arg0: i32, %arg1: i32, %arg2: i32) -> (i32, i32) {
    %c0_i32 = arith.constant 0 : i32
    return %arg2, %arg1 : i32, i32
  }
  func.func @transform_2(%arg0: i32, %arg1: i32, %arg2: i32) -> (i32, i32) {
    %c0_i32 = arith.constant 0 : i32
    %c0_i32_0 = arith.constant 0 : i32
    return %c0_i32, %arg1 : i32, i32
  }
  func.func @transform_3(%arg0: i32, %arg1: i32, %arg2: i32) -> (i32, i32) {
    %c0_i32 = arith.constant 0 : i32
    return %arg0, %arg1 : i32, i32
  }
}

</mosaic_0001>

<bundles_post_ra>
// kernel: _lambda_.64
= control target key start
LH: loop header
LB: loop body
LE: loop exit
PB: predicated region body
PF: predicated region fallthrough
CT: control target
= control target key end

     0   :  { %vm14_vm0 = vcmask 516096   ;;  %vm82_vm1 = vcmask 523264   ;;  %v428_v0 = vmov 0.0   ;;  %s1318_s0 = inlined_call_operand.vmem [shape: f32[512,64], index: 0, kind: input, shape index: {}]   ;;  %s1319_s1 = inlined_call_operand.vmem [shape: f32[1,64], index: 1, kind: output, shape index: {0}]   ;;  %s1320_s2 = inlined_call_operand.vmem [shape: f32[1,64], index: 2, kind: output, shape index: {1}]  }
   0x1   :  { %15 = vst.msk [vmem:[%s1319_s1] sm:$0x1] %vm14_vm0, %v428_v0  ;;  %16 = vst.msk [vmem:[%s1320_s2] sm:$0x1] %vm14_vm0, %v428_v0  ;;  %v455_v1 = vld [vmem:[%s1318_s0] sm:$0xff]  ;;  %v460_v2 = vld [vmem:[%s1318_s0 + $0x8] sm:$0xff] }
   0x2   :  { %v465_v3 = vld [vmem:[%s1318_s0 + $0x10] sm:$0xff]  ;;  %v83_v4 = vsel %vm82_vm1, %v455_v1, 0.0  ;;  %v84_v5 = vsel %vm82_vm1, %v460_v2, 0.0  ;;  %v476_v7 = vld [vmem:[%s1318_s0 + $0x18] sm:$0xff]  ;;  %v483_v10 = vld [vmem:[%s1318_s0 + $0x20] sm:$0xff] }
   0x3   :  { %v86_v6 = vsel %vm82_vm1, %v465_v3, 0.0  ;;  %v85_v8 = vadd.f32 %v84_v5, %v83_v4  ;;  %v88_v9 = vsel %vm82_vm1, %v476_v7, 0.0  ;;  %v90_v12 = vsel %vm82_vm1, %v483_v10, 0.0  ;;  %v490_v13 = vld [vmem:[%s1318_s0 + $0x28] sm:$0xff]  ;;  %v497_v16 = vld [vmem:[%s1318_s0 + $0x30] sm:$0xff]  ;;  %v502_v18 = vld [vmem:[%s1318_s0 + $0x38] sm:$0xff] }
   0x4   :  { %v92_v15 = vsel %vm82_vm1, %v490_v13, 0.0  ;;  %v507_v19 = vld [vmem:[%s1318_s0 + $0x40] sm:$0xff]  ;;  %v94_v20 = vsel %vm82_vm1, %v497_v16, 0.0  ;;  %v514_v21 = vld [vmem:[%s1318_s0 + $0x48] sm:$0xff]  ;;  %v519_v22 = vld [vmem:[%s1318_s0 + $0x50] sm:$0xff]  ;;  %v96_v25 = vsel %vm82_vm1, %v502_v18, 0.0 }
   0x5   :  { %v87_v11 = vadd.f32 %v86_v6, %v85_v8  ;;  %v524_v23 = vld [vmem:[%s1318_s0 + $0x58] sm:$0xff]  ;;  %v98_v26 = vsel %vm82_vm1, %v507_v19, 0.0  ;;  %v533_v27 = vld [vmem:[%s1318_s0 + $0x108] sm:$0xff]  ;;  %v538_v28 = vld [vmem:[%s1318_s0 + $0x110] sm:$0xff]  ;;  %v100_v30 = vsel %vm82_vm1, %v514_v21, 0.0  ;;  %v102_v31 = vsel %vm82_vm1, %v519_v22, 0.0 }
   0x6   :  { %v543_v29 = vld [vmem:[%s1318_s0 + $0x118] sm:$0xff]  ;;  %v551_v32 = vsel %vm82_vm1, %v524_v23, 0.0  ;;  %v556_v33 = vld [vmem:[%s1318_s0 + $0x120] sm:$0xff]  ;;  %v561_v34 = vld [vmem:[%s1318_s0 + $0x128] sm:$0xff]  ;;  %v570_v37 = vsel %vm82_vm1, %v533_v27, 0.0  ;;  %v574_v38 = vsel %vm82_vm1, %v538_v28, 0.0 }
   0x7   :  { %v89_v14 = vadd.f32 %v88_v9, %v87_v11  ;;  %v566_v35 = vld [vmem:[%s1318_s0 + $0x130] sm:$0xff]  ;;  %1339 = vst [vmem:[#allocation2_spill] sm:$0xff] %v570_v37  ;;  %1340 = vst [vmem:[#allocation3_spill] sm:$0xff] %v574_v38  ;;  %v578_v39 = vsel %vm82_vm1, %v543_v29, 0.0  ;;  %v583_v40 = vld [vmem:[%s1318_s0 + $0x138] sm:$0xff]  ;;  %v597_v43 = vsel %vm82_vm1, %v556_v33, 0.0  ;;  %v222_v37 = vmul.f32 %v465_v3, %v465_v3 }
   0x8   :  { %1341 = vst [vmem:[#allocation4_spill] sm:$0xff] %v578_v39  ;;  %v588_v41 = vld [vmem:[%s1318_s0 + $0x140] sm:$0xff]  ;;  %v593_v42 = vld [vmem:[%s1318_s0 + $0x148] sm:$0xff]  ;;  %1342 = vst [vmem:[#allocation5_spill] sm:$0xff] %v597_v43  ;;  %v601_v44 = vsel %vm82_vm1, %v561_v34, 0.0  ;;  %v605_v45 = vsel %vm82_vm1, %v566_v35, 0.0 }
   0x9   :  { %v91_v17 = vadd.f32 %v90_v12, %v89_v14  ;;  %1343 = vst [vmem:[#allocation6_spill] sm:$0xff] %v601_v44  ;;  %1344 = vst [vmem:[#allocation7_spill] sm:$0xff] %v605_v45  ;;  %v610_v46 = vld [vmem:[%s1318_s0 + $0x150] sm:$0xff]  ;;  %v615_v47 = vld [vmem:[%s1318_s0 + $0x158] sm:$0xff]  ;;  %v624_v50 = vsel %vm82_vm1, %v583_v40, 0.0  ;;  %v628_v51 = vsel %vm82_vm1, %v588_v41, 0.0 }
   0xa   :  { %v620_v48 = vld [vmem:[%s1318_s0 + $0x160] sm:$0xff]  ;;  %1345 = vst [vmem:[#allocation8_spill] sm:$0xff] %v624_v50  ;;  %1346 = vst [vmem:[#allocation9_spill] sm:$0xff] %v628_v51  ;;  %v632_v52 = vsel %vm82_vm1, %v593_v42, 0.0  ;;  %v637_v53 = vld [vmem:[%s1318_s0 + $0x168] sm:$0xff]  ;;  %v651_v56 = vsel %vm82_vm1, %v610_v46, 0.0 }
   0xb   :  { %v93_v24 = vadd.f32 %v92_v15, %v91_v17  ;;  %1347 = vst [vmem:[#allocation10_spill] sm:$0xff] %v632_v52  ;;  %v642_v54 = vld [vmem:[%s1318_s0 + $0x170] sm:$0xff]  ;;  %v647_v55 = vld [vmem:[%s1318_s0 + $0x178] sm:$0xff]  ;;  %1348 = vst [vmem:[#allocation11_spill] sm:$0xff] %v651_v56  ;;  %v655_v57 = vsel %vm82_vm1, %v615_v47, 0.0  ;;  %v659_v58 = vsel %vm82_vm1, %v620_v48, 0.0 }
   0xc   :  { %1349 = vst [vmem:[#allocation12_spill] sm:$0xff] %v655_v57  ;;  %1350 = vst [vmem:[#allocation13_spill] sm:$0xff] %v659_v58  ;;  %v664_v59 = vld [vmem:[%s1318_s0 + $0x180] sm:$0xff]  ;;  %v669_v60 = vld [vmem:[%s1318_s0 + $0x188] sm:$0xff]  ;;  %v678_v63 = vsel %vm82_vm1, %v637_v53, 0.0  ;;  %v682_v0 = vsel %vm82_vm1, %v642_v54, 0.0 }
   0xd   :  { %v95_v36 = vadd.f32 %v94_v20, %v93_v24  ;;  %v674_v61 = vld [vmem:[%s1318_s0 + $0x190] sm:$0xff]  ;;  %1351 = vst [vmem:[#allocation14_spill] sm:$0xff] %v678_v63  ;;  %1352 = vst [vmem:[#allocation15_spill] sm:$0xff] %v682_v0  ;;  %v686_v4 = vsel %vm82_vm1, %v647_v55, 0.0  ;;  %v691_v5 = vld [vmem:[%s1318_s0 + $0x198] sm:$0xff]  ;;  %v705_v9 = vsel %vm82_vm1, %v664_v59, 0.0 }
   0xe   :  { %1353 = vst [vmem:[#allocation16_spill] sm:$0xff] %v686_v4  ;;  %v696_v6 = vld [vmem:[%s1318_s0 + $0x1a0] sm:$0xff]  ;;  %v701_v8 = vld [vmem:[%s1318_s0 + $0x1a8] sm:$0xff]  ;;  %1354 = vst [vmem:[#allocation17_spill] sm:$0xff] %v705_v9  ;;  %v709_v11 = vsel %vm82_vm1, %v669_v60, 0.0  ;;  %v713_v12 = vsel %vm82_vm1, %v674_v61, 0.0 }
   0xf   :  { %v97_v49 = vadd.f32 %v96_v25, %v95_v36  ;;  %1355 = vst [vmem:[#allocation18_spill] sm:$0xff] %v709_v11  ;;  %1356 = vst [vmem:[#allocation19_spill] sm:$0xff] %v713_v12  ;;  %v718_v14 = vld [vmem:[%s1318_s0 + $0x60] sm:$0xff]  ;;  %v723_v15 = vld [vmem:[%s1318_s0 + $0x1b0] sm:$0xff]  ;;  %v737_v25 = vsel %vm82_vm1, %v691_v5, 0.0  ;;  %v745_v36 = vsel %vm82_vm1, %v701_v8, 0.0 }
  0x10   :  { %v728_v17 = vld [vmem:[%s1318_s0 + $0x1b8] sm:$0xff]  ;;  %v733_v20 = vld [vmem:[%s1318_s0 + $0x1c0] sm:$0xff]  ;;  %1357 = vst [vmem:[#allocation20_spill] sm:$0xff] %v737_v25  ;;  %1359 = vst [vmem:[#allocation22_spill] sm:$0xff] %v745_v36 }
  0x11   :  { %v99_v62 = vadd.f32 %v98_v26, %v97_v49  ;;  %v741_v26 = vsel %vm82_vm1, %v696_v6, 0.0  ;;  %v750_v49 = vld [vmem:[%s1318_s0 + $0x1c8] sm:$0xff]  ;;  %v768_v36 = vsel %vm82_vm1, %v728_v17, 0.0  ;;  %v772_v25 = vsel %vm82_vm1, %v733_v20, 0.0  ;;  %v777_v12 = vld [vmem:[%s1318_s0 + $0x1e0] sm:$0xff]  ;;  %v804_v0 = vld [vmem:[%s1318_s0 + $0x1f8] sm:$0xff] }
  0x12   :  { %1358 = vst [vmem:[#allocation21_spill] sm:$0xff] %v741_v26  ;;  %v764_v26 = vsel %vm82_vm1, %v723_v15, 0.0  ;;  %1361 = vst [vmem:[#allocation24_spill] sm:$0xff] %v768_v36  ;;  %v782_v11 = vld [vmem:[%s1318_s0 + $0x1e8] sm:$0xff]  ;;  %v791_v9 = vsel %vm82_vm1, %v750_v49, 0.0  ;;  %v826_v58 = vsel %vm82_vm1, %v804_v0, 0.0 }
  0x13   :  { %v101_v24 = vadd.f32 %v100_v30, %v99_v62  ;;  %v755_v30 = vld [vmem:[%s1318_s0 + $0x1d0] sm:$0xff]  ;;  %v760_v62 = vld [vmem:[%s1318_s0 + $0x1d8] sm:$0xff]  ;;  %1360 = vst [vmem:[#allocation23_spill] sm:$0xff] %v764_v26  ;;  %1362 = vst [vmem:[#allocation25_spill] sm:$0xff] %v772_v25 }
  0x14   :  { %v787_v26 = vld [vmem:[%s1318_s0 + $0x1f0] sm:$0xff]  ;;  %1364 = vst [vmem:[#allocation27_spill] sm:$0xff] %v791_v9  ;;  %v795_v25 = vsel %vm82_vm1, %v755_v30, 0.0  ;;  %v799_v4 = vsel %vm82_vm1, %v760_v62, 0.0  ;;  %1367 = vst [vmem:[#allocation30_spill] sm:$0xff] %v804_v0  ;;  %v814_v9 = vsel %vm82_vm1, %v782_v11, 0.0 }
  0x15   :  { %1363 = vst [vmem:[#allocation26_spill] sm:$0xff] %v787_v26  ;;  %v103_v36 = vadd.f32 %v102_v31, %v101_v24  ;;  %1365 = vst [vmem:[#allocation28_spill] sm:$0xff] %v795_v25  ;;  %v106_v31 = vsel %vm82_vm1, %v718_v14, 0.0  ;;  %v810_v24 = vsel %vm82_vm1, %v777_v12, 0.0  ;;  %v818_v25 = vsel %vm82_vm1, %v787_v26, 0.0  ;;  %v855_v56 = vld [vmem:[%s1318_s0 + $0x90] sm:$0xff] }
  0x16   :  { %1366 = vst [vmem:[#allocation29_spill] sm:$0xff] %v799_v4  ;;  %1368 = vst [vmem:[#allocation31_spill] sm:$0xff] %v810_v24  ;;  %v30_v4 = vld [vmem:[%s1318_s0 + $0x68] sm:$0xff]  ;;  %v860_v52 = vld [vmem:[%s1318_s0 + $0x98] sm:$0xff] }
  0x17   :  { %1369 = vst [vmem:[#allocation32_spill] sm:$0xff] %v814_v9  ;;  %1370 = vst [vmem:[#allocation33_spill] sm:$0xff] %v818_v25  ;;  %v105_v63 = vadd.f32 %v551_v32, %v103_v36  ;;  %v108_v24 = vsel %vm82_vm1, %v30_v4, 0.0  ;;  %v31_v9 = vld [vmem:[%s1318_s0 + $0x70] sm:$0xff]  ;;  %v835_v25 = vld [vmem:[%s1318_s0 + $0x78] sm:$0xff]  ;;  %v120_v39 = vsel %vm82_vm1, %v860_v52, 0.0 }
  0x18   :  { %1371 = vst [vmem:[#allocation34_spill] sm:$0xff] %v826_v58  ;;  %1372 = vst [vmem:[#allocation35_spill] sm:$0xff] %v835_v25  ;;  %v840_v32 = vld [vmem:[%s1318_s0 + $0x80] sm:$0xff]  ;;  %v845_v36 = vld [vmem:[%s1318_s0 + $0x88] sm:$0xff]  ;;  %v110_v58 = vsel %vm82_vm1, %v31_v9, 0.0 }
  0x19   :  { %v107_v57 = vadd.f32 %v106_v31, %v105_v63  ;;  %1373 = vst [vmem:[#allocation36_spill] sm:$0xff] %v840_v32  ;;  %1374 = vst [vmem:[#allocation37_spill] sm:$0xff] %v845_v36  ;;  %v220_v63 = vmul.f32 %v455_v1, %v455_v1  ;;  %v221_v31 = vmul.f32 %v460_v2, %v460_v2  ;;  %v865_v51 = vld [vmem:[%s1318_s0 + $0xa0] sm:$0xff]  ;;  %v112_v1 = vsel %vm82_vm1, %v835_v25, 0.0  ;;  %v876_v44 = vld [vmem:[%s1318_s0 + $0xa8] sm:$0xff] }
  0x1a   :  { %1375 = vst [vmem:[#allocation38_spill] sm:$0xff] %v855_v56  ;;  %1376 = vst [vmem:[#allocation39_spill] sm:$0xff] %v860_v52  ;;  %v114_v2 = vsel %vm82_vm1, %v840_v32, 0.0  ;;  %v116_v45 = vsel %vm82_vm1, %v845_v36, 0.0  ;;  %v881_v43 = vld [vmem:[%s1318_s0 + $0xb0] sm:$0xff]  ;;  %v122_v38 = vsel %vm82_vm1, %v865_v51, 0.0  ;;  %v223_v25 = vmul.f32 %v476_v7, %v476_v7 }
  0x1b   :  { %1377 = vst [vmem:[#allocation40_spill] sm:$0xff] %v865_v51  ;;  %v109_v50 = vadd.f32 %v108_v24, %v107_v57  ;;  %1378 = vst [vmem:[#allocation41_spill] sm:$0xff] %v876_v44  ;;  %v886_v57 = vld [vmem:[%s1318_s0 + $0xb8] sm:$0xff]  ;;  %v118_v24 = vsel %vm82_vm1, %v855_v56, 0.0  ;;  %v899_v36 = vld [vmem:[%s1318_s0 + $0xc0] sm:$0xff]  ;;  %v124_v51 = vsel %vm82_vm1, %v876_v44, 0.0 }
  0x1c   :  { %1379 = vst [vmem:[#allocation42_spill] sm:$0xff] %v881_v43  ;;  %1380 = vst [vmem:[#allocation43_spill] sm:$0xff] %v886_v57  ;;  %v904_v32 = vld [vmem:[%s1318_s0 + $0xc8] sm:$0xff]  ;;  %v909_v52 = vld [vmem:[%s1318_s0 + $0xd0] sm:$0xff]  ;;  %v915_v3 = vsel %vm82_vm1, %v881_v43, 0.0 }
  0x1d   :  { %1381 = vst [vmem:[#allocation44_spill] sm:$0xff] %v899_v36  ;;  %1382 = vst [vmem:[#allocation45_spill] sm:$0xff] %v904_v32  ;;  %v111_v56 = vadd.f32 %v110_v58, %v109_v50  ;;  %v922_v0 = vld [vmem:[%s1318_s0 + $0xd8] sm:$0xff]  ;;  %v927_v26 = vld [vmem:[%s1318_s0 + $0xe0] sm:$0xff]  ;;  %v931_v50 = vsel %vm82_vm1, %v886_v57, 0.0  ;;  %v935_v58 = vsel %vm82_vm1, %v899_v36, 0.0 }
  0x1e   :  { %1383 = vst [vmem:[#allocation46_spill] sm:$0xff] %v909_v52  ;;  %1384 = vst [vmem:[#allocation47_spill] sm:$0xff] %v922_v0  ;;  %v939_v7 = vsel %vm82_vm1, %v904_v32, 0.0  ;;  %v943_v43 = vsel %vm82_vm1, %v909_v52, 0.0  ;;  %v948_v44 = vld [vmem:[%s1318_s0 + $0xe8] sm:$0xff]  ;;  %v953_v57 = vld [vmem:[%s1318_s0 + $0xf0] sm:$0xff]  ;;  %v224_v52 = vmul.f32 %v483_v10, %v483_v10  ;;  %v228_v10 = vmul.f32 %v507_v19, %v507_v19 }
  0x1f   :  { %1385 = vst [vmem:[#allocation48_spill] sm:$0xff] %v927_v26  ;;  %1386 = vst [vmem:[#allocation49_spill] sm:$0xff] %v935_v58  ;;  %v113_v36 = vadd.f32 %v112_v1, %v111_v56  ;;  %v957_v58 = vsel %vm82_vm1, %v922_v0, 0.0  ;;  %v961_v32 = vsel %vm82_vm1, %v927_v26, 0.0  ;;  %v225_v56 = vmul.f32 %v490_v13, %v490_v13 }
  0x20   :  { %1387 = vst [vmem:[#allocation50_spill] sm:$0xff] %v939_v7  ;;  %1388 = vst [vmem:[#allocation51_spill] sm:$0xff] %v943_v43  ;;  %v967_v43 = vsel %vm82_vm1, %v948_v44, 0.0  ;;  %v971_v7 = vsel %vm82_vm1, %v953_v57, 0.0  ;;  %v226_v1 = vmul.f32 %v497_v16, %v497_v16  ;;  %v227_v26 = vmul.f32 %v502_v18, %v502_v18 }
  0x21   :  { %1389 = vst [vmem:[#allocation52_spill] sm:$0xff] %v948_v44  ;;  %1390 = vst [vmem:[#allocation53_spill] sm:$0xff] %v953_v57  ;;  %v115_v0 = vadd.f32 %v114_v2, %v113_v36  ;;  %v229_v44 = vmul.f32 %v514_v21, %v514_v21  ;;  %v230_v57 = vmul.f32 %v519_v22, %v519_v22 }
  0x22   :  { %1391 = vst [vmem:[#allocation54_spill] sm:$0xff] %v971_v7  ;;  %v231_v7 = vmul.f32 %v524_v23, %v524_v23  ;;  %v232_v13 = vmul.f32 %v718_v14, %v718_v14  ;;  %v989_v16 = vmul.f32 %v30_v4, %v30_v4  ;;  %v991_v2 = vmul.f32 %v31_v9, %v31_v9 }
  0x23   :  { %v117_v36 = vadd.f32 %v116_v45, %v115_v0  ;;  %v253_v18 = vmul.f32 %v533_v27, %v533_v27  ;;  %v254_v19 = vmul.f32 %v538_v28, %v538_v28  ;;  %v255_v21 = vmul.f32 %v543_v29, %v543_v29 }
  0x24   :  { %v256_v22 = vmul.f32 %v556_v33, %v556_v33  ;;  %v257_v23 = vmul.f32 %v561_v34, %v561_v34  ;;  %v258_v45 = vmul.f32 %v566_v35, %v566_v35  ;;  %v259_v4 = vmul.f32 %v583_v40, %v583_v40 }
  0x25   :  { %v119_v0 = vadd.f32 %v118_v24, %v117_v36  ;;  %v260_v27 = vmul.f32 %v588_v41, %v588_v41  ;;  %v261_v28 = vmul.f32 %v593_v42, %v593_v42  ;;  %v262_v29 = vmul.f32 %v610_v46, %v610_v46 }
  0x26   :  { %v263_v33 = vmul.f32 %v615_v47, %v615_v47  ;;  %v284_v34 = vsel %vm82_vm1, %v220_v63, 0.0  ;;  %v285_v35 = vsel %vm82_vm1, %v221_v31, 0.0  ;;  %v264_v40 = vmul.f32 %v620_v48, %v620_v48 }
  0x27   :  { %v121_v9 = vadd.f32 %v120_v39, %v119_v0  ;;  %v286_v14 = vadd.f32 %v285_v35, %v284_v34  ;;  %v287_v41 = vsel %vm82_vm1, %v222_v37, 0.0  ;;  %v265_v42 = vmul.f32 %v637_v53, %v637_v53  ;;  %v1392_v0 = vld [vmem:[#allocation26_spill] sm:$0xff] }
  0x28   :  { %v266_v46 = vmul.f32 %v642_v54, %v642_v54  ;;  %v267_v47 = vmul.f32 %v647_v55, %v647_v55  ;;  %v289_v63 = vsel %vm82_vm1, %v223_v25, 0.0  ;;  %v268_v39 = vmul.f32 %v664_v59, %v664_v59  ;;  %v1393_v34 = vld [vmem:[#allocation30_spill] sm:$0xff] }
  0x29   :  { %v123_v24 = vadd.f32 %v122_v38, %v121_v9  ;;  %v269_v48 = vmul.f32 %v669_v60, %v669_v60  ;;  %v288_v31 = vadd.f32 %v287_v41, %v286_v14  ;;  %v270_v37 = vmul.f32 %v674_v61, %v674_v61  ;;  %v1394_v41 = vld [vmem:[#allocation49_spill] sm:$0xff] }
  0x2a   :  { %v271_v53 = vmul.f32 %v691_v5, %v691_v5  ;;  %v272_v54 = vmul.f32 %v696_v6, %v696_v6  ;;  %v291_v55 = vsel %vm82_vm1, %v224_v52, 0.0  ;;  %v273_v38 = vmul.f32 %v701_v8, %v701_v8 }
  0x2b   :  { %v125_v25 = vadd.f32 %v124_v51, %v123_v24  ;;  %v274_v59 = vmul.f32 %v723_v15, %v723_v15  ;;  %v290_v60 = vadd.f32 %v289_v63, %v288_v31  ;;  %v275_v36 = vmul.f32 %v728_v17, %v728_v17 }
  0x2c   :  { %v276_v61 = vmul.f32 %v733_v20, %v733_v20  ;;  %v277_v5 = vmul.f32 %v750_v49, %v750_v49  ;;  %v293_v6 = vsel %vm82_vm1, %v225_v56, 0.0  ;;  %v278_v52 = vmul.f32 %v755_v30, %v755_v30 }
  0x2d   :  { %v127_v51 = vadd.f32 %v915_v3, %v125_v25  ;;  %v279_v8 = vmul.f32 %v760_v62, %v760_v62  ;;  %v292_v15 = vadd.f32 %v291_v55, %v290_v60  ;;  %v280_v17 = vmul.f32 %v777_v12, %v777_v12  ;;  %v1396_v25 = vld [vmem:[#allocation51_spill] sm:$0xff] }
  0x2e   :  { %v281_v20 = vmul.f32 %v782_v11, %v782_v11  ;;  %v282_v49 = vmul.f32 %v1392_v0, %v1392_v0  ;;  %v295_v56 = vsel %vm82_vm1, %v226_v1, 0.0  ;;  %v283_v30 = vmul.f32 %v1393_v34, %v1393_v34  ;;  %v1398_v34 = vld [vmem:[#allocation54_spill] sm:$0xff] }
  0x2f   :  { %v129_v3 = vadd.f32 %v931_v50, %v127_v51  ;;  %v294_v35 = vadd.f32 %v293_v6, %v292_v15  ;;  %v297_v62 = vsel %vm82_vm1, %v227_v26, 0.0  ;;  %v299_v9 = vsel %vm82_vm1, %v228_v10, 0.0 }
  0x30   :  { %v301_v12 = vsel %vm82_vm1, %v229_v44, 0.0  ;;  %v303_v14 = vsel %vm82_vm1, %v230_v57, 0.0  ;;  %v305_v11 = vsel %vm82_vm1, %v231_v7, 0.0  ;;  %v307_v1 = vsel %vm82_vm1, %v232_v13, 0.0  ;;  %v1395_v7 = vld [vmem:[#allocation50_spill] sm:$0xff] }
  0x31   :  { %v131_v63 = vadd.f32 %v1394_v41, %v129_v3  ;;  %v296_v24 = vadd.f32 %v295_v56, %v294_v35  ;;  %v1072_v50 = vsel %vm82_vm1, %v253_v18, 0.0  ;;  %v1075_v31 = vsel %vm82_vm1, %v254_v19, 0.0  ;;  %v1397_v56 = vld [vmem:[#allocation35_spill] sm:$0xff] }
  0x32   :  { %v1078_v26 = vsel %vm82_vm1, %v255_v21, 0.0  ;;  %v1081_v44 = vsel %vm82_vm1, %v256_v22, 0.0  ;;  %v1084_v57 = vsel %vm82_vm1, %v257_v23, 0.0  ;;  %v1088_v13 = vsel %vm82_vm1, %v258_v45, 0.0 }
  0x33   :  { %v133_v10 = vadd.f32 %v1395_v7, %v131_v63  ;;  %v298_v55 = vadd.f32 %v297_v62, %v296_v24  ;;  %v1091_v18 = vsel %vm82_vm1, %v259_v4, 0.0  ;;  %v1094_v19 = vsel %vm82_vm1, %v260_v27, 0.0  ;;  %v1399_v62 = vld [vmem:[#allocation36_spill] sm:$0xff] }
  0x34   :  { %v1097_v21 = vsel %vm82_vm1, %v261_v28, 0.0  ;;  %v1100_v22 = vsel %vm82_vm1, %v262_v29, 0.0  ;;  %v1103_v23 = vsel %vm82_vm1, %v263_v33, 0.0  ;;  %v1107_v45 = vsel %vm82_vm1, %v264_v40, 0.0 }
  0x35   :  { %v135_v60 = vadd.f32 %v1396_v25, %v133_v10  ;;  %v300_v6 = vadd.f32 %v299_v9, %v298_v55  ;;  %v1110_v4 = vsel %vm82_vm1, %v265_v42, 0.0  ;;  %v1113_v27 = vsel %vm82_vm1, %v266_v46, 0.0  ;;  %v1401_v10 = vld [vmem:[#allocation38_spill] sm:$0xff] }
  0x36   :  { %v1116_v28 = vsel %vm82_vm1, %v267_v47, 0.0  ;;  %v1119_v29 = vsel %vm82_vm1, %v268_v39, 0.0  ;;  %v1122_v33 = vsel %vm82_vm1, %v269_v48, 0.0  ;;  %v1126_v40 = vsel %vm82_vm1, %v270_v37, 0.0  ;;  %v1402_v25 = vld [vmem:[#allocation2_spill] sm:$0xff] }
  0x37   :  { %v137_v51 = vadd.f32 %v957_v58, %v135_v60  ;;  %v302_v15 = vadd.f32 %v301_v12, %v300_v6  ;;  %v1129_v42 = vsel %vm82_vm1, %v271_v53, 0.0  ;;  %v1132_v46 = vsel %vm82_vm1, %v272_v54, 0.0 }
  0x38   :  { %v1135_v47 = vsel %vm82_vm1, %v273_v38, 0.0  ;;  %v1138_v39 = vsel %vm82_vm1, %v274_v59, 0.0  ;;  %v1141_v48 = vsel %vm82_vm1, %v275_v36, 0.0  ;;  %v1145_v37 = vsel %vm82_vm1, %v276_v61, 0.0 }
  0x39   :  { %v139_v58 = vadd.f32 %v961_v32, %v137_v51  ;;  %v304_v0 = vadd.f32 %v303_v14, %v302_v15  ;;  %v1148_v53 = vsel %vm82_vm1, %v277_v5, 0.0  ;;  %v1151_v54 = vsel %vm82_vm1, %v278_v52, 0.0  ;;  %v1165_v32 = vld [vmem:[%s1318_s0 + $0xf8] sm:$0xff]  ;;  %v1403_v51 = vld [vmem:[#allocation39_spill] sm:$0xff] }
  0x3a   :  { %v1154_v38 = vsel %vm82_vm1, %v279_v8, 0.0  ;;  %v1157_v59 = vsel %vm82_vm1, %v280_v17, 0.0  ;;  %v1160_v36 = vsel %vm82_vm1, %v281_v20, 0.0  ;;  %v1169_v52 = vsel %vm82_vm1, %v282_v49, 0.0 }
  0x3b   :  { %v141_v61 = vadd.f32 %v967_v43, %v139_v58  ;;  %v306_v5 = vadd.f32 %v305_v11, %v304_v0  ;;  %v1172_v8 = vsel %vm82_vm1, %v283_v30, 0.0  ;;  %v144_v17 = vsel %vm82_vm1, %v1165_v32, 0.0  ;;  %v1183_v43 = vld [vmem:[%s1318_s0 + $0x100] sm:$0xff]  ;;  %v1404_v58 = vld [vmem:[#allocation3_spill] sm:$0xff] }
  0x3c   :  { %v235_v20 = vmul.f32 %v1397_v56, %v1397_v56  ;;  %v309_v3 = vsel %vm82_vm1, %v989_v16, 0.0  ;;  %v146_v30 = vsel %vm82_vm1, %v1183_v43, 0.0  ;;  %v236_v9 = vmul.f32 %v1399_v62, %v1399_v62  ;;  %v1400_v16 = vld [vmem:[#allocation37_spill] sm:$0xff] }
  0x3d   :  { %v143_v49 = vadd.f32 %v1398_v34, %v141_v61  ;;  %v308_v35 = vadd.f32 %v307_v1, %v306_v5  ;;  %v311_v12 = vsel %vm82_vm1, %v991_v2, 0.0  ;;  %v237_v41 = vmul.f32 %v1400_v16, %v1400_v16  ;;  %v1405_v5 = vld [vmem:[#allocation40_spill] sm:$0xff]  ;;  %v1408_v62 = vld [vmem:[#allocation5_spill] sm:$0xff] }
  0x3e   :  { %v313_v63 = vsel %vm82_vm1, %v235_v20, 0.0  ;;  %v238_v1 = vmul.f32 %v1401_v10, %v1401_v10  ;;  %v315_v55 = vsel %vm82_vm1, %v236_v9, 0.0  ;;  %v239_v2 = vmul.f32 %v1403_v51, %v1403_v51  ;;  %v1406_v20 = vld [vmem:[#allocation4_spill] sm:$0xff] }
  0x3f   :  { %v145_v14 = vadd.f32 %v144_v17, %v143_v49  ;;  %v310_v11 = vadd.f32 %v309_v3, %v308_v35  ;;  %v317_v15 = vsel %vm82_vm1, %v237_v41, 0.0  ;;  %v240_v17 = vmul.f32 %v1405_v5, %v1405_v5  ;;  %v1407_v49 = vld [vmem:[#allocation41_spill] sm:$0xff]  ;;  %v1410_v41 = vld [vmem:[#allocation6_spill] sm:$0xff] }
  0x40   :  { %v319_v56 = vsel %vm82_vm1, %v238_v1, 0.0  ;;  %v241_v35 = vmul.f32 %v1407_v49, %v1407_v49 }
  0x41   :  { %v147_v24 = vadd.f32 %v146_v30, %v145_v14  ;;  %v312_v7 = vadd.f32 %v311_v12, %v310_v11  ;;  %v321_v30 = vsel %vm82_vm1, %v239_v2, 0.0  ;;  %v1409_v14 = vld [vmem:[#allocation42_spill] sm:$0xff]  ;;  %v323_v16 = vsel %vm82_vm1, %v240_v17, 0.0 }
  0x42   :  { %v242_v11 = vmul.f32 %v1409_v14, %v1409_v14  ;;  %v325_v1 = vsel %vm82_vm1, %v241_v35, 0.0 }
  0x43   :  { %v149_v60 = vadd.f32 %v1402_v25, %v147_v24  ;;  %v314_v6 = vadd.f32 %v313_v63, %v312_v7  ;;  %v1411_v7 = vld [vmem:[#allocation43_spill] sm:$0xff] }
  0x44   :  { %v243_v10 = vmul.f32 %v1411_v7, %v1411_v7  ;;  %v327_v2 = vsel %vm82_vm1, %v242_v11, 0.0 }
  0x45   :  { %v151_v0 = vadd.f32 %v1404_v58, %v149_v60  ;;  %v316_v61 = vadd.f32 %v315_v55, %v314_v6  ;;  %v1412_v55 = vld [vmem:[#allocation7_spill] sm:$0xff]  ;;  %v1413_v6 = vld [vmem:[#allocation44_spill] sm:$0xff] }
  0x46   :  { %v244_v51 = vmul.f32 %v1413_v6, %v1413_v6  ;;  %v329_v17 = vsel %vm82_vm1, %v243_v10, 0.0 }
  0x47   :  { %v153_v3 = vadd.f32 %v1406_v20, %v151_v0  ;;  %v318_v34 = vadd.f32 %v317_v15, %v316_v61  ;;  %v1414_v15 = vld [vmem:[#allocation8_spill] sm:$0xff]  ;;  %v1415_v61 = vld [vmem:[#allocation45_spill] sm:$0xff] }
  0x48   :  { %v245_v5 = vmul.f32 %v1415_v61, %v1415_v61  ;;  %v331_v35 = vsel %vm82_vm1, %v244_v51, 0.0 }
  0x49   :  { %v155_v9 = vadd.f32 %v1408_v62, %v153_v3  ;;  %v320_v12 = vadd.f32 %v319_v56, %v318_v34  ;;  %v1416_v56 = vld [vmem:[#allocation9_spill] sm:$0xff]  ;;  %v1417_v34 = vld [vmem:[#allocation46_spill] sm:$0xff] }
  0x4a   :  { %v246_v49 = vmul.f32 %v1417_v34, %v1417_v34  ;;  %v333_v11 = vsel %vm82_vm1, %v245_v5, 0.0 }
  0x4b   :  { %v157_v63 = vadd.f32 %v1410_v41, %v155_v9  ;;  %v322_v24 = vadd.f32 %v321_v30, %v320_v12  ;;  %v1418_v30 = vld [vmem:[#allocation10_spill] sm:$0xff]  ;;  %v1419_v12 = vld [vmem:[#allocation47_spill] sm:$0xff] }
  0x4c   :  { %v247_v14 = vmul.f32 %v1419_v12, %v1419_v12  ;;  %v335_v10 = vsel %vm82_vm1, %v246_v49, 0.0  ;;  %v1427_v49 = vld [vmem:[#allocation15_spill] sm:$0xff]  ;;  %v1428_v12 = vld [vmem:[#allocation16_spill] sm:$0xff] }
  0x4d   :  { %v159_v25 = vadd.f32 %v1412_v55, %v157_v63  ;;  %v324_v60 = vadd.f32 %v323_v16, %v322_v24  ;;  %v1420_v16 = vld [vmem:[#allocation11_spill] sm:$0xff]  ;;  %v1421_v24 = vld [vmem:[#allocation48_spill] sm:$0xff] }
  0x4e   :  { %v248_v7 = vmul.f32 %v1421_v24, %v1421_v24  ;;  %v337_v51 = vsel %vm82_vm1, %v247_v14, 0.0 }
  0x4f   :  { %v161_v58 = vadd.f32 %v1414_v15, %v159_v25  ;;  %v326_v0 = vadd.f32 %v325_v1, %v324_v60  ;;  %v1422_v1 = vld [vmem:[#allocation12_spill] sm:$0xff] }
  0x50   :  { %v1423_v60 = vld [vmem:[#allocation52_spill] sm:$0xff]  ;;  %v339_v5 = vsel %vm82_vm1, %v248_v7, 0.0  ;;  %v1430_v7 = vld [vmem:[#allocation18_spill] sm:$0xff] }
  0x51   :  { %v163_v20 = vadd.f32 %v1416_v56, %v161_v58  ;;  %v328_v3 = vadd.f32 %v327_v2, %v326_v0  ;;  %v249_v6 = vmul.f32 %v1423_v60, %v1423_v60  ;;  %v1424_v2 = vld [vmem:[#allocation13_spill] sm:$0xff] }
  0x52   :  { %v1425_v0 = vld [vmem:[#allocation53_spill] sm:$0xff] }
  0x53   :  { %v165_v62 = vadd.f32 %v1418_v30, %v163_v20  ;;  %v330_v9 = vadd.f32 %v329_v17, %v328_v3  ;;  %v250_v61 = vmul.f32 %v1425_v0, %v1425_v0  ;;  %v1426_v17 = vld [vmem:[#allocation14_spill] sm:$0xff]  ;;  %v251_v3 = vmul.f32 %v1165_v32, %v1165_v32 }
  0x54   :  { %v341_v34 = vsel %vm82_vm1, %v249_v6, 0.0  ;;  %v1432_v6 = vld [vmem:[#allocation20_spill] sm:$0xff]  ;;  %v1434_v0 = vld [vmem:[#allocation22_spill] sm:$0xff] }
  0x55   :  { %v167_v41 = vadd.f32 %v1420_v16, %v165_v62  ;;  %v332_v63 = vadd.f32 %v331_v35, %v330_v9  ;;  %v252_v62 = vmul.f32 %v1183_v43, %v1183_v43  ;;  %v343_v9 = vsel %vm82_vm1, %v250_v61, 0.0 }
  0x56   :  { %v345_v16 = vsel %vm82_vm1, %v251_v3, 0.0  ;;  %v1436_v3 = vld [vmem:[#allocation24_spill] sm:$0xff] }
  0x57   :  { %v169_v55 = vadd.f32 %v1422_v1, %v167_v41  ;;  %v334_v25 = vadd.f32 %v333_v11, %v332_v63  ;;  %v1429_v41 = vld [vmem:[#allocation17_spill] sm:$0xff]  ;;  %v347_v32 = vsel %vm82_vm1, %v252_v62, 0.0  ;;  %v1438_v62 = vld [vmem:[#allocation27_spill] sm:$0xff] }
  0x59   :  { %v171_v15 = vadd.f32 %v1424_v2, %v169_v55  ;;  %v336_v58 = vadd.f32 %v335_v10, %v334_v25  ;;  %v1431_v55 = vld [vmem:[#allocation19_spill] sm:$0xff]  ;;  %v1433_v2 = vld [vmem:[#allocation21_spill] sm:$0xff] }
  0x5b   :  { %v173_v56 = vadd.f32 %v1426_v17, %v171_v15  ;;  %v338_v20 = vadd.f32 %v337_v51, %v336_v58  ;;  %v1435_v17 = vld [vmem:[#allocation23_spill] sm:$0xff] }
  0x5d   :  { %v175_v35 = vadd.f32 %v1427_v49, %v173_v56  ;;  %v340_v30 = vadd.f32 %v339_v5, %v338_v20 }
  0x5f   :  { %v177_v14 = vadd.f32 %v1428_v12, %v175_v35  ;;  %v342_v11 = vadd.f32 %v341_v34, %v340_v30  ;;  %v1437_v35 = vld [vmem:[#allocation25_spill] sm:$0xff]  ;;  %v1439_v12 = vld [vmem:[#allocation28_spill] sm:$0xff] }
  0x61   :  { %v179_v63 = vadd.f32 %v1429_v41, %v177_v14  ;;  %v344_v24 = vadd.f32 %v343_v9, %v342_v11  ;;  %v1440_v11 = vld [vmem:[#allocation29_spill] sm:$0xff]  ;;  %v1441_v41 = vld [vmem:[#allocation31_spill] sm:$0xff] }
  0x63   :  { %v181_v10 = vadd.f32 %v1430_v7, %v179_v63  ;;  %v346_v1 = vadd.f32 %v345_v16, %v344_v24  ;;  %v1442_v24 = vld [vmem:[#allocation32_spill] sm:$0xff]  ;;  %v1443_v7 = vld [vmem:[#allocation33_spill] sm:$0xff] }
  0x65   :  { %v183_v25 = vadd.f32 %v1431_v55, %v181_v10  ;;  %v348_v60 = vadd.f32 %v347_v32, %v346_v1  ;;  %v1444_v1 = vld [vmem:[#allocation34_spill] sm:$0xff] }
  0x67   :  { %v185_v43 = vadd.f32 %v1432_v6, %v183_v25  ;;  %v350_v51 = vadd.f32 %v1072_v50, %v348_v60 }
  0x69   :  { %v187_v15 = vadd.f32 %v1433_v2, %v185_v43  ;;  %v352_v58 = vadd.f32 %v1075_v31, %v350_v51 }
  0x6b   :  { %v189_v61 = vadd.f32 %v1434_v0, %v187_v15  ;;  %v354_v5 = vadd.f32 %v1078_v26, %v352_v58 }
  0x6d   :  { %v191_v56 = vadd.f32 %v1435_v17, %v189_v61  ;;  %v356_v20 = vadd.f32 %v1081_v44, %v354_v5 }
  0x6f   :  { %v193_v34 = vadd.f32 %v1436_v3, %v191_v56  ;;  %v358_v49 = vadd.f32 %v1084_v57, %v356_v20 }
  0x71   :  { %v195_v30 = vadd.f32 %v1437_v35, %v193_v34  ;;  %v360_v50 = vadd.f32 %v1088_v13, %v358_v49 }
  0x73   :  { %v197_v9 = vadd.f32 %v1438_v62, %v195_v30  ;;  %v362_v31 = vadd.f32 %v1091_v18, %v360_v50 }
  0x75   :  { %v199_v14 = vadd.f32 %v1439_v12, %v197_v9  ;;  %v364_v26 = vadd.f32 %v1094_v19, %v362_v31 }
  0x77   :  { %v201_v16 = vadd.f32 %v1440_v11, %v199_v14  ;;  %v366_v44 = vadd.f32 %v1097_v21, %v364_v26 }
  0x79   :  { %v203_v63 = vadd.f32 %v1441_v41, %v201_v16  ;;  %v368_v57 = vadd.f32 %v1100_v22, %v366_v44 }
  0x7b   :  { %v205_v32 = vadd.f32 %v1442_v24, %v203_v63  ;;  %v370_v13 = vadd.f32 %v1103_v23, %v368_v57 }
  0x7d   :  { %v207_v10 = vadd.f32 %v1443_v7, %v205_v32  ;;  %v372_v18 = vadd.f32 %v1107_v45, %v370_v13  ;;  %v81_v45 = vld [vmem:[%s1319_s1] sm:$0x1] }
  0x7f   :  { %v209_v55 = vadd.f32 %v1444_v1, %v207_v10  ;;  %v374_v19 = vadd.f32 %v1110_v4, %v372_v18 }
  0x81   :  { %v210_v25 = vrot.slane %v209_v55, 4  ;;  %v376_v60 = vadd.f32 %v1113_v27, %v374_v19 }
  0x83   :  { %v211_v21 = vadd.f32 %v210_v25, %v209_v55  ;;  %v378_v6 = vadd.f32 %v1116_v28, %v376_v60 }
  0x85   :  { %v212_v43 = vrot.slane %v211_v21, 2  ;;  %v380_v22 = vadd.f32 %v1119_v29, %v378_v6 }
  0x87   :  { %v213_v51 = vadd.f32 %v212_v43, %v211_v21  ;;  %v382_v23 = vadd.f32 %v1122_v33, %v380_v22 }
  0x89   :  { %v214_v2 = vrot.slane %v213_v51, 1  ;;  %v384_v15 = vadd.f32 %v1126_v40, %v382_v23 }
  0x8b   :  { %v215_v4 = vadd.f32 %v214_v2, %v213_v51  ;;  %v386_v58 = vadd.f32 %v1129_v42, %v384_v15 }
  0x8d   :  { %v216_v27 = vadd.f32 %v215_v4, %v81_v45  ;;  %v388_v0 = vadd.f32 %v1132_v46, %v386_v58 }
  0x8f   :  { %218 = vst.msk [vmem:[%s1319_s1] sm:$0x1] %vm14_vm0, %v216_v27  ;;  %v390_v28 = vadd.f32 %v1135_v47, %v388_v0 }
  0x91   :  { %v392_v29 = vadd.f32 %v1138_v39, %v390_v28 }
  0x93   :  { %v394_v33 = vadd.f32 %v1141_v48, %v392_v29 }
  0x95   :  { %v396_v40 = vadd.f32 %v1145_v37, %v394_v33  ;;  %v219_v37 = vld [vmem:[%s1320_s2] sm:$0x1] }
  0x97   :  { %v398_v61 = vadd.f32 %v1148_v53, %v396_v40 }
  0x99   :  { %v400_v42 = vadd.f32 %v1151_v54, %v398_v61 }
  0x9b   :  { %v402_v5 = vadd.f32 %v1154_v38, %v400_v42 }
  0x9d   :  { %v404_v46 = vadd.f32 %v1157_v59, %v402_v5 }
  0x9f   :  { %v406_v17 = vadd.f32 %v1160_v36, %v404_v46 }
  0xa1   :  { %v408_v56 = vadd.f32 %v1169_v52, %v406_v17 }
  0xa3   :  { %v410_v47 = vadd.f32 %v1172_v8, %v408_v56 }
  0xa5   :  { %v411_v20 = vrot.slane %v410_v47, 4 }
  0xa7   :  { %v412_v39 = vadd.f32 %v411_v20, %v410_v47 }
  0xa9   :  { %v413_v3 = vrot.slane %v412_v39, 2 }
  0xab   :  { %v414_v48 = vadd.f32 %v413_v3, %v412_v39 }
  0xad   :  { %v415_v34 = vrot.slane %v414_v48, 1 }
  0xaf   :  { %v416_v53 = vadd.f32 %v415_v34, %v414_v48 }
  0xb1   :  { %v417_v54 = vadd.f32 %v416_v53, %v219_v37 }
  0xb3   :  { %418 = vst.msk [vmem:[%s1320_s2] sm:$0x1] %vm14_vm0, %v417_v54 }

// kernel: _lambda_.63
= control target key start
LH: loop header
LB: loop body
LE: loop exit
PB: predicated region body
PF: predicated region fallthrough
CT: control target
= control target key end

     0   :  { %s1425_s12 = smov 0   ;;  %s1427_s13 = smov 0   ;;  %s1618_s0 = inlined_call_operand.vmem [shape: bf16[512,256], index: 0, kind: input, shape index: {}]   ;;  %s1619_s1 = inlined_call_operand.vmem [shape: bf16[256,128], index: 1, kind: input, shape index: {}]   ;;  %s1620_s2 = inlined_call_operand.vmem [shape: f32[1,128], index: 2, kind: input, shape index: {}]   ;;  %s1621_s3 = inlined_call_operand.vmem [shape: f32[512,128], index: 3, kind: output, shape index: {}]  }
   0x1   :  { %s1429_s14 = smov 0  }
   0x2 LB: > { %s32_s15 = sadd.s32 1, %s1399_s13  ;;  %p1107_p0 = scmp.ge.s32.totalorder %s1403_s14, 1  ;;  %s1403_s14 = sphi %s1429_s14, %s13_s14   ;;  %s1399_s13 = sphi %s1427_s13, %s1623_s13   ;;  %s1395_s12 = sphi %s1425_s12, %s1622_s12  }
   0x3   : > { %p34_p1 = scmp.ge.s32.totalorder %s32_s15, 2  ;;  %p191_p2 = scmp.lt.s32.totalorder %s1403_s14, 3 }
   0x5   : > { %s1625_s15 = smov (%p34_p1, %s32_s15), 0  ;;  %p192_p3 = pnand %p1107_p0, %p191_p2 }
   0x6   : > { %v1317_v0 = vld [vmem:[%s1619_s1 + $0x40] sm:$0xff] (!%p192_p3)   ;;  %s1108_s18 = sshll.u32 (!%p192_p3), %s1395_s12, 5  ;;  %v1319_v2 = vld [vmem:[%s1619_s1 + $0x48] sm:$0xff] (!%p192_p3)   ;;  %v1321_v4 = vld [vmem:[%s1619_s1 + $0x50] sm:$0xff] (!%p192_p3)  }
   0x7   : > { %195 = sbr.rel (%p192_p3) target bundleno = 315 (0x13b), region = 32  ;;  %v1318_v1 = vld [vmem:[%s1619_s1] sm:$0xff] (!%p192_p3)   ;;  %1165 = vmatprep.subr.bf16.mxu0 (!%p192_p3), %v1317_v0  ;;  %1277 = vmatprep.subr.bf16.mxu1 (!%p192_p3), %v1317_v0  ;;  %v1320_v3 = vld [vmem:[%s1619_s1 + $0x8] sm:$0xff] (!%p192_p3)   ;;  %p236_p4 = scmp.lt.s32.totalorder (!%p192_p3), %s1108_s18, 63  ;;  %v1322_v5 = vld [vmem:[%s1619_s1 + $0x10] sm:$0xff] (!%p192_p3)  }
   0x8   : > { %1166 = vmatpush3.bf16.msra.mxu0 (!%p192_p3), %v1318_v1  ;;  %1285 = vmatpush3.bf16.msra.mxu1 (!%p192_p3), %v1318_v1  ;;  %v1323_v6 = vld [vmem:[%s1619_s1 + $0x58] sm:$0xff] (!%p192_p3)   ;;  %v1325_v8 = vld [vmem:[%s1619_s1 + $0x60] sm:$0xff] (!%p192_p3)   ;;  %v1327_v10 = vld [vmem:[%s1619_s1 + $0x68] sm:$0xff] (!%p192_p3)  }
   0x9   : > { %1167 = vmatprep.subr.bf16.mxu0 (!%p192_p3), %v1319_v2  ;;  %1278 = vmatprep.subr.bf16.mxu1 (!%p192_p3), %v1319_v2  ;;  %v1324_v7 = vld [vmem:[%s1619_s1 + $0x18] sm:$0xff] (!%p192_p3)   ;;  %v1326_v9 = vld [vmem:[%s1619_s1 + $0x20] sm:$0xff] (!%p192_p3)   ;;  %v1328_v13 = vld [vmem:[%s1619_s1 + $0x28] sm:$0xff] (!%p192_p3)  }
   0xa   : > { %v1329_v14 = vld [vmem:[%s1619_s1 + $0x70] sm:$0xff] (!%p192_p3)   ;;  %v1331_v16 = vld [vmem:[%s1619_s1 + $0x78] sm:$0xff] (!%p192_p3)   ;;  %v1536_v51 = vld [vmem:[%s1620_s2] ss:$0 sm:$0xff] (!%p192_p3) }
   0xb   : > { %v1330_v15 = vld [vmem:[%s1619_s1 + $0x30] sm:$0xff] (!%p192_p3)   ;;  %v1332_v17 = vld [vmem:[%s1619_s1 + $0x38] sm:$0xff] (!%p192_p3)  }
   0xc   : > { %1168 = vmatpush3.bf16.msra.mxu0 (!%p192_p3), %v1320_v3  ;;  %1286 = vmatpush3.bf16.msra.mxu1 (!%p192_p3), %v1320_v3 }
   0xd   : > { %1169 = vmatprep.subr.bf16.mxu0 (!%p192_p3), %v1321_v4  ;;  %1279 = vmatprep.subr.bf16.mxu1 (!%p192_p3), %v1321_v4 }
   0xe   : > { %s1627_s18 = smov (!%p236_p4, %s1108_s18), 63 }
   0xf   : > { %s1164_s6 = sshll.u32 %s1627_s18, 3 }
  0x10   : > { %1170 = vmatpush3.bf16.msra.mxu0 %v1322_v5  ;;  %1287 = vmatpush3.bf16.msra.mxu1 %v1322_v5  ;;  %s1478_s11 = scalar_lea.vmem %s1618_s0, %s1164_s6  ;;  %s1543_s8 = scalar_lea.vmem %s1621_s3, %s1164_s6 }
  0x11   : > { %1171 = vmatprep.subr.bf16.mxu0 %v1323_v6  ;;  %1280 = vmatprep.subr.bf16.mxu1 %v1323_v6  ;;  %v1335_v11 = vld [vmem:[%s1478_s11 + $0x4] ss:$8 sps:$4 sm:$0xff]   ;;  %v1333_v18 = vld [vmem:[%s1478_s11] ss:$8 sps:$4 sm:$0xff]   ;;  %v1339_v20 = vld [vmem:[%s1478_s11 + $0x14] ss:$8 sps:$4 sm:$0xff]  }
  0x12   : > { %v1338_v12 = vld [vmem:[%s1478_s11 + $0x84] ss:$8 sps:$4 sm:$0xff]   ;;  %688 = vmatprep.mubr.bf16.mxu0 %v1335_v11  ;;  %v1336_v19 = vld [vmem:[%s1478_s11 + $0x80] ss:$8 sps:$4 sm:$0xff]   ;;  %v1341_v21 = vld [vmem:[%s1478_s11 + $0x94] ss:$8 sps:$4 sm:$0xff]  }
  0x13   : > { %752 = vmatprep.mubr.bf16.mxu1 %v1338_v12  ;;  %v1343_v22 = vld [vmem:[%s1478_s11 + $0x10] ss:$8 sps:$4 sm:$0xff]   ;;  %v1345_v24 = vld [vmem:[%s1478_s11 + $0x24] ss:$8 sps:$4 sm:$0xff]   ;;  %v1349_v26 = vld [vmem:[%s1478_s11 + $0x20] ss:$8 sps:$4 sm:$0xff]  }
  0x14   : > { %1172 = vmatpush3.bf16.msra.mxu0 %v1324_v7  ;;  %1288 = vmatpush3.bf16.msra.mxu1 %v1324_v7  ;;  %v1344_v23 = vld [vmem:[%s1478_s11 + $0x90] ss:$8 sps:$4 sm:$0xff]   ;;  %v1347_v25 = vld [vmem:[%s1478_s11 + $0xa4] ss:$8 sps:$4 sm:$0xff]   ;;  %v1350_v27 = vld [vmem:[%s1478_s11 + $0xa0] ss:$8 sps:$4 sm:$0xff]  }
  0x15   : > { %1173 = vmatprep.subr.bf16.mxu0 %v1325_v8  ;;  %1281 = vmatprep.subr.bf16.mxu1 %v1325_v8  ;;  %v1351_v28 = vld [vmem:[%s1478_s11 + $0x34] ss:$8 sps:$4 sm:$0xff]   ;;  %v1355_v30 = vld [vmem:[%s1478_s11 + $0x30] ss:$8 sps:$4 sm:$0xff]   ;;  %v1357_v32 = vld [vmem:[%s1478_s11 + $0x44] ss:$8 sps:$4 sm:$0xff]  }
  0x16   : > { %v1353_v29 = vld [vmem:[%s1478_s11 + $0xb4] ss:$8 sps:$4 sm:$0xff]   ;;  %v1356_v31 = vld [vmem:[%s1478_s11 + $0xb0] ss:$8 sps:$4 sm:$0xff]   ;;  %v1359_v33 = vld [vmem:[%s1478_s11 + $0xc4] ss:$8 sps:$4 sm:$0xff]  }
  0x17   : > { %v1361_v34 = vld [vmem:[%s1478_s11 + $0x40] ss:$8 sps:$4 sm:$0xff]   ;;  %v1363_v36 = vld [vmem:[%s1478_s11 + $0x54] ss:$8 sps:$4 sm:$0xff]   ;;  %v1367_v38 = vld [vmem:[%s1478_s11 + $0x50] ss:$8 sps:$4 sm:$0xff]  }
  0x18   : > { %1174 = vmatpush3.bf16.msra.mxu0 %v1326_v9  ;;  %1289 = vmatpush3.bf16.msra.mxu1 %v1326_v9  ;;  %v1362_v35 = vld [vmem:[%s1478_s11 + $0xc0] ss:$8 sps:$4 sm:$0xff]   ;;  %v1365_v37 = vld [vmem:[%s1478_s11 + $0xd4] ss:$8 sps:$4 sm:$0xff]   ;;  %v1368_v39 = vld [vmem:[%s1478_s11 + $0xd0] ss:$8 sps:$4 sm:$0xff]  }
  0x19   : > { %1175 = vmatprep.subr.bf16.mxu0 %v1327_v10  ;;  %1282 = vmatprep.subr.bf16.mxu1 %v1327_v10  ;;  %v1369_v40 = vld [vmem:[%s1478_s11 + $0x64] ss:$8 sps:$4 sm:$0xff]   ;;  %v1373_v42 = vld [vmem:[%s1478_s11 + $0x60] ss:$8 sps:$4 sm:$0xff]   ;;  %v1375_v44 = vld [vmem:[%s1478_s11 + $0x74] ss:$8 sps:$4 sm:$0xff]  }
  0x1a   : > { %v1371_v41 = vld [vmem:[%s1478_s11 + $0xe4] ss:$8 sps:$4 sm:$0xff]   ;;  %v1374_v43 = vld [vmem:[%s1478_s11 + $0xe0] ss:$8 sps:$4 sm:$0xff]   ;;  %v1377_v45 = vld [vmem:[%s1478_s11 + $0xf4] ss:$8 sps:$4 sm:$0xff]  }
  0x1b   : > { %v1379_v46 = vld [vmem:[%s1478_s11 + $0x70] ss:$8 sps:$4 sm:$0xff]  }
  0x1c   : > { %1176 = vmatpush3.bf16.msra.mxu0 %v1328_v13  ;;  %1290 = vmatpush3.bf16.msra.mxu1 %v1328_v13  ;;  %v1380_v47 = vld [vmem:[%s1478_s11 + $0xf0] ss:$8 sps:$4 sm:$0xff]  }
  0x1d   : > { %1177 = vmatprep.subr.bf16.mxu0 %v1329_v14  ;;  %1283 = vmatprep.subr.bf16.mxu1 %v1329_v14 }
  0x20   : > { %1178 = vmatpush3.bf16.msra.mxu0 %v1330_v15  ;;  %1291 = vmatpush3.bf16.msra.mxu1 %v1330_v15 }
  0x21   : > { %1179 = vmatprep.subr.bf16.mxu0 %v1331_v16  ;;  %1284 = vmatprep.subr.bf16.mxu1 %v1331_v16 }
  0x24   : > { %1180 = vmatpush3.bf16.msra.mxu0 %v1332_v17  ;;  %1292 = vmatpush3.bf16.msra.mxu1 %v1332_v17 }
  0x27   : > { %689 = vmatmul.mubr.bf16.vlgmr.msra.gmra.mrb[0].mxu0 %v1333_v18  ;;  %753 = vmatmul.mubr.bf16.vlgmr.msra.gmra.mrb[0].mxu1 %v1336_v19 }
  0x28   : > { %696 = vmatprep.mubr.bf16.mxu0 %v1339_v20  ;;  %760 = vmatprep.mubr.bf16.mxu1 %v1341_v21 }
  0x2f   : > { %697 = vmatmul.mubr.bf16.gmra.mrb[4].mxu0 %v1343_v22  ;;  %761 = vmatmul.mubr.bf16.gmra.mrb[4].mxu1 %v1344_v23 }
  0x30   : > { %704 = vmatprep.mubr.bf16.mxu0 %v1345_v24  ;;  %768 = vmatprep.mubr.bf16.mxu1 %v1347_v25 }
  0x37   : > { %705 = vmatmul.mubr.bf16.gmra.mrb[8].mxu0 %v1349_v26  ;;  %769 = vmatmul.mubr.bf16.gmra.mrb[8].mxu1 %v1350_v27 }
  0x38   : > { %712 = vmatprep.mubr.bf16.mxu0 %v1351_v28  ;;  %776 = vmatprep.mubr.bf16.mxu1 %v1353_v29 }
  0x3f   : > { %713 = vmatmul.mubr.bf16.gmra.mrb[12].mxu0 %v1355_v30  ;;  %777 = vmatmul.mubr.bf16.gmra.mrb[12].mxu1 %v1356_v31 }
  0x40   : > { %720 = vmatprep.mubr.bf16.mxu0 %v1357_v32  ;;  %784 = vmatprep.mubr.bf16.mxu1 %v1359_v33 }
  0x47   : > { %721 = vmatmul.mubr.bf16.gmra.mrb[16].mxu0 %v1361_v34  ;;  %785 = vmatmul.mubr.bf16.gmra.mrb[16].mxu1 %v1362_v35 }
  0x48   : > { %728 = vmatprep.mubr.bf16.mxu0 %v1363_v36  ;;  %792 = vmatprep.mubr.bf16.mxu1 %v1365_v37 }
  0x4f   : > { %729 = vmatmul.mubr.bf16.gmra.mrb[20].mxu0 %v1367_v38  ;;  %793 = vmatmul.mubr.bf16.gmra.mrb[20].mxu1 %v1368_v39 }
  0x50   : > { %736 = vmatprep.mubr.bf16.mxu0 %v1369_v40  ;;  %800 = vmatprep.mubr.bf16.mxu1 %v1371_v41 }
  0x57   : > { %737 = vmatmul.mubr.bf16.gmra.mrb[24].mxu0 %v1373_v42  ;;  %801 = vmatmul.mubr.bf16.gmra.mrb[24].mxu1 %v1374_v43 }
  0x58   : > { %744 = vmatprep.mubr.bf16.mxu0 %v1375_v44  ;;  %808 = vmatprep.mubr.bf16.mxu1 %v1377_v45 }
  0x5f   : > { %745 = vmatmul.mubr.bf16.gmra.mrb[28].mxu0 %v1379_v46  ;;  %809 = vmatmul.mubr.bf16.gmra.mrb[28].mxu1 %v1380_v47 }
  0xfa   : > { %v1181_v48 = vpop.f32.mrb[0].mxu0  ;;  %v1229_v49 = vpop.f32.mrb[0].mxu1 }
  0xfb   : > { %v1182_v50 = vpop.f32.mrb[1].mxu0  ;;  %v1230_v52 = vpop.f32.mrb[1].mxu1 }
  0xfc   : > { %v1183_v53 = vadd.f32 %v1182_v50, %v1181_v48  ;;  %v1231_v54 = vadd.f32 %v1230_v52, %v1229_v49  ;;  %v1184_v55 = vpop.f32.mrb[2].mxu0  ;;  %v1232_v56 = vpop.f32.mrb[2].mxu1 }
  0xfd   : > { %v1185_v57 = vpop.f32.mrb[3].mxu0  ;;  %v1233_v58 = vpop.f32.mrb[3].mxu1 }
  0xfe   : > { %v923_v59 = vadd.f32 %v1183_v53, %v1536_v51  ;;  %v939_v60 = vadd.f32 %v1231_v54, %v1536_v51  ;;  %v1186_v61 = vadd.f32 %v1185_v57, %v1184_v55  ;;  %v1234_v62 = vadd.f32 %v1233_v58, %v1232_v56 }
 0x100   : > { %955 = vst [vmem:[%s1543_s8] sm:$0xff] %v923_v59  ;;  %971 = vst [vmem:[%s1543_s8 + $0x80] sm:$0xff] %v939_v60  ;;  %v924_v63 = vadd.f32 %v1186_v61, %v1536_v51  ;;  %v940_v0 = vadd.f32 %v1234_v62, %v1536_v51 }
 0x102   : > { %956 = vst [vmem:[%s1543_s8 + $0x8] sm:$0xff] %v924_v63  ;;  %972 = vst [vmem:[%s1543_s8 + $0x88] sm:$0xff] %v940_v0  ;;  %v1187_v1 = vpop.f32.mrb[4].mxu0  ;;  %v1235_v2 = vpop.f32.mrb[4].mxu1 }
 0x103   : > { %v1188_v3 = vpop.f32.mrb[5].mxu0  ;;  %v1236_v4 = vpop.f32.mrb[5].mxu1 }
 0x104   : > { %v1189_v5 = vadd.f32 %v1188_v3, %v1187_v1  ;;  %v1237_v6 = vadd.f32 %v1236_v4, %v1235_v2  ;;  %v1190_v7 = vpop.f32.mrb[6].mxu0  ;;  %v1238_v8 = vpop.f32.mrb[6].mxu1 }
 0x105   : > { %v1191_v9 = vpop.f32.mrb[7].mxu0  ;;  %v1239_v10 = vpop.f32.mrb[7].mxu1 }
 0x106   : > { %v925_v11 = vadd.f32 %v1189_v5, %v1536_v51  ;;  %v941_v12 = vadd.f32 %v1237_v6, %v1536_v51  ;;  %v1192_v13 = vadd.f32 %v1191_v9, %v1190_v7  ;;  %v1240_v14 = vadd.f32 %v1239_v10, %v1238_v8 }
 0x108   : > { %957 = vst [vmem:[%s1543_s8 + $0x10] sm:$0xff] %v925_v11  ;;  %973 = vst [vmem:[%s1543_s8 + $0x90] sm:$0xff] %v941_v12  ;;  %v926_v15 = vadd.f32 %v1192_v13, %v1536_v51  ;;  %v942_v16 = vadd.f32 %v1240_v14, %v1536_v51 }
 0x10a   : > { %958 = vst [vmem:[%s1543_s8 + $0x18] sm:$0xff] %v926_v15  ;;  %974 = vst [vmem:[%s1543_s8 + $0x98] sm:$0xff] %v942_v16  ;;  %v1193_v17 = vpop.f32.mrb[8].mxu0  ;;  %v1241_v18 = vpop.f32.mrb[8].mxu1 }
 0x10b   : > { %v1194_v19 = vpop.f32.mrb[9].mxu0  ;;  %v1242_v20 = vpop.f32.mrb[9].mxu1 }
 0x10c   : > { %v1195_v21 = vadd.f32 %v1194_v19, %v1193_v17  ;;  %v1243_v22 = vadd.f32 %v1242_v20, %v1241_v18  ;;  %v1196_v23 = vpop.f32.mrb[10].mxu0  ;;  %v1244_v24 = vpop.f32.mrb[10].mxu1 }
 0x10d   : > { %v1197_v25 = vpop.f32.mrb[11].mxu0  ;;  %v1245_v26 = vpop.f32.mrb[11].mxu1 }
 0x10e   : > { %v927_v27 = vadd.f32 %v1195_v21, %v1536_v51  ;;  %v943_v28 = vadd.f32 %v1243_v22, %v1536_v51  ;;  %v1198_v29 = vadd.f32 %v1197_v25, %v1196_v23  ;;  %v1246_v30 = vadd.f32 %v1245_v26, %v1244_v24 }
 0x110   : > { %959 = vst [vmem:[%s1543_s8 + $0x20] sm:$0xff] %v927_v27  ;;  %975 = vst [vmem:[%s1543_s8 + $0xa0] sm:$0xff] %v943_v28  ;;  %v928_v31 = vadd.f32 %v1198_v29, %v1536_v51  ;;  %v944_v32 = vadd.f32 %v1246_v30, %v1536_v51 }
 0x112   : > { %960 = vst [vmem:[%s1543_s8 + $0x28] sm:$0xff] %v928_v31  ;;  %976 = vst [vmem:[%s1543_s8 + $0xa8] sm:$0xff] %v944_v32  ;;  %v1199_v33 = vpop.f32.mrb[12].mxu0  ;;  %v1247_v34 = vpop.f32.mrb[12].mxu1 }
 0x113   : > { %v1200_v35 = vpop.f32.mrb[13].mxu0  ;;  %v1248_v36 = vpop.f32.mrb[13].mxu1 }
 0x114   : > { %v1201_v37 = vadd.f32 %v1200_v35, %v1199_v33  ;;  %v1249_v38 = vadd.f32 %v1248_v36, %v1247_v34  ;;  %v1202_v39 = vpop.f32.mrb[14].mxu0  ;;  %v1250_v40 = vpop.f32.mrb[14].mxu1 }
 0x115   : > { %v1203_v41 = vpop.f32.mrb[15].mxu0  ;;  %v1251_v42 = vpop.f32.mrb[15].mxu1 }
 0x116   : > { %v929_v43 = vadd.f32 %v1201_v37, %v1536_v51  ;;  %v945_v44 = vadd.f32 %v1249_v38, %v1536_v51  ;;  %v1204_v45 = vadd.f32 %v1203_v41, %v1202_v39  ;;  %v1252_v46 = vadd.f32 %v1251_v42, %v1250_v40 }
 0x118   : > { %961 = vst [vmem:[%s1543_s8 + $0x30] sm:$0xff] %v929_v43  ;;  %977 = vst [vmem:[%s1543_s8 + $0xb0] sm:$0xff] %v945_v44  ;;  %v930_v47 = vadd.f32 %v1204_v45, %v1536_v51  ;;  %v946_v48 = vadd.f32 %v1252_v46, %v1536_v51 }
 0x11a   : > { %962 = vst [vmem:[%s1543_s8 + $0x38] sm:$0xff] %v930_v47  ;;  %978 = vst [vmem:[%s1543_s8 + $0xb8] sm:$0xff] %v946_v48  ;;  %v1205_v49 = vpop.f32.mrb[16].mxu0  ;;  %v1253_v50 = vpop.f32.mrb[16].mxu1 }
 0x11b   : > { %v1206_v52 = vpop.f32.mrb[17].mxu0  ;;  %v1254_v53 = vpop.f32.mrb[17].mxu1 }
 0x11c   : > { %v1207_v54 = vadd.f32 %v1206_v52, %v1205_v49  ;;  %v1255_v55 = vadd.f32 %v1254_v53, %v1253_v50  ;;  %v1208_v56 = vpop.f32.mrb[18].mxu0  ;;  %v1256_v57 = vpop.f32.mrb[18].mxu1 }
 0x11d   : > { %v1209_v58 = vpop.f32.mrb[19].mxu0  ;;  %v1257_v59 = vpop.f32.mrb[19].mxu1 }
 0x11e   : > { %v931_v60 = vadd.f32 %v1207_v54, %v1536_v51  ;;  %v947_v61 = vadd.f32 %v1255_v55, %v1536_v51  ;;  %v1210_v62 = vadd.f32 %v1209_v58, %v1208_v56  ;;  %v1258_v63 = vadd.f32 %v1257_v59, %v1256_v57 }
 0x120   : > { %963 = vst [vmem:[%s1543_s8 + $0x40] sm:$0xff] %v931_v60  ;;  %979 = vst [vmem:[%s1543_s8 + $0xc0] sm:$0xff] %v947_v61  ;;  %v932_v0 = vadd.f32 %v1210_v62, %v1536_v51  ;;  %v948_v1 = vadd.f32 %v1258_v63, %v1536_v51 }
 0x122   : > { %964 = vst [vmem:[%s1543_s8 + $0x48] sm:$0xff] %v932_v0  ;;  %980 = vst [vmem:[%s1543_s8 + $0xc8] sm:$0xff] %v948_v1  ;;  %v1211_v2 = vpop.f32.mrb[20].mxu0  ;;  %v1259_v3 = vpop.f32.mrb[20].mxu1 }
 0x123   : > { %v1212_v4 = vpop.f32.mrb[21].mxu0  ;;  %v1260_v5 = vpop.f32.mrb[21].mxu1 }
 0x124   : > { %v1213_v6 = vadd.f32 %v1212_v4, %v1211_v2  ;;  %v1261_v7 = vadd.f32 %v1260_v5, %v1259_v3  ;;  %v1214_v8 = vpop.f32.mrb[22].mxu0  ;;  %v1262_v9 = vpop.f32.mrb[22].mxu1 }
 0x125   : > { %v1215_v10 = vpop.f32.mrb[23].mxu0  ;;  %v1263_v11 = vpop.f32.mrb[23].mxu1 }
 0x126   : > { %v933_v12 = vadd.f32 %v1213_v6, %v1536_v51  ;;  %v949_v13 = vadd.f32 %v1261_v7, %v1536_v51  ;;  %v1216_v14 = vadd.f32 %v1215_v10, %v1214_v8  ;;  %v1264_v15 = vadd.f32 %v1263_v11, %v1262_v9 }
 0x128   : > { %965 = vst [vmem:[%s1543_s8 + $0x50] sm:$0xff] %v933_v12  ;;  %981 = vst [vmem:[%s1543_s8 + $0xd0] sm:$0xff] %v949_v13  ;;  %v934_v16 = vadd.f32 %v1216_v14, %v1536_v51  ;;  %v950_v17 = vadd.f32 %v1264_v15, %v1536_v51 }
 0x12a   : > { %966 = vst [vmem:[%s1543_s8 + $0x58] sm:$0xff] %v934_v16  ;;  %982 = vst [vmem:[%s1543_s8 + $0xd8] sm:$0xff] %v950_v17  ;;  %v1217_v18 = vpop.f32.mrb[24].mxu0  ;;  %v1265_v19 = vpop.f32.mrb[24].mxu1 }
 0x12b   : > { %v1218_v20 = vpop.f32.mrb[25].mxu0  ;;  %v1266_v21 = vpop.f32.mrb[25].mxu1 }
 0x12c   : > { %v1219_v22 = vadd.f32 %v1218_v20, %v1217_v18  ;;  %v1267_v23 = vadd.f32 %v1266_v21, %v1265_v19  ;;  %v1220_v24 = vpop.f32.mrb[26].mxu0  ;;  %v1268_v25 = vpop.f32.mrb[26].mxu1 }
 0x12d   : > { %v1221_v26 = vpop.f32.mrb[27].mxu0  ;;  %v1269_v27 = vpop.f32.mrb[27].mxu1 }
 0x12e   : > { %v935_v28 = vadd.f32 %v1219_v22, %v1536_v51  ;;  %v951_v29 = vadd.f32 %v1267_v23, %v1536_v51  ;;  %v1222_v30 = vadd.f32 %v1221_v26, %v1220_v24  ;;  %v1270_v31 = vadd.f32 %v1269_v27, %v1268_v25 }
 0x130   : > { %967 = vst [vmem:[%s1543_s8 + $0x60] sm:$0xff] %v935_v28  ;;  %983 = vst [vmem:[%s1543_s8 + $0xe0] sm:$0xff] %v951_v29  ;;  %v936_v32 = vadd.f32 %v1222_v30, %v1536_v51  ;;  %v952_v33 = vadd.f32 %v1270_v31, %v1536_v51 }
 0x132   : > { %968 = vst [vmem:[%s1543_s8 + $0x68] sm:$0xff] %v936_v32  ;;  %984 = vst [vmem:[%s1543_s8 + $0xe8] sm:$0xff] %v952_v33  ;;  %v1223_v34 = vpop.f32.mrb[28].mxu0  ;;  %v1271_v35 = vpop.f32.mrb[28].mxu1 }
 0x133   : > { %v1224_v36 = vpop.f32.mrb[29].mxu0  ;;  %v1272_v37 = vpop.f32.mrb[29].mxu1 }
 0x134   : > { %v1225_v38 = vadd.f32 %v1224_v36, %v1223_v34  ;;  %v1273_v39 = vadd.f32 %v1272_v37, %v1271_v35  ;;  %v1226_v40 = vpop.f32.mrb[30].mxu0  ;;  %v1274_v41 = vpop.f32.mrb[30].mxu1 }
 0x135   : > { %v1227_v42 = vpop.f32.mrb[31].mxu0  ;;  %v1275_v43 = vpop.f32.mrb[31].mxu1 }
 0x136   : > { %v937_v44 = vadd.f32 %v1225_v38, %v1536_v51  ;;  %v953_v45 = vadd.f32 %v1273_v39, %v1536_v51  ;;  %v1228_v46 = vadd.f32 %v1227_v42, %v1226_v40  ;;  %v1276_v47 = vadd.f32 %v1275_v43, %v1274_v41 }
 0x138   : > { %969 = vst [vmem:[%s1543_s8 + $0x70] sm:$0xff] %v937_v44  ;;  %985 = vst [vmem:[%s1543_s8 + $0xf0] sm:$0xff] %v953_v45  ;;  %v938_v48 = vadd.f32 %v1228_v46, %v1536_v51  ;;  %v954_v49 = vadd.f32 %v1276_v47, %v1536_v51 }
 0x13a   : > { %970 = vst [vmem:[%s1543_s8 + $0x78] sm:$0xff] %v938_v48  ;;  %986 = vst [vmem:[%s1543_s8 + $0xf8] sm:$0xff] %v954_v49 }
 0x13b PF: > { %s13_s14 = sadd.s32 1, %s1403_s14   ;;  %s1622_s12 = smov %s1399_s13 }
 0x13c   : > { %p10_p5 = scmp.ge.s32.totalorder %s13_s14, 4   ;;  %s1623_s13 = smov %s1625_s15 }
 0x13e   :  { %12 = sbr.rel (!%p10_p5) target bundleno = 2 (0x2), region = 76 }

// kernel: _lambda_.65
= control target key start
LH: loop header
LB: loop body
LE: loop exit
PB: predicated region body
PF: predicated region fallthrough
CT: control target
= control target key end

     0   :  { %vm540_vm0 = vcmask 519168   ;;  %s1345_s0 = inlined_call_operand.vmem [shape: f32[512,64], index: 0, kind: input, shape index: {}]   ;;  %s1346_s1 = inlined_call_operand.vmem [shape: f32[1,64], index: 1, kind: input, shape index: {}]   ;;  %s1347_s2 = inlined_call_operand.vmem [shape: f32[1,64], index: 2, kind: input, shape index: {}]   ;;  %s1348_s3 = inlined_call_operand.vmem [shape: bf16[512,64], index: 3, kind: output, shape index: {}]  }
   0x1   :  { %v14_v0 = vld [vmem:[%s1345_s0] sm:$0xff]  ;;  %v15_v4 = vld [vmem:[%s1345_s0 + $0x8] sm:$0xff]  ;;  %v16_v5 = vld [vmem:[%s1345_s0 + $0x10] sm:$0xff] }
   0x2   :  { %v765_v1 = vld [vmem:[%s1346_s1] ss:$0 sm:$0xff]  ;;  %v17_v6 = vld [vmem:[%s1345_s0 + $0x18] sm:$0xff]  ;;  %v19_v11 = vld [vmem:[%s1345_s0 + $0x28] sm:$0xff] }
   0x3   :  { %v770_v2 = vld [vmem:[%s1347_s2] ss:$0 sm:$0xff]  ;;  %v85_v3 = vmul.f32 %v765_v1, %v14_v0  ;;  %v86_v7 = vmul.f32 %v765_v1, %v15_v4  ;;  %v87_v8 = vmul.f32 %v765_v1, %v16_v5  ;;  %v88_v9 = vmul.f32 %v765_v1, %v17_v6  ;;  %v20_v12 = vld [vmem:[%s1345_s0 + $0x30] sm:$0xff]  ;;  %v21_v17 = vld [vmem:[%s1345_s0 + $0x38] sm:$0xff] }
   0x4   :  { %v18_v10 = vld [vmem:[%s1345_s0 + $0x20] sm:$0xff]  ;;  %v90_v15 = vmul.f32 %v765_v1, %v19_v11  ;;  %v91_v16 = vmul.f32 %v765_v1, %v20_v12  ;;  %v92_v21 = vmul.f32 %v765_v1, %v21_v17  ;;  %v23_v35 = vld [vmem:[%s1345_s0 + $0x48] sm:$0xff]  ;;  %v24_v36 = vld [vmem:[%s1345_s0 + $0x50] sm:$0xff] }
   0x5   :  { %v156_v13 = vadd.f32 %v770_v2, %v85_v3  ;;  %v89_v14 = vmul.f32 %v765_v1, %v18_v10  ;;  %v157_v18 = vadd.f32 %v770_v2, %v86_v7  ;;  %v158_v19 = vadd.f32 %v770_v2, %v87_v8  ;;  %v22_v30 = vld [vmem:[%s1345_s0 + $0x40] sm:$0xff]  ;;  %v25_v37 = vld [vmem:[%s1345_s0 + $0x58] sm:$0xff]  ;;  %v27_v43 = vld [vmem:[%s1345_s0 + $0x68] sm:$0xff] }
   0x6   :  { %v159_v20 = vadd.f32 %v770_v2, %v88_v9  ;;  %v161_v24 = vadd.f32 %v770_v2, %v90_v15  ;;  %v162_v25 = vadd.f32 %v770_v2, %v91_v16  ;;  %v163_v29 = vadd.f32 %v770_v2, %v92_v21  ;;  %v26_v42 = vld [vmem:[%s1345_s0 + $0x60] sm:$0xff]  ;;  %v28_v44 = vld [vmem:[%s1345_s0 + $0x70] sm:$0xff]  ;;  %v29_v49 = vld [vmem:[%s1345_s0 + $0x78] sm:$0xff] }
   0x7   :  { %v220_v22 = vmax.f32 %v156_v13, 0.0  ;;  %v160_v23 = vadd.f32 %v770_v2, %v89_v14  ;;  %v221_v26 = vmax.f32 %v157_v18, 0.0  ;;  %v222_v27 = vmax.f32 %v158_v19, 0.0  ;;  %v30_v8 = vld [vmem:[%s1345_s0 + $0x80] sm:$0xff]  ;;  %v31_v13 = vld [vmem:[%s1345_s0 + $0x88] sm:$0xff]  ;;  %v32_v14 = vld [vmem:[%s1345_s0 + $0x90] sm:$0xff] }
   0x8   :  { %v223_v28 = vmax.f32 %v159_v20, 0.0  ;;  %v225_v33 = vmax.f32 %v161_v24, 0.0  ;;  %v226_v34 = vmax.f32 %v162_v25, 0.0  ;;  %v227_v41 = vmax.f32 %v163_v29, 0.0  ;;  %v33_v15 = vld [vmem:[%s1345_s0 + $0x98] sm:$0xff]  ;;  %v34_v20 = vld [vmem:[%s1345_s0 + $0xa0] sm:$0xff] }
   0x9   :  { %v675_v31 = vpack.c.bf16 %v220_v22, %v220_v22  ;;  %v224_v32 = vmax.f32 %v160_v23, 0.0  ;;  %v676_v38 = vpack.c.bf16 %v221_v26, %v221_v26  ;;  %v677_v39 = vpack.c.bf16 %v222_v27, %v222_v27  ;;  %v35_v21 = vld [vmem:[%s1345_s0 + $0xa8] sm:$0xff]  ;;  %v36_v22 = vld [vmem:[%s1345_s0 + $0xb0] sm:$0xff]  ;;  %v37_v27 = vld [vmem:[%s1345_s0 + $0xb8] sm:$0xff] }
   0xa   :  { %v678_v40 = vpack.c.bf16 %v223_v28, %v223_v28  ;;  %v680_v46 = vpack.c.bf16 %v225_v33, %v225_v33  ;;  %v681_v47 = vpack.c.bf16 %v226_v34, %v226_v34  ;;  %v93_v48 = vmul.f32 %v765_v1, %v22_v30 }
   0xb   :  { %541 = vst.msk [vmem:[%s1348_s3] sm:$0xf] %vm540_vm0, %v675_v31  ;;  %v679_v45 = vpack.c.bf16 %v224_v32, %v224_v32  ;;  %542 = vst.msk [vmem:[%s1348_s3 + $0x4] sm:$0xf] %vm540_vm0, %v676_v38  ;;  %v682_v50 = vpack.c.bf16 %v227_v41, %v227_v41  ;;  %v94_v51 = vmul.f32 %v765_v1, %v23_v35 }
   0xc   :  { %543 = vst.msk [vmem:[%s1348_s3 + $0x8] sm:$0xf] %vm540_vm0, %v677_v39  ;;  %544 = vst.msk [vmem:[%s1348_s3 + $0xc] sm:$0xf] %vm540_vm0, %v678_v40  ;;  %v95_v52 = vmul.f32 %v765_v1, %v24_v36  ;;  %v96_v53 = vmul.f32 %v765_v1, %v25_v37  ;;  %v164_v54 = vadd.f32 %v770_v2, %v93_v48  ;;  %v38_v48 = vld [vmem:[%s1345_s0 + $0xc0] sm:$0xff] }
   0xd   :  { %545 = vst.msk [vmem:[%s1348_s3 + $0x10] sm:$0xf] %vm540_vm0, %v679_v45  ;;  %546 = vst.msk [vmem:[%s1348_s3 + $0x14] sm:$0xf] %vm540_vm0, %v680_v46  ;;  %v97_v55 = vmul.f32 %v765_v1, %v26_v42  ;;  %v98_v56 = vmul.f32 %v765_v1, %v27_v43  ;;  %v99_v57 = vmul.f32 %v765_v1, %v28_v44 }
   0xe   :  { %547 = vst.msk [vmem:[%s1348_s3 + $0x18] sm:$0xf] %vm540_vm0, %v681_v47  ;;  %548 = vst.msk [vmem:[%s1348_s3 + $0x1c] sm:$0xf] %vm540_vm0, %v682_v50  ;;  %v165_v58 = vadd.f32 %v770_v2, %v94_v51  ;;  %v166_v59 = vadd.f32 %v770_v2, %v95_v52  ;;  %v167_v60 = vadd.f32 %v770_v2, %v96_v53  ;;  %v228_v62 = vmax.f32 %v164_v54, 0.0  ;;  %v39_v53 = vld [vmem:[%s1345_s0 + $0xc8] sm:$0xff] }
   0xf   :  { %v100_v61 = vmul.f32 %v765_v1, %v29_v49  ;;  %v168_v63 = vadd.f32 %v770_v2, %v97_v55  ;;  %v169_v0 = vadd.f32 %v770_v2, %v98_v56  ;;  %v170_v3 = vadd.f32 %v770_v2, %v99_v57  ;;  %v40_v54 = vld [vmem:[%s1345_s0 + $0xd0] sm:$0xff]  ;;  %v41_v55 = vld [vmem:[%s1345_s0 + $0xd8] sm:$0xff] }
  0x10   :  { %v229_v4 = vmax.f32 %v165_v58, 0.0  ;;  %v230_v5 = vmax.f32 %v166_v59, 0.0  ;;  %v231_v6 = vmax.f32 %v167_v60, 0.0  ;;  %v683_v9 = vpack.c.bf16 %v228_v62, %v228_v62  ;;  %v42_v60 = vld [vmem:[%s1345_s0 + $0xe0] sm:$0xff]  ;;  %v44_v62 = vld [vmem:[%s1345_s0 + $0xf0] sm:$0xff] }
  0x11   :  { %v171_v7 = vadd.f32 %v770_v2, %v100_v61  ;;  %v232_v10 = vmax.f32 %v168_v63, 0.0  ;;  %v233_v11 = vmax.f32 %v169_v0, 0.0  ;;  %v234_v12 = vmax.f32 %v170_v3, 0.0  ;;  %v43_v61 = vld [vmem:[%s1345_s0 + $0xe8] sm:$0xff] }
  0x12   :  { %v684_v16 = vpack.c.bf16 %v229_v4, %v229_v4  ;;  %v685_v17 = vpack.c.bf16 %v230_v5, %v230_v5  ;;  %v686_v18 = vpack.c.bf16 %v231_v6, %v231_v6  ;;  %549 = vst.msk [vmem:[%s1348_s3 + $0x20] sm:$0xf] %vm540_vm0, %v683_v9  ;;  %v101_v26 = vmul.f32 %v765_v1, %v30_v8  ;;  %v45_v5 = vld [vmem:[%s1345_s0 + $0xf8] sm:$0xff] }
  0x13   :  { %v235_v19 = vmax.f32 %v171_v7, 0.0  ;;  %v687_v23 = vpack.c.bf16 %v232_v10, %v232_v10  ;;  %v688_v24 = vpack.c.bf16 %v233_v11, %v233_v11  ;;  %v689_v25 = vpack.c.bf16 %v234_v12, %v234_v12 }
  0x14   :  { %550 = vst.msk [vmem:[%s1348_s3 + $0x24] sm:$0xf] %vm540_vm0, %v684_v16  ;;  %551 = vst.msk [vmem:[%s1348_s3 + $0x28] sm:$0xf] %vm540_vm0, %v685_v17  ;;  %v102_v29 = vmul.f32 %v765_v1, %v31_v13  ;;  %v103_v30 = vmul.f32 %v765_v1, %v32_v14  ;;  %v104_v31 = vmul.f32 %v765_v1, %v33_v15 }
  0x15   :  { %552 = vst.msk [vmem:[%s1348_s3 + $0x2c] sm:$0xf] %vm540_vm0, %v686_v18  ;;  %v690_v28 = vpack.c.bf16 %v235_v19, %v235_v19  ;;  %553 = vst.msk [vmem:[%s1348_s3 + $0x30] sm:$0xf] %vm540_vm0, %v687_v23  ;;  %v172_v32 = vadd.f32 %v770_v2, %v101_v26  ;;  %v105_v33 = vmul.f32 %v765_v1, %v34_v20  ;;  %v46_v26 = vld [vmem:[%s1345_s0 + $0x100] sm:$0xff] }
  0x16   :  { %554 = vst.msk [vmem:[%s1348_s3 + $0x34] sm:$0xf] %vm540_vm0, %v688_v24  ;;  %555 = vst.msk [vmem:[%s1348_s3 + $0x38] sm:$0xf] %vm540_vm0, %v689_v25  ;;  %v106_v34 = vmul.f32 %v765_v1, %v35_v21  ;;  %v107_v35 = vmul.f32 %v765_v1, %v36_v22  ;;  %v173_v36 = vadd.f32 %v770_v2, %v102_v29 }
  0x17   :  { %556 = vst.msk [vmem:[%s1348_s3 + $0x3c] sm:$0xf] %vm540_vm0, %v690_v28  ;;  %v174_v37 = vadd.f32 %v770_v2, %v103_v30  ;;  %v175_v38 = vadd.f32 %v770_v2, %v104_v31  ;;  %v108_v39 = vmul.f32 %v765_v1, %v37_v27  ;;  %v236_v40 = vmax.f32 %v172_v32, 0.0  ;;  %v47_v31 = vld [vmem:[%s1345_s0 + $0x108] sm:$0xff]  ;;  %v48_v32 = vld [vmem:[%s1345_s0 + $0x110] sm:$0xff] }
  0x18   :  { %v176_v41 = vadd.f32 %v770_v2, %v105_v33  ;;  %v177_v42 = vadd.f32 %v770_v2, %v106_v34  ;;  %v178_v43 = vadd.f32 %v770_v2, %v107_v35  ;;  %v237_v44 = vmax.f32 %v173_v36, 0.0  ;;  %v49_v33 = vld [vmem:[%s1345_s0 + $0x118] sm:$0xff] }
  0x19   :  { %v238_v45 = vmax.f32 %v174_v37, 0.0  ;;  %v239_v46 = vmax.f32 %v175_v38, 0.0  ;;  %v179_v47 = vadd.f32 %v770_v2, %v108_v39  ;;  %v691_v49 = vpack.c.bf16 %v236_v40, %v236_v40  ;;  %v50_v38 = vld [vmem:[%s1345_s0 + $0x120] sm:$0xff]  ;;  %v51_v39 = vld [vmem:[%s1345_s0 + $0x128] sm:$0xff]  ;;  %v52_v40 = vld [vmem:[%s1345_s0 + $0x130] sm:$0xff] }
  0x1a   :  { %v240_v50 = vmax.f32 %v176_v41, 0.0  ;;  %v241_v51 = vmax.f32 %v177_v42, 0.0  ;;  %v242_v52 = vmax.f32 %v178_v43, 0.0  ;;  %v692_v56 = vpack.c.bf16 %v237_v44, %v237_v44 }
  0x1b   :  { %v693_v57 = vpack.c.bf16 %v238_v45, %v238_v45  ;;  %v694_v58 = vpack.c.bf16 %v239_v46, %v239_v46  ;;  %v243_v59 = vmax.f32 %v179_v47, 0.0  ;;  %557 = vst.msk [vmem:[%s1348_s3 + $0x40] sm:$0xf] %vm540_vm0, %v691_v49  ;;  %v109_v4 = vmul.f32 %v765_v1, %v38_v48  ;;  %v53_v45 = vld [vmem:[%s1345_s0 + $0x138] sm:$0xff] }
  0x1c   :  { %v695_v63 = vpack.c.bf16 %v240_v50, %v240_v50  ;;  %v696_v0 = vpack.c.bf16 %v241_v51, %v241_v51  ;;  %v697_v3 = vpack.c.bf16 %v242_v52, %v242_v52  ;;  %558 = vst.msk [vmem:[%s1348_s3 + $0x44] sm:$0xf] %vm540_vm0, %v692_v56  ;;  %v110_v7 = vmul.f32 %v765_v1, %v39_v53 }
  0x1d   :  { %559 = vst.msk [vmem:[%s1348_s3 + $0x48] sm:$0xf] %vm540_vm0, %v693_v57  ;;  %560 = vst.msk [vmem:[%s1348_s3 + $0x4c] sm:$0xf] %vm540_vm0, %v694_v58  ;;  %v698_v6 = vpack.c.bf16 %v243_v59, %v243_v59  ;;  %v111_v8 = vmul.f32 %v765_v1, %v40_v54  ;;  %v112_v9 = vmul.f32 %v765_v1, %v41_v55 }
  0x1e   :  { %561 = vst.msk [vmem:[%s1348_s3 + $0x50] sm:$0xf] %vm540_vm0, %v695_v63  ;;  %562 = vst.msk [vmem:[%s1348_s3 + $0x54] sm:$0xf] %vm540_vm0, %v696_v0  ;;  %v180_v10 = vadd.f32 %v770_v2, %v109_v4  ;;  %v113_v11 = vmul.f32 %v765_v1, %v42_v60  ;;  %v114_v12 = vmul.f32 %v765_v1, %v43_v61  ;;  %v54_v4 = vld [vmem:[%s1345_s0 + $0x140] sm:$0xff] }
  0x1f   :  { %563 = vst.msk [vmem:[%s1348_s3 + $0x58] sm:$0xf] %vm540_vm0, %v697_v3  ;;  %v115_v13 = vmul.f32 %v765_v1, %v44_v62  ;;  %564 = vst.msk [vmem:[%s1348_s3 + $0x5c] sm:$0xf] %vm540_vm0, %v698_v6  ;;  %v181_v14 = vadd.f32 %v770_v2, %v110_v7  ;;  %v182_v15 = vadd.f32 %v770_v2, %v111_v8 }
  0x20   :  { %v183_v16 = vadd.f32 %v770_v2, %v112_v9  ;;  %v116_v17 = vmul.f32 %v765_v1, %v45_v5  ;;  %v244_v18 = vmax.f32 %v180_v10, 0.0  ;;  %v184_v19 = vadd.f32 %v770_v2, %v113_v11  ;;  %v55_v9 = vld [vmem:[%s1345_s0 + $0x148] sm:$0xff]  ;;  %v56_v10 = vld [vmem:[%s1345_s0 + $0x150] sm:$0xff]  ;;  %v57_v11 = vld [vmem:[%s1345_s0 + $0x158] sm:$0xff] }
  0x21   :  { %v185_v20 = vadd.f32 %v770_v2, %v114_v12  ;;  %v186_v21 = vadd.f32 %v770_v2, %v115_v13  ;;  %v245_v22 = vmax.f32 %v181_v14, 0.0  ;;  %v246_v23 = vmax.f32 %v182_v15, 0.0 }
  0x22   :  { %v247_v24 = vmax.f32 %v183_v16, 0.0  ;;  %v187_v25 = vadd.f32 %v770_v2, %v116_v17  ;;  %v699_v27 = vpack.c.bf16 %v244_v18, %v244_v18  ;;  %v248_v28 = vmax.f32 %v184_v19, 0.0  ;;  %v58_v16 = vld [vmem:[%s1345_s0 + $0x160] sm:$0xff]  ;;  %v59_v17 = vld [vmem:[%s1345_s0 + $0x168] sm:$0xff]  ;;  %v60_v18 = vld [vmem:[%s1345_s0 + $0x170] sm:$0xff] }
  0x23   :  { %v249_v29 = vmax.f32 %v185_v20, 0.0  ;;  %v250_v30 = vmax.f32 %v186_v21, 0.0  ;;  %v700_v34 = vpack.c.bf16 %v245_v22, %v245_v22  ;;  %v701_v35 = vpack.c.bf16 %v246_v23, %v246_v23  ;;  %v61_v23 = vld [vmem:[%s1345_s0 + $0x178] sm:$0xff] }
  0x24   :  { %v702_v36 = vpack.c.bf16 %v247_v24, %v247_v24  ;;  %v251_v37 = vmax.f32 %v187_v25, 0.0  ;;  %565 = vst.msk [vmem:[%s1348_s3 + $0x60] sm:$0xf] %vm540_vm0, %v699_v27  ;;  %v703_v41 = vpack.c.bf16 %v248_v28, %v248_v28  ;;  %v117_v44 = vmul.f32 %v765_v1, %v46_v26 }
  0x25   :  { %v704_v42 = vpack.c.bf16 %v249_v29, %v249_v29  ;;  %v705_v43 = vpack.c.bf16 %v250_v30, %v250_v30  ;;  %566 = vst.msk [vmem:[%s1348_s3 + $0x64] sm:$0xf] %vm540_vm0, %v700_v34  ;;  %567 = vst.msk [vmem:[%s1348_s3 + $0x68] sm:$0xf] %vm540_vm0, %v701_v35  ;;  %v118_v47 = vmul.f32 %v765_v1, %v47_v31 }
  0x26   :  { %568 = vst.msk [vmem:[%s1348_s3 + $0x6c] sm:$0xf] %vm540_vm0, %v702_v36  ;;  %v706_v46 = vpack.c.bf16 %v251_v37, %v251_v37  ;;  %v119_v48 = vmul.f32 %v765_v1, %v48_v32  ;;  %v120_v49 = vmul.f32 %v765_v1, %v49_v33  ;;  %569 = vst.msk [vmem:[%s1348_s3 + $0x70] sm:$0xf] %vm540_vm0, %v703_v41 }
  0x27   :  { %570 = vst.msk [vmem:[%s1348_s3 + $0x74] sm:$0xf] %vm540_vm0, %v704_v42  ;;  %571 = vst.msk [vmem:[%s1348_s3 + $0x78] sm:$0xf] %vm540_vm0, %v705_v43  ;;  %v188_v50 = vadd.f32 %v770_v2, %v117_v44  ;;  %v121_v51 = vmul.f32 %v765_v1, %v50_v38  ;;  %v122_v52 = vmul.f32 %v765_v1, %v51_v39  ;;  %v62_v44 = vld [vmem:[%s1345_s0 + $0x180] sm:$0xff] }
  0x28   :  { %v123_v53 = vmul.f32 %v765_v1, %v52_v40  ;;  %572 = vst.msk [vmem:[%s1348_s3 + $0x7c] sm:$0xf] %vm540_vm0, %v706_v46  ;;  %v189_v54 = vadd.f32 %v770_v2, %v118_v47  ;;  %v190_v55 = vadd.f32 %v770_v2, %v119_v48  ;;  %v191_v56 = vadd.f32 %v770_v2, %v120_v49  ;;  %v63_v49 = vld [vmem:[%s1345_s0 + $0x188] sm:$0xff] }
  0x29   :  { %v124_v57 = vmul.f32 %v765_v1, %v53_v45  ;;  %v252_v58 = vmax.f32 %v188_v50, 0.0  ;;  %v192_v59 = vadd.f32 %v770_v2, %v121_v51  ;;  %v193_v60 = vadd.f32 %v770_v2, %v122_v52  ;;  %v64_v50 = vld [vmem:[%s1345_s0 + $0x190] sm:$0xff]  ;;  %v65_v51 = vld [vmem:[%s1345_s0 + $0x198] sm:$0xff] }
  0x2a   :  { %v194_v61 = vadd.f32 %v770_v2, %v123_v53  ;;  %v253_v62 = vmax.f32 %v189_v54, 0.0  ;;  %v254_v63 = vmax.f32 %v190_v55, 0.0  ;;  %v255_v0 = vmax.f32 %v191_v56, 0.0  ;;  %v66_v56 = vld [vmem:[%s1345_s0 + $0x1a0] sm:$0xff] }
  0x2b   :  { %v195_v3 = vadd.f32 %v770_v2, %v124_v57  ;;  %v707_v5 = vpack.c.bf16 %v252_v58, %v252_v58  ;;  %v256_v6 = vmax.f32 %v192_v59, 0.0  ;;  %v257_v7 = vmax.f32 %v193_v60, 0.0  ;;  %v67_v57 = vld [vmem:[%s1345_s0 + $0x1a8] sm:$0xff]  ;;  %v68_v58 = vld [vmem:[%s1345_s0 + $0x1b0] sm:$0xff] }
  0x2c   :  { %v258_v8 = vmax.f32 %v194_v61, 0.0  ;;  %v708_v12 = vpack.c.bf16 %v253_v62, %v253_v62  ;;  %v709_v13 = vpack.c.bf16 %v254_v63, %v254_v63  ;;  %v710_v14 = vpack.c.bf16 %v255_v0, %v255_v0  ;;  %v69_v63 = vld [vmem:[%s1345_s0 + $0x1b8] sm:$0xff] }
  0x2d   :  { %v259_v15 = vmax.f32 %v195_v3, 0.0  ;;  %573 = vst.msk [vmem:[%s1348_s3 + $0x80] sm:$0xf] %vm540_vm0, %v707_v5  ;;  %v711_v19 = vpack.c.bf16 %v256_v6, %v256_v6  ;;  %v712_v20 = vpack.c.bf16 %v257_v7, %v257_v7  ;;  %v125_v22 = vmul.f32 %v765_v1, %v54_v4 }
  0x2e   :  { %v713_v21 = vpack.c.bf16 %v258_v8, %v258_v8  ;;  %574 = vst.msk [vmem:[%s1348_s3 + $0x84] sm:$0xf] %vm540_vm0, %v708_v12  ;;  %575 = vst.msk [vmem:[%s1348_s3 + $0x88] sm:$0xf] %vm540_vm0, %v709_v13  ;;  %v126_v25 = vmul.f32 %v765_v1, %v55_v9  ;;  %v127_v26 = vmul.f32 %v765_v1, %v56_v10 }
  0x2f   :  { %576 = vst.msk [vmem:[%s1348_s3 + $0x8c] sm:$0xf] %vm540_vm0, %v710_v14  ;;  %v714_v24 = vpack.c.bf16 %v259_v15, %v259_v15  ;;  %v128_v27 = vmul.f32 %v765_v1, %v57_v11  ;;  %577 = vst.msk [vmem:[%s1348_s3 + $0x90] sm:$0xf] %vm540_vm0, %v711_v19  ;;  %v196_v28 = vadd.f32 %v770_v2, %v125_v22  ;;  %v70_v22 = vld [vmem:[%s1345_s0 + $0x1c0] sm:$0xff] }
  0x30   :  { %578 = vst.msk [vmem:[%s1348_s3 + $0x94] sm:$0xf] %vm540_vm0, %v712_v20  ;;  %579 = vst.msk [vmem:[%s1348_s3 + $0x98] sm:$0xf] %vm540_vm0, %v713_v21  ;;  %v129_v29 = vmul.f32 %v765_v1, %v58_v16  ;;  %v130_v30 = vmul.f32 %v765_v1, %v59_v17  ;;  %v131_v31 = vmul.f32 %v765_v1, %v60_v18 }
  0x31   :  { %580 = vst.msk [vmem:[%s1348_s3 + $0x9c] sm:$0xf] %vm540_vm0, %v714_v24  ;;  %v197_v32 = vadd.f32 %v770_v2, %v126_v25  ;;  %v198_v33 = vadd.f32 %v770_v2, %v127_v26  ;;  %v199_v34 = vadd.f32 %v770_v2, %v128_v27  ;;  %v132_v35 = vmul.f32 %v765_v1, %v61_v23  ;;  %v71_v27 = vld [vmem:[%s1345_s0 + $0x1c8] sm:$0xff] }
  0x32   :  { %v260_v36 = vmax.f32 %v196_v28, 0.0  ;;  %v200_v37 = vadd.f32 %v770_v2, %v129_v29  ;;  %v201_v38 = vadd.f32 %v770_v2, %v130_v30  ;;  %v202_v39 = vadd.f32 %v770_v2, %v131_v31  ;;  %v72_v28 = vld [vmem:[%s1345_s0 + $0x1d0] sm:$0xff]  ;;  %v73_v29 = vld [vmem:[%s1345_s0 + $0x1d8] sm:$0xff] }
  0x33   :  { %v261_v40 = vmax.f32 %v197_v32, 0.0  ;;  %v262_v41 = vmax.f32 %v198_v33, 0.0  ;;  %v263_v42 = vmax.f32 %v199_v34, 0.0  ;;  %v203_v43 = vadd.f32 %v770_v2, %v132_v35  ;;  %v74_v34 = vld [vmem:[%s1345_s0 + $0x1e0] sm:$0xff]  ;;  %v75_v35 = vld [vmem:[%s1345_s0 + $0x1e8] sm:$0xff] }
  0x34   :  { %v715_v45 = vpack.c.bf16 %v260_v36, %v260_v36  ;;  %v264_v46 = vmax.f32 %v200_v37, 0.0  ;;  %v265_v47 = vmax.f32 %v201_v38, 0.0  ;;  %v266_v48 = vmax.f32 %v202_v39, 0.0  ;;  %v76_v36 = vld [vmem:[%s1345_s0 + $0x1f0] sm:$0xff] }
  0x35   :  { %v716_v52 = vpack.c.bf16 %v261_v40, %v261_v40  ;;  %v717_v53 = vpack.c.bf16 %v262_v41, %v262_v41  ;;  %v718_v54 = vpack.c.bf16 %v263_v42, %v263_v42  ;;  %v267_v55 = vmax.f32 %v203_v43, 0.0  ;;  %v77_v41 = vld [vmem:[%s1345_s0 + $0x1f8] sm:$0xff] }
  0x36   :  { %581 = vst.msk [vmem:[%s1348_s3 + $0xa0] sm:$0xf] %vm540_vm0, %v715_v45  ;;  %v719_v59 = vpack.c.bf16 %v264_v46, %v264_v46  ;;  %v720_v60 = vpack.c.bf16 %v265_v47, %v265_v47  ;;  %v721_v61 = vpack.c.bf16 %v266_v48, %v266_v48  ;;  %v133_v62 = vmul.f32 %v765_v1, %v62_v44 }
  0x37   :  { %582 = vst.msk [vmem:[%s1348_s3 + $0xa4] sm:$0xf] %vm540_vm0, %v716_v52  ;;  %583 = vst.msk [vmem:[%s1348_s3 + $0xa8] sm:$0xf] %vm540_vm0, %v717_v53  ;;  %v722_v0 = vpack.c.bf16 %v267_v55, %v267_v55  ;;  %v134_v3 = vmul.f32 %v765_v1, %v63_v49  ;;  %v135_v4 = vmul.f32 %v765_v1, %v64_v50 }
  0x38   :  { %584 = vst.msk [vmem:[%s1348_s3 + $0xac] sm:$0xf] %vm540_vm0, %v718_v54  ;;  %v136_v5 = vmul.f32 %v765_v1, %v65_v51  ;;  %585 = vst.msk [vmem:[%s1348_s3 + $0xb0] sm:$0xf] %vm540_vm0, %v719_v59  ;;  %v204_v6 = vadd.f32 %v770_v2, %v133_v62  ;;  %v137_v7 = vmul.f32 %v765_v1, %v66_v56 }
  0x39   :  { %586 = vst.msk [vmem:[%s1348_s3 + $0xb4] sm:$0xf] %vm540_vm0, %v720_v60  ;;  %587 = vst.msk [vmem:[%s1348_s3 + $0xb8] sm:$0xf] %vm540_vm0, %v721_v61  ;;  %v138_v8 = vmul.f32 %v765_v1, %v67_v57  ;;  %v139_v9 = vmul.f32 %v765_v1, %v68_v58  ;;  %v205_v10 = vadd.f32 %v770_v2, %v134_v3 }
  0x3a   :  { %588 = vst.msk [vmem:[%s1348_s3 + $0xbc] sm:$0xf] %vm540_vm0, %v722_v0  ;;  %v206_v11 = vadd.f32 %v770_v2, %v135_v4  ;;  %v207_v12 = vadd.f32 %v770_v2, %v136_v5  ;;  %v140_v13 = vmul.f32 %v765_v1, %v69_v63  ;;  %v268_v14 = vmax.f32 %v204_v6, 0.0 }
  0x3b   :  { %v208_v15 = vadd.f32 %v770_v2, %v137_v7  ;;  %v209_v16 = vadd.f32 %v770_v2, %v138_v8  ;;  %v210_v17 = vadd.f32 %v770_v2, %v139_v9  ;;  %v269_v18 = vmax.f32 %v205_v10, 0.0 }
  0x3c   :  { %v270_v19 = vmax.f32 %v206_v11, 0.0  ;;  %v271_v20 = vmax.f32 %v207_v12, 0.0  ;;  %v211_v21 = vadd.f32 %v770_v2, %v140_v13  ;;  %v723_v23 = vpack.c.bf16 %v268_v14, %v268_v14 }
  0x3d   :  { %v272_v24 = vmax.f32 %v208_v15, 0.0  ;;  %v273_v25 = vmax.f32 %v209_v16, 0.0  ;;  %v274_v26 = vmax.f32 %v210_v17, 0.0  ;;  %v724_v30 = vpack.c.bf16 %v269_v18, %v269_v18 }
  0x3e   :  { %v725_v31 = vpack.c.bf16 %v270_v19, %v270_v19  ;;  %v726_v32 = vpack.c.bf16 %v271_v20, %v271_v20  ;;  %v275_v33 = vmax.f32 %v211_v21, 0.0  ;;  %589 = vst.msk [vmem:[%s1348_s3 + $0xc0] sm:$0xf] %vm540_vm0, %v723_v23  ;;  %v141_v40 = vmul.f32 %v765_v1, %v70_v22 }
  0x3f   :  { %v727_v37 = vpack.c.bf16 %v272_v24, %v272_v24  ;;  %v728_v38 = vpack.c.bf16 %v273_v25, %v273_v25  ;;  %v729_v39 = vpack.c.bf16 %v274_v26, %v274_v26  ;;  %590 = vst.msk [vmem:[%s1348_s3 + $0xc4] sm:$0xf] %vm540_vm0, %v724_v30  ;;  %v142_v43 = vmul.f32 %v765_v1, %v71_v27 }
  0x40   :  { %591 = vst.msk [vmem:[%s1348_s3 + $0xc8] sm:$0xf] %vm540_vm0, %v725_v31  ;;  %592 = vst.msk [vmem:[%s1348_s3 + $0xcc] sm:$0xf] %vm540_vm0, %v726_v32  ;;  %v730_v42 = vpack.c.bf16 %v275_v33, %v275_v33  ;;  %v143_v44 = vmul.f32 %v765_v1, %v72_v28  ;;  %v144_v45 = vmul.f32 %v765_v1, %v73_v29 }
  0x41   :  { %593 = vst.msk [vmem:[%s1348_s3 + $0xd0] sm:$0xf] %vm540_vm0, %v727_v37  ;;  %594 = vst.msk [vmem:[%s1348_s3 + $0xd4] sm:$0xf] %vm540_vm0, %v728_v38  ;;  %v212_v46 = vadd.f32 %v770_v2, %v141_v40  ;;  %v145_v47 = vmul.f32 %v765_v1, %v74_v34  ;;  %v146_v48 = vmul.f32 %v765_v1, %v75_v35 }
  0x42   :  { %595 = vst.msk [vmem:[%s1348_s3 + $0xd8] sm:$0xf] %vm540_vm0, %v729_v39  ;;  %v147_v49 = vmul.f32 %v765_v1, %v76_v36  ;;  %596 = vst.msk [vmem:[%s1348_s3 + $0xdc] sm:$0xf] %vm540_vm0, %v730_v42  ;;  %v213_v50 = vadd.f32 %v770_v2, %v142_v43  ;;  %v214_v51 = vadd.f32 %v770_v2, %v143_v44 }
  0x43   :  { %v215_v52 = vadd.f32 %v770_v2, %v144_v45  ;;  %v148_v53 = vmul.f32 %v765_v1, %v77_v41  ;;  %v276_v54 = vmax.f32 %v212_v46, 0.0  ;;  %v216_v55 = vadd.f32 %v770_v2, %v145_v47 }
  0x44   :  { %v217_v56 = vadd.f32 %v770_v2, %v146_v48  ;;  %v218_v57 = vadd.f32 %v770_v2, %v147_v49  ;;  %v277_v58 = vmax.f32 %v213_v50, 0.0  ;;  %v278_v59 = vmax.f32 %v214_v51, 0.0 }
  0x45   :  { %v279_v60 = vmax.f32 %v215_v52, 0.0  ;;  %v219_v61 = vadd.f32 %v770_v2, %v148_v53  ;;  %v731_v62 = vpack.c.bf16 %v276_v54, %v276_v54  ;;  %v280_v63 = vmax.f32 %v216_v55, 0.0 }
  0x46   :  { %v281_v0 = vmax.f32 %v217_v56, 0.0  ;;  %v282_v3 = vmax.f32 %v218_v57, 0.0  ;;  %v732_v4 = vpack.c.bf16 %v277_v58, %v277_v58  ;;  %v733_v5 = vpack.c.bf16 %v278_v59, %v278_v59 }
  0x47   :  { %v734_v6 = vpack.c.bf16 %v279_v60, %v279_v60  ;;  %v283_v1 = vmax.f32 %v219_v61, 0.0  ;;  %597 = vst.msk [vmem:[%s1348_s3 + $0xe0] sm:$0xf] %vm540_vm0, %v731_v62  ;;  %v735_v7 = vpack.c.bf16 %v280_v63, %v280_v63 }
  0x48   :  { %v736_v8 = vpack.c.bf16 %v281_v0, %v281_v0  ;;  %v737_v9 = vpack.c.bf16 %v282_v3, %v282_v3  ;;  %598 = vst.msk [vmem:[%s1348_s3 + $0xe4] sm:$0xf] %vm540_vm0, %v732_v4  ;;  %599 = vst.msk [vmem:[%s1348_s3 + $0xe8] sm:$0xf] %vm540_vm0, %v733_v5 }
  0x49   :  { %600 = vst.msk [vmem:[%s1348_s3 + $0xec] sm:$0xf] %vm540_vm0, %v734_v6  ;;  %v738_v2 = vpack.c.bf16 %v283_v1, %v283_v1  ;;  %601 = vst.msk [vmem:[%s1348_s3 + $0xf0] sm:$0xf] %vm540_vm0, %v735_v7 }
  0x4a   :  { %602 = vst.msk [vmem:[%s1348_s3 + $0xf4] sm:$0xf] %vm540_vm0, %v736_v8  ;;  %603 = vst.msk [vmem:[%s1348_s3 + $0xf8] sm:$0xf] %vm540_vm0, %v737_v9 }
  0x4b   :  { %604 = vst.msk [vmem:[%s1348_s3 + $0xfc] sm:$0xf] %vm540_vm0, %v738_v2 }

// kernel: _lambda_.66
= control target key start
LH: loop header
LB: loop body
LE: loop exit
PB: predicated region body
PF: predicated region fallthrough
CT: control target
= control target key end

     0   :  { %s631_s6 = smov 0   ;;  %s1072_s0 = inlined_call_operand.vmem [shape: bf16[2,9,2,9,128], index: 0, kind: input, shape index: {}]   ;;  %s1073_s1 = inlined_call_operand.vmem [shape: bf16[2,8,8,64], index: 1, kind: output, shape index: {}]  }
   0x1 LB: > { %s591_s7 = sadd.s32 4294967295, %s618_s6   ;;  %p595_p0 = scmp.ge.s32.totalorder %s618_s6, 1  ;;  %s618_s6 = sphi %s631_s6, %s11_s6  }
   0x2   : > { %p87_p1 = scmp.lt.s32.totalorder %s618_s6, 3 }
   0x4   : > { %p88_p2 = pnand %p595_p0, %p87_p1 }
   0x6   : > { %91 = sbr.rel (%p88_p2) target bundleno = 175 (0xaf), region = 24 }
   0xd   : > { %p107_p3 = scmp.lt.s32.totalorder %s591_s7, 1  ;;  %s620_s12 = smov 64   ;;  %vm191_vm0 = vsmask.f32 3328  ;;  %vm192_vm1 = vsmask.f32 7440 }
   0xe   : > { %vm859_vm2 = vmor %vm191_vm0, %vm192_vm1  ;;  %vm527_vm3 = vcmask 519168  }
   0xf   : > { %s1101_s7 = smov (!%p107_p3, %s591_s7), 1 }
  0x10   : > { %s602_s8 = smul.u32 144, %s1101_s7  ;;  %s601_s13 = sshll.u32 %s1101_s7, 5 }
  0x11   : > { %s1019_s16 = scalar_lea.vmem %s1073_s1, %s601_s13 }
  0x12   : > { %s645_s11 = scalar_lea.vmem %s1072_s0, %s602_s8 }
  0x13   : > { %v648_v0 = vld [vmem:[%s645_s11 + $0x20] sm:$0xf]  ;;  %v658_v2 = vld [vmem:[%s645_s11 + $0x30] sm:$0xf]  ;;  %v688_v8 = vld [vmem:[%s645_s11 + $0x18] sm:$0xf] }
  0x14   : > { %v651_v1 = vld [vmem:[%s645_s11] sm:$0xf]  ;;  %163 = vrot.lane.b32.xlu1 %v648_v0, %s620_s12  ;;  %v661_v3 = vld [vmem:[%s645_s11 + $0x10] sm:$0xf]  ;;  %v691_v9 = vld [vmem:[%s645_s11 + $0x8] sm:$0xf] }
  0x15   : > { %159 = vrot.lane.b32.xlu0 %v651_v1, %s620_s12  ;;  %v668_v4 = vld [vmem:[%s645_s11 + $0x50] sm:$0xf]  ;;  %v671_v5 = vld [vmem:[%s645_s11 + $0x40] sm:$0xf]  ;;  %v698_v10 = vld [vmem:[%s645_s11 + $0x38] sm:$0xf] }
  0x16   : > { %v678_v6 = vld [vmem:[%s645_s11 + $0x70] sm:$0xf]  ;;  %v681_v7 = vld [vmem:[%s645_s11 + $0x60] sm:$0xf]  ;;  %v701_v11 = vld [vmem:[%s645_s11 + $0x28] sm:$0xf] }
  0x17   : > { %1081 = vst [vmem:[#allocation2_spill] sm:$0xff] %v678_v6  ;;  %1082 = vst [vmem:[#allocation3_spill] sm:$0xff] %v681_v7  ;;  %v708_v12 = vld [vmem:[%s645_s11 + $0x58] sm:$0xf]  ;;  %v711_v13 = vld [vmem:[%s645_s11 + $0x48] sm:$0xf] }
  0x18   : > { %165 = vrot.lane.b32.xlu1 %v658_v2, %s620_s12  ;;  %1083 = vst [vmem:[#allocation4_spill] sm:$0xff] %v708_v12  ;;  %1084 = vst [vmem:[#allocation5_spill] sm:$0xff] %v711_v13  ;;  %v718_v14 = vld [vmem:[%s645_s11 + $0x78] sm:$0xf]  ;;  %v721_v15 = vld [vmem:[%s645_s11 + $0x68] sm:$0xf] }
  0x19   : > { %161 = vrot.lane.b32.xlu0 %v661_v3, %s620_s12  ;;  %1085 = vst [vmem:[#allocation6_spill] sm:$0xff] %v718_v14  ;;  %1086 = vst [vmem:[#allocation7_spill] sm:$0xff] %v721_v15  ;;  %v728_v16 = vld [vmem:[%s645_s11 + $0x80] sm:$0xf]  ;;  %v223_v17 = vshrl.u32 %v648_v0, 16  ;;  %v226_v18 = vshll.u32 %v648_v0, 16 }
  0x1a   : > { %1087 = vst [vmem:[#allocation8_spill] sm:$0xff] %v728_v16  ;;  %v195_v19 = vshrl.u32 %v651_v1, 16  ;;  %v198_v20 = vshll.u32 %v651_v1, 16  ;;  %v237_v21 = vshrl.u32 %v658_v2, 16  ;;  %v240_v22 = vshll.u32 %v658_v2, 16 }
  0x1b   : > { %v209_v23 = vshrl.u32 %v661_v3, 16  ;;  %v212_v24 = vshll.u32 %v661_v3, 16  ;;  %v740_v25 = vrot.slane %v223_v17, 4  ;;  %v742_v26 = vrot.slane %v226_v18, 5  ;;  %v126_v59 = vld [vmem:[%s645_s11 + $0x24] sm:$0x1] }
  0x1c   : > { %169 = vrot.lane.b32.xlu1 %v668_v4, %s620_s12  ;;  %v265_v27 = vshrl.u32 %v668_v4, 16  ;;  %v268_v28 = vshll.u32 %v668_v4, 16  ;;  %v746_v29 = vrot.slane %v195_v19, 4  ;;  %v748_v30 = vrot.slane %v198_v20, 5  ;;  %v118_v60 = vld [vmem:[%s645_s11 + $0x4] sm:$0x1] }
  0x1d   : > { %167 = vrot.lane.b32.xlu0 %v671_v5, %s620_s12  ;;  %v750_v31 = vrot.slane %v237_v21, 4  ;;  %v752_v32 = vrot.slane %v240_v22, 5  ;;  %v754_v33 = vrot.slane %v209_v23, 4  ;;  %v251_v34 = vshrl.u32 %v671_v5, 16  ;;  %v130_v18 = vld [vmem:[%s645_s11 + $0x34] sm:$0x1] }
  0x1e   : > { %v254_v35 = vshll.u32 %v671_v5, 16  ;;  %v293_v36 = vshrl.u32 %v678_v6, 16  ;;  %v759_v37 = vrot.slane %v212_v24, 5  ;;  %v296_v38 = vshll.u32 %v678_v6, 16 }
  0x1f   : > { %v279_v39 = vshrl.u32 %v681_v7, 16  ;;  %v282_v40 = vshll.u32 %v681_v7, 16  ;;  %v764_v41 = vrot.slane %v265_v27, 4  ;;  %v766_v42 = vrot.slane %v268_v28, 5 }
  0x20   : > { %173 = vrot.lane.b32.xlu1 %v678_v6, %s620_s12  ;;  %v377_v43 = vshrl.u32 %v688_v8, 16  ;;  %v380_v44 = vshll.u32 %v688_v8, 16  ;;  %v363_v45 = vshrl.u32 %v691_v9, 16  ;;  %v366_v46 = vshll.u32 %v691_v9, 16 }
  0x21   : > { %171 = vrot.lane.b32.xlu0 %v681_v7, %s620_s12  ;;  %v405_v47 = vshrl.u32 %v698_v10, 16  ;;  %v408_v48 = vshll.u32 %v698_v10, 16  ;;  %v774_v49 = vrot.slane %v251_v34, 4  ;;  %v776_v50 = vrot.slane %v254_v35, 5 }
  0x22   : > { %v778_v51 = vrot.slane %v293_v36, 4  ;;  %v391_v52 = vshrl.u32 %v701_v11, 16  ;;  %v781_v53 = vrot.slane %v296_v38, 5  ;;  %v783_v54 = vrot.slane %v279_v39, 4 }
  0x23   : > { %v785_v55 = vrot.slane %v282_v40, 5  ;;  %v394_v56 = vshll.u32 %v701_v11, 16  ;;  %v788_v57 = vrot.slane %v377_v43, 4  ;;  %v790_v58 = vrot.slane %v380_v44, 5 }
  0x24   : > { %332 = vrot.lane.b32.xlu1 %v688_v8, %s620_s12  ;;  %v794_v61 = vrot.slane %v363_v45, 4  ;;  %v796_v62 = vrot.slane %v366_v46, 5  ;;  %v798_v63 = vrot.slane %v405_v47, 4  ;;  %v800_v17 = vrot.slane %v408_v48, 5  ;;  %v138_v48 = vld [vmem:[%s645_s11 + $0x54] sm:$0x1] }
  0x25   : > { %330 = vrot.lane.b32.xlu0 %v691_v9, %s620_s12  ;;  %v803_v19 = vrot.slane %v391_v52, 4  ;;  %v433_v20 = vshrl.u32 %v708_v12, 16  ;;  %v436_v21 = vshll.u32 %v708_v12, 16  ;;  %v419_v22 = vshrl.u32 %v711_v13, 16 }
  0x26   : > { %v808_v23 = vrot.slane %v394_v56, 5  ;;  %v232_v24 = vshll.u32 %v126_v59, 16  ;;  %v229_v27 = vor.u32 %v742_v26, %v740_v25  ;;  %v204_v28 = vshll.u32 %v118_v60, 16 }
  0x27   : > { %v422_v34 = vshll.u32 %v711_v13, 16  ;;  %v201_v35 = vor.u32 %v748_v30, %v746_v29  ;;  %v243_v36 = vor.u32 %v752_v32, %v750_v31  ;;  %v246_v38 = vshll.u32 %v130_v18, 16  ;;  %v122_v30 = vld [vmem:[%s645_s11 + $0x14] sm:$0x1] }
  0x28   : > { %336 = vrot.lane.b32.xlu1 %v698_v10, %s620_s12  ;;  %v461_v39 = vshrl.u32 %v718_v14, 16  ;;  %v464_v40 = vshll.u32 %v718_v14, 16  ;;  %v447_v43 = vshrl.u32 %v721_v15, 16  ;;  %v450_v44 = vshll.u32 %v721_v15, 16 }
  0x29   : > { %334 = vrot.lane.b32.xlu0 %v701_v11, %s620_s12  ;;  %v821_v25 = vrot.slane %v433_v20, 4  ;;  %v823_v26 = vrot.slane %v436_v21, 5  ;;  %v825_v45 = vrot.slane %v419_v22, 4  ;;  %v504_v29 = vshrl.u32 %v728_v16, 16 }
  0x2a   : > { %v507_v31 = vshll.u32 %v728_v16, 16  ;;  %v830_v32 = vrot.slane %v232_v24, 5  ;;  %v832_v46 = vrot.slane %v229_v27, 4  ;;  %v834_v47 = vrot.slane %v204_v28, 5 }
  0x2b   : > { %v841_v59 = vrot.slane %v201_v35, 4  ;;  %v843_v60 = vrot.slane %v243_v36, 4  ;;  %v845_v18 = vrot.slane %v246_v38, 5  ;;  %v215_v20 = vor.u32 %v759_v37, %v754_v33  ;;  %v134_v35 = vld [vmem:[%s645_s11 + $0x44] sm:$0x1] }
  0x2c   : > { %340 = vrot.lane.b32.xlu1 %v708_v12, %s620_s12  ;;  %v849_v21 = vrot.slane %v422_v34, 5  ;;  %v851_v22 = vrot.slane %v461_v39, 4  ;;  %v853_v24 = vrot.slane %v464_v40, 5  ;;  %v855_v27 = vrot.slane %v447_v43, 4  ;;  %v142_v38 = vld [vmem:[%s645_s11 + $0x64] sm:$0x1] }
  0x2d   : > { %338 = vrot.lane.b32.xlu0 %v711_v13, %s620_s12  ;;  %v218_v36 = vshll.u32 %v122_v30, 16  ;;  %v271_v33 = vor.u32 %v766_v42, %v764_v41  ;;  %v274_v37 = vshll.u32 %v138_v48, 16  ;;  %v257_v34 = vor.u32 %v776_v50, %v774_v49  ;;  %v124_v39 = vld [vmem:[%s645_s11 + $0x1c] sm:$0x1]  ;;  %v128_v42 = vld [vmem:[%s645_s11 + $0x2c] sm:$0x1] }
  0x2e   : > { %v870_v40 = vrot.slane %v450_v44, 5  ;;  %v872_v43 = vrot.slane %v504_v29, 4  ;;  %v890_v50 = vrot.slane %v215_v20, 4  ;;  %v260_v29 = vshll.u32 %v134_v35, 16  ;;  %v132_v48 = vld [vmem:[%s645_s11 + $0x3c] sm:$0x1] }
  0x2f   : > { %v285_v30 = vor.u32 %v785_v55, %v783_v54  ;;  %v288_v41 = vshll.u32 %v142_v38, 16  ;;  %v901_v6 = vrot.slane %v218_v36, 5  ;;  %v903_v13 = vrot.slane %v271_v33, 4  ;;  %v910_v35 = vld [vmem:[%s645_s11 + $0x74] sm:$0x1] }
  0x30   : > { %344 = vrot.lane.b32.xlu1 %v718_v14, %s620_s12  ;;  %v383_v14 = vor.u32 %v790_v58, %v788_v57  ;;  %v905_v20 = vrot.slane %v274_v37, 5  ;;  %v907_v12 = vrot.slane %v257_v34, 4  ;;  %v369_v7 = vor.u32 %v796_v62, %v794_v61  ;;  %v140_v57 = vld [vmem:[%s645_s11 + $0x5c] sm:$0x1] }
  0x31   : > { %342 = vrot.lane.b32.xlu0 %v721_v15, %s620_s12  ;;  %v386_v15 = vshll.u32 %v124_v39, 16  ;;  %v411_v55 = vor.u32 %v800_v17, %v798_v63  ;;  %v414_v38 = vshll.u32 %v132_v48, 16  ;;  %v919_v36 = vrot.slane %v260_v29, 5 }
  0x32   : > { %v299_v37 = vor.u32 %v781_v53, %v778_v51  ;;  %v397_v34 = vor.u32 %v808_v23, %v803_v19  ;;  %v400_v61 = vshll.u32 %v128_v42, 16  ;;  %v927_v62 = vrot.slane %v285_v30, 4 }
  0x33   : > { %v929_v39 = vrot.slane %v288_v41, 5  ;;  %v388_v63 = vrot.slane %v386_v15, 5  ;;  %v384_v17 = vrot.slane %v383_v14, 4  ;;  %v221_v29 = vsel %vm859_vm2, %v890_v50, %v901_v6  ;;  %v136_v41 = vld [vmem:[%s645_s11 + $0x4c] sm:$0x1] }
  0x34   : > { %v439_v51 = vor.u32 %v823_v26, %v821_v25  ;;  %v442_v53 = vshll.u32 %v140_v57, 16  ;;  %v370_v19 = vrot.slane %v369_v7, 4  ;;  %v412_v30 = vrot.slane %v411_v55, 4 }
  0x35   : > { %499 = vrot.lane.b32.xlu0 %v728_v16, %s620_s12  ;;  %v874_v16 = vrot.slane %v507_v31, 5  ;;  %v120_v31 = vld [vmem:[%s645_s11 + $0xc] sm:$0x1]  ;;  %v416_v42 = vrot.slane %v414_v38, 5  ;;  %v277_v14 = vsel %vm859_vm2, %v903_v13, %v905_v20  ;;  %v398_v50 = vrot.slane %v397_v34, 4 }
  0x36   : > { %v372_v54 = vshll.u32 %v120_v31, 16  ;;  %v302_v31 = vshll.u32 %v910_v35, 16  ;;  %v402_v48 = vrot.slane %v400_v61, 5  ;;  %v425_v25 = vor.u32 %v849_v21, %v825_v45  ;;  %v148_v38 = vld [vmem:[%s645_s11 + $0x7c] sm:$0x1] }
  0x37   : > { %v263_v7 = vsel %vm859_vm2, %v907_v12, %v919_v36  ;;  %v953_v26 = vrot.slane %v299_v37, 4  ;;  %v389_v55 = vsel %vm859_vm2, %v384_v17, %v388_v63  ;;  %v962_v57 = vrot.slane %v439_v51, 4  ;;  %v144_v36 = vld [vmem:[%s645_s11 + $0x6c] sm:$0x1] }
  0x38   : > { %v374_v23 = vrot.slane %v372_v54, 5  ;;  %v291_v54 = vsel %vm859_vm2, %v927_v62, %v929_v39  ;;  %v964_v45 = vrot.slane %v442_v53, 5  ;;  %v428_v21 = vshll.u32 %v136_v41, 16 }
  0x39   : > { %v467_v12 = vor.u32 %v853_v24, %v851_v22  ;;  %v417_v63 = vsel %vm859_vm2, %v412_v30, %v416_v42  ;;  %v403_v22 = vsel %vm859_vm2, %v398_v50, %v402_v48  ;;  %v426_v24 = vrot.slane %v425_v25, 4 }
  0x3a   : > { %v375_v61 = vsel %vm859_vm2, %v370_v19, %v374_v23  ;;  %v456_v19 = vshll.u32 %v144_v36, 16 }
  0x3b   : > { %v468_v30 = vrot.slane %v467_v12, 4  ;;  %v1093_v12 = vld [vmem:[#allocation3_spill] sm:$0xff] }
  0x86   : > { %v837_v52 = vpop.permute.xlu1 %163 }
  0x87   : > { %v839_v56 = vpop.permute.xlu0 %159  ;;  %v185_v17 = vmax.bf16 %v837_v52, %v648_v0  ;;  %v445_v0 = vsel %vm859_vm2, %v962_v57, %v964_v45  ;;  %v430_v52 = vrot.slane %v428_v21, 5  ;;  %v150_v57 = vld [vmem:[%s645_s11 + $0x84] sm:$0x1] }
  0x88   : > { %v183_v37 = vmax.bf16 %v839_v56, %v651_v1  ;;  %v470_v1 = vshll.u32 %v148_v38, 16  ;;  %v513_v36 = vshll.u32 %v150_v57, 16 }
  0x8a   : > { %v888_v49 = vpop.permute.xlu1 %165  ;;  %v472_v25 = vrot.slane %v470_v1, 5 }
  0x8b   : > { %v892_v44 = vpop.permute.xlu0 %161  ;;  %v186_v23 = vmax.bf16 %v888_v49, %v658_v2  ;;  %v1091_v2 = vsel %vm859_vm2, %v832_v46, %v830_v32  ;;  %v1092_v32 = vsel %vm859_vm2, %v843_v60, %v845_v18 }
  0x8c   : > { %v184_v34 = vmax.bf16 %v892_v44, %v661_v3  ;;  %v453_v44 = vor.u32 %v870_v40, %v855_v27  ;;  %v316_v49 = vmax.bf16 %v1091_v2, %v185_v17 }
  0x8d   : > { %v317_v46 = vmax.bf16 %v1092_v32, %v186_v23 }
  0x8e   : > { %v917_v58 = vpop.permute.xlu1 %169  ;;  %v315_v42 = vmax.bf16 %v221_v29, %v184_v34 }
  0x8f   : > { %v921_v33 = vpop.permute.xlu0 %167 }
  0x90   : > { %v187_v41 = vmax.bf16 %v921_v33, %v671_v5  ;;  %v188_v5 = vmax.bf16 %v917_v58, %v668_v4  ;;  %v431_v4 = vsel %vm859_vm2, %v426_v24, %v430_v52 }
  0x92   : > { %v943_v15 = vpop.permute.xlu1 %173  ;;  %v318_v21 = vmax.bf16 %v263_v7, %v187_v41  ;;  %v1099_v41 = vld [vmem:[#allocation8_spill] sm:$0xff] }
  0x93   : > { %v945_v6 = vpop.permute.xlu0 %171 }
  0x94   : > { %v189_v60 = vmax.bf16 %v945_v6, %v1093_v12  ;;  %v319_v6 = vmax.bf16 %v277_v14, %v188_v5  ;;  %v515_v14 = vrot.slane %v513_v36, 5 }
  0x96   : > { %v333_v51 = vpop.permute.xlu1 %332  ;;  %v320_v13 = vmax.bf16 %v291_v54, %v189_v60 }
  0x97   : > { %v331_v53 = vpop.permute.xlu0 %330  ;;  %v355_v56 = vmax.bf16 %v333_v51, %v688_v8  ;;  %v1090_v8 = vsel %vm859_vm2, %v841_v59, %v834_v47  ;;  %v510_v47 = vor.u32 %v874_v16, %v872_v43  ;;  %v458_v16 = vrot.slane %v456_v19, 5 }
  0x98   : > { %v354_v3 = vmax.bf16 %v331_v53, %v691_v9  ;;  %v314_v9 = vmax.bf16 %v1090_v8, %v183_v37  ;;  %v304_v51 = vrot.slane %v302_v31, 5  ;;  %v473_v53 = vsel %vm859_vm2, %v468_v30, %v472_v25  ;;  %v1098_v30 = vld [vmem:[#allocation7_spill] sm:$0xff] }
  0x99   : > { %v483_v27 = vmax.bf16 %v389_v55, %v355_v56 }
  0x9a   : > { %v482_v40 = vmax.bf16 %v375_v61, %v354_v3  ;;  %v337_v50 = vpop.permute.xlu1 %336  ;;  %v1094_v61 = vld [vmem:[#allocation4_spill] sm:$0xff]  ;;  %v305_v62 = vsel %vm859_vm2, %v953_v26, %v304_v51 }
  0x9b   : > { %v335_v48 = vpop.permute.xlu0 %334  ;;  %v491_v59 = vmax.bf16 %v483_v27, %v315_v42  ;;  %v357_v55 = vmax.bf16 %v337_v50, %v698_v10  ;;  %v454_v10 = vrot.slane %v453_v44, 4  ;;  %v1096_v44 = vld [vmem:[#allocation2_spill] sm:$0xff] }
  0x9c   : > { %v490_v29 = vmax.bf16 %v482_v40, %v314_v9  ;;  %v356_v38 = vmax.bf16 %v335_v48, %v701_v11  ;;  %v190_v19 = vmax.bf16 %v943_v15, %v1096_v44 }
  0x9d   : > { %v520_v11 = vmax.bf16 %v491_v59, %v316_v49  ;;  %v485_v33 = vmax.bf16 %v417_v63, %v357_v55  ;;  %v1095_v63 = vld [vmem:[#allocation5_spill] sm:$0xff]  ;;  %v459_v35 = vsel %vm859_vm2, %v454_v10, %v458_v16 }
  0x9e   : > { %v519_v43 = vmax.bf16 %v490_v29, %v315_v42  ;;  %v484_v45 = vmax.bf16 %v403_v22, %v356_v38  ;;  %v341_v18 = vpop.permute.xlu1 %340  ;;  %v511_v22 = vrot.slane %v510_v47, 4  ;;  %v321_v2 = vmax.bf16 %v305_v62, %v190_v19 }
  0x9f   : > { %v339_v58 = vpop.permute.xlu0 %338  ;;  %529 = vst.msk [vmem:[%s1019_s16 + $0x4] sm:$0xf] %vm527_vm3, %v520_v11  ;;  %v493_v37 = vmax.bf16 %v485_v33, %v317_v46  ;;  %v359_v17 = vmax.bf16 %v341_v18, %v1094_v61 }
  0xa0   : > { %528 = vst.msk [vmem:[%s1019_s16] sm:$0xf] %vm527_vm3, %v519_v43  ;;  %v492_v34 = vmax.bf16 %v484_v45, %v316_v49  ;;  %v358_v7 = vmax.bf16 %v339_v58, %v1095_v63  ;;  %v516_v27 = vsel %vm859_vm2, %v511_v22, %v515_v14 }
  0xa1   : > { %v522_v24 = vmax.bf16 %v493_v37, %v318_v21  ;;  %v487_v56 = vmax.bf16 %v445_v0, %v359_v17  ;;  %v1097_v0 = vld [vmem:[#allocation6_spill] sm:$0xff] }
  0xa2   : > { %v521_v1 = vmax.bf16 %v492_v34, %v317_v46  ;;  %v486_v3 = vmax.bf16 %v431_v4, %v358_v7  ;;  %v345_v20 = vpop.permute.xlu1 %344 }
  0xa3   : > { %v343_v31 = vpop.permute.xlu0 %342  ;;  %531 = vst.msk [vmem:[%s1019_s16 + $0xc] sm:$0xf] %vm527_vm3, %v522_v24  ;;  %v495_v23 = vmax.bf16 %v487_v56, %v319_v6  ;;  %v361_v52 = vmax.bf16 %v345_v20, %v1097_v0 }
  0xa4   : > { %530 = vst.msk [vmem:[%s1019_s16 + $0x8] sm:$0xf] %vm527_vm3, %v521_v1  ;;  %v494_v15 = vmax.bf16 %v486_v3, %v318_v21  ;;  %v360_v8 = vmax.bf16 %v343_v31, %v1098_v30 }
  0xa5   : > { %v524_v39 = vmax.bf16 %v495_v23, %v320_v13  ;;  %v489_v9 = vmax.bf16 %v473_v53, %v361_v52 }
  0xa6   : > { %v523_v54 = vmax.bf16 %v494_v15, %v319_v6  ;;  %v488_v42 = vmax.bf16 %v459_v35, %v360_v8 }
  0xa7   : > { %v500_v40 = vpop.permute.xlu0 %499  ;;  %533 = vst.msk [vmem:[%s1019_s16 + $0x14] sm:$0xf] %vm527_vm3, %v524_v39  ;;  %v497_v48 = vmax.bf16 %v489_v9, %v321_v2 }
  0xa8   : > { %532 = vst.msk [vmem:[%s1019_s16 + $0x10] sm:$0xf] %vm527_vm3, %v523_v54  ;;  %v496_v49 = vmax.bf16 %v488_v42, %v320_v13  ;;  %v502_v50 = vmax.bf16 %v500_v40, %v1099_v41 }
  0xaa   : > { %v525_v25 = vmax.bf16 %v496_v49, %v321_v2  ;;  %v518_v26 = vmax.bf16 %v516_v27, %v502_v50 }
  0xac   : > { %534 = vst.msk [vmem:[%s1019_s16 + $0x18] sm:$0xf] %vm527_vm3, %v525_v25  ;;  %v526_v47 = vmax.bf16 %v518_v26, %v497_v48 }
  0xae   : > { %535 = vst.msk [vmem:[%s1019_s16 + $0x1c] sm:$0xf] %vm527_vm3, %v526_v47 }
  0xaf PF: > { %s11_s6 = sadd.s32 1, %s618_s6  }
  0xb0   : > { %p8_p4 = scmp.ge.s32.totalorder %s11_s6, 4  }
  0xb2   :  { %10 = sbr.rel (!%p8_p4) target bundleno = 1 (0x1), region = 54 }

// kernel: _lambda_.67
= control target key start
LH: loop header
LB: loop body
LE: loop exit
PB: predicated region body
PF: predicated region fallthrough
CT: control target
= control target key end

     0   :  { %s1722_s1 = inlined_call_operand.vmem [shape: bf16[640,128], index: 1, kind: input, shape index: {}]   ;;  %s1723_s0 = inlined_call_operand.vmem [shape: bf16[128,640], index: 0, kind: input, shape index: {}]   ;;  %s1724_s2 = inlined_call_operand.vmem [shape: f32[1,128], index: 2, kind: input, shape index: {}]   ;;  %s1725_s3 = inlined_call_operand.vmem [shape: f32[128,128], index: 3, kind: output, shape index: {}]  }
   0x1   :  { %v1285_v0 = vld [vmem:[%s1722_s1 + $0x40] sm:$0xff]   ;;  %v1289_v4 = vld [vmem:[%s1722_s1 + $0x48] sm:$0xff]   ;;  %v1293_v8 = vld [vmem:[%s1722_s1 + $0x50] sm:$0xff]  }
   0x2   :  { %v1286_v1 = vld [vmem:[%s1722_s1 + $0xc0] sm:$0xff]   ;;  %1093 = vmatprep.subr.bf16.mxu0 %v1285_v0  ;;  %v1290_v5 = vld [vmem:[%s1722_s1 + $0xc8] sm:$0xff]   ;;  %v1294_v9 = vld [vmem:[%s1722_s1 + $0xd0] sm:$0xff]  }
   0x3   :  { %v1287_v2 = vld [vmem:[%s1722_s1] sm:$0xff]   ;;  %1157 = vmatprep.subr.bf16.mxu1 %v1286_v1  ;;  %v1291_v6 = vld [vmem:[%s1722_s1 + $0x8] sm:$0xff]   ;;  %v1295_v10 = vld [vmem:[%s1722_s1 + $0x10] sm:$0xff]  }
   0x4   :  { %v1288_v3 = vld [vmem:[%s1722_s1 + $0x80] sm:$0xff]   ;;  %1094 = vmatpush3.bf16.msra.mxu0 %v1287_v2  ;;  %v1292_v7 = vld [vmem:[%s1722_s1 + $0x88] sm:$0xff]   ;;  %v1296_v11 = vld [vmem:[%s1722_s1 + $0x90] sm:$0xff]  }
   0x5   :  { %1158 = vmatpush3.bf16.msra.mxu1 %v1288_v3  ;;  %1095 = vmatprep.subr.bf16.mxu0 %v1289_v4  ;;  %v1297_v12 = vld [vmem:[%s1722_s1 + $0x58] sm:$0xff]   ;;  %v1301_v16 = vld [vmem:[%s1722_s1 + $0x60] sm:$0xff]   ;;  %v1305_v20 = vld [vmem:[%s1722_s1 + $0x68] sm:$0xff]  }
   0x6   :  { %1159 = vmatprep.subr.bf16.mxu1 %v1290_v5  ;;  %v1298_v13 = vld [vmem:[%s1722_s1 + $0xd8] sm:$0xff]   ;;  %v1302_v17 = vld [vmem:[%s1722_s1 + $0xe0] sm:$0xff]   ;;  %v1306_v21 = vld [vmem:[%s1722_s1 + $0xe8] sm:$0xff]  }
   0x7   :  { %v1299_v14 = vld [vmem:[%s1722_s1 + $0x18] sm:$0xff]   ;;  %v1303_v18 = vld [vmem:[%s1722_s1 + $0x20] sm:$0xff]   ;;  %v1307_v22 = vld [vmem:[%s1722_s1 + $0x28] sm:$0xff]  }
   0x8   :  { %1096 = vmatpush3.bf16.msra.mxu0 %v1291_v6  ;;  %v1300_v15 = vld [vmem:[%s1722_s1 + $0x98] sm:$0xff]   ;;  %v1304_v19 = vld [vmem:[%s1722_s1 + $0xa0] sm:$0xff]   ;;  %v1308_v23 = vld [vmem:[%s1722_s1 + $0xa8] sm:$0xff]  }
   0x9   :  { %1160 = vmatpush3.bf16.msra.mxu1 %v1292_v7  ;;  %1097 = vmatprep.subr.bf16.mxu0 %v1293_v8  ;;  %v1309_v24 = vld [vmem:[%s1722_s1 + $0x70] sm:$0xff]   ;;  %v1313_v28 = vld [vmem:[%s1722_s1 + $0x78] sm:$0xff]   ;;  %v1322_v35 = vld [vmem:[%s1723_s0 + $0xc] ss:$20 sps:$4 sm:$0xff]  }
   0xa   :  { %1161 = vmatprep.subr.bf16.mxu1 %v1294_v9  ;;  %v1310_v25 = vld [vmem:[%s1722_s1 + $0xf0] sm:$0xff]   ;;  %v1314_v29 = vld [vmem:[%s1722_s1 + $0xf8] sm:$0xff]   ;;  %v1323_v36 = vld [vmem:[%s1722_s1 + $0x100] sm:$0xff]   ;;  %756 = vmatprep.mubr.bf16.mxu1 %v1322_v35 }
   0xb   :  { %v1311_v26 = vld [vmem:[%s1722_s1 + $0x30] sm:$0xff]   ;;  %v1315_v30 = vld [vmem:[%s1722_s1 + $0x38] sm:$0xff]   ;;  %v1324_v37 = vld [vmem:[%s1723_s0 + $0x2c] ss:$20 sps:$4 sm:$0xff]  }
   0xc   :  { %1098 = vmatpush3.bf16.msra.mxu0 %v1295_v10  ;;  %v1312_v27 = vld [vmem:[%s1722_s1 + $0xb0] sm:$0xff]   ;;  %v1316_v31 = vld [vmem:[%s1722_s1 + $0xb8] sm:$0xff]   ;;  %v1330_v39 = vld [vmem:[%s1722_s1 + $0x108] sm:$0xff]  }
   0xd   :  { %1162 = vmatpush3.bf16.msra.mxu1 %v1296_v11  ;;  %1099 = vmatprep.subr.bf16.mxu0 %v1297_v12  ;;  %v1317_v32 = vld [vmem:[%s1723_s0] ss:$20 sps:$4 sm:$0xff]   ;;  %v1319_v33 = vld [vmem:[%s1723_s0 + $0x4] ss:$20 sps:$4 sm:$0xff]   ;;  %v1320_v34 = vld [vmem:[%s1723_s0 + $0x8] ss:$20 sps:$4 sm:$0xff]  }
   0xe   :  { %1163 = vmatprep.subr.bf16.mxu1 %v1298_v13  ;;  %659 = vmatprep.mubr.bf16.mxu0 %v1319_v33  ;;  %v1326_v38 = vld [vmem:[%s1723_s0 + $0x34] ss:$20 sps:$4 sm:$0xff]   ;;  %v1329_v41 = vld [vmem:[%s1723_s0 + $0x30] ss:$20 sps:$4 sm:$0xff]   ;;  %v1344_v45 = vld [vmem:[%s1722_s1 + $0x118] sm:$0xff]  }
   0xf   :  { %v1328_v40 = vld [vmem:[%s1723_s0 + $0x28] ss:$20 sps:$4 sm:$0xff]   ;;  %v1337_v44 = vld [vmem:[%s1722_s1 + $0x110] sm:$0xff]   ;;  %v1336_v47 = vld [vmem:[%s1723_s0 + $0x58] ss:$20 sps:$4 sm:$0xff]  }
  0x10   :  { %1100 = vmatpush3.bf16.msra.mxu0 %v1299_v14  ;;  %v1331_v42 = vld [vmem:[%s1723_s0 + $0x54] ss:$20 sps:$4 sm:$0xff]   ;;  %v1333_v43 = vld [vmem:[%s1723_s0 + $0x5c] ss:$20 sps:$4 sm:$0xff]   ;;  %v1340_v49 = vld [vmem:[%s1723_s0 + $0x84] ss:$20 sps:$4 sm:$0xff]  }
  0x11   :  { %1164 = vmatpush3.bf16.msra.mxu1 %v1300_v15  ;;  %1101 = vmatprep.subr.bf16.mxu0 %v1301_v16  ;;  %v1335_v46 = vld [vmem:[%s1723_s0 + $0x50] ss:$20 sps:$4 sm:$0xff]   ;;  %v1358_v51 = vld [vmem:[%s1722_s1 + $0x128] sm:$0xff]   ;;  %v1343_v53 = vld [vmem:[%s1723_s0 + $0x80] ss:$20 sps:$4 sm:$0xff]  }
  0x12   :  { %1165 = vmatprep.subr.bf16.mxu1 %v1302_v17  ;;  %v1338_v48 = vld [vmem:[%s1723_s0 + $0x7c] ss:$20 sps:$4 sm:$0xff]   ;;  %v1351_v50 = vld [vmem:[%s1722_s1 + $0x120] sm:$0xff]   ;;  %v1342_v52 = vld [vmem:[%s1723_s0 + $0x78] ss:$20 sps:$4 sm:$0xff]  }
  0x13   :  { %v1345_v54 = vld [vmem:[%s1723_s0 + $0xa4] ss:$20 sps:$4 sm:$0xff]   ;;  %v1365_v55 = vld [vmem:[%s1722_s1 + $0x130] sm:$0xff]   ;;  %v1347_v56 = vld [vmem:[%s1723_s0 + $0xac] ss:$20 sps:$4 sm:$0xff]  }
  0x14   :  { %1102 = vmatpush3.bf16.msra.mxu0 %v1303_v18  ;;  %v1372_v57 = vld [vmem:[%s1722_s1 + $0x138] sm:$0xff]   ;;  %v1349_v58 = vld [vmem:[%s1723_s0 + $0xa0] ss:$20 sps:$4 sm:$0xff]   ;;  %v1357_v63 = vld [vmem:[%s1723_s0 + $0xd0] ss:$20 sps:$4 sm:$0xff]  }
  0x15   :  { %1166 = vmatpush3.bf16.msra.mxu1 %v1304_v19  ;;  %1103 = vmatprep.subr.bf16.mxu0 %v1305_v20  ;;  %v1350_v59 = vld [vmem:[%s1723_s0 + $0xa8] ss:$20 sps:$4 sm:$0xff]   ;;  %v1352_v60 = vld [vmem:[%s1723_s0 + $0xcc] ss:$20 sps:$4 sm:$0xff]   ;;  %v1363_v2 = vld [vmem:[%s1723_s0 + $0xf0] ss:$20 sps:$4 sm:$0xff]  }
  0x16   :  { %1167 = vmatprep.subr.bf16.mxu1 %v1306_v21  ;;  %v1354_v61 = vld [vmem:[%s1723_s0 + $0xd4] ss:$20 sps:$4 sm:$0xff]   ;;  %v1361_v1 = vld [vmem:[%s1723_s0 + $0xfc] ss:$20 sps:$4 sm:$0xff]   ;;  %v1364_v3 = vld [vmem:[%s1723_s0 + $0xf8] ss:$20 sps:$4 sm:$0xff]  }
  0x17   :  { %v1356_v62 = vld [vmem:[%s1723_s0 + $0xc8] ss:$20 sps:$4 sm:$0xff]   ;;  %v1368_v5 = vld [vmem:[%s1723_s0 + $0x124] ss:$20 sps:$4 sm:$0xff]   ;;  %v1371_v7 = vld [vmem:[%s1723_s0 + $0x120] ss:$20 sps:$4 sm:$0xff]  }
  0x18   :  { %1104 = vmatpush3.bf16.msra.mxu0 %v1307_v22  ;;  %v1359_v0 = vld [vmem:[%s1723_s0 + $0xf4] ss:$20 sps:$4 sm:$0xff]   ;;  %v1366_v4 = vld [vmem:[%s1723_s0 + $0x11c] ss:$20 sps:$4 sm:$0xff]   ;;  %v1370_v6 = vld [vmem:[%s1723_s0 + $0x118] ss:$20 sps:$4 sm:$0xff]  }
  0x19   :  { %1168 = vmatpush3.bf16.msra.mxu1 %v1308_v23  ;;  %1105 = vmatprep.subr.bf16.mxu0 %v1309_v24  ;;  %v1373_v8 = vld [vmem:[%s1723_s0 + $0x10] ss:$20 sps:$4 sm:$0xff]   ;;  %v1375_v10 = vld [vmem:[%s1723_s0 + $0x38] ss:$20 sps:$4 sm:$0xff]   ;;  %v1377_v12 = vld [vmem:[%s1723_s0 + $0x60] ss:$20 sps:$4 sm:$0xff]  }
  0x1a   :  { %1169 = vmatprep.subr.bf16.mxu1 %v1310_v25  ;;  %v1374_v9 = vld [vmem:[%s1723_s0 + $0xb0] ss:$20 sps:$4 sm:$0xff]   ;;  %v1376_v11 = vld [vmem:[%s1723_s0 + $0xd8] ss:$20 sps:$4 sm:$0xff]   ;;  %v1378_v13 = vld [vmem:[%s1723_s0 + $0x100] ss:$20 sps:$4 sm:$0xff]  }
  0x1b   :  { %v1379_v14 = vld [vmem:[%s1723_s0 + $0x88] ss:$20 sps:$4 sm:$0xff]  }
  0x1c   :  { %1106 = vmatpush3.bf16.msra.mxu0 %v1311_v26  ;;  %v1380_v15 = vld [vmem:[%s1723_s0 + $0x128] ss:$20 sps:$4 sm:$0xff]  }
  0x1d   :  { %1170 = vmatpush3.bf16.msra.mxu1 %v1312_v27  ;;  %1107 = vmatprep.subr.bf16.mxu0 %v1313_v28 }
  0x1e   :  { %1171 = vmatprep.subr.bf16.mxu1 %v1314_v29 }
  0x20   :  { %1108 = vmatpush3.bf16.msra.mxu0 %v1315_v30 }
  0x21   :  { %1172 = vmatpush3.bf16.msra.mxu1 %v1316_v31  ;;  %1237 = vmatprep.subr.bf16.mxu0 %v1323_v36 }
  0x22   :  { %1269 = vmatprep.subr.bf16.mxu1 %v1323_v36 }
  0x23   :  { %660 = vmatmul.mubr.bf16.vlgmr.msra.gmra.mrb[0].mxu0 %v1317_v32 }
  0x24   :  { %757 = vmatmul.mubr.bf16.vlgmr.msra.gmra.mrb[0].mxu1 %v1320_v34  ;;  %1238 = vmatpush3.bf16.msra.mxu0 %v1323_v36 }
  0x25   :  { %1277 = vmatpush3.bf16.msra.mxu1 %v1323_v36  ;;  %667 = vmatprep.mubr.bf16.mxu0 %v1324_v37 }
  0x26   :  { %764 = vmatprep.mubr.bf16.mxu1 %v1326_v38  ;;  %1239 = vmatprep.subr.bf16.mxu0 %v1330_v39 }
  0x27   :  { %1270 = vmatprep.subr.bf16.mxu1 %v1330_v39 }
  0x28   :  { %1240 = vmatpush3.bf16.msra.mxu0 %v1330_v39 }
  0x29   :  { %1278 = vmatpush3.bf16.msra.mxu1 %v1330_v39  ;;  %1241 = vmatprep.subr.bf16.mxu0 %v1337_v44 }
  0x2a   :  { %1271 = vmatprep.subr.bf16.mxu1 %v1337_v44 }
  0x2b   :  { %668 = vmatmul.mubr.bf16.gmra.mrb[4].mxu0 %v1328_v40 }
  0x2c   :  { %765 = vmatmul.mubr.bf16.gmra.mrb[4].mxu1 %v1329_v41  ;;  %675 = vmatprep.mubr.bf16.mxu0 %v1331_v42 }
  0x2d   :  { %772 = vmatprep.mubr.bf16.mxu1 %v1333_v43  ;;  %1242 = vmatpush3.bf16.msra.mxu0 %v1337_v44 }
  0x2e   :  { %1279 = vmatpush3.bf16.msra.mxu1 %v1337_v44  ;;  %1243 = vmatprep.subr.bf16.mxu0 %v1344_v45 }
  0x2f   :  { %1272 = vmatprep.subr.bf16.mxu1 %v1344_v45 }
  0x31   :  { %1244 = vmatpush3.bf16.msra.mxu0 %v1344_v45 }
  0x32   :  { %1280 = vmatpush3.bf16.msra.mxu1 %v1344_v45  ;;  %1245 = vmatprep.subr.bf16.mxu0 %v1351_v50 }
  0x33   :  { %676 = vmatmul.mubr.bf16.gmra.mrb[8].mxu0 %v1335_v46  ;;  %1273 = vmatprep.subr.bf16.mxu1 %v1351_v50 }
  0x34   :  { %773 = vmatmul.mubr.bf16.gmra.mrb[8].mxu1 %v1336_v47  ;;  %683 = vmatprep.mubr.bf16.mxu0 %v1338_v48 }
  0x35   :  { %780 = vmatprep.mubr.bf16.mxu1 %v1340_v49  ;;  %1246 = vmatpush3.bf16.msra.mxu0 %v1351_v50 }
  0x36   :  { %1281 = vmatpush3.bf16.msra.mxu1 %v1351_v50  ;;  %1247 = vmatprep.subr.bf16.mxu0 %v1358_v51 }
  0x37   :  { %1274 = vmatprep.subr.bf16.mxu1 %v1358_v51 }
  0x39   :  { %1248 = vmatpush3.bf16.msra.mxu0 %v1358_v51 }
  0x3a   :  { %1282 = vmatpush3.bf16.msra.mxu1 %v1358_v51  ;;  %1249 = vmatprep.subr.bf16.mxu0 %v1365_v55 }
  0x3b   :  { %684 = vmatmul.mubr.bf16.gmra.mrb[12].mxu0 %v1342_v52  ;;  %1275 = vmatprep.subr.bf16.mxu1 %v1365_v55 }
  0x3c   :  { %781 = vmatmul.mubr.bf16.gmra.mrb[12].mxu1 %v1343_v53  ;;  %691 = vmatprep.mubr.bf16.mxu0 %v1345_v54 }
  0x3d   :  { %788 = vmatprep.mubr.bf16.mxu1 %v1347_v56  ;;  %1250 = vmatpush3.bf16.msra.mxu0 %v1365_v55 }
  0x3e   :  { %1283 = vmatpush3.bf16.msra.mxu1 %v1365_v55  ;;  %1251 = vmatprep.subr.bf16.mxu0 %v1372_v57 }
  0x3f   :  { %1276 = vmatprep.subr.bf16.mxu1 %v1372_v57 }
  0x41   :  { %1252 = vmatpush3.bf16.msra.mxu0 %v1372_v57 }
  0x42   :  { %1284 = vmatpush3.bf16.msra.mxu1 %v1372_v57 }
  0x43   :  { %692 = vmatmul.mubr.bf16.gmra.mrb[16].mxu0 %v1349_v58 }
  0x44   :  { %789 = vmatmul.mubr.bf16.gmra.mrb[16].mxu1 %v1350_v59  ;;  %699 = vmatprep.mubr.bf16.mxu0 %v1352_v60 }
  0x45   :  { %796 = vmatprep.mubr.bf16.mxu1 %v1354_v61 }
  0x4b   :  { %700 = vmatmul.mubr.bf16.gmra.mrb[20].mxu0 %v1356_v62 }
  0x4c   :  { %797 = vmatmul.mubr.bf16.gmra.mrb[20].mxu1 %v1357_v63  ;;  %707 = vmatprep.mubr.bf16.mxu0 %v1359_v0 }
  0x4d   :  { %804 = vmatprep.mubr.bf16.mxu1 %v1361_v1 }
  0x53   :  { %708 = vmatmul.mubr.bf16.gmra.mrb[24].mxu0 %v1363_v2 }
  0x54   :  { %805 = vmatmul.mubr.bf16.gmra.mrb[24].mxu1 %v1364_v3  ;;  %715 = vmatprep.mubr.bf16.mxu0 %v1366_v4 }
  0x55   :  { %812 = vmatprep.mubr.bf16.mxu1 %v1368_v5 }
  0x5b   :  { %716 = vmatmul.mubr.bf16.gmra.mrb[28].mxu0 %v1370_v6 }
  0x5c   :  { %813 = vmatmul.mubr.bf16.gmra.mrb[28].mxu1 %v1371_v7  ;;  %1253 = vmatprep.mubr.bf16.mxu0 %v1373_v8 }
  0x5d   :  { %1261 = vmatprep.mubr.bf16.mxu1 %v1374_v9 }
  0x63   :  { %1254 = vmatmul.mubr.bf16.vlgmr.msra.gmra.mrb[32].mxu0 %v1375_v10 }
  0x64   :  { %1262 = vmatmul.mubr.bf16.vlgmr.msra.gmra.mrb[32].mxu1 %v1376_v11  ;;  %1257 = vmatprep.mubr.bf16.mxu0 %v1377_v12 }
  0x65   :  { %1265 = vmatprep.mubr.bf16.mxu1 %v1378_v13 }
  0x6b   :  { %1258 = vmatmul.mubr.bf16.gmra.mrb[36].mxu0 %v1379_v14 }
  0x6c   :  { %1266 = vmatmul.mubr.bf16.gmra.mrb[36].mxu1 %v1380_v15 }
  0xf6   :  { %v1109_v16 = vpop.f32.mrb[0].mxu0 }
  0xf7   :  { %v1173_v17 = vpop.f32.mrb[0].mxu1  ;;  %v1110_v18 = vpop.f32.mrb[1].mxu0 }
  0xf8   :  { %v1111_v19 = vadd.f32 %v1110_v18, %v1109_v16  ;;  %v1174_v20 = vpop.f32.mrb[1].mxu1  ;;  %v1112_v21 = vpop.f32.mrb[2].mxu0 }
  0xf9   :  { %v1175_v22 = vadd.f32 %v1174_v20, %v1173_v17  ;;  %v1176_v23 = vpop.f32.mrb[2].mxu1  ;;  %v1113_v24 = vpop.f32.mrb[3].mxu0 }
  0xfa   :  { %v1114_v25 = vadd.f32 %v1113_v24, %v1112_v21  ;;  %v1177_v26 = vpop.f32.mrb[3].mxu1 }
  0xfb   :  { %v1178_v27 = vadd.f32 %v1177_v26, %v1176_v23  ;;  %v1641_v28 = vadd.f32 %v1175_v22, %v1111_v19 }
  0xfd   :  { %v1643_v29 = vadd.f32 %v1178_v27, %v1114_v25 }
  0xfe   :  { %v1115_v30 = vpop.f32.mrb[4].mxu0 }
  0xff   :  { %v1179_v31 = vpop.f32.mrb[4].mxu1  ;;  %v1116_v32 = vpop.f32.mrb[5].mxu0 }
 0x100   :  { %v1117_v33 = vadd.f32 %v1116_v32, %v1115_v30  ;;  %v1180_v34 = vpop.f32.mrb[5].mxu1  ;;  %v1118_v35 = vpop.f32.mrb[6].mxu0 }
 0x101   :  { %v1181_v36 = vadd.f32 %v1180_v34, %v1179_v31  ;;  %v1182_v37 = vpop.f32.mrb[6].mxu1  ;;  %v1119_v38 = vpop.f32.mrb[7].mxu0 }
 0x102   :  { %v1120_v39 = vadd.f32 %v1119_v38, %v1118_v35  ;;  %v1183_v40 = vpop.f32.mrb[7].mxu1 }
 0x103   :  { %v1184_v41 = vadd.f32 %v1183_v40, %v1182_v37  ;;  %v1645_v42 = vadd.f32 %v1181_v36, %v1117_v33 }
 0x105   :  { %v1647_v43 = vadd.f32 %v1184_v41, %v1120_v39 }
 0x106   :  { %v1121_v44 = vpop.f32.mrb[8].mxu0 }
 0x107   :  { %v1185_v45 = vpop.f32.mrb[8].mxu1  ;;  %v1122_v46 = vpop.f32.mrb[9].mxu0 }
 0x108   :  { %v1123_v47 = vadd.f32 %v1122_v46, %v1121_v44  ;;  %v1186_v48 = vpop.f32.mrb[9].mxu1  ;;  %v1124_v49 = vpop.f32.mrb[10].mxu0 }
 0x109   :  { %v1187_v50 = vadd.f32 %v1186_v48, %v1185_v45  ;;  %v1188_v51 = vpop.f32.mrb[10].mxu1  ;;  %v1125_v52 = vpop.f32.mrb[11].mxu0 }
 0x10a   :  { %v1126_v53 = vadd.f32 %v1125_v52, %v1124_v49  ;;  %v1189_v54 = vpop.f32.mrb[11].mxu1 }
 0x10b   :  { %v1190_v55 = vadd.f32 %v1189_v54, %v1188_v51  ;;  %v1649_v56 = vadd.f32 %v1187_v50, %v1123_v47 }
 0x10d   :  { %v1651_v57 = vadd.f32 %v1190_v55, %v1126_v53 }
 0x10e   :  { %v1127_v58 = vpop.f32.mrb[12].mxu0 }
 0x10f   :  { %v1191_v59 = vpop.f32.mrb[12].mxu1  ;;  %v1128_v60 = vpop.f32.mrb[13].mxu0 }
 0x110   :  { %v1129_v61 = vadd.f32 %v1128_v60, %v1127_v58  ;;  %v1192_v62 = vpop.f32.mrb[13].mxu1  ;;  %v1130_v63 = vpop.f32.mrb[14].mxu0 }
 0x111   :  { %v1193_v0 = vadd.f32 %v1192_v62, %v1191_v59  ;;  %v1194_v1 = vpop.f32.mrb[14].mxu1  ;;  %v1131_v2 = vpop.f32.mrb[15].mxu0 }
 0x112   :  { %v1132_v3 = vadd.f32 %v1131_v2, %v1130_v63  ;;  %v1195_v4 = vpop.f32.mrb[15].mxu1 }
 0x113   :  { %v1196_v5 = vadd.f32 %v1195_v4, %v1194_v1  ;;  %v1653_v6 = vadd.f32 %v1193_v0, %v1129_v61 }
 0x115   :  { %v1655_v7 = vadd.f32 %v1196_v5, %v1132_v3 }
 0x116   :  { %v1133_v8 = vpop.f32.mrb[16].mxu0 }
 0x117   :  { %v1197_v9 = vpop.f32.mrb[16].mxu1  ;;  %v1134_v10 = vpop.f32.mrb[17].mxu0 }
 0x118   :  { %v1135_v11 = vadd.f32 %v1134_v10, %v1133_v8  ;;  %v1198_v12 = vpop.f32.mrb[17].mxu1  ;;  %v1136_v13 = vpop.f32.mrb[18].mxu0 }
 0x119   :  { %v1199_v14 = vadd.f32 %v1198_v12, %v1197_v9  ;;  %v1200_v15 = vpop.f32.mrb[18].mxu1  ;;  %v1137_v16 = vpop.f32.mrb[19].mxu0  ;;  %v1092_v9 = vld [vmem:[%s1724_s2] ss:$0 sm:$0xff] }
 0x11a   :  { %v1138_v17 = vadd.f32 %v1137_v16, %v1136_v13  ;;  %v1201_v18 = vpop.f32.mrb[19].mxu1 }
 0x11b   :  { %v1202_v19 = vadd.f32 %v1201_v18, %v1200_v15  ;;  %v791_v20 = vadd.f32 %v1199_v14, %v1135_v11 }
 0x11d   :  { %v1657_v21 = vadd.f32 %v1202_v19, %v1138_v17 }
 0x11e   :  { %v1139_v22 = vpop.f32.mrb[20].mxu0 }
 0x11f   :  { %v1203_v23 = vpop.f32.mrb[20].mxu1  ;;  %v1140_v24 = vpop.f32.mrb[21].mxu0 }
 0x120   :  { %v1141_v25 = vadd.f32 %v1140_v24, %v1139_v22  ;;  %v1204_v26 = vpop.f32.mrb[21].mxu1  ;;  %v1142_v27 = vpop.f32.mrb[22].mxu0 }
 0x121   :  { %v1205_v30 = vadd.f32 %v1204_v26, %v1203_v23  ;;  %v1206_v31 = vpop.f32.mrb[22].mxu1  ;;  %v1143_v32 = vpop.f32.mrb[23].mxu0 }
 0x122   :  { %v1144_v33 = vadd.f32 %v1143_v32, %v1142_v27  ;;  %v1207_v34 = vpop.f32.mrb[23].mxu1 }
 0x123   :  { %v1208_v35 = vadd.f32 %v1207_v34, %v1206_v31  ;;  %v799_v36 = vadd.f32 %v1205_v30, %v1141_v25 }
 0x125   :  { %v802_v37 = vadd.f32 %v1208_v35, %v1144_v33 }
 0x126   :  { %v1145_v38 = vpop.f32.mrb[24].mxu0 }
 0x127   :  { %v1209_v39 = vpop.f32.mrb[24].mxu1  ;;  %v1146_v40 = vpop.f32.mrb[25].mxu0 }
 0x128   :  { %v1147_v41 = vadd.f32 %v1146_v40, %v1145_v38  ;;  %v1210_v44 = vpop.f32.mrb[25].mxu1  ;;  %v1148_v45 = vpop.f32.mrb[26].mxu0 }
 0x129   :  { %v1211_v46 = vadd.f32 %v1210_v44, %v1209_v39  ;;  %v1212_v47 = vpop.f32.mrb[26].mxu1  ;;  %v1149_v48 = vpop.f32.mrb[27].mxu0 }
 0x12a   :  { %v1150_v49 = vadd.f32 %v1149_v48, %v1148_v45  ;;  %v1213_v50 = vpop.f32.mrb[27].mxu1 }
 0x12b   :  { %v1214_v51 = vadd.f32 %v1213_v50, %v1212_v47  ;;  %v807_v52 = vadd.f32 %v1211_v46, %v1147_v41 }
 0x12d   :  { %v1659_v53 = vadd.f32 %v1214_v51, %v1150_v49 }
 0x12e   :  { %v1151_v54 = vpop.f32.mrb[28].mxu0 }
 0x12f   :  { %v1215_v55 = vpop.f32.mrb[28].mxu1  ;;  %v1152_v58 = vpop.f32.mrb[29].mxu0 }
 0x130   :  { %v1153_v59 = vadd.f32 %v1152_v58, %v1151_v54  ;;  %v1216_v60 = vpop.f32.mrb[29].mxu1  ;;  %v1154_v61 = vpop.f32.mrb[30].mxu0 }
 0x131   :  { %v1217_v62 = vadd.f32 %v1216_v60, %v1215_v55  ;;  %v1218_v63 = vpop.f32.mrb[30].mxu1  ;;  %v1155_v0 = vpop.f32.mrb[31].mxu0 }
 0x132   :  { %v1156_v1 = vadd.f32 %v1155_v0, %v1154_v61  ;;  %v1219_v2 = vpop.f32.mrb[31].mxu1 }
 0x133   :  { %v1220_v3 = vadd.f32 %v1219_v2, %v1218_v63  ;;  %v815_v4 = vadd.f32 %v1217_v62, %v1153_v59 }
 0x135   :  { %v818_v5 = vadd.f32 %v1220_v3, %v1156_v1 }
 0x136   :  { %v1255_v8 = vpop.f32.mrb[32].mxu0 }
 0x137   :  { %v864_v10 = vadd.f32 %v1255_v8, %v1645_v42  ;;  %v1263_v11 = vpop.f32.mrb[32].mxu1  ;;  %v855_v12 = vpop.f32.mrb[33].mxu0 }
 0x138   :  { %v896_v13 = vadd.f32 %v1263_v11, %v799_v36  ;;  %v856_v14 = vadd.f32 %v855_v12, %v1641_v28  ;;  %v887_v15 = vpop.f32.mrb[33].mxu1  ;;  %v1256_v16 = vpop.f32.mrb[34].mxu0 }
 0x139   :  { %v978_v17 = vadd.f32 %v1092_v9, %v864_v10  ;;  %v888_v18 = vadd.f32 %v887_v15, %v791_v20  ;;  %v867_v19 = vadd.f32 %v1256_v16, %v1647_v43  ;;  %v1264_v22 = vpop.f32.mrb[34].mxu1  ;;  %v858_v23 = vpop.f32.mrb[35].mxu0 }
 0x13a   :  { %v986_v24 = vadd.f32 %v1092_v9, %v896_v13  ;;  %v976_v25 = vadd.f32 %v1092_v9, %v856_v14  ;;  %v899_v26 = vadd.f32 %v1264_v22, %v802_v37  ;;  %v859_v27 = vadd.f32 %v858_v23, %v1643_v29  ;;  %v890_v30 = vpop.f32.mrb[35].mxu1 }
 0x13b   :  { %994 = vst [vmem:[%s1725_s3 + $0x10] sm:$0xff] %v978_v17  ;;  %v984_v42 = vadd.f32 %v1092_v9, %v888_v18  ;;  %v979_v28 = vadd.f32 %v1092_v9, %v867_v19  ;;  %v891_v31 = vadd.f32 %v890_v30, %v1657_v21 }
 0x13c   :  { %1002 = vst [vmem:[%s1725_s3 + $0x50] sm:$0xff] %v986_v24  ;;  %992 = vst [vmem:[%s1725_s3] sm:$0xff] %v976_v25  ;;  %v987_v43 = vadd.f32 %v1092_v9, %v899_v26  ;;  %v977_v20 = vadd.f32 %v1092_v9, %v859_v27 }
 0x13d   :  { %1000 = vst [vmem:[%s1725_s3 + $0x40] sm:$0xff] %v984_v42  ;;  %995 = vst [vmem:[%s1725_s3 + $0x18] sm:$0xff] %v979_v28  ;;  %v985_v29 = vadd.f32 %v1092_v9, %v891_v31 }
 0x13e   :  { %1003 = vst [vmem:[%s1725_s3 + $0x58] sm:$0xff] %v987_v43  ;;  %993 = vst [vmem:[%s1725_s3 + $0x8] sm:$0xff] %v977_v20  ;;  %v1259_v21 = vpop.f32.mrb[36].mxu0 }
 0x13f   :  { %1001 = vst [vmem:[%s1725_s3 + $0x48] sm:$0xff] %v985_v29  ;;  %v880_v32 = vadd.f32 %v1259_v21, %v1653_v6  ;;  %v1267_v33 = vpop.f32.mrb[36].mxu1  ;;  %v871_v34 = vpop.f32.mrb[37].mxu0 }
 0x140   :  { %v912_v35 = vadd.f32 %v1267_v33, %v815_v4  ;;  %v872_v36 = vadd.f32 %v871_v34, %v1649_v56  ;;  %v903_v37 = vpop.f32.mrb[37].mxu1  ;;  %v1260_v38 = vpop.f32.mrb[38].mxu0 }
 0x141   :  { %v982_v39 = vadd.f32 %v1092_v9, %v880_v32  ;;  %v904_v40 = vadd.f32 %v903_v37, %v807_v52  ;;  %v883_v41 = vadd.f32 %v1260_v38, %v1655_v7  ;;  %v1268_v44 = vpop.f32.mrb[38].mxu1  ;;  %v874_v45 = vpop.f32.mrb[39].mxu0 }
 0x142   :  { %v990_v46 = vadd.f32 %v1092_v9, %v912_v35  ;;  %v980_v47 = vadd.f32 %v1092_v9, %v872_v36  ;;  %v915_v48 = vadd.f32 %v1268_v44, %v818_v5  ;;  %v875_v49 = vadd.f32 %v874_v45, %v1651_v57  ;;  %v906_v50 = vpop.f32.mrb[39].mxu1 }
 0x143   :  { %998 = vst [vmem:[%s1725_s3 + $0x30] sm:$0xff] %v982_v39  ;;  %v988_v6 = vadd.f32 %v1092_v9, %v904_v40  ;;  %v983_v56 = vadd.f32 %v1092_v9, %v883_v41  ;;  %v907_v51 = vadd.f32 %v906_v50, %v1659_v53 }
 0x144   :  { %1006 = vst [vmem:[%s1725_s3 + $0x70] sm:$0xff] %v990_v46  ;;  %996 = vst [vmem:[%s1725_s3 + $0x20] sm:$0xff] %v980_v47  ;;  %v991_v7 = vadd.f32 %v1092_v9, %v915_v48  ;;  %v981_v52 = vadd.f32 %v1092_v9, %v875_v49 }
 0x145   :  { %1004 = vst [vmem:[%s1725_s3 + $0x60] sm:$0xff] %v988_v6  ;;  %999 = vst [vmem:[%s1725_s3 + $0x38] sm:$0xff] %v983_v56  ;;  %v989_v57 = vadd.f32 %v1092_v9, %v907_v51 }
 0x146   :  { %1007 = vst [vmem:[%s1725_s3 + $0x78] sm:$0xff] %v991_v7  ;;  %997 = vst [vmem:[%s1725_s3 + $0x28] sm:$0xff] %v981_v52 }
 0x147   :  { %1005 = vst [vmem:[%s1725_s3 + $0x68] sm:$0xff] %v989_v57 }

// kernel: _lambda_.68
= control target key start
LH: loop header
LB: loop body
LE: loop exit
PB: predicated region body
PF: predicated region fallthrough
CT: control target
= control target key end

     0   :  { %vm14_vm0 = vcmask 516096   ;;  %vm34_vm1 = vcmask 523264   ;;  %v140_v0 = vmov 0.0   ;;  %s258_s0 = inlined_call_operand.vmem [shape: f32[128,64], index: 0, kind: input, shape index: {}]   ;;  %s259_s1 = inlined_call_operand.vmem [shape: f32[1,64], index: 1, kind: output, shape index: {0}]   ;;  %s260_s2 = inlined_call_operand.vmem [shape: f32[1,64], index: 2, kind: output, shape index: {1}]  }
   0x1   :  { %15 = vst.msk [vmem:[%s259_s1] sm:$0x1] %vm14_vm0, %v140_v0  ;;  %v17_v1 = vld [vmem:[%s258_s0] sm:$0xff]  ;;  %v18_v2 = vld [vmem:[%s258_s0 + $0x8] sm:$0xff]  ;;  %v19_v3 = vld [vmem:[%s258_s0 + $0x10] sm:$0xff] }
   0x2   :  { %16 = vst.msk [vmem:[%s260_s2] sm:$0x1] %vm14_vm0, %v140_v0  ;;  %v35_v4 = vsel %vm34_vm1, %v17_v1, 0.0  ;;  %v36_v5 = vsel %vm34_vm1, %v18_v2, 0.0  ;;  %v38_v6 = vsel %vm34_vm1, %v19_v3, 0.0  ;;  %v20_v7 = vld [vmem:[%s258_s0 + $0x18] sm:$0xff]  ;;  %v76_v15 = vmul.f32 %v17_v1, %v17_v1 }
   0x3   :  { %v37_v8 = vadd.f32 %v36_v5, %v35_v4  ;;  %v40_v9 = vsel %vm34_vm1, %v20_v7, 0.0  ;;  %v21_v10 = vld [vmem:[%s258_s0 + $0x20] sm:$0xff]  ;;  %v22_v13 = vld [vmem:[%s258_s0 + $0x28] sm:$0xff]  ;;  %v77_v16 = vmul.f32 %v18_v2, %v18_v2  ;;  %v78_v17 = vmul.f32 %v19_v3, %v19_v3  ;;  %v23_v19 = vld [vmem:[%s258_s0 + $0x30] sm:$0xff] }
   0x4   :  { %v42_v12 = vsel %vm34_vm1, %v21_v10, 0.0  ;;  %v44_v18 = vsel %vm34_vm1, %v22_v13, 0.0  ;;  %v79_v21 = vmul.f32 %v20_v7, %v20_v7  ;;  %v46_v22 = vsel %vm34_vm1, %v23_v19, 0.0  ;;  %v24_v24 = vld [vmem:[%s258_s0 + $0x38] sm:$0xff]  ;;  %v25_v31 = vld [vmem:[%s258_s0 + $0x40] sm:$0xff]  ;;  %v26_v37 = vld [vmem:[%s258_s0 + $0x48] sm:$0xff] }
   0x5   :  { %v39_v11 = vadd.f32 %v38_v6, %v37_v8  ;;  %v80_v23 = vmul.f32 %v21_v10, %v21_v10  ;;  %v92_v26 = vsel %vm34_vm1, %v76_v15, 0.0  ;;  %v93_v27 = vsel %vm34_vm1, %v77_v16, 0.0  ;;  %v27_v43 = vld [vmem:[%s258_s0 + $0x50] sm:$0xff]  ;;  %v28_v49 = vld [vmem:[%s258_s0 + $0x58] sm:$0xff]  ;;  %v29_v55 = vld [vmem:[%s258_s0 + $0x60] sm:$0xff] }
   0x6   :  { %v95_v28 = vsel %vm34_vm1, %v78_v17, 0.0  ;;  %v48_v29 = vsel %vm34_vm1, %v24_v24, 0.0  ;;  %v94_v30 = vadd.f32 %v93_v27, %v92_v26  ;;  %v81_v33 = vmul.f32 %v22_v13, %v22_v13  ;;  %v30_v61 = vld [vmem:[%s258_s0 + $0x68] sm:$0xff]  ;;  %v31_v3 = vld [vmem:[%s258_s0 + $0x70] sm:$0xff] }
   0x7   :  { %v41_v14 = vadd.f32 %v40_v9, %v39_v11  ;;  %v97_v34 = vsel %vm34_vm1, %v79_v21, 0.0  ;;  %v50_v35 = vsel %vm34_vm1, %v25_v31, 0.0  ;;  %v82_v39 = vmul.f32 %v23_v19, %v23_v19  ;;  %v32_v9 = vld [vmem:[%s258_s0 + $0x78] sm:$0xff] }
   0x8   :  { %v96_v36 = vadd.f32 %v95_v28, %v94_v30  ;;  %v99_v40 = vsel %vm34_vm1, %v80_v23, 0.0  ;;  %v52_v41 = vsel %vm34_vm1, %v26_v37, 0.0  ;;  %v83_v45 = vmul.f32 %v24_v24, %v24_v24 }
   0x9   :  { %v43_v20 = vadd.f32 %v42_v12, %v41_v14  ;;  %v101_v46 = vsel %vm34_vm1, %v81_v33, 0.0  ;;  %v54_v47 = vsel %vm34_vm1, %v27_v43, 0.0  ;;  %v84_v51 = vmul.f32 %v25_v31, %v25_v31 }
   0xa   :  { %v98_v42 = vadd.f32 %v97_v34, %v96_v36  ;;  %v103_v52 = vsel %vm34_vm1, %v82_v39, 0.0  ;;  %v56_v53 = vsel %vm34_vm1, %v28_v49, 0.0  ;;  %v85_v57 = vmul.f32 %v26_v37, %v26_v37  ;;  %v33_v36 = vld [vmem:[%s259_s1] sm:$0x1] }
   0xb   :  { %v45_v25 = vadd.f32 %v44_v18, %v43_v20  ;;  %v105_v58 = vsel %vm34_vm1, %v83_v45, 0.0  ;;  %v58_v59 = vsel %vm34_vm1, %v29_v55, 0.0  ;;  %v86_v63 = vmul.f32 %v27_v43, %v27_v43 }
   0xc   :  { %v100_v48 = vadd.f32 %v99_v40, %v98_v42  ;;  %v107_v0 = vsel %vm34_vm1, %v84_v51, 0.0  ;;  %v60_v1 = vsel %vm34_vm1, %v30_v61, 0.0  ;;  %v87_v5 = vmul.f32 %v28_v49, %v28_v49 }
   0xd   :  { %v47_v32 = vadd.f32 %v46_v22, %v45_v25  ;;  %v109_v6 = vsel %vm34_vm1, %v85_v57, 0.0  ;;  %v62_v7 = vsel %vm34_vm1, %v31_v3, 0.0  ;;  %v88_v11 = vmul.f32 %v29_v55, %v29_v55 }
   0xe   :  { %v102_v54 = vadd.f32 %v101_v46, %v100_v48  ;;  %v111_v12 = vsel %vm34_vm1, %v86_v63, 0.0  ;;  %v64_v13 = vsel %vm34_vm1, %v32_v9, 0.0  ;;  %v89_v16 = vmul.f32 %v30_v61, %v30_v61 }
   0xf   :  { %v49_v38 = vadd.f32 %v48_v29, %v47_v32  ;;  %v113_v17 = vsel %vm34_vm1, %v87_v5, 0.0  ;;  %v90_v20 = vmul.f32 %v31_v3, %v31_v3  ;;  %v115_v21 = vsel %vm34_vm1, %v88_v11, 0.0 }
  0x10   :  { %v104_v60 = vadd.f32 %v103_v52, %v102_v54  ;;  %v91_v24 = vmul.f32 %v32_v9, %v32_v9  ;;  %v117_v25 = vsel %vm34_vm1, %v89_v16, 0.0 }
  0x11   :  { %v51_v44 = vadd.f32 %v50_v35, %v49_v38  ;;  %v119_v28 = vsel %vm34_vm1, %v90_v20, 0.0 }
  0x12   :  { %v106_v2 = vadd.f32 %v105_v58, %v104_v60  ;;  %v121_v31 = vsel %vm34_vm1, %v91_v24, 0.0 }
  0x13   :  { %v53_v50 = vadd.f32 %v52_v41, %v51_v44  ;;  %v75_v44 = vld [vmem:[%s260_s2] sm:$0x1] }
  0x14   :  { %v108_v8 = vadd.f32 %v107_v0, %v106_v2 }
  0x15   :  { %v55_v56 = vadd.f32 %v54_v47, %v53_v50 }
  0x16   :  { %v110_v14 = vadd.f32 %v109_v6, %v108_v8 }
  0x17   :  { %v57_v62 = vadd.f32 %v56_v53, %v55_v56 }
  0x18   :  { %v112_v18 = vadd.f32 %v111_v12, %v110_v14 }
  0x19   :  { %v59_v4 = vadd.f32 %v58_v59, %v57_v62 }
  0x1a   :  { %v114_v22 = vadd.f32 %v113_v17, %v112_v18 }
  0x1b   :  { %v61_v10 = vadd.f32 %v60_v1, %v59_v4 }
  0x1c   :  { %v116_v26 = vadd.f32 %v115_v21, %v114_v22 }
  0x1d   :  { %v63_v15 = vadd.f32 %v62_v7, %v61_v10 }
  0x1e   :  { %v118_v29 = vadd.f32 %v117_v25, %v116_v26 }
  0x1f   :  { %v65_v19 = vadd.f32 %v64_v13, %v63_v15 }
  0x20   :  { %v120_v32 = vadd.f32 %v119_v28, %v118_v29 }
  0x21   :  { %v66_v23 = vrot.slane %v65_v19, 4 }
  0x22   :  { %v122_v34 = vadd.f32 %v121_v31, %v120_v32 }
  0x23   :  { %v67_v27 = vadd.f32 %v66_v23, %v65_v19 }
  0x24   :  { %v123_v37 = vrot.slane %v122_v34, 4 }
  0x25   :  { %v68_v30 = vrot.slane %v67_v27, 2 }
  0x26   :  { %v124_v39 = vadd.f32 %v123_v37, %v122_v34 }
  0x27   :  { %v69_v33 = vadd.f32 %v68_v30, %v67_v27 }
  0x28   :  { %v125_v41 = vrot.slane %v124_v39, 2 }
  0x29   :  { %v70_v35 = vrot.slane %v69_v33, 1 }
  0x2a   :  { %v126_v42 = vadd.f32 %v125_v41, %v124_v39 }
  0x2b   :  { %v71_v38 = vadd.f32 %v70_v35, %v69_v33 }
  0x2c   :  { %v127_v43 = vrot.slane %v126_v42, 1 }
  0x2d   :  { %v72_v40 = vadd.f32 %v71_v38, %v33_v36 }
  0x2e   :  { %v128_v45 = vadd.f32 %v127_v43, %v126_v42 }
  0x2f   :  { %74 = vst.msk [vmem:[%s259_s1] sm:$0x1] %vm14_vm0, %v72_v40 }
  0x30   :  { %v129_v46 = vadd.f32 %v128_v45, %v75_v44 }
  0x32   :  { %130 = vst.msk [vmem:[%s260_s2] sm:$0x1] %vm14_vm0, %v129_v46 }

// kernel: _lambda_.69
= control target key start
LH: loop header
LB: loop body
LE: loop exit
PB: predicated region body
PF: predicated region fallthrough
CT: control target
= control target key end

     0   :  { %vm156_vm0 = vcmask 519168   ;;  %s385_s0 = inlined_call_operand.vmem [shape: f32[128,64], index: 0, kind: input, shape index: {}]   ;;  %s386_s1 = inlined_call_operand.vmem [shape: f32[1,64], index: 1, kind: input, shape index: {}]   ;;  %s387_s2 = inlined_call_operand.vmem [shape: f32[1,64], index: 2, kind: input, shape index: {}]   ;;  %s388_s3 = inlined_call_operand.vmem [shape: bf16[128,64], index: 3, kind: output, shape index: {}]  }
   0x1   :  { %v14_v0 = vld [vmem:[%s385_s0] sm:$0xff]  ;;  %v15_v4 = vld [vmem:[%s385_s0 + $0x8] sm:$0xff]  ;;  %v16_v5 = vld [vmem:[%s385_s0 + $0x10] sm:$0xff] }
   0x2   :  { %v237_v1 = vld [vmem:[%s386_s1] ss:$0 sm:$0xff]  ;;  %v17_v6 = vld [vmem:[%s385_s0 + $0x18] sm:$0xff]  ;;  %v19_v11 = vld [vmem:[%s385_s0 + $0x28] sm:$0xff] }
   0x3   :  { %v242_v2 = vld [vmem:[%s387_s2] ss:$0 sm:$0xff]  ;;  %v37_v3 = vmul.f32 %v237_v1, %v14_v0  ;;  %v38_v7 = vmul.f32 %v237_v1, %v15_v4  ;;  %v39_v8 = vmul.f32 %v237_v1, %v16_v5  ;;  %v40_v9 = vmul.f32 %v237_v1, %v17_v6  ;;  %v20_v12 = vld [vmem:[%s385_s0 + $0x30] sm:$0xff]  ;;  %v21_v17 = vld [vmem:[%s385_s0 + $0x38] sm:$0xff] }
   0x4   :  { %v18_v10 = vld [vmem:[%s385_s0 + $0x20] sm:$0xff]  ;;  %v42_v15 = vmul.f32 %v237_v1, %v19_v11  ;;  %v43_v16 = vmul.f32 %v237_v1, %v20_v12  ;;  %v44_v21 = vmul.f32 %v237_v1, %v21_v17  ;;  %v23_v35 = vld [vmem:[%s385_s0 + $0x48] sm:$0xff]  ;;  %v24_v36 = vld [vmem:[%s385_s0 + $0x50] sm:$0xff] }
   0x5   :  { %v60_v13 = vadd.f32 %v242_v2, %v37_v3  ;;  %v41_v14 = vmul.f32 %v237_v1, %v18_v10  ;;  %v61_v18 = vadd.f32 %v242_v2, %v38_v7  ;;  %v62_v19 = vadd.f32 %v242_v2, %v39_v8  ;;  %v22_v30 = vld [vmem:[%s385_s0 + $0x40] sm:$0xff]  ;;  %v25_v37 = vld [vmem:[%s385_s0 + $0x58] sm:$0xff]  ;;  %v27_v43 = vld [vmem:[%s385_s0 + $0x68] sm:$0xff] }
   0x6   :  { %v63_v20 = vadd.f32 %v242_v2, %v40_v9  ;;  %v65_v24 = vadd.f32 %v242_v2, %v42_v15  ;;  %v66_v25 = vadd.f32 %v242_v2, %v43_v16  ;;  %v67_v29 = vadd.f32 %v242_v2, %v44_v21  ;;  %v26_v42 = vld [vmem:[%s385_s0 + $0x60] sm:$0xff]  ;;  %v28_v44 = vld [vmem:[%s385_s0 + $0x70] sm:$0xff]  ;;  %v29_v49 = vld [vmem:[%s385_s0 + $0x78] sm:$0xff] }
   0x7   :  { %v76_v22 = vmax.f32 %v60_v13, 0.0  ;;  %v64_v23 = vadd.f32 %v242_v2, %v41_v14  ;;  %v77_v26 = vmax.f32 %v61_v18, 0.0  ;;  %v78_v27 = vmax.f32 %v62_v19, 0.0 }
   0x8   :  { %v79_v28 = vmax.f32 %v63_v20, 0.0  ;;  %v81_v33 = vmax.f32 %v65_v24, 0.0  ;;  %v82_v34 = vmax.f32 %v66_v25, 0.0  ;;  %v83_v41 = vmax.f32 %v67_v29, 0.0 }
   0x9   :  { %v195_v31 = vpack.c.bf16 %v76_v22, %v76_v22  ;;  %v80_v32 = vmax.f32 %v64_v23, 0.0  ;;  %v196_v38 = vpack.c.bf16 %v77_v26, %v77_v26  ;;  %v197_v39 = vpack.c.bf16 %v78_v27, %v78_v27 }
   0xa   :  { %v198_v40 = vpack.c.bf16 %v79_v28, %v79_v28  ;;  %v200_v46 = vpack.c.bf16 %v81_v33, %v81_v33  ;;  %v201_v47 = vpack.c.bf16 %v82_v34, %v82_v34  ;;  %v45_v48 = vmul.f32 %v237_v1, %v22_v30 }
   0xb   :  { %157 = vst.msk [vmem:[%s388_s3] sm:$0xf] %vm156_vm0, %v195_v31  ;;  %v199_v45 = vpack.c.bf16 %v80_v32, %v80_v32  ;;  %158 = vst.msk [vmem:[%s388_s3 + $0x4] sm:$0xf] %vm156_vm0, %v196_v38  ;;  %v202_v50 = vpack.c.bf16 %v83_v41, %v83_v41  ;;  %v46_v51 = vmul.f32 %v237_v1, %v23_v35 }
   0xc   :  { %159 = vst.msk [vmem:[%s388_s3 + $0x8] sm:$0xf] %vm156_vm0, %v197_v39  ;;  %160 = vst.msk [vmem:[%s388_s3 + $0xc] sm:$0xf] %vm156_vm0, %v198_v40  ;;  %v47_v52 = vmul.f32 %v237_v1, %v24_v36  ;;  %v48_v53 = vmul.f32 %v237_v1, %v25_v37  ;;  %v68_v54 = vadd.f32 %v242_v2, %v45_v48 }
   0xd   :  { %161 = vst.msk [vmem:[%s388_s3 + $0x10] sm:$0xf] %vm156_vm0, %v199_v45  ;;  %162 = vst.msk [vmem:[%s388_s3 + $0x14] sm:$0xf] %vm156_vm0, %v200_v46  ;;  %v49_v55 = vmul.f32 %v237_v1, %v26_v42  ;;  %v50_v56 = vmul.f32 %v237_v1, %v27_v43  ;;  %v51_v57 = vmul.f32 %v237_v1, %v28_v44 }
   0xe   :  { %163 = vst.msk [vmem:[%s388_s3 + $0x18] sm:$0xf] %vm156_vm0, %v201_v47  ;;  %164 = vst.msk [vmem:[%s388_s3 + $0x1c] sm:$0xf] %vm156_vm0, %v202_v50  ;;  %v69_v58 = vadd.f32 %v242_v2, %v46_v51  ;;  %v70_v59 = vadd.f32 %v242_v2, %v47_v52  ;;  %v71_v60 = vadd.f32 %v242_v2, %v48_v53  ;;  %v84_v62 = vmax.f32 %v68_v54, 0.0 }
   0xf   :  { %v52_v61 = vmul.f32 %v237_v1, %v29_v49  ;;  %v72_v63 = vadd.f32 %v242_v2, %v49_v55  ;;  %v73_v0 = vadd.f32 %v242_v2, %v50_v56  ;;  %v74_v3 = vadd.f32 %v242_v2, %v51_v57 }
  0x10   :  { %v85_v4 = vmax.f32 %v69_v58, 0.0  ;;  %v86_v5 = vmax.f32 %v70_v59, 0.0  ;;  %v87_v6 = vmax.f32 %v71_v60, 0.0  ;;  %v203_v8 = vpack.c.bf16 %v84_v62, %v84_v62 }
  0x11   :  { %v75_v7 = vadd.f32 %v242_v2, %v52_v61  ;;  %v88_v9 = vmax.f32 %v72_v63, 0.0  ;;  %v89_v10 = vmax.f32 %v73_v0, 0.0  ;;  %v90_v11 = vmax.f32 %v74_v3, 0.0 }
  0x12   :  { %v204_v12 = vpack.c.bf16 %v85_v4, %v85_v4  ;;  %v205_v13 = vpack.c.bf16 %v86_v5, %v86_v5  ;;  %v206_v14 = vpack.c.bf16 %v87_v6, %v87_v6  ;;  %165 = vst.msk [vmem:[%s388_s3 + $0x20] sm:$0xf] %vm156_vm0, %v203_v8 }
  0x13   :  { %v91_v1 = vmax.f32 %v75_v7, 0.0  ;;  %v207_v15 = vpack.c.bf16 %v88_v9, %v88_v9  ;;  %v208_v16 = vpack.c.bf16 %v89_v10, %v89_v10  ;;  %v209_v17 = vpack.c.bf16 %v90_v11, %v90_v11 }
  0x14   :  { %166 = vst.msk [vmem:[%s388_s3 + $0x24] sm:$0xf] %vm156_vm0, %v204_v12  ;;  %167 = vst.msk [vmem:[%s388_s3 + $0x28] sm:$0xf] %vm156_vm0, %v205_v13 }
  0x15   :  { %168 = vst.msk [vmem:[%s388_s3 + $0x2c] sm:$0xf] %vm156_vm0, %v206_v14  ;;  %v210_v2 = vpack.c.bf16 %v91_v1, %v91_v1  ;;  %169 = vst.msk [vmem:[%s388_s3 + $0x30] sm:$0xf] %vm156_vm0, %v207_v15 }
  0x16   :  { %170 = vst.msk [vmem:[%s388_s3 + $0x34] sm:$0xf] %vm156_vm0, %v208_v16  ;;  %171 = vst.msk [vmem:[%s388_s3 + $0x38] sm:$0xf] %vm156_vm0, %v209_v17 }
  0x17   :  { %172 = vst.msk [vmem:[%s388_s3 + $0x3c] sm:$0xf] %vm156_vm0, %v210_v2 }

// kernel: _lambda_.72
= control target key start
LH: loop header
LB: loop body
LE: loop exit
PB: predicated region body
PF: predicated region fallthrough
CT: control target
= control target key end

     0   :  { %vm207_vm0 = vcmask 519168   ;;  %s504_s0 = inlined_call_operand.vmem [shape: f32[128,64], index: 0, kind: input, shape index: {}]   ;;  %s505_s1 = inlined_call_operand.vmem [shape: bf16[128,64], index: 1, kind: input, shape index: {}]   ;;  %s506_s2 = inlined_call_operand.vmem [shape: f32[1,64], index: 2, kind: input, shape index: {}]   ;;  %s507_s3 = inlined_call_operand.vmem [shape: f32[1,64], index: 3, kind: input, shape index: {}]   ;;  %s508_s4 = inlined_call_operand.vmem [shape: bf16[128,64], index: 4, kind: output, shape index: {}]  }
   0x1   :  { %v17_v0 = vld [vmem:[%s504_s0] sm:$0xff]  ;;  %v18_v5 = vld [vmem:[%s504_s0 + $0x8] sm:$0xff]  ;;  %v19_v6 = vld [vmem:[%s504_s0 + $0x10] sm:$0xff] }
   0x2   :  { %v332_v1 = vld [vmem:[%s506_s2] ss:$0 sm:$0xff]  ;;  %v294_v11 = vld [vmem:[%s505_s1 + $0x8] sm:$0xff]   ;;  %v20_v12 = vld [vmem:[%s504_s0 + $0x18] sm:$0xff] }
   0x3   :  { %v337_v2 = vld [vmem:[%s507_s3] ss:$0 sm:$0xff]  ;;  %v40_v3 = vmul.f32 %v332_v1, %v17_v0  ;;  %v41_v8 = vmul.f32 %v332_v1, %v18_v5  ;;  %v42_v10 = vmul.f32 %v332_v1, %v19_v6  ;;  %v268_v15 = vunpack.c.l.bf16 %v294_v11  ;;  %v295_v18 = vld [vmem:[%s505_s1 + $0x10] sm:$0xff]   ;;  %v22_v19 = vld [vmem:[%s504_s0 + $0x28] sm:$0xff] }
   0x4   :  { %v263_v4 = vld [vmem:[%s505_s1] sm:$0xff]   ;;  %v43_v16 = vmul.f32 %v332_v1, %v20_v12  ;;  %v269_v17 = vunpack.c.h.bf16 %v294_v11  ;;  %v23_v20 = vld [vmem:[%s504_s0 + $0x30] sm:$0xff]  ;;  %v272_v24 = vunpack.c.l.bf16 %v295_v18  ;;  %v296_v25 = vld [vmem:[%s505_s1 + $0x18] sm:$0xff]   ;;  %v45_v28 = vmul.f32 %v332_v1, %v22_v19 }
   0x5   :  { %v264_v7 = vunpack.c.l.bf16 %v263_v4  ;;  %v265_v9 = vunpack.c.h.bf16 %v263_v4  ;;  %v21_v13 = vld [vmem:[%s504_s0 + $0x20] sm:$0xff]  ;;  %v63_v14 = vadd.f32 %v337_v2, %v40_v3  ;;  %v64_v21 = vadd.f32 %v337_v2, %v41_v8  ;;  %v24_v34 = vld [vmem:[%s504_s0 + $0x38] sm:$0xff]  ;;  %v26_v53 = vld [vmem:[%s504_s0 + $0x48] sm:$0xff] }
   0x6   :  { %v65_v22 = vadd.f32 %v337_v2, %v42_v10  ;;  %v44_v23 = vmul.f32 %v332_v1, %v21_v13  ;;  %v66_v27 = vadd.f32 %v337_v2, %v43_v16  ;;  %v273_v29 = vunpack.c.h.bf16 %v295_v18  ;;  %v25_v47 = vld [vmem:[%s504_s0 + $0x40] sm:$0xff]  ;;  %v27_v58 = vld [vmem:[%s504_s0 + $0x50] sm:$0xff]  ;;  %v298_v59 = vld [vmem:[%s505_s1 + $0x28] sm:$0xff]  }
   0x7   :  { %v111_v26 = vadd.f32 %v264_v7, %v63_v14  ;;  %v112_v30 = vadd.f32 %v265_v9, %v64_v21  ;;  %v46_v33 = vmul.f32 %v332_v1, %v23_v20  ;;  %v68_v37 = vadd.f32 %v337_v2, %v45_v28  ;;  %v297_v48 = vld [vmem:[%s505_s1 + $0x20] sm:$0xff]   ;;  %v28_v0 = vld [vmem:[%s504_s0 + $0x58] sm:$0xff]  ;;  %v299_v8 = vld [vmem:[%s505_s1 + $0x30] sm:$0xff]  }
   0x8   :  { %v113_v31 = vadd.f32 %v268_v15, %v65_v22  ;;  %v67_v32 = vadd.f32 %v337_v2, %v44_v23  ;;  %v114_v36 = vadd.f32 %v269_v17, %v66_v27  ;;  %v276_v38 = vunpack.c.l.bf16 %v296_v25  ;;  %v29_v7 = vld [vmem:[%s504_s0 + $0x60] sm:$0xff]  ;;  %v30_v13 = vld [vmem:[%s504_s0 + $0x68] sm:$0xff]  ;;  %v31_v22 = vld [vmem:[%s504_s0 + $0x70] sm:$0xff] }
   0x9   :  { %v127_v35 = vmax.f32 %v111_v26, 0.0  ;;  %v128_v39 = vmax.f32 %v112_v30, 0.0  ;;  %v69_v42 = vadd.f32 %v337_v2, %v46_v33  ;;  %v116_v45 = vadd.f32 %v273_v29, %v68_v37  ;;  %v300_v27 = vld [vmem:[%s505_s1 + $0x38] sm:$0xff]  }
   0xa   :  { %v129_v40 = vmax.f32 %v113_v31, 0.0  ;;  %v115_v41 = vadd.f32 %v272_v24, %v67_v32  ;;  %v130_v44 = vmax.f32 %v114_v36, 0.0  ;;  %v47_v46 = vmul.f32 %v332_v1, %v24_v34  ;;  %v32_v36 = vld [vmem:[%s504_s0 + $0x78] sm:$0xff] }
   0xb   :  { %v246_v43 = vpack.c.bf16 %v127_v35, %v127_v35  ;;  %v247_v49 = vpack.c.bf16 %v128_v39, %v128_v39  ;;  %v117_v52 = vadd.f32 %v276_v38, %v69_v42  ;;  %v132_v55 = vmax.f32 %v116_v45, 0.0 }
   0xc   :  { %v248_v50 = vpack.c.bf16 %v129_v40, %v129_v40  ;;  %v131_v51 = vmax.f32 %v115_v41, 0.0  ;;  %v249_v54 = vpack.c.bf16 %v130_v44, %v130_v44  ;;  %v70_v56 = vadd.f32 %v337_v2, %v47_v46 }
   0xd   :  { %208 = vst.msk [vmem:[%s508_s4] sm:$0xf] %vm207_vm0, %v246_v43  ;;  %v277_v57 = vunpack.c.h.bf16 %v296_v25  ;;  %209 = vst.msk [vmem:[%s508_s4 + $0x4] sm:$0xf] %vm207_vm0, %v247_v49  ;;  %v133_v61 = vmax.f32 %v117_v52, 0.0  ;;  %v48_v62 = vmul.f32 %v332_v1, %v25_v47  ;;  %v280_v63 = vunpack.c.l.bf16 %v297_v48 }
   0xe   :  { %210 = vst.msk [vmem:[%s508_s4 + $0x8] sm:$0xf] %vm207_vm0, %v248_v50  ;;  %v250_v60 = vpack.c.bf16 %v131_v51, %v131_v51  ;;  %211 = vst.msk [vmem:[%s508_s4 + $0xc] sm:$0xf] %vm207_vm0, %v249_v54  ;;  %v251_v3 = vpack.c.bf16 %v132_v55, %v132_v55  ;;  %v49_v5 = vmul.f32 %v332_v1, %v26_v53  ;;  %v281_v6 = vunpack.c.h.bf16 %v297_v48 }
   0xf   :  { %v118_v4 = vadd.f32 %v277_v57, %v70_v56  ;;  %v252_v9 = vpack.c.bf16 %v133_v61, %v133_v61  ;;  %v71_v10 = vadd.f32 %v337_v2, %v48_v62  ;;  %v50_v11 = vmul.f32 %v332_v1, %v27_v58 }
  0x10   :  { %212 = vst.msk [vmem:[%s508_s4 + $0x10] sm:$0xf] %vm207_vm0, %v250_v60  ;;  %v284_v12 = vunpack.c.l.bf16 %v298_v59  ;;  %213 = vst.msk [vmem:[%s508_s4 + $0x14] sm:$0xf] %vm207_vm0, %v251_v3  ;;  %v72_v15 = vadd.f32 %v337_v2, %v49_v5  ;;  %v51_v16 = vmul.f32 %v332_v1, %v28_v0  ;;  %v285_v17 = vunpack.c.h.bf16 %v298_v59 }
  0x11   :  { %v134_v14 = vmax.f32 %v118_v4, 0.0  ;;  %214 = vst.msk [vmem:[%s508_s4 + $0x18] sm:$0xf] %vm207_vm0, %v252_v9  ;;  %v119_v18 = vadd.f32 %v280_v63, %v71_v10  ;;  %v73_v19 = vadd.f32 %v337_v2, %v50_v11  ;;  %v52_v20 = vmul.f32 %v332_v1, %v29_v7 }
  0x12   :  { %v288_v21 = vunpack.c.l.bf16 %v299_v8  ;;  %v120_v24 = vadd.f32 %v281_v6, %v72_v15  ;;  %v74_v25 = vadd.f32 %v337_v2, %v51_v16  ;;  %v53_v26 = vmul.f32 %v332_v1, %v30_v13 }
  0x13   :  { %v253_v23 = vpack.c.bf16 %v134_v14, %v134_v14  ;;  %v135_v28 = vmax.f32 %v119_v18, 0.0  ;;  %v121_v29 = vadd.f32 %v284_v12, %v73_v19  ;;  %v75_v30 = vadd.f32 %v337_v2, %v52_v20 }
  0x14   :  { %v289_v31 = vunpack.c.h.bf16 %v299_v8  ;;  %v136_v32 = vmax.f32 %v120_v24, 0.0  ;;  %v122_v33 = vadd.f32 %v285_v17, %v74_v25  ;;  %v76_v34 = vadd.f32 %v337_v2, %v53_v26 }
  0x15   :  { %215 = vst.msk [vmem:[%s508_s4 + $0x1c] sm:$0xf] %vm207_vm0, %v253_v23  ;;  %v54_v35 = vmul.f32 %v332_v1, %v31_v22  ;;  %v254_v37 = vpack.c.bf16 %v135_v28, %v135_v28  ;;  %v137_v38 = vmax.f32 %v121_v29, 0.0  ;;  %v123_v39 = vadd.f32 %v288_v21, %v75_v30 }
  0x16   :  { %v292_v40 = vunpack.c.l.bf16 %v300_v27  ;;  %v255_v41 = vpack.c.bf16 %v136_v32, %v136_v32  ;;  %v138_v42 = vmax.f32 %v122_v33, 0.0  ;;  %v124_v43 = vadd.f32 %v289_v31, %v76_v34 }
  0x17   :  { %v77_v44 = vadd.f32 %v337_v2, %v54_v35  ;;  %216 = vst.msk [vmem:[%s508_s4 + $0x20] sm:$0xf] %vm207_vm0, %v254_v37  ;;  %v256_v45 = vpack.c.bf16 %v137_v38, %v137_v38  ;;  %v139_v46 = vmax.f32 %v123_v39, 0.0  ;;  %v55_v47 = vmul.f32 %v332_v1, %v32_v36 }
  0x18   :  { %v293_v48 = vunpack.c.h.bf16 %v300_v27  ;;  %217 = vst.msk [vmem:[%s508_s4 + $0x24] sm:$0xf] %vm207_vm0, %v255_v41  ;;  %v257_v49 = vpack.c.bf16 %v138_v42, %v138_v42  ;;  %v140_v50 = vmax.f32 %v124_v43, 0.0 }
  0x19   :  { %v125_v51 = vadd.f32 %v292_v40, %v77_v44  ;;  %218 = vst.msk [vmem:[%s508_s4 + $0x28] sm:$0xf] %vm207_vm0, %v256_v45  ;;  %v258_v52 = vpack.c.bf16 %v139_v46, %v139_v46  ;;  %v78_v53 = vadd.f32 %v337_v2, %v55_v47 }
  0x1a   :  { %219 = vst.msk [vmem:[%s508_s4 + $0x2c] sm:$0xf] %vm207_vm0, %v257_v49  ;;  %v259_v1 = vpack.c.bf16 %v140_v50, %v140_v50 }
  0x1b   :  { %v141_v54 = vmax.f32 %v125_v51, 0.0  ;;  %220 = vst.msk [vmem:[%s508_s4 + $0x30] sm:$0xf] %vm207_vm0, %v258_v52  ;;  %v126_v55 = vadd.f32 %v293_v48, %v78_v53 }
  0x1c   :  { %221 = vst.msk [vmem:[%s508_s4 + $0x34] sm:$0xf] %vm207_vm0, %v259_v1 }
  0x1d   :  { %v260_v56 = vpack.c.bf16 %v141_v54, %v141_v54  ;;  %v142_v2 = vmax.f32 %v126_v55, 0.0 }
  0x1f   :  { %222 = vst.msk [vmem:[%s508_s4 + $0x38] sm:$0xf] %vm207_vm0, %v260_v56  ;;  %v261_v57 = vpack.c.bf16 %v142_v2, %v142_v2 }
  0x21   :  { %223 = vst.msk [vmem:[%s508_s4 + $0x3c] sm:$0xf] %vm207_vm0, %v261_v57 }

// kernel: _lambda_.80
= control target key start
LH: loop header
LB: loop body
LE: loop exit
PB: predicated region body
PF: predicated region fallthrough
CT: control target
= control target key end

     0   :  { %v57_v0 = vmov 0.0   ;;  %s103_s1 = inlined_call_operand.vmem [shape: f32[1,128], index: 1, kind: output, shape index: {0}]   ;;  %s104_s2 = inlined_call_operand.vmem [shape: f32[1,128], index: 2, kind: output, shape index: {1}]   ;;  %s105_s0 = inlined_call_operand.vmem [shape: f32[32,128], index: 0, kind: input, shape index: {}]  }
   0x1   :  { %14 = vst [vmem:[%s103_s1] sm:$0x1] %v57_v0  ;;  %15 = vst [vmem:[%s104_s2] sm:$0x1] %v57_v0  ;;  %v16_v1 = vld [vmem:[%s105_s0] sm:$0xff]  ;;  %v17_v2 = vld [vmem:[%s105_s0 + $0x8] sm:$0xff] }
   0x2   :  { %v18_v3 = vld [vmem:[%s105_s0 + $0x10] sm:$0xff]  ;;  %v19_v4 = vld [vmem:[%s105_s0 + $0x18] sm:$0xff]  ;;  %v21_v5 = vadd.f32 %v17_v2, %v16_v1  ;;  %v33_v6 = vmul.f32 %v16_v1, %v16_v1  ;;  %v34_v7 = vmul.f32 %v17_v2, %v17_v2 }
   0x3   :  { %v35_v8 = vmul.f32 %v18_v3, %v18_v3  ;;  %v36_v10 = vmul.f32 %v19_v4, %v19_v4 }
   0x4   :  { %v22_v9 = vadd.f32 %v21_v5, %v18_v3  ;;  %v37_v11 = vadd.f32 %v34_v7, %v33_v6 }
   0x6   :  { %v23_v12 = vadd.f32 %v22_v9, %v19_v4  ;;  %v38_v13 = vadd.f32 %v37_v11, %v35_v8 }
   0x8   :  { %v24_v14 = vrot.slane %v23_v12, 4  ;;  %v39_v15 = vadd.f32 %v38_v13, %v36_v10  ;;  %v20_v24 = vld [vmem:[%s103_s1] sm:$0x1] }
   0x9   :  { %v32_v27 = vld [vmem:[%s104_s2] sm:$0x1] }
   0xa   :  { %v25_v16 = vadd.f32 %v24_v14, %v23_v12  ;;  %v40_v17 = vrot.slane %v39_v15, 4 }
   0xc   :  { %v26_v18 = vrot.slane %v25_v16, 2  ;;  %v41_v19 = vadd.f32 %v40_v17, %v39_v15 }
   0xe   :  { %v27_v20 = vadd.f32 %v26_v18, %v25_v16  ;;  %v42_v21 = vrot.slane %v41_v19, 2 }
  0x10   :  { %v28_v22 = vrot.slane %v27_v20, 1  ;;  %v43_v23 = vadd.f32 %v42_v21, %v41_v19 }
  0x12   :  { %v29_v25 = vadd.f32 %v28_v22, %v27_v20  ;;  %v44_v26 = vrot.slane %v43_v23, 1 }
  0x14   :  { %v30_v28 = vadd.f32 %v29_v25, %v20_v24  ;;  %v45_v29 = vadd.f32 %v44_v26, %v43_v23 }
  0x16   :  { %31 = vst [vmem:[%s103_s1] sm:$0x1] %v30_v28  ;;  %v46_v30 = vadd.f32 %v45_v29, %v32_v27 }
  0x18   :  { %47 = vst [vmem:[%s104_s2] sm:$0x1] %v46_v30 }

// kernel: _lambda_.79
= control target key start
LH: loop header
LB: loop body
LE: loop exit
PB: predicated region body
PF: predicated region fallthrough
CT: control target
= control target key end

     0   :  { %s968_s1 = inlined_call_operand.vmem [shape: bf16[640,128], index: 1, kind: input, shape index: {}]   ;;  %s969_s0 = inlined_call_operand.vmem [shape: bf16[32,640], index: 0, kind: input, shape index: {}]   ;;  %s970_s2 = inlined_call_operand.vmem [shape: f32[1,128], index: 2, kind: input, shape index: {}]   ;;  %s971_s3 = inlined_call_operand.vmem [shape: f32[32,128], index: 3, kind: output, shape index: {}]  }
   0x1   :  { %v729_v0 = vld [vmem:[%s968_s1 + $0x40] sm:$0xff]   ;;  %v733_v4 = vld [vmem:[%s968_s1 + $0x48] sm:$0xff]   ;;  %v737_v8 = vld [vmem:[%s968_s1 + $0x50] sm:$0xff]  }
   0x2   :  { %v730_v1 = vld [vmem:[%s968_s1 + $0xc0] sm:$0xff]   ;;  %643 = vmatprep.subr.bf16.mxu0 %v729_v0  ;;  %v734_v5 = vld [vmem:[%s968_s1 + $0xc8] sm:$0xff]   ;;  %v738_v9 = vld [vmem:[%s968_s1 + $0xd0] sm:$0xff]  }
   0x3   :  { %v731_v2 = vld [vmem:[%s968_s1] sm:$0xff]   ;;  %671 = vmatprep.subr.bf16.mxu1 %v730_v1  ;;  %v735_v6 = vld [vmem:[%s968_s1 + $0x8] sm:$0xff]   ;;  %v739_v10 = vld [vmem:[%s968_s1 + $0x10] sm:$0xff]  }
   0x4   :  { %v732_v3 = vld [vmem:[%s968_s1 + $0x80] sm:$0xff]   ;;  %644 = vmatpush3.bf16.msra.mxu0 %v731_v2  ;;  %v736_v7 = vld [vmem:[%s968_s1 + $0x88] sm:$0xff]   ;;  %v740_v11 = vld [vmem:[%s968_s1 + $0x90] sm:$0xff]  }
   0x5   :  { %672 = vmatpush3.bf16.msra.mxu1 %v732_v3  ;;  %645 = vmatprep.subr.bf16.mxu0 %v733_v4  ;;  %v741_v12 = vld [vmem:[%s968_s1 + $0x58] sm:$0xff]   ;;  %v745_v16 = vld [vmem:[%s968_s1 + $0x60] sm:$0xff]   ;;  %v749_v20 = vld [vmem:[%s968_s1 + $0x68] sm:$0xff]  }
   0x6   :  { %673 = vmatprep.subr.bf16.mxu1 %v734_v5  ;;  %v742_v13 = vld [vmem:[%s968_s1 + $0xd8] sm:$0xff]   ;;  %v746_v17 = vld [vmem:[%s968_s1 + $0xe0] sm:$0xff]   ;;  %v750_v21 = vld [vmem:[%s968_s1 + $0xe8] sm:$0xff]  }
   0x7   :  { %v743_v14 = vld [vmem:[%s968_s1 + $0x18] sm:$0xff]   ;;  %v747_v18 = vld [vmem:[%s968_s1 + $0x20] sm:$0xff]   ;;  %v751_v22 = vld [vmem:[%s968_s1 + $0x28] sm:$0xff]  }
   0x8   :  { %646 = vmatpush3.bf16.msra.mxu0 %v735_v6  ;;  %v744_v15 = vld [vmem:[%s968_s1 + $0x98] sm:$0xff]   ;;  %v748_v19 = vld [vmem:[%s968_s1 + $0xa0] sm:$0xff]   ;;  %v752_v23 = vld [vmem:[%s968_s1 + $0xa8] sm:$0xff]  }
   0x9   :  { %674 = vmatpush3.bf16.msra.mxu1 %v736_v7  ;;  %647 = vmatprep.subr.bf16.mxu0 %v737_v8  ;;  %v753_v24 = vld [vmem:[%s968_s1 + $0x70] sm:$0xff]   ;;  %v757_v28 = vld [vmem:[%s968_s1 + $0x78] sm:$0xff]   ;;  %v766_v35 = vld [vmem:[%s969_s0 + $0xc] ss:$20 sps:$4 sm:$0xff]  }
   0xa   :  { %675 = vmatprep.subr.bf16.mxu1 %v738_v9  ;;  %v754_v25 = vld [vmem:[%s968_s1 + $0xf0] sm:$0xff]   ;;  %v758_v29 = vld [vmem:[%s968_s1 + $0xf8] sm:$0xff]   ;;  %v767_v36 = vld [vmem:[%s968_s1 + $0x100] sm:$0xff]   ;;  %492 = vmatprep.mubr.bf16.mxu1 %v766_v35 }
   0xb   :  { %v755_v26 = vld [vmem:[%s968_s1 + $0x30] sm:$0xff]   ;;  %v759_v30 = vld [vmem:[%s968_s1 + $0x38] sm:$0xff]   ;;  %v768_v37 = vld [vmem:[%s968_s1 + $0x108] sm:$0xff]  }
   0xc   :  { %648 = vmatpush3.bf16.msra.mxu0 %v739_v10  ;;  %v756_v27 = vld [vmem:[%s968_s1 + $0xb0] sm:$0xff]   ;;  %v760_v31 = vld [vmem:[%s968_s1 + $0xb8] sm:$0xff]   ;;  %v772_v39 = vld [vmem:[%s969_s0 + $0x2c] ss:$20 sps:$4 sm:$0xff]  }
   0xd   :  { %676 = vmatpush3.bf16.msra.mxu1 %v740_v11  ;;  %649 = vmatprep.subr.bf16.mxu0 %v741_v12  ;;  %v761_v32 = vld [vmem:[%s969_s0] ss:$20 sps:$4 sm:$0xff]   ;;  %v763_v33 = vld [vmem:[%s969_s0 + $0x4] ss:$20 sps:$4 sm:$0xff]   ;;  %v764_v34 = vld [vmem:[%s969_s0 + $0x8] ss:$20 sps:$4 sm:$0xff]  }
   0xe   :  { %677 = vmatprep.subr.bf16.mxu1 %v742_v13  ;;  %443 = vmatprep.mubr.bf16.mxu0 %v763_v33  ;;  %v769_v38 = vld [vmem:[%s968_s1 + $0x110] sm:$0xff]   ;;  %v770_v41 = vld [vmem:[%s968_s1 + $0x118] sm:$0xff]   ;;  %v771_v45 = vld [vmem:[%s968_s1 + $0x120] sm:$0xff]  }
   0xf   :  { %v774_v40 = vld [vmem:[%s969_s0 + $0x34] ss:$20 sps:$4 sm:$0xff]   ;;  %v778_v43 = vld [vmem:[%s969_s0 + $0x30] ss:$20 sps:$4 sm:$0xff]   ;;  %v780_v48 = vld [vmem:[%s968_s1 + $0x138] sm:$0xff]  }
  0x10   :  { %650 = vmatpush3.bf16.msra.mxu0 %v743_v14  ;;  %v777_v42 = vld [vmem:[%s969_s0 + $0x28] ss:$20 sps:$4 sm:$0xff]   ;;  %v781_v44 = vld [vmem:[%s969_s0 + $0x10] ss:$20 sps:$4 sm:$0xff]   ;;  %v782_v49 = vld [vmem:[%s969_s0 + $0x38] ss:$20 sps:$4 sm:$0xff]  }
  0x11   :  { %678 = vmatpush3.bf16.msra.mxu1 %v744_v15  ;;  %651 = vmatprep.subr.bf16.mxu0 %v745_v16  ;;  %v776_v46 = vld [vmem:[%s968_s1 + $0x128] sm:$0xff]   ;;  %v779_v47 = vld [vmem:[%s968_s1 + $0x130] sm:$0xff]   ;;  %v642_v15 = vld [vmem:[%s970_s2] ss:$0 sm:$0xff] }
  0x12   :  { %679 = vmatprep.subr.bf16.mxu1 %v746_v17 }
  0x14   :  { %652 = vmatpush3.bf16.msra.mxu0 %v747_v18 }
  0x15   :  { %680 = vmatpush3.bf16.msra.mxu1 %v748_v19  ;;  %653 = vmatprep.subr.bf16.mxu0 %v749_v20 }
  0x16   :  { %681 = vmatprep.subr.bf16.mxu1 %v750_v21 }
  0x18   :  { %654 = vmatpush3.bf16.msra.mxu0 %v751_v22 }
  0x19   :  { %682 = vmatpush3.bf16.msra.mxu1 %v752_v23  ;;  %655 = vmatprep.subr.bf16.mxu0 %v753_v24 }
  0x1a   :  { %683 = vmatprep.subr.bf16.mxu1 %v754_v25 }
  0x1c   :  { %656 = vmatpush3.bf16.msra.mxu0 %v755_v26 }
  0x1d   :  { %684 = vmatpush3.bf16.msra.mxu1 %v756_v27  ;;  %657 = vmatprep.subr.bf16.mxu0 %v757_v28 }
  0x1e   :  { %685 = vmatprep.subr.bf16.mxu1 %v758_v29 }
  0x20   :  { %658 = vmatpush3.bf16.msra.mxu0 %v759_v30 }
  0x21   :  { %686 = vmatpush3.bf16.msra.mxu1 %v760_v31  ;;  %709 = vmatprep.subr.bf16.mxu0 %v767_v36 }
  0x23   :  { %444 = vmatmul.mubr.bf16.vlgmr.msra.gmra.mrb[0].mxu0 %v761_v32 }
  0x24   :  { %493 = vmatmul.mubr.bf16.vlgmr.msra.gmra.mrb[0].mxu1 %v764_v34  ;;  %710 = vmatpush3.bf16.msra.mxu0 %v767_v36 }
  0x25   :  { %711 = vmatprep.subr.bf16.mxu0 %v768_v37  ;;  %451 = vmatprep.mubr.bf16.mxu0 %v772_v39 }
  0x26   :  { %500 = vmatprep.mubr.bf16.mxu1 %v774_v40 }
  0x28   :  { %712 = vmatpush3.bf16.msra.mxu0 %v768_v37 }
  0x29   :  { %713 = vmatprep.subr.bf16.mxu0 %v769_v38 }
  0x2b   :  { %452 = vmatmul.mubr.bf16.gmra.mrb[4].mxu0 %v777_v42 }
  0x2c   :  { %501 = vmatmul.mubr.bf16.gmra.mrb[4].mxu1 %v778_v43  ;;  %714 = vmatpush3.bf16.msra.mxu0 %v769_v38 }
  0x2d   :  { %715 = vmatprep.subr.bf16.mxu0 %v770_v41  ;;  %725 = vmatprep.mubr.bf16.mxu0 %v781_v44 }
  0x30   :  { %716 = vmatpush3.bf16.msra.mxu0 %v770_v41 }
  0x31   :  { %717 = vmatprep.subr.bf16.mxu0 %v771_v45 }
  0x34   :  { %718 = vmatpush3.bf16.msra.mxu0 %v771_v45 }
  0x35   :  { %719 = vmatprep.subr.bf16.mxu0 %v776_v46 }
  0x38   :  { %720 = vmatpush3.bf16.msra.mxu0 %v776_v46 }
  0x39   :  { %721 = vmatprep.subr.bf16.mxu0 %v779_v47 }
  0x3c   :  { %722 = vmatpush3.bf16.msra.mxu0 %v779_v47 }
  0x3d   :  { %723 = vmatprep.subr.bf16.mxu0 %v780_v48 }
  0x40   :  { %724 = vmatpush3.bf16.msra.mxu0 %v780_v48 }
  0x43   :  { %726 = vmatmul.mubr.bf16.vlgmr.msra.gmra.mrb[8].mxu0 %v782_v49 }
  0xf6   :  { %v659_v50 = vpop.f32.mrb[0].mxu0 }
  0xf7   :  { %v687_v51 = vpop.f32.mrb[0].mxu1  ;;  %v660_v52 = vpop.f32.mrb[1].mxu0 }
  0xf8   :  { %v661_v53 = vadd.f32 %v660_v52, %v659_v50  ;;  %v688_v54 = vpop.f32.mrb[1].mxu1  ;;  %v662_v55 = vpop.f32.mrb[2].mxu0 }
  0xf9   :  { %v689_v56 = vadd.f32 %v688_v54, %v687_v51  ;;  %v690_v57 = vpop.f32.mrb[2].mxu1  ;;  %v663_v58 = vpop.f32.mrb[3].mxu0 }
  0xfa   :  { %v664_v59 = vadd.f32 %v663_v58, %v662_v55  ;;  %v691_v60 = vpop.f32.mrb[3].mxu1 }
  0xfb   :  { %v692_v61 = vadd.f32 %v691_v60, %v690_v57  ;;  %v495_v62 = vadd.f32 %v689_v56, %v661_v53 }
  0xfd   :  { %v498_v63 = vadd.f32 %v692_v61, %v664_v59 }
  0xfe   :  { %v665_v0 = vpop.f32.mrb[4].mxu0 }
  0xff   :  { %v693_v1 = vpop.f32.mrb[4].mxu1  ;;  %v666_v2 = vpop.f32.mrb[5].mxu0 }
 0x100   :  { %v667_v3 = vadd.f32 %v666_v2, %v665_v0  ;;  %v694_v4 = vpop.f32.mrb[5].mxu1  ;;  %v668_v5 = vpop.f32.mrb[6].mxu0 }
 0x101   :  { %v695_v6 = vadd.f32 %v694_v4, %v693_v1  ;;  %v696_v7 = vpop.f32.mrb[6].mxu1  ;;  %v669_v8 = vpop.f32.mrb[7].mxu0 }
 0x102   :  { %v670_v9 = vadd.f32 %v669_v8, %v668_v5  ;;  %v697_v10 = vpop.f32.mrb[7].mxu1 }
 0x103   :  { %v698_v11 = vadd.f32 %v697_v10, %v696_v7  ;;  %v503_v12 = vadd.f32 %v695_v6, %v667_v3 }
 0x105   :  { %v506_v13 = vadd.f32 %v698_v11, %v670_v9 }
 0x116   :  { %v727_v14 = vpop.f32.mrb[8].mxu0 }
 0x117   :  { %v552_v16 = vadd.f32 %v727_v14, %v503_v12  ;;  %v543_v17 = vpop.f32.mrb[9].mxu0 }
 0x118   :  { %v544_v18 = vadd.f32 %v543_v17, %v495_v62  ;;  %v728_v19 = vpop.f32.mrb[10].mxu0 }
 0x119   :  { %v582_v20 = vadd.f32 %v642_v15, %v552_v16  ;;  %v555_v21 = vadd.f32 %v728_v19, %v506_v13  ;;  %v546_v22 = vpop.f32.mrb[11].mxu0 }
 0x11a   :  { %v580_v23 = vadd.f32 %v642_v15, %v544_v18  ;;  %v547_v24 = vadd.f32 %v546_v22, %v498_v63 }
 0x11b   :  { %586 = vst [vmem:[%s971_s3 + $0x10] sm:$0xff] %v582_v20  ;;  %v583_v25 = vadd.f32 %v642_v15, %v555_v21 }
 0x11c   :  { %584 = vst [vmem:[%s971_s3] sm:$0xff] %v580_v23  ;;  %v581_v26 = vadd.f32 %v642_v15, %v547_v24 }
 0x11d   :  { %587 = vst [vmem:[%s971_s3 + $0x18] sm:$0xff] %v583_v25 }
 0x11e   :  { %585 = vst [vmem:[%s971_s3 + $0x8] sm:$0xff] %v581_v26 }

// kernel: _lambda_.81
= control target key start
LH: loop header
LB: loop body
LE: loop exit
PB: predicated region body
PF: predicated region fallthrough
CT: control target
= control target key end

     0   :  { %s133_s0 = inlined_call_operand.vmem [shape: f32[32,128], index: 0, kind: input, shape index: {}]   ;;  %s134_s1 = inlined_call_operand.vmem [shape: f32[1,128], index: 1, kind: input, shape index: {}]   ;;  %s135_s2 = inlined_call_operand.vmem [shape: f32[1,128], index: 2, kind: input, shape index: {}]   ;;  %s136_s3 = inlined_call_operand.vmem [shape: bf16[32,128], index: 3, kind: output, shape index: {}]  }
   0x1   :  { %v14_v0 = vld [vmem:[%s133_s0] sm:$0xff]  ;;  %v15_v1 = vld [vmem:[%s133_s0 + $0x8] sm:$0xff]  ;;  %v16_v6 = vld [vmem:[%s133_s0 + $0x10] sm:$0xff] }
   0x2   :  { %v68_v2 = vld [vmem:[%s134_s1] ss:$0 sm:$0xff]  ;;  %v17_v7 = vld [vmem:[%s133_s0 + $0x18] sm:$0xff] }
   0x3   :  { %v25_v3 = vmul.f32 %v68_v2, %v14_v0  ;;  %v26_v4 = vmul.f32 %v68_v2, %v15_v1  ;;  %v69_v5 = vld [vmem:[%s135_s2] ss:$0 sm:$0xff]  ;;  %v27_v8 = vmul.f32 %v68_v2, %v16_v6  ;;  %v28_v9 = vmul.f32 %v68_v2, %v17_v7 }
   0x5   :  { %v36_v10 = vadd.f32 %v69_v5, %v25_v3  ;;  %v37_v11 = vadd.f32 %v69_v5, %v26_v4  ;;  %v38_v12 = vadd.f32 %v69_v5, %v27_v8  ;;  %v39_v13 = vadd.f32 %v69_v5, %v28_v9 }
   0x7   :  { %v40_v14 = vmax.f32 %v36_v10, 0.0  ;;  %v41_v15 = vmax.f32 %v37_v11, 0.0  ;;  %v42_v16 = vmax.f32 %v38_v12, 0.0  ;;  %v43_v17 = vmax.f32 %v39_v13, 0.0 }
   0x9   :  { %v81_v18 = vpack.c.bf16 %v41_v15, %v40_v14  ;;  %v86_v19 = vpack.c.bf16 %v43_v17, %v42_v16 }
   0xb   :  { %82 = vst [vmem:[%s136_s3] sm:$0xff] %v81_v18   ;;  %88 = vst [vmem:[%s136_s3 + $0x8] sm:$0xff] %v86_v19  }

// kernel: _lambda_.82
= control target key start
LH: loop header
LB: loop body
LE: loop exit
PB: predicated region body
PF: predicated region fallthrough
CT: control target
= control target key end

     0   :  { %s1032_s12 = smov 0   ;;  %s1034_s13 = smov 0   ;;  %s1148_s0 = inlined_call_operand.vmem [shape: bf16[32,1152], index: 0, kind: input, shape index: {}]   ;;  %s1149_s1 = inlined_call_operand.vmem [shape: bf16[1152,128], index: 1, kind: input, shape index: {}]   ;;  %s1150_s2 = inlined_call_operand.vmem [shape: f32[1,128], index: 2, kind: input, shape index: {}]   ;;  %s1151_s3 = inlined_call_operand.vmem [shape: f32[32,128], index: 3, kind: output, shape index: {}]  }
   0x1   :  { %s1036_s14 = smov 0   ;;  %s1038_s15 = smov 0  }
   0x2   :  { %s1040_s16 = smov 0  }
   0x3 LB: > { %s25_s17 = sadd.s32 1, %s1005_s15  ;;  %p48_p1 = scmp.ne.s32.totalorder %s997_s13, %s993_s12  ;;  %s1009_s16 = sphi %s1040_s16, %s13_s16   ;;  %s1005_s15 = sphi %s1038_s15, %s1155_s15   ;;  %s1001_s14 = sphi %s1036_s14, %s1154_s14   ;;  %s997_s13 = sphi %s1034_s13, %s1153_s13   ;;  %s993_s12 = sphi %s1032_s12, %s1152_s12  }
   0x4   : > { %p26_p0 = scmp.ge.s32.totalorder %s25_s17, 3  ;;  %p49_p2 = scmp.eq.s32.totalorder %s1009_s16, 0 }
   0x5   : > { %s41_s19 = sadd.s32 1, %s997_s13  ;;  %p788_p5 = scmp.ge.s32.totalorder %s1009_s16, 3 }
   0x6   : > { %s1157_s17 = smov (%p26_p0, %s25_s17), 0  ;;  %p50_p3 = por %p49_p2, %p48_p1 }
   0x7   : > { %s37_s18 = ssub.s32 %s1005_s15, %s1157_s17  ;;  %162 = sbr.rel (%p788_p5) target bundleno = 23 (0x17), region = 20 }
   0x8   : > { %p39_p4 = scmp.eq.s32.totalorder %s37_s18, 0 }
   0xa   : > { %s1067_s20 = scalar_select %p39_p4, %s997_s13, %s41_s19  }
   0xe   : > { %165 = sbr.rel (!%p50_p3) target bundleno = 23 (0x17), region = 24  ;;  %s167_s21 = sand.u32 (%p50_p3), 1, %s997_s13  }
   0xf   : > { %s837_s22 = smul.u32 (%p50_p3), 12, %s1005_s15 }
  0x10   : > { %s896_s23 = smul.u32 (%p50_p3), 48, %s167_s21 }
  0x11   : > { %s175_s26 = scalar_lea.vmem (%p50_p3), %s1148_s0, %s837_s22 }
  0x12   : > { %v190_v0 = vld [vmem:[%s175_s26] sm:$0xff] (%p50_p3)  ;;  %v194_v2 = vld [vmem:[%s175_s26 + $0x48] sm:$0xff] (%p50_p3)  ;;  %s169_s27 = scalar_lea.vmem (%p50_p3), [#allocation3], %s896_s23  ;;  %v794_v6 = vld [vmem:[%s175_s26 + $0x50] sm:$0xf] (%p50_p3) }
  0x13   : > { %v192_v1 = vld [vmem:[%s175_s26 + $0x24] sm:$0xff] (%p50_p3)  ;;  %191 = vst [vmem:[%s169_s27] sm:$0xff] (%p50_p3), %v190_v0  ;;  %195 = vst [vmem:[%s169_s27 + $0x18] sm:$0xff] (%p50_p3), %v194_v2  ;;  %v196_v3 = vld [vmem:[%s175_s26 + $0x6c] sm:$0xff] (%p50_p3) }
  0x14   : > { %193 = vst [vmem:[%s169_s27 + $0xc] sm:$0xff] (%p50_p3), %v192_v1  ;;  %v790_v4 = vld [vmem:[%s175_s26 + $0x8] sm:$0xf] (%p50_p3)  ;;  %v792_v5 = vld [vmem:[%s175_s26 + $0x2c] sm:$0xf] (%p50_p3)  ;;  %197 = vst [vmem:[%s169_s27 + $0x24] sm:$0xff] (%p50_p3), %v196_v3 }
  0x15   : > { %791 = vst [vmem:[%s169_s27 + $0x8] sm:$0xf] %v790_v4  ;;  %793 = vst [vmem:[%s169_s27 + $0x14] sm:$0xf] %v792_v5  ;;  %v796_v7 = vld [vmem:[%s175_s26 + $0x74] sm:$0xf] }
  0x16   : > { %795 = vst [vmem:[%s169_s27 + $0x20] sm:$0xf] %v794_v6  ;;  %797 = vst [vmem:[%s169_s27 + $0x2c] sm:$0xf] %v796_v7 }
  0x17 PF: > { %p798_p6 = scmp.ge.s32.totalorder %s1009_s16, 1  ;;  %p229_p7 = scmp.lt.s32.totalorder %s1009_s16, 4 }
  0x19   : > { %p230_p8 = pnand %p798_p6, %p229_p7 }
  0x1a   : > { %s236_s28 = sand.u32 (!%p230_p8), 1, %s993_s12   ;;  %s275_s29 = smul.u32 (!%p230_p8), 48, %s1001_s14 }
  0x1b   : > { %233 = sbr.rel (%p230_p8) target bundleno = 314 (0x13a), region = 54  ;;  %p800_p10 = scmp.ne.s32.totalorder (!%p230_p8), %s1001_s14, 0 }
  0x1c   : > { %s897_s30 = smul.u32 (!%p230_p8), 48, %s236_s28  ;;  %p276_p9 = scmp.lt.s32.totalorder (!%p230_p8), %s275_s29, 143 }
  0x1e   : > { %s1084_s8 = scalar_lea.vmem (!%p230_p8), [#allocation3], %s897_s30 }
  0x22   : > { %s1159_s29 = smov (!%p276_p9, %s275_s29), 143  ;;  %300 = sbr.rel (%p800_p10) target bundleno = 41 (0x29), region = 62 }
  0x23   : > { %s799_s4 = sshll.u32 %s1159_s29, 2  ;;  %v1011_v8 = vmov (!%p800_p10), 0.0  }
  0x24   : > { %s1082_s7 = scalar_lea.vmem %s1149_s1, %s799_s4  ;;  %301 = vst [vmem:[#allocation2] sm:$0xff] (!%p800_p10), %v1011_v8  ;;  %302 = vst [vmem:[#allocation2 + $0x8] sm:$0xff] (!%p800_p10), %v1011_v8 }
  0x25   : > { %303 = vst [vmem:[#allocation2 + $0x10] sm:$0xff] (!%p800_p10), %v1011_v8  ;;  %304 = vst [vmem:[#allocation2 + $0x18] sm:$0xff] (!%p800_p10), %v1011_v8 }
  0x29 PF: > { %v939_v9 = vld [vmem:[%s1082_s7 + $0x40] sm:$0xff]   ;;  %v942_v12 = vld [vmem:[%s1082_s7 + $0x48] sm:$0xff]   ;;  %v945_v15 = vld [vmem:[%s1082_s7 + $0x50] sm:$0xff]   ;;  %p831_p11 = scmp.ne.s32.totalorder %s1001_s14, 2 }
  0x2a   : > { %v940_v10 = vld [vmem:[%s1082_s7] sm:$0xff]   ;;  %838 = vmatprep.subr.bf16.mxu0 %v939_v9  ;;  %v943_v13 = vld [vmem:[%s1082_s7 + $0x8] sm:$0xff]   ;;  %v946_v16 = vld [vmem:[%s1082_s7 + $0x10] sm:$0xff]  }
  0x2b   : > { %v941_v11 = vld [vmem:[%s1082_s7 + $0x80] sm:$0xff]   ;;  %839 = vmatpush3.bf16.msra.mxu0 %v940_v10  ;;  %v944_v14 = vld [vmem:[%s1082_s7 + $0x88] sm:$0xff]   ;;  %v947_v17 = vld [vmem:[%s1082_s7 + $0x90] sm:$0xff]  }
  0x2c   : > { %876 = vmatprep.subr.bf16.mxu1 %v941_v11  ;;  %840 = vmatprep.subr.bf16.mxu0 %v942_v12  ;;  %v948_v18 = vld [vmem:[%s1082_s7 + $0x58] sm:$0xff]   ;;  %v951_v21 = vld [vmem:[%s1082_s7 + $0x60] sm:$0xff]   ;;  %v954_v24 = vld [vmem:[%s1082_s7 + $0x68] sm:$0xff]  }
  0x2d   : > { %877 = vmatpush3.bf16.msra.mxu1 %v941_v11  ;;  %v949_v19 = vld [vmem:[%s1082_s7 + $0x18] sm:$0xff]   ;;  %v953_v22 = vld [vmem:[%s1082_s7 + $0xa0] sm:$0xff]   ;;  %v956_v25 = vld [vmem:[%s1082_s7 + $0xa8] sm:$0xff]  }
  0x2e   : > { %878 = vmatprep.subr.bf16.mxu1 %v944_v14  ;;  %v950_v20 = vld [vmem:[%s1082_s7 + $0x98] sm:$0xff]   ;;  %v952_v23 = vld [vmem:[%s1082_s7 + $0x20] sm:$0xff]   ;;  %v955_v26 = vld [vmem:[%s1082_s7 + $0x28] sm:$0xff]  }
  0x2f   : > { %841 = vmatpush3.bf16.msra.mxu0 %v943_v13  ;;  %v957_v27 = vld [vmem:[%s1082_s7 + $0x70] sm:$0xff]   ;;  %v960_v30 = vld [vmem:[%s1082_s7 + $0x78] sm:$0xff]   ;;  %v305_v45 = vld [vmem:[#allocation2] sm:$0xff] }
  0x30   : > { %842 = vmatprep.subr.bf16.mxu0 %v945_v15  ;;  %v958_v28 = vld [vmem:[%s1082_s7 + $0x30] sm:$0xff]   ;;  %v962_v31 = vld [vmem:[%s1082_s7 + $0xb8] sm:$0xff]   ;;  %v306_v50 = vld [vmem:[#allocation2 + $0x8] sm:$0xff] }
  0x31   : > { %879 = vmatpush3.bf16.msra.mxu1 %v944_v14  ;;  %v959_v29 = vld [vmem:[%s1082_s7 + $0xb0] sm:$0xff]   ;;  %v961_v34 = vld [vmem:[%s1082_s7 + $0x38] sm:$0xff]   ;;  %v832_v4 = vld [vmem:[%s1150_s2] ss:$0 sm:$0xff] (!%p831_p11) }
  0x32   : > { %880 = vmatprep.subr.bf16.mxu1 %v947_v17  ;;  %v965_v32 = vld [vmem:[%s1084_s8 + $0x4] ss:$12 sps:$4 sm:$0xff]   ;;  %v966_v33 = vld [vmem:[%s1084_s8 + $0x8] ss:$12 sps:$4 sm:$0xff]   ;;  %v963_v35 = vld [vmem:[%s1084_s8] ss:$12 sps:$4 sm:$0xff]  }
  0x33   : > { %843 = vmatpush3.bf16.msra.mxu0 %v946_v16  ;;  %573 = vmatprep.mubr.bf16.mxu0 %v965_v32  ;;  %v968_v36 = vld [vmem:[%s1084_s8 + $0x1c] ss:$12 sps:$4 sm:$0xff]   ;;  %v967_v37 = vld [vmem:[%s1084_s8 + $0x20] ss:$12 sps:$4 sm:$0xff]   ;;  %v970_v38 = vld [vmem:[%s1084_s8 + $0x18] ss:$12 sps:$4 sm:$0xff]  }
  0x34   : > { %844 = vmatprep.subr.bf16.mxu0 %v948_v18  ;;  %892 = vmatprep.mubr.bf16.mxu1 %v966_v33  ;;  %v307_v59 = vld [vmem:[#allocation2 + $0x10] sm:$0xff]  ;;  %v308_v63 = vld [vmem:[#allocation2 + $0x18] sm:$0xff] }
  0x35   : > { %881 = vmatpush3.bf16.msra.mxu1 %v947_v17 }
  0x36   : > { %882 = vmatprep.subr.bf16.mxu1 %v950_v20 }
  0x37   : > { %845 = vmatpush3.bf16.msra.mxu0 %v949_v19 }
  0x38   : > { %846 = vmatprep.subr.bf16.mxu0 %v951_v21 }
  0x39   : > { %883 = vmatpush3.bf16.msra.mxu1 %v950_v20 }
  0x3a   : > { %884 = vmatprep.subr.bf16.mxu1 %v953_v22 }
  0x3b   : > { %847 = vmatpush3.bf16.msra.mxu0 %v952_v23 }
  0x3c   : > { %848 = vmatprep.subr.bf16.mxu0 %v954_v24 }
  0x3d   : > { %885 = vmatpush3.bf16.msra.mxu1 %v953_v22 }
  0x3e   : > { %886 = vmatprep.subr.bf16.mxu1 %v956_v25 }
  0x3f   : > { %849 = vmatpush3.bf16.msra.mxu0 %v955_v26 }
  0x40   : > { %850 = vmatprep.subr.bf16.mxu0 %v957_v27 }
  0x41   : > { %887 = vmatpush3.bf16.msra.mxu1 %v956_v25 }
  0x42   : > { %888 = vmatprep.subr.bf16.mxu1 %v959_v29 }
  0x43   : > { %851 = vmatpush3.bf16.msra.mxu0 %v958_v28 }
  0x44   : > { %852 = vmatprep.subr.bf16.mxu0 %v960_v30 }
  0x45   : > { %889 = vmatpush3.bf16.msra.mxu1 %v959_v29 }
  0x46   : > { %890 = vmatprep.subr.bf16.mxu1 %v962_v31 }
  0x47   : > { %853 = vmatpush3.bf16.msra.mxu0 %v961_v34 }
  0x49   : > { %891 = vmatpush3.bf16.msra.mxu1 %v962_v31 }
  0x4a   : > { %574 = vmatmul.mubr.bf16.vlgmr.msra.gmra.mrb[0].mxu0 %v963_v35 }
  0x4b   : > { %581 = vmatprep.mubr.bf16.mxu0 %v968_v36 }
  0x4c   : > { %893 = vmatmul.mubr.bf16.vlgmr.msra.gmra.mrb[0].mxu1 %v967_v37 }
  0x52   : > { %582 = vmatmul.mubr.bf16.gmra.mrb[4].mxu0 %v970_v38 }
 0x11d   : > { %v854_v39 = vpop.f32.mrb[0].mxu0 }
 0x11e   : > { %v855_v40 = vpop.f32.mrb[1].mxu0 }
 0x11f   : > { %v856_v41 = vadd.f32 %v855_v40, %v854_v39  ;;  %v857_v42 = vpop.f32.mrb[2].mxu0  ;;  %v894_v43 = vpop.f32.mrb[0].mxu1 }
 0x120   : > { %v858_v44 = vpop.f32.mrb[3].mxu0  ;;  %v624_v46 = vpop.f32.mrb[1].mxu1 }
 0x121   : > { %v859_v47 = vadd.f32 %v858_v44, %v857_v42  ;;  %v625_v48 = vadd.f32 %v856_v41, %v624_v46  ;;  %v895_v49 = vpop.f32.mrb[2].mxu1 }
 0x122   : > { %v627_v51 = vpop.f32.mrb[3].mxu1 }
 0x123   : > { %v639_v52 = vadd.f32 %v625_v48, %v305_v45  ;;  %v628_v53 = vadd.f32 %v859_v47, %v627_v51 }
 0x125   : > { %643 = vst [vmem:[#allocation2] sm:$0xff] %v639_v52  ;;  %v640_v54 = vadd.f32 %v628_v53, %v306_v50  ;;  %v860_v55 = vpop.f32.mrb[4].mxu0 }
 0x126   : > { %v861_v56 = vpop.f32.mrb[5].mxu0 }
 0x127   : > { %644 = vst [vmem:[#allocation2 + $0x8] sm:$0xff] %v640_v54  ;;  %v862_v57 = vadd.f32 %v861_v56, %v860_v55  ;;  %v863_v58 = vpop.f32.mrb[6].mxu0 }
 0x128   : > { %v864_v60 = vpop.f32.mrb[7].mxu0 }
 0x129   : > { %v633_v61 = vadd.f32 %v894_v43, %v862_v57  ;;  %v865_v62 = vadd.f32 %v864_v60, %v863_v58  ;;  %650 = sbr.rel (%p831_p11) target bundleno = 314 (0x13a), region = 66 }
 0x12b   : > { %v641_v0 = vadd.f32 %v633_v61, %v307_v59  ;;  %v636_v1 = vadd.f32 %v895_v49, %v865_v62 }
 0x12c   : > { %v651_v3 = vld [vmem:[#allocation2] sm:$0xff] (!%p831_p11) }
 0x12d   : > { %645 = vst [vmem:[#allocation2 + $0x10] sm:$0xff] %v641_v0  ;;  %v642_v2 = vadd.f32 %v636_v1, %v308_v63  ;;  %v662_v6 = vadd.f32 (!%p831_p11), %v832_v4, %v651_v3 }
 0x12e   : > { %v652_v5 = vld [vmem:[#allocation2 + $0x8] sm:$0xff] (!%p831_p11) }
 0x12f   : > { %646 = vst [vmem:[#allocation2 + $0x18] sm:$0xff] %v642_v2  ;;  %v663_v7 = vadd.f32 (!%p831_p11), %v832_v4, %v652_v5  ;;  %666 = vst [vmem:[%s1151_s3] sm:$0xff] (!%p831_p11), %v662_v6 }
 0x131   : > { %667 = vst [vmem:[%s1151_s3 + $0x8] sm:$0xff] %v663_v7 }
 0x134   : > { %v653_v8 = vld [vmem:[#allocation2 + $0x10] sm:$0xff] }
 0x135   : > { %v664_v10 = vadd.f32 %v832_v4, %v653_v8 }
 0x136   : > { %v654_v9 = vld [vmem:[#allocation2 + $0x18] sm:$0xff] }
 0x137   : > { %v665_v11 = vadd.f32 %v832_v4, %v654_v9  ;;  %668 = vst [vmem:[%s1151_s3 + $0x10] sm:$0xff] %v664_v10 }
 0x139   : > { %669 = vst [vmem:[%s1151_s3 + $0x18] sm:$0xff] %v665_v11 }
 0x13a PF: > { %s13_s16 = sadd.s32 1, %s1009_s16   ;;  %s1152_s12 = smov %s997_s13 }
 0x13b   : > { %p10_p12 = scmp.ge.s32.totalorder %s13_s16, 5   ;;  %s1153_s13 = smov %s1067_s20 }
 0x13c   : > { %s1154_s14 = smov %s1005_s15  ;;  %s1155_s15 = smov %s1157_s17 }
 0x13d   :  { %12 = sbr.rel (!%p10_p12) target bundleno = 3 (0x3), region = 113 }

// kernel: _lambda_.85
= control target key start
LH: loop header
LB: loop body
LE: loop exit
PB: predicated region body
PF: predicated region fallthrough
CT: control target
= control target key end

     0   :  { %s129_s0 = inlined_call_operand.vmem [shape: f32[32,128], index: 0, kind: input, shape index: {}]   ;;  %s130_s1 = inlined_call_operand.vmem [shape: f32[1,128], index: 1, kind: input, shape index: {}]   ;;  %s131_s2 = inlined_call_operand.vmem [shape: f32[1,128], index: 2, kind: input, shape index: {}]   ;;  %s132_s3 = inlined_call_operand.vmem [shape: bf16[32,128], index: 3, kind: output, shape index: {}]  }
   0x1   :  { %v14_v0 = vld [vmem:[%s129_s0] sm:$0xff]  ;;  %v15_v1 = vld [vmem:[%s129_s0 + $0x8] sm:$0xff]  ;;  %v16_v6 = vld [vmem:[%s129_s0 + $0x10] sm:$0xff] }
   0x2   :  { %v64_v2 = vld [vmem:[%s130_s1] ss:$0 sm:$0xff]  ;;  %v17_v7 = vld [vmem:[%s129_s0 + $0x18] sm:$0xff] }
   0x3   :  { %v25_v3 = vmul.f32 %v64_v2, %v14_v0  ;;  %v26_v4 = vmul.f32 %v64_v2, %v15_v1  ;;  %v65_v5 = vld [vmem:[%s131_s2] ss:$0 sm:$0xff]  ;;  %v27_v8 = vmul.f32 %v64_v2, %v16_v6  ;;  %v28_v9 = vmul.f32 %v64_v2, %v17_v7 }
   0x5   :  { %v36_v10 = vadd.f32 %v65_v5, %v25_v3  ;;  %v37_v11 = vadd.f32 %v65_v5, %v26_v4  ;;  %v38_v12 = vadd.f32 %v65_v5, %v27_v8  ;;  %v39_v13 = vadd.f32 %v65_v5, %v28_v9 }
   0x7   :  { %v77_v14 = vpack.c.bf16 %v37_v11, %v36_v10  ;;  %v82_v15 = vpack.c.bf16 %v39_v13, %v38_v12 }
   0x9   :  { %78 = vst [vmem:[%s132_s3] sm:$0xff] %v77_v14   ;;  %84 = vst [vmem:[%s132_s3 + $0x8] sm:$0xff] %v82_v15  }

// kernel: _lambda_.83
= control target key start
LH: loop header
LB: loop body
LE: loop exit
PB: predicated region body
PF: predicated region fallthrough
CT: control target
= control target key end

     0   :  { %s306_s1 = inlined_call_operand.vmem [shape: bf16[128,128], index: 1, kind: input, shape index: {}]   ;;  %s307_s0 = inlined_call_operand.vmem [shape: bf16[32,128], index: 0, kind: input, shape index: {}]   ;;  %s308_s2 = inlined_call_operand.vmem [shape: f32[1,128], index: 2, kind: input, shape index: {}]   ;;  %s309_s3 = inlined_call_operand.vmem [shape: f32[32,128], index: 3, kind: output, shape index: {}]  }
   0x1   :  { %v231_v0 = vld [vmem:[%s306_s1] sm:$0xff]   ;;  %v232_v1 = vld [vmem:[%s306_s1 + $0x8] sm:$0xff]   ;;  %v233_v2 = vld [vmem:[%s306_s1 + $0x10] sm:$0xff]  }
   0x2   :  { %211 = vmatprep.subr.bf16.mxu0 %v231_v0  ;;  %v234_v3 = vld [vmem:[%s306_s1 + $0x18] sm:$0xff]   ;;  %v239_v4 = vld [vmem:[%s307_s0] sm:$0xff]   ;;  %v236_v6 = vld [vmem:[%s306_s1 + $0x28] sm:$0xff]  }
   0x3   :  { %212 = vmatpush3.bf16.msra.mxu0 %v231_v0  ;;  %227 = vmatprep.mubr.bf16.mxu0 %v239_v4  ;;  %v235_v5 = vld [vmem:[%s306_s1 + $0x20] sm:$0xff]   ;;  %v237_v7 = vld [vmem:[%s306_s1 + $0x30] sm:$0xff]   ;;  %v238_v8 = vld [vmem:[%s306_s1 + $0x38] sm:$0xff]  }
   0x4   :  { %213 = vmatprep.subr.bf16.mxu0 %v232_v1  ;;  %v240_v9 = vld [vmem:[%s307_s0 + $0x8] sm:$0xff]   ;;  %v200_v10 = vld [vmem:[%s308_s2] ss:$0 sm:$0xff] }
   0x7   :  { %214 = vmatpush3.bf16.msra.mxu0 %v232_v1 }
   0x8   :  { %215 = vmatprep.subr.bf16.mxu0 %v233_v2 }
   0xb   :  { %216 = vmatpush3.bf16.msra.mxu0 %v233_v2 }
   0xc   :  { %217 = vmatprep.subr.bf16.mxu0 %v234_v3 }
   0xf   :  { %218 = vmatpush3.bf16.msra.mxu0 %v234_v3 }
  0x10   :  { %219 = vmatprep.subr.bf16.mxu0 %v235_v5 }
  0x13   :  { %220 = vmatpush3.bf16.msra.mxu0 %v235_v5 }
  0x14   :  { %221 = vmatprep.subr.bf16.mxu0 %v236_v6 }
  0x17   :  { %222 = vmatpush3.bf16.msra.mxu0 %v236_v6 }
  0x18   :  { %223 = vmatprep.subr.bf16.mxu0 %v237_v7 }
  0x1b   :  { %224 = vmatpush3.bf16.msra.mxu0 %v237_v7 }
  0x1c   :  { %225 = vmatprep.subr.bf16.mxu0 %v238_v8 }
  0x1f   :  { %226 = vmatpush3.bf16.msra.mxu0 %v238_v8 }
  0x22   :  { %228 = vmatmul.mubr.bf16.vlgmr.msra.gmra.mrb[0].mxu0 %v240_v9 }
  0xf5   :  { %v229_v11 = vpop.f32.mrb[0].mxu0 }
  0xf6   :  { %v180_v12 = vadd.f32 %v229_v11, %v200_v10  ;;  %v141_v13 = vpop.f32.mrb[1].mxu0 }
  0xf7   :  { %v178_v14 = vadd.f32 %v200_v10, %v141_v13  ;;  %v230_v15 = vpop.f32.mrb[2].mxu0 }
  0xf8   :  { %184 = vst [vmem:[%s309_s3 + $0x10] sm:$0xff] %v180_v12  ;;  %v181_v16 = vadd.f32 %v230_v15, %v200_v10  ;;  %v144_v17 = vpop.f32.mrb[3].mxu0 }
  0xf9   :  { %182 = vst [vmem:[%s309_s3] sm:$0xff] %v178_v14  ;;  %v179_v18 = vadd.f32 %v200_v10, %v144_v17 }
  0xfa   :  { %185 = vst [vmem:[%s309_s3 + $0x18] sm:$0xff] %v181_v16 }
  0xfb   :  { %183 = vst [vmem:[%s309_s3 + $0x8] sm:$0xff] %v179_v18 }

// kernel: _lambda_.87
= control target key start
LH: loop header
LB: loop body
LE: loop exit
PB: predicated region body
PF: predicated region fallthrough
CT: control target
= control target key end

     0   :  { %s168_s0 = inlined_call_operand.vmem [shape: f32[32,128], index: 0, kind: input, shape index: {}]   ;;  %s169_s1 = inlined_call_operand.vmem [shape: bf16[32,128], index: 1, kind: input, shape index: {}]   ;;  %s170_s2 = inlined_call_operand.vmem [shape: f32[1,128], index: 2, kind: input, shape index: {}]   ;;  %s171_s3 = inlined_call_operand.vmem [shape: f32[1,128], index: 3, kind: input, shape index: {}]   ;;  %s172_s4 = inlined_call_operand.vmem [shape: bf16[32,128], index: 4, kind: output, shape index: {}]  }
   0x1   :  { %v17_v0 = vld [vmem:[%s168_s0] sm:$0xff]  ;;  %v18_v1 = vld [vmem:[%s168_s0 + $0x8] sm:$0xff]  ;;  %v19_v7 = vld [vmem:[%s168_s0 + $0x10] sm:$0xff] }
   0x2   :  { %v83_v2 = vld [vmem:[%s170_s2] ss:$0 sm:$0xff]  ;;  %v20_v10 = vld [vmem:[%s168_s0 + $0x18] sm:$0xff]  ;;  %v111_v12 = vld [vmem:[%s169_s1 + $0x8] sm:$0xff]  }
   0x3   :  { %v28_v3 = vmul.f32 %v83_v2, %v17_v0  ;;  %v29_v4 = vmul.f32 %v83_v2, %v18_v1  ;;  %v84_v5 = vld [vmem:[%s171_s3] ss:$0 sm:$0xff]  ;;  %v30_v11 = vmul.f32 %v83_v2, %v19_v7  ;;  %v31_v15 = vmul.f32 %v83_v2, %v20_v10 }
   0x4   :  { %v94_v6 = vld [vmem:[%s169_s1] sm:$0xff]   ;;  %v99_v16 = vunpack.c.l.bf16 %v111_v12  ;;  %v100_v18 = vunpack.c.h.bf16 %v111_v12 }
   0x5   :  { %v95_v8 = vunpack.c.l.bf16 %v94_v6  ;;  %v96_v9 = vunpack.c.h.bf16 %v94_v6  ;;  %v39_v13 = vadd.f32 %v84_v5, %v28_v3  ;;  %v40_v14 = vadd.f32 %v84_v5, %v29_v4 }
   0x6   :  { %v41_v17 = vadd.f32 %v84_v5, %v30_v11  ;;  %v42_v21 = vadd.f32 %v84_v5, %v31_v15 }
   0x7   :  { %v51_v19 = vadd.f32 %v95_v8, %v39_v13  ;;  %v52_v20 = vadd.f32 %v96_v9, %v40_v14 }
   0x8   :  { %v53_v22 = vadd.f32 %v99_v16, %v41_v17  ;;  %v54_v25 = vadd.f32 %v100_v18, %v42_v21 }
   0x9   :  { %v55_v23 = vmax.f32 %v51_v19, 0.0  ;;  %v56_v24 = vmax.f32 %v52_v20, 0.0 }
   0xa   :  { %v57_v26 = vmax.f32 %v53_v22, 0.0  ;;  %v58_v28 = vmax.f32 %v54_v25, 0.0 }
   0xb   :  { %v104_v27 = vpack.c.bf16 %v56_v24, %v55_v23 }
   0xc   :  { %v109_v29 = vpack.c.bf16 %v58_v28, %v57_v26 }
   0xd   :  { %105 = vst [vmem:[%s172_s4] sm:$0xff] %v104_v27  }
   0xe   :  { %112 = vst [vmem:[%s172_s4 + $0x8] sm:$0xff] %v109_v29  }

// kernel: _lambda_.95
= control target key start
LH: loop header
LB: loop body
LE: loop exit
PB: predicated region body
PF: predicated region fallthrough
CT: control target
= control target key end

     0   :  { %v14_v0 = vlaneseq  ;;  %v112_v8 = vmov 0.0   ;;  %v113_v19 = vmov 1966171168   ;;  %s171_s0 = inlined_call_operand.vmem [shape: f32[16,256], index: 0, kind: input, shape index: {}]   ;;  %s172_s1 = inlined_call_operand.vmem [shape: f32[1,256], index: 1, kind: output, shape index: {0}]   ;;  %s173_s2 = inlined_call_operand.vmem [shape: f32[1,256], index: 2, kind: output, shape index: {1}]  }
   0x1   :  { %v20_v1 = vld [vmem:[%s171_s0] sm:$0xff]  ;;  %v21_v2 = vld [vmem:[%s171_s0 + $0x8] sm:$0xff]  ;;  %v22_v3 = vld [vmem:[%s171_s0 + $0x10] sm:$0xff]  ;;  %v43_v20 = vunpack.c.l.s4 %v113_v19 }
   0x2   :  { %vm138_vm0 = vcmp.lt.s32.totalorder %v14_v0, 256  ;;  %v23_v5 = vld [vmem:[%s171_s0 + $0x18] sm:$0xff]  ;;  %v25_v6 = vadd.f32 %v22_v3, %v20_v1  ;;  %v64_v7 = vmul.f32 %v20_v1, %v20_v1  ;;  %v65_v10 = vmul.f32 %v21_v2, %v21_v2 }
   0x3   :  { %18 = vst.msk [vmem:[%s172_s1] sm:$0x3] %vm138_vm0, %v112_v8  ;;  %v32_v9 = vadd.f32 %v23_v5, %v21_v2  ;;  %19 = vst.msk [vmem:[%s173_s2] sm:$0x3] %vm138_vm0, %v112_v8  ;;  %v66_v11 = vmul.f32 %v22_v3, %v22_v3  ;;  %v67_v13 = vmul.f32 %v23_v5, %v23_v5  ;;  %v44_v29 = vunpack.c.0.s8 %v43_v20 }
   0x4   :  { %v26_v12 = vrot.slane %v25_v6, 4  ;;  %v46_v30 = vshrl.u32 %v14_v0, 7 }
   0x5   :  { %v33_v14 = vrot.slane %v32_v9, 4  ;;  %v68_v15 = vadd.f32 %v66_v11, %v64_v7  ;;  %v75_v17 = vadd.f32 %v67_v13, %v65_v10 }
   0x6   :  { %v27_v16 = vadd.f32 %v26_v12, %v25_v6  ;;  %v47_v39 = vsub.s32 %v44_v29, %v46_v30 }
   0x7   :  { %v34_v18 = vadd.f32 %v33_v14, %v32_v9  ;;  %v69_v21 = vrot.slane %v68_v15, 4  ;;  %v76_v23 = vrot.slane %v75_v17, 4 }
   0x8   :  { %v28_v22 = vrot.slane %v27_v16, 2 }
   0x9   :  { %v35_v24 = vrot.slane %v34_v18, 2  ;;  %v70_v25 = vadd.f32 %v69_v21, %v68_v15  ;;  %v77_v27 = vadd.f32 %v76_v23, %v75_v17 }
   0xa   :  { %v29_v26 = vadd.f32 %v28_v22, %v27_v16  ;;  %v24_v46 = vld [vmem:[%s172_s1] sm:$0x3] }
   0xb   :  { %v36_v28 = vadd.f32 %v35_v24, %v34_v18  ;;  %v71_v31 = vrot.slane %v70_v25, 2  ;;  %v78_v33 = vrot.slane %v77_v27, 2  ;;  %v63_v51 = vld [vmem:[%s173_s2] sm:$0x3] }
   0xc   :  { %v30_v32 = vrot.slane %v29_v26, 1 }
   0xd   :  { %v37_v34 = vrot.slane %v36_v28, 1  ;;  %v72_v35 = vadd.f32 %v71_v31, %v70_v25  ;;  %v79_v37 = vadd.f32 %v78_v33, %v77_v27 }
   0xe   :  { %v31_v36 = vadd.f32 %v30_v32, %v29_v26 }
   0xf   :  { %v38_v38 = vadd.f32 %v37_v34, %v36_v28  ;;  %v73_v40 = vrot.slane %v72_v35, 1  ;;  %v80_v41 = vrot.slane %v79_v37, 1 }
  0x11   :  { %v41_v42 = vcombine.low %v31_v36, %v38_v38  ;;  %v74_v43 = vadd.f32 %v73_v40, %v72_v35  ;;  %v81_v44 = vadd.f32 %v80_v41, %v79_v37 }
  0x13   :  { %v48_v45 = vrot.slane %v41_v42, %v47_v39  ;;  %v84_v47 = vcombine.low %v74_v43, %v81_v44 }
  0x15   :  { %v55_v48 = vrot.slane %v48_v45, %v47_v39  ;;  %v91_v49 = vrot.slane %v84_v47, %v47_v39 }
  0x17   :  { %v57_v50 = vadd.f32 %v55_v48, %v24_v46  ;;  %v98_v52 = vrot.slane %v91_v49, %v47_v39 }
  0x19   :  { %62 = vst.msk [vmem:[%s172_s1] sm:$0x3] %vm138_vm0, %v57_v50  ;;  %v100_v53 = vadd.f32 %v98_v52, %v63_v51 }
  0x1b   :  { %101 = vst.msk [vmem:[%s173_s2] sm:$0x3] %vm138_vm0, %v100_v53 }

// kernel: _lambda_.94
= control target key start
LH: loop header
LB: loop body
LE: loop exit
PB: predicated region body
PF: predicated region fallthrough
CT: control target
= control target key end

     0   :  { %s1133_s12 = smov 0   ;;  %s1135_s13 = smov 0   ;;  %s1270_s0 = inlined_call_operand.vmem [shape: bf16[16,1152], index: 0, kind: input, shape index: {}]   ;;  %s1271_s1 = inlined_call_operand.vmem [shape: bf16[1152,256], index: 1, kind: input, shape index: {}]   ;;  %s1272_s2 = inlined_call_operand.vmem [shape: f32[1,256], index: 2, kind: input, shape index: {}]   ;;  %s1273_s3 = inlined_call_operand.vmem [shape: f32[16,256], index: 3, kind: output, shape index: {}]  }
   0x1   :  { %s1137_s14 = smov 0   ;;  %s1139_s15 = smov 0  }
   0x2   :  { %s1141_s16 = smov 0  }
   0x3 LB: > { %s25_s17 = sadd.s32 1, %s1105_s15  ;;  %p48_p1 = scmp.ne.s32.totalorder %s1097_s13, %s1093_s12  ;;  %s1109_s16 = sphi %s1141_s16, %s13_s16   ;;  %s1105_s15 = sphi %s1139_s15, %s1277_s15   ;;  %s1101_s14 = sphi %s1137_s14, %s1276_s14   ;;  %s1097_s13 = sphi %s1135_s13, %s1275_s13   ;;  %s1093_s12 = sphi %s1133_s12, %s1274_s12  }
   0x4   : > { %p26_p0 = scmp.ge.s32.totalorder %s25_s17, 3  ;;  %p49_p2 = scmp.eq.s32.totalorder %s1109_s16, 0 }
   0x5   : > { %s41_s19 = sadd.s32 1, %s1097_s13  ;;  %p879_p5 = scmp.ge.s32.totalorder %s1109_s16, 3 }
   0x6   : > { %s1279_s17 = smov (%p26_p0, %s25_s17), 0  ;;  %p50_p3 = por %p49_p2, %p48_p1 }
   0x7   : > { %s37_s18 = ssub.s32 %s1105_s15, %s1279_s17  ;;  %164 = sbr.rel (%p879_p5) target bundleno = 21 (0x15), region = 20 }
   0x8   : > { %p39_p4 = scmp.eq.s32.totalorder %s37_s18, 0 }
   0xa   : > { %s1168_s20 = scalar_select %p39_p4, %s1097_s13, %s41_s19  }
   0xe   : > { %167 = sbr.rel (!%p50_p3) target bundleno = 21 (0x15), region = 24  ;;  %s169_s21 = sand.u32 (%p50_p3), 1, %s1097_s13  }
   0xf   : > { %s945_s22 = smul.u32 (%p50_p3), 12, %s1105_s15 }
  0x10   : > { %s951_s23 = smul.u32 (%p50_p3), 24, %s169_s21 }
  0x11   : > { %s177_s26 = scalar_lea.vmem (%p50_p3), %s1270_s0, %s945_s22 }
  0x12   : > { %v192_v0 = vld [vmem:[%s177_s26] sm:$0xff] (%p50_p3)  ;;  %v881_v2 = vld [vmem:[%s177_s26 + $0x8] sm:$0xf] (%p50_p3)  ;;  %s171_s27 = scalar_lea.vmem (%p50_p3), [#allocation3], %s951_s23  ;;  %v883_v3 = vld [vmem:[%s177_s26 + $0x2c] sm:$0xf] (%p50_p3) }
  0x13   : > { %v194_v1 = vld [vmem:[%s177_s26 + $0x24] sm:$0xff] (%p50_p3)  ;;  %193 = vst [vmem:[%s171_s27] sm:$0xff] (%p50_p3), %v192_v0  ;;  %882 = vst [vmem:[%s171_s27 + $0x8] sm:$0xf] (%p50_p3), %v881_v2 }
  0x14   : > { %195 = vst [vmem:[%s171_s27 + $0xc] sm:$0xff] (%p50_p3), %v194_v1  ;;  %884 = vst [vmem:[%s171_s27 + $0x14] sm:$0xf] (%p50_p3), %v883_v3 }
  0x15 PF: > { %p885_p6 = scmp.ge.s32.totalorder %s1109_s16, 1  ;;  %p226_p7 = scmp.lt.s32.totalorder %s1109_s16, 4 }
  0x17   : > { %p227_p8 = pnand %p885_p6, %p226_p7 }
  0x18   : > { %s233_s28 = sand.u32 (!%p227_p8), 1, %s1093_s12   ;;  %s277_s29 = smul.u32 (!%p227_p8), 48, %s1101_s14 }
  0x19   : > { %230 = sbr.rel (%p227_p8) target bundleno = 334 (0x14e), region = 54  ;;  %p888_p10 = scmp.ne.s32.totalorder (!%p227_p8), %s1101_s14, 0 }
  0x1a   : > { %s952_s30 = smul.u32 (!%p227_p8), 24, %s233_s28  ;;  %p279_p9 = scmp.lt.s32.totalorder (!%p227_p8), %s277_s29, 143 }
  0x1c   : > { %s1185_s8 = scalar_lea.vmem (!%p227_p8), [#allocation3], %s952_s30 }
  0x20   : > { %s1281_s29 = smov (!%p279_p9, %s277_s29), 143  ;;  %310 = sbr.rel (%p888_p10) target bundleno = 39 (0x27), region = 62 }
  0x21   : > { %s946_s4 = sshll.u32 %s1281_s29, 3  ;;  %v1111_v4 = vmov (!%p888_p10), 0.0  }
  0x22   : > { %s1183_s7 = scalar_lea.vmem %s1271_s1, %s946_s4  ;;  %311 = vst [vmem:[#allocation2] sm:$0xff] (!%p888_p10), %v1111_v4  ;;  %312 = vst [vmem:[#allocation2 + $0x8] sm:$0xff] (!%p888_p10), %v1111_v4 }
  0x23   : > { %313 = vst [vmem:[#allocation2 + $0x10] sm:$0xff] (!%p888_p10), %v1111_v4  ;;  %314 = vst [vmem:[#allocation2 + $0x18] sm:$0xff] (!%p888_p10), %v1111_v4 }
  0x27 PF: > { %v995_v5 = vld [vmem:[%s1183_s7 + $0x4] ss:$8 sps:$4 sm:$0xff]   ;;  %v997_v6 = vld [vmem:[%s1183_s7] ss:$8 sps:$4 sm:$0xff]   ;;  %v1112_v7 = vmov 0   ;;  %p940_p11 = scmp.ne.s32.totalorder %s1101_s14, 2 }
  0x28   : > { %702 = vmatprep.mubr.bf16.mxu0 %v1112_v7  ;;  %627 = vmatprep.subr.bf16.mxu1 %v995_v5  ;;  %v998_v8 = vld [vmem:[%s1183_s7 + $0x14] ss:$8 sps:$4 sm:$0xff]   ;;  %v1000_v9 = vld [vmem:[%s1183_s7 + $0x10] ss:$8 sps:$4 sm:$0xff]   ;;  %v1001_v10 = vld [vmem:[%s1183_s7 + $0x24] ss:$8 sps:$4 sm:$0xff]  }
  0x29   : > { %628 = vmatpush1.bf16.msra.mxu1 %v997_v6  ;;  %v1003_v11 = vld [vmem:[%s1183_s7 + $0x20] ss:$8 sps:$4 sm:$0xff]   ;;  %v1004_v12 = vld [vmem:[%s1183_s7 + $0x34] ss:$8 sps:$4 sm:$0xff]   ;;  %v1006_v13 = vld [vmem:[%s1183_s7 + $0x30] ss:$8 sps:$4 sm:$0xff]  }
  0x2a   : > { %629 = vmatprep.subr.bf16.mxu1 %v998_v8  ;;  %v1019_v14 = vld [vmem:[%s1183_s7 + $0x104] ss:$8 sps:$4 sm:$0xff]   ;;  %v1021_v15 = vld [vmem:[%s1183_s7 + $0x100] ss:$8 sps:$4 sm:$0xff]   ;;  %v1025_v17 = vld [vmem:[%s1183_s7 + $0x114] ss:$8 sps:$4 sm:$0xff]  }
  0x2b   : > { %v1007_v16 = vld [vmem:[%s1183_s7 + $0x44] ss:$8 sps:$4 sm:$0xff]   ;;  %670 = vmatprep.subr.bf16.mxu0 %v1019_v14  ;;  %v1027_v18 = vld [vmem:[%s1183_s7 + $0x110] ss:$8 sps:$4 sm:$0xff]   ;;  %v1009_v19 = vld [vmem:[%s1183_s7 + $0x40] ss:$8 sps:$4 sm:$0xff]  }
  0x2c   : > { %671 = vmatpush1.bf16.msra.mxu0 %v1021_v15  ;;  %v1010_v20 = vld [vmem:[%s1183_s7 + $0x54] ss:$8 sps:$4 sm:$0xff]   ;;  %v1031_v21 = vld [vmem:[%s1183_s7 + $0x124] ss:$8 sps:$4 sm:$0xff]   ;;  %v1033_v22 = vld [vmem:[%s1183_s7 + $0x120] ss:$8 sps:$4 sm:$0xff]  }
  0x2d   : > { %630 = vmatpush1.bf16.msra.mxu1 %v1000_v9  ;;  %672 = vmatprep.subr.bf16.mxu0 %v1025_v17  ;;  %v1012_v23 = vld [vmem:[%s1183_s7 + $0x50] ss:$8 sps:$4 sm:$0xff]   ;;  %v1037_v24 = vld [vmem:[%s1183_s7 + $0x134] ss:$8 sps:$4 sm:$0xff]   ;;  %v1013_v25 = vld [vmem:[%s1183_s7 + $0x64] ss:$8 sps:$4 sm:$0xff]  }
  0x2e   : > { %631 = vmatprep.subr.bf16.mxu1 %v1001_v10  ;;  %v1039_v26 = vld [vmem:[%s1183_s7 + $0x130] ss:$8 sps:$4 sm:$0xff]   ;;  %v1015_v27 = vld [vmem:[%s1183_s7 + $0x60] ss:$8 sps:$4 sm:$0xff]   ;;  %v1043_v28 = vld [vmem:[%s1183_s7 + $0x144] ss:$8 sps:$4 sm:$0xff]  }
  0x2f   : > { %v1016_v29 = vld [vmem:[%s1183_s7 + $0x74] ss:$8 sps:$4 sm:$0xff]   ;;  %v1045_v30 = vld [vmem:[%s1183_s7 + $0x140] ss:$8 sps:$4 sm:$0xff]   ;;  %v1018_v31 = vld [vmem:[%s1183_s7 + $0x70] ss:$8 sps:$4 sm:$0xff]  }
  0x30   : > { %673 = vmatpush1.bf16.msra.mxu0 %v1027_v18  ;;  %v1049_v32 = vld [vmem:[%s1183_s7 + $0x154] ss:$8 sps:$4 sm:$0xff]   ;;  %v1022_v33 = vld [vmem:[%s1183_s7 + $0x84] ss:$8 sps:$4 sm:$0xff]   ;;  %v1051_v34 = vld [vmem:[%s1183_s7 + $0x150] ss:$8 sps:$4 sm:$0xff]  }
  0x31   : > { %632 = vmatpush1.bf16.msra.mxu1 %v1003_v11  ;;  %674 = vmatprep.subr.bf16.mxu0 %v1031_v21  ;;  %v1024_v35 = vld [vmem:[%s1183_s7 + $0x80] ss:$8 sps:$4 sm:$0xff]   ;;  %v1055_v36 = vld [vmem:[%s1183_s7 + $0x164] ss:$8 sps:$4 sm:$0xff]   ;;  %v1028_v37 = vld [vmem:[%s1183_s7 + $0x94] ss:$8 sps:$4 sm:$0xff]  }
  0x32   : > { %633 = vmatprep.subr.bf16.mxu1 %v1004_v12  ;;  %v1057_v38 = vld [vmem:[%s1183_s7 + $0x160] ss:$8 sps:$4 sm:$0xff]   ;;  %v1030_v40 = vld [vmem:[%s1183_s7 + $0x90] ss:$8 sps:$4 sm:$0xff]   ;;  %v1061_v41 = vld [vmem:[%s1183_s7 + $0x174] ss:$8 sps:$4 sm:$0xff]  }
  0x33   : > { %v1070_v39 = vld [vmem:[%s1185_s8 + $0x4] ss:$12 sps:$4 sm:$0xff]   ;;  %v1067_v46 = vld [vmem:[%s1185_s8 + $0x8] ss:$12 sps:$4 sm:$0xff]   ;;  %v1068_v56 = vld [vmem:[%s1185_s8] ss:$12 sps:$4 sm:$0xff]  }
  0x34   : > { %675 = vmatpush1.bf16.msra.mxu0 %v1033_v22  ;;  %v1034_v42 = vld [vmem:[%s1183_s7 + $0xa4] ss:$8 sps:$4 sm:$0xff]   ;;  %659 = vmatprep.mubr.bf16.mxu1 %v1070_v39  ;;  %v1063_v43 = vld [vmem:[%s1183_s7 + $0x170] ss:$8 sps:$4 sm:$0xff]   ;;  %v1036_v44 = vld [vmem:[%s1183_s7 + $0xa0] ss:$8 sps:$4 sm:$0xff]  }
  0x35   : > { %634 = vmatpush1.bf16.msra.mxu1 %v1006_v13  ;;  %676 = vmatprep.subr.bf16.mxu0 %v1037_v24  ;;  %v1040_v45 = vld [vmem:[%s1183_s7 + $0xb4] ss:$8 sps:$4 sm:$0xff]   ;;  %v1042_v47 = vld [vmem:[%s1183_s7 + $0xb0] ss:$8 sps:$4 sm:$0xff]   ;;  %v1046_v48 = vld [vmem:[%s1183_s7 + $0xc4] ss:$8 sps:$4 sm:$0xff]   ;;  %v731_v13 = vlaneseq (!%p940_p11) }
  0x36   : > { %635 = vmatprep.subr.bf16.mxu1 %v1007_v16  ;;  %v1048_v49 = vld [vmem:[%s1183_s7 + $0xc0] ss:$8 sps:$4 sm:$0xff]   ;;  %v1052_v50 = vld [vmem:[%s1183_s7 + $0xd4] ss:$8 sps:$4 sm:$0xff]   ;;  %v1054_v51 = vld [vmem:[%s1183_s7 + $0xd0] ss:$8 sps:$4 sm:$0xff]  }
  0x37   : > { %v1058_v52 = vld [vmem:[%s1183_s7 + $0xe4] ss:$8 sps:$4 sm:$0xff]   ;;  %v1060_v53 = vld [vmem:[%s1183_s7 + $0xe0] ss:$8 sps:$4 sm:$0xff]   ;;  %v1064_v54 = vld [vmem:[%s1183_s7 + $0xf4] ss:$8 sps:$4 sm:$0xff]  }
  0x38   : > { %677 = vmatpush1.bf16.msra.mxu0 %v1039_v26  ;;  %v1066_v55 = vld [vmem:[%s1183_s7 + $0xf0] ss:$8 sps:$4 sm:$0xff]   ;;  %v315_v61 = vld [vmem:[#allocation2] sm:$0xff]  ;;  %v316_v0 = vld [vmem:[#allocation2 + $0x8] sm:$0xff]  ;;  %v732_v14 = vshrl.u32 (!%p940_p11), %v731_v13, 7 }
  0x39   : > { %636 = vmatpush1.bf16.msra.mxu1 %v1009_v19  ;;  %678 = vmatprep.subr.bf16.mxu0 %v1043_v28  ;;  %v317_v3 = vld [vmem:[#allocation2 + $0x10] sm:$0xff]  ;;  %v318_v7 = vld [vmem:[#allocation2 + $0x18] sm:$0xff]  ;;  %v729_v15 = vld [vmem:[%s1272_s2] sm:$0x3] (!%p940_p11) }
  0x3a   : > { %637 = vmatprep.subr.bf16.mxu1 %v1010_v20  ;;  %v733_v17 = vsub.s32 (!%p940_p11), 0, %v732_v14  ;;  %v737_v18 = vsub.s32 (!%p940_p11), 1, %v732_v14 }
  0x3c   : > { %679 = vmatpush1.bf16.msra.mxu0 %v1045_v30  ;;  %v734_v22 = vrot.slane (!%p940_p11), %v729_v15, %v733_v17 }
  0x3d   : > { %638 = vmatpush1.bf16.msra.mxu1 %v1012_v23  ;;  %680 = vmatprep.subr.bf16.mxu0 %v1049_v32  ;;  %v738_v23 = vrot.slane (!%p940_p11), %v729_v15, %v737_v18 }
  0x3e   : > { %639 = vmatprep.subr.bf16.mxu1 %v1013_v25 }
  0x40   : > { %681 = vmatpush1.bf16.msra.mxu0 %v1051_v34 }
  0x41   : > { %640 = vmatpush1.bf16.msra.mxu1 %v1015_v27  ;;  %682 = vmatprep.subr.bf16.mxu0 %v1055_v36 }
  0x42   : > { %641 = vmatprep.subr.bf16.mxu1 %v1016_v29 }
  0x44   : > { %683 = vmatpush1.bf16.msra.mxu0 %v1057_v38 }
  0x45   : > { %642 = vmatpush1.bf16.msra.mxu1 %v1018_v31  ;;  %684 = vmatprep.subr.bf16.mxu0 %v1061_v41 }
  0x46   : > { %643 = vmatprep.subr.bf16.mxu1 %v1022_v33 }
  0x48   : > { %685 = vmatpush1.bf16.msra.mxu0 %v1063_v43 }
  0x49   : > { %644 = vmatpush1.bf16.msra.mxu1 %v1024_v35 }
  0x4a   : > { %645 = vmatprep.subr.bf16.mxu1 %v1028_v37 }
  0x4b   : > { %703 = vmatmul.mubr.bf16.vlgmr.msra.gmra.mrb[0].mxu0 %v1067_v46 }
  0x4d   : > { %646 = vmatpush1.bf16.msra.mxu1 %v1030_v40 }
  0x4e   : > { %647 = vmatprep.subr.bf16.mxu1 %v1034_v42 }
  0x51   : > { %648 = vmatpush1.bf16.msra.mxu1 %v1036_v44 }
  0x52   : > { %649 = vmatprep.subr.bf16.mxu1 %v1040_v45 }
  0x55   : > { %650 = vmatpush1.bf16.msra.mxu1 %v1042_v47 }
  0x56   : > { %651 = vmatprep.subr.bf16.mxu1 %v1046_v48 }
  0x59   : > { %652 = vmatpush1.bf16.msra.mxu1 %v1048_v49 }
  0x5a   : > { %653 = vmatprep.subr.bf16.mxu1 %v1052_v50 }
  0x5d   : > { %654 = vmatpush1.bf16.msra.mxu1 %v1054_v51 }
  0x5e   : > { %655 = vmatprep.subr.bf16.mxu1 %v1058_v52 }
  0x61   : > { %656 = vmatpush1.bf16.msra.mxu1 %v1060_v53 }
  0x62   : > { %657 = vmatprep.subr.bf16.mxu1 %v1064_v54 }
  0x65   : > { %658 = vmatpush1.bf16.msra.mxu1 %v1066_v55 }
  0x68   : > { %660 = vmatmul.mubr.bf16.vlgmr.msra.gmra.mrb[0].mxu1 %v1068_v56 }
 0x11e   : > { %v704_v57 = vpop.f32.mrb[0].mxu0 }
 0x11f   : > { %v706_v58 = vpop.f32.mrb[1].mxu0 }
 0x120   : > { %v708_v59 = vpop.f32.mrb[2].mxu0 }
 0x121   : > { %v710_v60 = vpop.f32.mrb[3].mxu0 }
 0x13b   : > { %v661_v62 = vpop.f32.mrb[0].mxu1 }
 0x13c   : > { %v705_v63 = vadd.f32 %v704_v57, %v661_v62  ;;  %v663_v1 = vpop.f32.mrb[1].mxu1 }
 0x13d   : > { %v707_v2 = vadd.f32 %v706_v58, %v663_v1  ;;  %v665_v4 = vpop.f32.mrb[2].mxu1  ;;  %724 = sbr.rel (%p940_p11) target bundleno = 334 (0x14e), region = 66 }
 0x13e   : > { %v713_v5 = vadd.f32 %v705_v63, %v315_v61  ;;  %v709_v6 = vadd.f32 %v708_v59, %v665_v4  ;;  %v667_v8 = vpop.f32.mrb[3].mxu1 }
 0x13f   : > { %v714_v9 = vadd.f32 %v707_v2, %v316_v0  ;;  %v711_v10 = vadd.f32 %v710_v60, %v667_v8 }
 0x140   : > { %717 = vst [vmem:[#allocation2] sm:$0xff] %v713_v5  ;;  %v715_v11 = vadd.f32 %v709_v6, %v317_v3 }
 0x141   : > { %718 = vst [vmem:[#allocation2 + $0x8] sm:$0xff] %v714_v9  ;;  %v716_v12 = vadd.f32 %v711_v10, %v318_v7 }
 0x142   : > { %719 = vst [vmem:[#allocation2 + $0x10] sm:$0xff] %v715_v11 }
 0x143   : > { %720 = vst [vmem:[#allocation2 + $0x18] sm:$0xff] %v716_v12 }
 0x147   : > { %v725_v16 = vld [vmem:[#allocation2] sm:$0xff] }
 0x148   : > { %v726_v19 = vld [vmem:[#allocation2 + $0x8] sm:$0xff]  ;;  %v741_v24 = vadd.f32 %v734_v22, %v725_v16 }
 0x149   : > { %v727_v20 = vld [vmem:[#allocation2 + $0x10] sm:$0xff]  ;;  %v742_v25 = vadd.f32 %v738_v23, %v726_v19 }
 0x14a   : > { %v728_v21 = vld [vmem:[#allocation2 + $0x18] sm:$0xff]  ;;  %v743_v26 = vadd.f32 %v734_v22, %v727_v20  ;;  %745 = vst [vmem:[%s1273_s3] sm:$0xff] %v741_v24 }
 0x14b   : > { %v744_v27 = vadd.f32 %v738_v23, %v728_v21  ;;  %746 = vst [vmem:[%s1273_s3 + $0x8] sm:$0xff] %v742_v25 }
 0x14c   : > { %747 = vst [vmem:[%s1273_s3 + $0x10] sm:$0xff] %v743_v26 }
 0x14d   : > { %748 = vst [vmem:[%s1273_s3 + $0x18] sm:$0xff] %v744_v27 }
 0x14e PF: > { %s13_s16 = sadd.s32 1, %s1109_s16   ;;  %s1274_s12 = smov %s1097_s13 }
 0x14f   : > { %p10_p12 = scmp.ge.s32.totalorder %s13_s16, 5   ;;  %s1275_s13 = smov %s1168_s20 }
 0x150   : > { %s1276_s14 = smov %s1105_s15  ;;  %s1277_s15 = smov %s1279_s17 }
 0x151   :  { %12 = sbr.rel (!%p10_p12) target bundleno = 3 (0x3), region = 113 }

// kernel: _lambda_.96
= control target key start
LH: loop header
LB: loop body
LE: loop exit
PB: predicated region body
PF: predicated region fallthrough
CT: control target
= control target key end

     0   :  { %v20_v0 = vlaneseq  ;;  %s120_s1 = inlined_call_operand.vmem [shape: f32[1,256], index: 1, kind: input, shape index: {}]   ;;  %s121_s2 = inlined_call_operand.vmem [shape: f32[1,256], index: 2, kind: input, shape index: {}]   ;;  %s122_s0 = inlined_call_operand.vmem [shape: f32[16,256], index: 0, kind: input, shape index: {}]   ;;  %s123_s3 = inlined_call_operand.vmem [shape: bf16[16,256], index: 3, kind: output, shape index: {}]  }
   0x1   :  { %v18_v2 = vld [vmem:[%s120_s1] sm:$0x3]  ;;  %v15_v7 = vld [vmem:[%s122_s0 + $0x8] sm:$0xff]  ;;  %v16_v8 = vld [vmem:[%s122_s0 + $0x10] sm:$0xff] }
   0x2   :  { %v21_v1 = vshrl.u32 %v20_v0, 7  ;;  %v34_v3 = vld [vmem:[%s121_s2] sm:$0x3]  ;;  %v17_v9 = vld [vmem:[%s122_s0 + $0x18] sm:$0xff] }
   0x3   :  { %v14_v4 = vld [vmem:[%s122_s0] sm:$0xff] }
   0x4   :  { %v22_v5 = vsub.s32 0, %v21_v1  ;;  %v26_v6 = vsub.s32 1, %v21_v1 }
   0x6   :  { %v23_v10 = vrot.slane %v18_v2, %v22_v5  ;;  %v27_v11 = vrot.slane %v18_v2, %v26_v6  ;;  %v39_v12 = vrot.slane %v34_v3, %v22_v5  ;;  %v43_v13 = vrot.slane %v34_v3, %v26_v6 }
   0x8   :  { %v30_v14 = vmul.f32 %v23_v10, %v14_v4  ;;  %v31_v15 = vmul.f32 %v27_v11, %v15_v7  ;;  %v32_v16 = vmul.f32 %v23_v10, %v16_v8  ;;  %v33_v17 = vmul.f32 %v27_v11, %v17_v9 }
   0xa   :  { %v46_v18 = vadd.f32 %v39_v12, %v30_v14  ;;  %v47_v19 = vadd.f32 %v43_v13, %v31_v15  ;;  %v48_v20 = vadd.f32 %v39_v12, %v32_v16  ;;  %v49_v21 = vadd.f32 %v43_v13, %v33_v17 }
   0xc   :  { %v50_v22 = vmax.f32 %v46_v18, 0.0  ;;  %v51_v23 = vmax.f32 %v47_v19, 0.0  ;;  %v52_v24 = vmax.f32 %v48_v20, 0.0  ;;  %v53_v25 = vmax.f32 %v49_v21, 0.0 }
   0xe   :  { %v74_v26 = vpack.c.bf16 %v51_v23, %v50_v22  ;;  %v75_v27 = vpack.c.bf16 %v53_v25, %v52_v24 }
  0x10   :  { %66 = vst [vmem:[%s123_s3] sm:$0xff] %v74_v26  ;;  %67 = vst [vmem:[%s123_s3 + $0x8] sm:$0xff] %v75_v27 }

// kernel: _lambda_.98
= control target key start
LH: loop header
LB: loop body
LE: loop exit
PB: predicated region body
PF: predicated region fallthrough
CT: control target
= control target key end

     0   :  { %v256_v1 = vmov 0   ;;  %v191_v18 = vlaneseq  ;;  %s343_s1 = inlined_call_operand.vmem [shape: bf16[128,256], index: 1, kind: input, shape index: {}]   ;;  %s344_s0 = inlined_call_operand.vmem [shape: bf16[16,128], index: 0, kind: input, shape index: {}]   ;;  %s345_s2 = inlined_call_operand.vmem [shape: f32[1,256], index: 2, kind: input, shape index: {}]   ;;  %s346_s3 = inlined_call_operand.vmem [shape: f32[16,256], index: 3, kind: output, shape index: {}]  }
   0x1   :  { %v231_v0 = vld [vmem:[%s343_s1 + $0x4] ss:$8 sps:$4 sm:$0xff]   ;;  %163 = vmatprep.mubr.bf16.mxu0 %v256_v1  ;;  %v233_v2 = vld [vmem:[%s343_s1] ss:$8 sps:$4 sm:$0xff]   ;;  %v234_v3 = vld [vmem:[%s343_s1 + $0x14] ss:$8 sps:$4 sm:$0xff]  }
   0x2   :  { %131 = vmatprep.subr.bf16.mxu0 %v231_v0  ;;  %v236_v4 = vld [vmem:[%s343_s1 + $0x10] ss:$8 sps:$4 sm:$0xff]   ;;  %v237_v5 = vld [vmem:[%s343_s1 + $0x24] ss:$8 sps:$4 sm:$0xff]   ;;  %v239_v6 = vld [vmem:[%s343_s1 + $0x20] ss:$8 sps:$4 sm:$0xff]  }
   0x3   :  { %132 = vmatpush1.bf16.msra.mxu0 %v233_v2  ;;  %v240_v7 = vld [vmem:[%s343_s1 + $0x34] ss:$8 sps:$4 sm:$0xff]   ;;  %v242_v8 = vld [vmem:[%s343_s1 + $0x30] ss:$8 sps:$4 sm:$0xff]   ;;  %v243_v9 = vld [vmem:[%s343_s1 + $0x44] ss:$8 sps:$4 sm:$0xff]  }
   0x4   :  { %133 = vmatprep.subr.bf16.mxu0 %v234_v3  ;;  %v245_v10 = vld [vmem:[%s343_s1 + $0x40] ss:$8 sps:$4 sm:$0xff]   ;;  %v246_v11 = vld [vmem:[%s343_s1 + $0x54] ss:$8 sps:$4 sm:$0xff]   ;;  %v248_v12 = vld [vmem:[%s343_s1 + $0x50] ss:$8 sps:$4 sm:$0xff]  }
   0x5   :  { %v249_v13 = vld [vmem:[%s343_s1 + $0x64] ss:$8 sps:$4 sm:$0xff]   ;;  %v251_v14 = vld [vmem:[%s343_s1 + $0x60] ss:$8 sps:$4 sm:$0xff]   ;;  %v252_v15 = vld [vmem:[%s343_s1 + $0x74] ss:$8 sps:$4 sm:$0xff]  }
   0x6   :  { %v254_v16 = vld [vmem:[%s343_s1 + $0x70] ss:$8 sps:$4 sm:$0xff]   ;;  %v255_v17 = vld [vmem:[%s344_s0] sm:$0xff]   ;;  %v192_v19 = vshrl.u32 %v191_v18, 7 }
   0x7   :  { %134 = vmatpush1.bf16.msra.mxu0 %v236_v4  ;;  %v189_v21 = vld [vmem:[%s345_s2] sm:$0x3] }
   0x8   :  { %135 = vmatprep.subr.bf16.mxu0 %v237_v5  ;;  %v193_v20 = vsub.s32 0, %v192_v19  ;;  %v197_v22 = vsub.s32 1, %v192_v19 }
   0xa   :  { %v194_v23 = vrot.slane %v189_v21, %v193_v20  ;;  %v198_v24 = vrot.slane %v189_v21, %v197_v22 }
   0xb   :  { %136 = vmatpush1.bf16.msra.mxu0 %v239_v6 }
   0xc   :  { %137 = vmatprep.subr.bf16.mxu0 %v240_v7 }
   0xf   :  { %138 = vmatpush1.bf16.msra.mxu0 %v242_v8 }
  0x10   :  { %139 = vmatprep.subr.bf16.mxu0 %v243_v9 }
  0x13   :  { %140 = vmatpush1.bf16.msra.mxu0 %v245_v10 }
  0x14   :  { %141 = vmatprep.subr.bf16.mxu0 %v246_v11 }
  0x17   :  { %142 = vmatpush1.bf16.msra.mxu0 %v248_v12 }
  0x18   :  { %143 = vmatprep.subr.bf16.mxu0 %v249_v13 }
  0x1b   :  { %144 = vmatpush1.bf16.msra.mxu0 %v251_v14 }
  0x1c   :  { %145 = vmatprep.subr.bf16.mxu0 %v252_v15 }
  0x1f   :  { %146 = vmatpush1.bf16.msra.mxu0 %v254_v16 }
  0x22   :  { %164 = vmatmul.mubr.bf16.vlgmr.msra.gmra.mrb[0].mxu0 %v255_v17 }
  0xf5   :  { %v165_v25 = vpop.f32.mrb[0].mxu0 }
  0xf6   :  { %v201_v26 = vadd.f32 %v194_v23, %v165_v25  ;;  %v167_v27 = vpop.f32.mrb[1].mxu0 }
  0xf7   :  { %v202_v28 = vadd.f32 %v198_v24, %v167_v27  ;;  %v169_v29 = vpop.f32.mrb[2].mxu0 }
  0xf8   :  { %205 = vst [vmem:[%s346_s3] sm:$0xff] %v201_v26  ;;  %v203_v30 = vadd.f32 %v194_v23, %v169_v29  ;;  %v171_v31 = vpop.f32.mrb[3].mxu0 }
  0xf9   :  { %206 = vst [vmem:[%s346_s3 + $0x8] sm:$0xff] %v202_v28  ;;  %v204_v32 = vadd.f32 %v198_v24, %v171_v31 }
  0xfa   :  { %207 = vst [vmem:[%s346_s3 + $0x10] sm:$0xff] %v203_v30 }
  0xfb   :  { %208 = vst [vmem:[%s346_s3 + $0x18] sm:$0xff] %v204_v32 }

// kernel: _lambda_.97
= control target key start
LH: loop header
LB: loop body
LE: loop exit
PB: predicated region body
PF: predicated region fallthrough
CT: control target
= control target key end

     0   :  { %s1596_s12 = smov 0   ;;  %s1598_s13 = smov 0   ;;  %s1784_s0 = inlined_call_operand.vmem [shape: bf16[16,2304], index: 0, kind: input, shape index: {}]   ;;  %s1785_s1 = inlined_call_operand.vmem [shape: bf16[2304,256], index: 1, kind: input, shape index: {}]   ;;  %s1786_s2 = inlined_call_operand.vmem [shape: f32[1,256], index: 2, kind: input, shape index: {}]   ;;  %s1787_s3 = inlined_call_operand.vmem [shape: f32[16,256], index: 3, kind: output, shape index: {}]  }
   0x1   :  { %s1600_s14 = smov 0   ;;  %s1602_s15 = smov 0  }
   0x2   :  { %s1604_s16 = smov 0  }
   0x3 LB: > { %s25_s17 = sadd.s32 1, %s1569_s15  ;;  %p48_p1 = scmp.ne.s32.totalorder %s1561_s13, %s1557_s12  ;;  %s1573_s16 = sphi %s1604_s16, %s13_s16   ;;  %s1569_s15 = sphi %s1602_s15, %s1791_s15   ;;  %s1565_s14 = sphi %s1600_s14, %s1790_s14   ;;  %s1561_s13 = sphi %s1598_s13, %s1789_s13   ;;  %s1557_s12 = sphi %s1596_s12, %s1788_s12  }
   0x4   : > { %p26_p0 = scmp.ge.s32.totalorder %s25_s17, 3  ;;  %p49_p2 = scmp.eq.s32.totalorder %s1573_s16, 0 }
   0x5   : > { %s41_s19 = sadd.s32 1, %s1561_s13  ;;  %p1216_p5 = scmp.ge.s32.totalorder %s1573_s16, 3 }
   0x6   : > { %s1793_s17 = smov (%p26_p0, %s25_s17), 0  ;;  %p50_p3 = por %p49_p2, %p48_p1 }
   0x7   : > { %s37_s18 = ssub.s32 %s1569_s15, %s1793_s17  ;;  %164 = sbr.rel (%p1216_p5) target bundleno = 22 (0x16), region = 20 }
   0x8   : > { %p39_p4 = scmp.eq.s32.totalorder %s37_s18, 0 }
   0xa   : > { %s1631_s20 = scalar_select %p39_p4, %s1561_s13, %s41_s19  }
   0xe   : > { %167 = sbr.rel (!%p50_p3) target bundleno = 22 (0x16), region = 24  ;;  %s169_s21 = sand.u32 (%p50_p3), 1, %s1561_s13  }
   0xf   : > { %s1329_s22 = smul.u32 (%p50_p3), 24, %s1569_s15 }
  0x10   : > { %s1339_s23 = smul.u32 (%p50_p3), 48, %s169_s21 }
  0x11   : > { %s177_s26 = scalar_lea.vmem (%p50_p3), %s1784_s0, %s1329_s22 }
  0x12   : > { %v190_v0 = vld [vmem:[%s177_s26] sm:$0xff] (%p50_p3)  ;;  %v192_v1 = vld [vmem:[%s177_s26 + $0x8] sm:$0xff] (%p50_p3)  ;;  %v194_v2 = vld [vmem:[%s177_s26 + $0x10] sm:$0xff] (%p50_p3)  ;;  %s171_s27 = scalar_lea.vmem (%p50_p3), [#allocation3], %s1339_s23 }
  0x13   : > { %191 = vst [vmem:[%s171_s27] sm:$0xff] (%p50_p3), %v190_v0  ;;  %193 = vst [vmem:[%s171_s27 + $0x8] sm:$0xff] (%p50_p3), %v192_v1  ;;  %v196_v3 = vld [vmem:[%s177_s26 + $0x48] sm:$0xff] (%p50_p3)  ;;  %v198_v4 = vld [vmem:[%s177_s26 + $0x50] sm:$0xff] (%p50_p3) }
  0x14   : > { %195 = vst [vmem:[%s171_s27 + $0x10] sm:$0xff] (%p50_p3), %v194_v2  ;;  %v200_v5 = vld [vmem:[%s177_s26 + $0x58] sm:$0xff] (%p50_p3)  ;;  %197 = vst [vmem:[%s171_s27 + $0x18] sm:$0xff] (%p50_p3), %v196_v3 }
  0x15   : > { %199 = vst [vmem:[%s171_s27 + $0x20] sm:$0xff] %v198_v4  ;;  %201 = vst [vmem:[%s171_s27 + $0x28] sm:$0xff] %v200_v5 }
  0x16 PF: > { %p1218_p6 = scmp.ge.s32.totalorder %s1573_s16, 1  ;;  %p221_p7 = scmp.lt.s32.totalorder %s1573_s16, 4 }
  0x18   : > { %p222_p8 = pnand %p1218_p6, %p221_p7 }
  0x19   : > { %s228_s28 = sand.u32 (!%p222_p8), 1, %s1557_s12   ;;  %s272_s29 = smul.u32 (!%p222_p8), 96, %s1565_s14 }
  0x1a   : > { %225 = sbr.rel (%p222_p8) target bundleno = 399 (0x18f), region = 51  ;;  %p1221_p10 = scmp.ne.s32.totalorder (!%p222_p8), %s1565_s14, 0 }
  0x1b   : > { %s1340_s30 = smul.u32 (!%p222_p8), 48, %s228_s28  ;;  %p274_p9 = scmp.lt.s32.totalorder (!%p222_p8), %s272_s29, 287 }
  0x1d   : > { %s1648_s8 = scalar_lea.vmem (!%p222_p8), [#allocation3], %s1340_s30 }
  0x21   : > { %s1795_s29 = smov (!%p274_p9, %s272_s29), 287  ;;  %304 = sbr.rel (%p1221_p10) target bundleno = 40 (0x28), region = 59 }
  0x22   : > { %s1330_s4 = sshll.u32 %s1795_s29, 3  ;;  %v1575_v6 = vmov (!%p1221_p10), 0.0  }
  0x23   : > { %s1646_s7 = scalar_lea.vmem %s1785_s1, %s1330_s4  ;;  %305 = vst [vmem:[#allocation2] sm:$0xff] (!%p1221_p10), %v1575_v6  ;;  %306 = vst [vmem:[#allocation2 + $0x8] sm:$0xff] (!%p1221_p10), %v1575_v6 }
  0x24   : > { %307 = vst [vmem:[#allocation2 + $0x10] sm:$0xff] (!%p1221_p10), %v1575_v6  ;;  %308 = vst [vmem:[#allocation2 + $0x18] sm:$0xff] (!%p1221_p10), %v1575_v6 }
  0x28 PF: > { %v1382_v7 = vld [vmem:[%s1646_s7 + $0x104] ss:$8 sps:$4 sm:$0xff]   ;;  %v1384_v8 = vld [vmem:[%s1646_s7 + $0x100] ss:$8 sps:$4 sm:$0xff]   ;;  %v1385_v9 = vld [vmem:[%s1646_s7 + $0x114] ss:$8 sps:$4 sm:$0xff]  }
  0x29   : > { %968 = vmatprep.subr.bf16.mxu0 %v1382_v7  ;;  %v1387_v10 = vld [vmem:[%s1646_s7 + $0x110] ss:$8 sps:$4 sm:$0xff]   ;;  %v1388_v11 = vld [vmem:[%s1646_s7 + $0x124] ss:$8 sps:$4 sm:$0xff]   ;;  %v1390_v12 = vld [vmem:[%s1646_s7 + $0x120] ss:$8 sps:$4 sm:$0xff]  }
  0x2a   : > { %969 = vmatpush1.bf16.msra.mxu0 %v1384_v8  ;;  %v1391_v13 = vld [vmem:[%s1646_s7 + $0x134] ss:$8 sps:$4 sm:$0xff]   ;;  %v1393_v14 = vld [vmem:[%s1646_s7 + $0x130] ss:$8 sps:$4 sm:$0xff]   ;;  %v1394_v15 = vld [vmem:[%s1646_s7 + $0x144] ss:$8 sps:$4 sm:$0xff]  }
  0x2b   : > { %970 = vmatprep.subr.bf16.mxu0 %v1385_v9  ;;  %v1396_v16 = vld [vmem:[%s1646_s7 + $0x140] ss:$8 sps:$4 sm:$0xff]   ;;  %v1397_v17 = vld [vmem:[%s1646_s7 + $0x154] ss:$8 sps:$4 sm:$0xff]   ;;  %v1399_v18 = vld [vmem:[%s1646_s7 + $0x150] ss:$8 sps:$4 sm:$0xff]  }
  0x2c   : > { %v1400_v19 = vld [vmem:[%s1646_s7 + $0x164] ss:$8 sps:$4 sm:$0xff]   ;;  %v1432_v21 = vld [vmem:[%s1646_s7] ss:$8 sps:$4 sm:$0xff]   ;;  %v1403_v24 = vld [vmem:[%s1646_s7 + $0x174] ss:$8 sps:$4 sm:$0xff]  }
  0x2d   : > { %v1429_v20 = vld [vmem:[%s1646_s7 + $0x4] ss:$8 sps:$4 sm:$0xff]   ;;  %v1402_v22 = vld [vmem:[%s1646_s7 + $0x160] ss:$8 sps:$4 sm:$0xff]   ;;  %v1439_v25 = vld [vmem:[%s1646_s7 + $0x14] ss:$8 sps:$4 sm:$0xff]  }
  0x2e   : > { %971 = vmatpush1.bf16.msra.mxu0 %v1387_v10  ;;  %925 = vmatprep.subr.bf16.mxu1 %v1429_v20  ;;  %v1435_v23 = vld [vmem:[%s1648_s8 + $0xc] ss:$24 sps:$4 sm:$0xff]   ;;  %v1441_v26 = vld [vmem:[%s1646_s7 + $0x10] ss:$8 sps:$4 sm:$0xff]   ;;  %v1447_v30 = vld [vmem:[%s1646_s7 + $0x20] ss:$8 sps:$4 sm:$0xff]  }
  0x2f   : > { %972 = vmatprep.subr.bf16.mxu0 %v1388_v11  ;;  %926 = vmatpush1.bf16.msra.mxu1 %v1432_v21  ;;  %v1405_v27 = vld [vmem:[%s1646_s7 + $0x170] ss:$8 sps:$4 sm:$0xff]   ;;  %v1406_v28 = vld [vmem:[%s1646_s7 + $0x184] ss:$8 sps:$4 sm:$0xff]   ;;  %v1408_v31 = vld [vmem:[%s1646_s7 + $0x180] ss:$8 sps:$4 sm:$0xff]  }
  0x30   : > { %1000 = vmatprep.mubr.bf16.mxu0 %v1435_v23  ;;  %927 = vmatprep.subr.bf16.mxu1 %v1439_v25  ;;  %v1445_v29 = vld [vmem:[%s1646_s7 + $0x24] ss:$8 sps:$4 sm:$0xff]   ;;  %v1451_v32 = vld [vmem:[%s1646_s7 + $0x34] ss:$8 sps:$4 sm:$0xff]   ;;  %v1453_v34 = vld [vmem:[%s1646_s7 + $0x30] ss:$8 sps:$4 sm:$0xff]  }
  0x31   : > { %v1409_v33 = vld [vmem:[%s1646_s7 + $0x194] ss:$8 sps:$4 sm:$0xff]   ;;  %v1457_v35 = vld [vmem:[%s1646_s7 + $0x44] ss:$8 sps:$4 sm:$0xff]   ;;  %v1411_v36 = vld [vmem:[%s1646_s7 + $0x190] ss:$8 sps:$4 sm:$0xff]  }
  0x32   : > { %973 = vmatpush1.bf16.msra.mxu0 %v1390_v12  ;;  %v1412_v37 = vld [vmem:[%s1646_s7 + $0x1a4] ss:$8 sps:$4 sm:$0xff]   ;;  %v1459_v38 = vld [vmem:[%s1646_s7 + $0x40] ss:$8 sps:$4 sm:$0xff]   ;;  %v1463_v39 = vld [vmem:[%s1646_s7 + $0x54] ss:$8 sps:$4 sm:$0xff]  }
  0x33   : > { %974 = vmatprep.subr.bf16.mxu0 %v1391_v13  ;;  %928 = vmatpush1.bf16.msra.mxu1 %v1441_v26  ;;  %v1414_v40 = vld [vmem:[%s1646_s7 + $0x1a0] ss:$8 sps:$4 sm:$0xff]   ;;  %v1415_v41 = vld [vmem:[%s1646_s7 + $0x1b4] ss:$8 sps:$4 sm:$0xff]   ;;  %v1465_v42 = vld [vmem:[%s1646_s7 + $0x50] ss:$8 sps:$4 sm:$0xff]  }
  0x34   : > { %929 = vmatprep.subr.bf16.mxu1 %v1445_v29  ;;  %v1469_v43 = vld [vmem:[%s1646_s7 + $0x64] ss:$8 sps:$4 sm:$0xff]   ;;  %v1417_v44 = vld [vmem:[%s1646_s7 + $0x1b0] ss:$8 sps:$4 sm:$0xff]   ;;  %v1471_v46 = vld [vmem:[%s1646_s7 + $0x60] ss:$8 sps:$4 sm:$0xff]  }
  0x35   : > { %v1418_v45 = vld [vmem:[%s1646_s7 + $0x1c4] ss:$8 sps:$4 sm:$0xff]   ;;  %v1475_v47 = vld [vmem:[%s1646_s7 + $0x74] ss:$8 sps:$4 sm:$0xff]   ;;  %v1420_v48 = vld [vmem:[%s1646_s7 + $0x1c0] ss:$8 sps:$4 sm:$0xff]  }
  0x36   : > { %975 = vmatpush1.bf16.msra.mxu0 %v1393_v14  ;;  %v1421_v49 = vld [vmem:[%s1646_s7 + $0x1d4] ss:$8 sps:$4 sm:$0xff]   ;;  %v1477_v50 = vld [vmem:[%s1646_s7 + $0x70] ss:$8 sps:$4 sm:$0xff]   ;;  %v1481_v51 = vld [vmem:[%s1646_s7 + $0x84] ss:$8 sps:$4 sm:$0xff]  }
  0x37   : > { %976 = vmatprep.subr.bf16.mxu0 %v1394_v15  ;;  %930 = vmatpush1.bf16.msra.mxu1 %v1447_v30  ;;  %v1423_v52 = vld [vmem:[%s1646_s7 + $0x1d0] ss:$8 sps:$4 sm:$0xff]   ;;  %v1424_v53 = vld [vmem:[%s1646_s7 + $0x1e4] ss:$8 sps:$4 sm:$0xff]   ;;  %v1483_v54 = vld [vmem:[%s1646_s7 + $0x80] ss:$8 sps:$4 sm:$0xff]  }
  0x38   : > { %931 = vmatprep.subr.bf16.mxu1 %v1451_v32  ;;  %v1487_v55 = vld [vmem:[%s1646_s7 + $0x94] ss:$8 sps:$4 sm:$0xff]   ;;  %v1426_v56 = vld [vmem:[%s1646_s7 + $0x1e0] ss:$8 sps:$4 sm:$0xff]   ;;  %v1489_v58 = vld [vmem:[%s1646_s7 + $0x90] ss:$8 sps:$4 sm:$0xff]  }
  0x39   : > { %v1427_v57 = vld [vmem:[%s1646_s7 + $0x1f4] ss:$8 sps:$4 sm:$0xff]   ;;  %v1493_v59 = vld [vmem:[%s1646_s7 + $0xa4] ss:$8 sps:$4 sm:$0xff]   ;;  %v1431_v60 = vld [vmem:[%s1646_s7 + $0x1f0] ss:$8 sps:$4 sm:$0xff]  }
  0x3a   : > { %977 = vmatpush1.bf16.msra.mxu0 %v1396_v16  ;;  %v1438_v61 = vld [vmem:[%s1646_s7 + $0x204] ss:$8 sps:$4 sm:$0xff]   ;;  %v1495_v62 = vld [vmem:[%s1646_s7 + $0xa0] ss:$8 sps:$4 sm:$0xff]   ;;  %v1499_v0 = vld [vmem:[%s1646_s7 + $0xb4] ss:$8 sps:$4 sm:$0xff]  }
  0x3b   : > { %978 = vmatprep.subr.bf16.mxu0 %v1397_v17  ;;  %932 = vmatpush1.bf16.msra.mxu1 %v1453_v34  ;;  %v1433_v63 = vld [vmem:[%s1648_s8 + $0x8] ss:$24 sps:$4 sm:$0xff]   ;;  %v1444_v2 = vld [vmem:[%s1646_s7 + $0x214] ss:$8 sps:$4 sm:$0xff]   ;;  %v1505_v5 = vld [vmem:[%s1646_s7 + $0xc4] ss:$8 sps:$4 sm:$0xff]  }
  0x3c   : > { %933 = vmatprep.subr.bf16.mxu1 %v1457_v35  ;;  %v1436_v1 = vld [vmem:[%s1646_s7 + $0x200] ss:$8 sps:$4 sm:$0xff]   ;;  %v1501_v3 = vld [vmem:[%s1646_s7 + $0xb0] ss:$8 sps:$4 sm:$0xff]   ;;  %v1528_v4 = vld [vmem:[%s1648_s8 + $0x4] ss:$24 sps:$4 sm:$0xff]  }
  0x3d   : > { %v1442_v6 = vld [vmem:[%s1646_s7 + $0x210] ss:$8 sps:$4 sm:$0xff]   ;;  %957 = vmatprep.mubr.bf16.mxu1 %v1528_v4  ;;  %v1534_v7 = vld [vmem:[%s1648_s8 + $0x14] ss:$24 sps:$4 sm:$0xff]   ;;  %v1507_v9 = vld [vmem:[%s1646_s7 + $0xc0] ss:$8 sps:$4 sm:$0xff]  }
  0x3e   : > { %979 = vmatpush1.bf16.msra.mxu0 %v1399_v18  ;;  %v1450_v8 = vld [vmem:[%s1646_s7 + $0x224] ss:$8 sps:$4 sm:$0xff]   ;;  %v1511_v10 = vld [vmem:[%s1646_s7 + $0xd4] ss:$8 sps:$4 sm:$0xff]   ;;  %v1448_v11 = vld [vmem:[%s1646_s7 + $0x220] ss:$8 sps:$4 sm:$0xff]  }
  0x3f   : > { %980 = vmatprep.subr.bf16.mxu0 %v1400_v19  ;;  %934 = vmatpush1.bf16.msra.mxu1 %v1459_v38  ;;  %v1456_v12 = vld [vmem:[%s1646_s7 + $0x234] ss:$8 sps:$4 sm:$0xff]   ;;  %v1513_v13 = vld [vmem:[%s1646_s7 + $0xd0] ss:$8 sps:$4 sm:$0xff]   ;;  %v1517_v14 = vld [vmem:[%s1646_s7 + $0xe4] ss:$8 sps:$4 sm:$0xff]  }
  0x40   : > { %935 = vmatprep.subr.bf16.mxu1 %v1463_v39  ;;  %v1454_v15 = vld [vmem:[%s1646_s7 + $0x230] ss:$8 sps:$4 sm:$0xff]   ;;  %v1462_v16 = vld [vmem:[%s1646_s7 + $0x244] ss:$8 sps:$4 sm:$0xff]   ;;  %v1519_v17 = vld [vmem:[%s1646_s7 + $0xe0] ss:$8 sps:$4 sm:$0xff]  }
  0x41   : > { %v1523_v18 = vld [vmem:[%s1646_s7 + $0xf4] ss:$8 sps:$4 sm:$0xff]   ;;  %v1460_v19 = vld [vmem:[%s1646_s7 + $0x240] ss:$8 sps:$4 sm:$0xff]   ;;  %v1525_v21 = vld [vmem:[%s1646_s7 + $0xf0] ss:$8 sps:$4 sm:$0xff]  }
  0x42   : > { %981 = vmatpush1.bf16.msra.mxu0 %v1402_v22  ;;  %v1468_v20 = vld [vmem:[%s1646_s7 + $0x254] ss:$8 sps:$4 sm:$0xff]   ;;  %v1466_v22 = vld [vmem:[%s1646_s7 + $0x250] ss:$8 sps:$4 sm:$0xff]   ;;  %v1474_v23 = vld [vmem:[%s1646_s7 + $0x264] ss:$8 sps:$4 sm:$0xff]  }
  0x43   : > { %982 = vmatprep.subr.bf16.mxu0 %v1403_v24  ;;  %936 = vmatpush1.bf16.msra.mxu1 %v1465_v42  ;;  %v1526_v24 = vld [vmem:[%s1648_s8] ss:$24 sps:$4 sm:$0xff]   ;;  %v1480_v26 = vld [vmem:[%s1646_s7 + $0x274] ss:$8 sps:$4 sm:$0xff]   ;;  %v1498_v32 = vld [vmem:[%s1646_s7 + $0x2a4] ss:$8 sps:$4 sm:$0xff]  }
  0x44   : > { %937 = vmatprep.subr.bf16.mxu1 %v1469_v43  ;;  %v1472_v25 = vld [vmem:[%s1646_s7 + $0x260] ss:$8 sps:$4 sm:$0xff]   ;;  %v1492_v30 = vld [vmem:[%s1646_s7 + $0x294] ss:$8 sps:$4 sm:$0xff]   ;;  %v1502_v35 = vld [vmem:[%s1646_s7 + $0x2b0] ss:$8 sps:$4 sm:$0xff]  }
  0x45   : > { %v1484_v29 = vld [vmem:[%s1646_s7 + $0x280] ss:$8 sps:$4 sm:$0xff]   ;;  %v1504_v34 = vld [vmem:[%s1646_s7 + $0x2b4] ss:$8 sps:$4 sm:$0xff]   ;;  %v1514_v39 = vld [vmem:[%s1646_s7 + $0x2d0] ss:$8 sps:$4 sm:$0xff]  }
  0x46   : > { %983 = vmatpush1.bf16.msra.mxu0 %v1405_v27  ;;  %v1478_v27 = vld [vmem:[%s1646_s7 + $0x270] ss:$8 sps:$4 sm:$0xff]   ;;  %v1516_v38 = vld [vmem:[%s1646_s7 + $0x2d4] ss:$8 sps:$4 sm:$0xff]   ;;  %p1324_p11 = scmp.ne.s32.totalorder %s1565_s14, 2 }
  0x47   : > { %984 = vmatprep.subr.bf16.mxu0 %v1406_v28  ;;  %938 = vmatpush1.bf16.msra.mxu1 %v1471_v46  ;;  %v1486_v28 = vld [vmem:[%s1646_s7 + $0x284] ss:$8 sps:$4 sm:$0xff]   ;;  %v1531_v42 = vld [vmem:[%s1646_s7 + $0x2f4] ss:$8 sps:$4 sm:$0xff]   ;;  %v1529_v43 = vld [vmem:[%s1646_s7 + $0x2f0] ss:$8 sps:$4 sm:$0xff]  }
  0x48   : > { %939 = vmatprep.subr.bf16.mxu1 %v1475_v47 }
  0x4a   : > { %985 = vmatpush1.bf16.msra.mxu0 %v1408_v31  ;;  %v1490_v31 = vld [vmem:[%s1646_s7 + $0x290] ss:$8 sps:$4 sm:$0xff]  }
  0x4b   : > { %986 = vmatprep.subr.bf16.mxu0 %v1409_v33  ;;  %940 = vmatpush1.bf16.msra.mxu1 %v1477_v50  ;;  %v1496_v33 = vld [vmem:[%s1646_s7 + $0x2a0] ss:$8 sps:$4 sm:$0xff]  }
  0x4c   : > { %941 = vmatprep.subr.bf16.mxu1 %v1481_v51 }
  0x4e   : > { %987 = vmatpush1.bf16.msra.mxu0 %v1411_v36  ;;  %v1510_v36 = vld [vmem:[%s1646_s7 + $0x2c4] ss:$8 sps:$4 sm:$0xff]  }
  0x4f   : > { %988 = vmatprep.subr.bf16.mxu0 %v1412_v37  ;;  %942 = vmatpush1.bf16.msra.mxu1 %v1483_v54  ;;  %v1508_v37 = vld [vmem:[%s1646_s7 + $0x2c0] ss:$8 sps:$4 sm:$0xff]  }
  0x50   : > { %943 = vmatprep.subr.bf16.mxu1 %v1487_v55  ;;  %v311_v55 = vld [vmem:[#allocation2 + $0x10] sm:$0xff] }
  0x52   : > { %989 = vmatpush1.bf16.msra.mxu0 %v1414_v40  ;;  %v1522_v40 = vld [vmem:[%s1646_s7 + $0x2e4] ss:$8 sps:$4 sm:$0xff]  }
  0x53   : > { %990 = vmatprep.subr.bf16.mxu0 %v1415_v41  ;;  %944 = vmatpush1.bf16.msra.mxu1 %v1489_v58  ;;  %v1520_v41 = vld [vmem:[%s1646_s7 + $0x2e0] ss:$8 sps:$4 sm:$0xff]  }
  0x54   : > { %945 = vmatprep.subr.bf16.mxu1 %v1493_v59  ;;  %v312_v59 = vld [vmem:[#allocation2 + $0x18] sm:$0xff] }
  0x56   : > { %991 = vmatpush1.bf16.msra.mxu0 %v1417_v44  ;;  %v1532_v44 = vld [vmem:[%s1648_s8 + $0x10] ss:$24 sps:$4 sm:$0xff]  }
  0x57   : > { %992 = vmatprep.subr.bf16.mxu0 %v1418_v45  ;;  %946 = vmatpush1.bf16.msra.mxu1 %v1495_v62 }
  0x58   : > { %947 = vmatprep.subr.bf16.mxu1 %v1499_v0 }
  0x5a   : > { %993 = vmatpush1.bf16.msra.mxu0 %v1420_v48 }
  0x5b   : > { %994 = vmatprep.subr.bf16.mxu0 %v1421_v49  ;;  %948 = vmatpush1.bf16.msra.mxu1 %v1501_v3  ;;  %v309_v49 = vld [vmem:[#allocation2] sm:$0xff] }
  0x5c   : > { %949 = vmatprep.subr.bf16.mxu1 %v1505_v5  ;;  %v1070_v3 = vld [vmem:[%s1786_s2] sm:$0x3] (!%p1324_p11) }
  0x5e   : > { %995 = vmatpush1.bf16.msra.mxu0 %v1423_v52  ;;  %v310_v52 = vld [vmem:[#allocation2 + $0x8] sm:$0xff] }
  0x5f   : > { %996 = vmatprep.subr.bf16.mxu0 %v1424_v53  ;;  %950 = vmatpush1.bf16.msra.mxu1 %v1507_v9 }
  0x60   : > { %951 = vmatprep.subr.bf16.mxu1 %v1511_v10 }
  0x62   : > { %997 = vmatpush1.bf16.msra.mxu0 %v1426_v56 }
  0x63   : > { %998 = vmatprep.subr.bf16.mxu0 %v1427_v57  ;;  %952 = vmatpush1.bf16.msra.mxu1 %v1513_v13 }
  0x64   : > { %953 = vmatprep.subr.bf16.mxu1 %v1517_v14 }
  0x66   : > { %999 = vmatpush1.bf16.msra.mxu0 %v1431_v60 }
  0x67   : > { %1011 = vmatprep.subr.bf16.mxu0 %v1438_v61  ;;  %954 = vmatpush1.bf16.msra.mxu1 %v1519_v17 }
  0x68   : > { %955 = vmatprep.subr.bf16.mxu1 %v1523_v18 }
  0x69   : > { %1001 = vmatmul.mubr.bf16.vlgmr.msra.gmra.mrb[0].mxu0 %v1433_v63 }
  0x6a   : > { %1012 = vmatpush1.bf16.msra.mxu0 %v1436_v1  ;;  %1043 = vmatprep.mubr.bf16.mxu0 %v1534_v7  ;;  %v1072_v1 = vlaneseq (!%p1324_p11) }
  0x6b   : > { %1013 = vmatprep.subr.bf16.mxu0 %v1444_v2  ;;  %956 = vmatpush1.bf16.msra.mxu1 %v1525_v21 }
  0x6c   : > { %v1073_v2 = vshrl.u32 (!%p1324_p11), %v1072_v1, 7 }
  0x6e   : > { %1014 = vmatpush1.bf16.msra.mxu0 %v1442_v6  ;;  %958 = vmatmul.mubr.bf16.vlgmr.msra.gmra.mrb[0].mxu1 %v1526_v24  ;;  %v1074_v5 = vsub.s32 (!%p1324_p11), 0, %v1073_v2  ;;  %v1078_v6 = vsub.s32 (!%p1324_p11), 1, %v1073_v2 }
  0x6f   : > { %1015 = vmatprep.subr.bf16.mxu0 %v1450_v8 }
  0x70   : > { %v1075_v10 = vrot.slane (!%p1324_p11), %v1070_v3, %v1074_v5 }
  0x72   : > { %1016 = vmatpush1.bf16.msra.mxu0 %v1448_v11  ;;  %v1079_v11 = vrot.slane (!%p1324_p11), %v1070_v3, %v1078_v6 }
  0x73   : > { %1017 = vmatprep.subr.bf16.mxu0 %v1456_v12 }
  0x76   : > { %1018 = vmatpush1.bf16.msra.mxu0 %v1454_v15 }
  0x77   : > { %1019 = vmatprep.subr.bf16.mxu0 %v1462_v16 }
  0x7a   : > { %1020 = vmatpush1.bf16.msra.mxu0 %v1460_v19 }
  0x7b   : > { %1021 = vmatprep.subr.bf16.mxu0 %v1468_v20 }
  0x7e   : > { %1022 = vmatpush1.bf16.msra.mxu0 %v1466_v22 }
  0x7f   : > { %1023 = vmatprep.subr.bf16.mxu0 %v1474_v23 }
  0x82   : > { %1024 = vmatpush1.bf16.msra.mxu0 %v1472_v25 }
  0x83   : > { %1025 = vmatprep.subr.bf16.mxu0 %v1480_v26 }
  0x86   : > { %1026 = vmatpush1.bf16.msra.mxu0 %v1478_v27 }
  0x87   : > { %1027 = vmatprep.subr.bf16.mxu0 %v1486_v28 }
  0x8a   : > { %1028 = vmatpush1.bf16.msra.mxu0 %v1484_v29 }
  0x8b   : > { %1029 = vmatprep.subr.bf16.mxu0 %v1492_v30 }
  0x8e   : > { %1030 = vmatpush1.bf16.msra.mxu0 %v1490_v31 }
  0x8f   : > { %1031 = vmatprep.subr.bf16.mxu0 %v1498_v32 }
  0x92   : > { %1032 = vmatpush1.bf16.msra.mxu0 %v1496_v33 }
  0x93   : > { %1033 = vmatprep.subr.bf16.mxu0 %v1504_v34 }
  0x96   : > { %1034 = vmatpush1.bf16.msra.mxu0 %v1502_v35 }
  0x97   : > { %1035 = vmatprep.subr.bf16.mxu0 %v1510_v36 }
  0x9a   : > { %1036 = vmatpush1.bf16.msra.mxu0 %v1508_v37 }
  0x9b   : > { %1037 = vmatprep.subr.bf16.mxu0 %v1516_v38 }
  0x9e   : > { %1038 = vmatpush1.bf16.msra.mxu0 %v1514_v39 }
  0x9f   : > { %1039 = vmatprep.subr.bf16.mxu0 %v1522_v40 }
  0xa2   : > { %1040 = vmatpush1.bf16.msra.mxu0 %v1520_v41 }
  0xa3   : > { %1041 = vmatprep.subr.bf16.mxu0 %v1531_v42 }
  0xa6   : > { %1042 = vmatpush1.bf16.msra.mxu0 %v1529_v43 }
  0xa9   : > { %1044 = vmatmul.mubr.bf16.vlgmr.msra.gmra.mrb[0].mxu0 %v1532_v44 }
 0x141   : > { %v959_v45 = vpop.f32.mrb[0].mxu1 }
 0x142   : > { %v961_v46 = vpop.f32.mrb[1].mxu1 }
 0x143   : > { %v963_v47 = vpop.f32.mrb[2].mxu1 }
 0x144   : > { %v965_v48 = vpop.f32.mrb[3].mxu1 }
 0x17c   : > { %v1045_v50 = vpop.f32.mrb[0].mxu0 }
 0x17d   : > { %v1331_v51 = vadd.f32 %v1045_v50, %v959_v45  ;;  %v1047_v53 = vpop.f32.mrb[1].mxu0 }
 0x17e   : > { %v1332_v54 = vadd.f32 %v1047_v53, %v961_v46  ;;  %v1049_v56 = vpop.f32.mrb[2].mxu0  ;;  %1065 = sbr.rel (%p1324_p11) target bundleno = 399 (0x18f), region = 63 }
 0x17f   : > { %v1054_v57 = vadd.f32 %v1331_v51, %v309_v49  ;;  %v1333_v58 = vadd.f32 %v1049_v56, %v963_v47  ;;  %v1051_v60 = vpop.f32.mrb[3].mxu0 }
 0x180   : > { %v1055_v61 = vadd.f32 %v1332_v54, %v310_v52  ;;  %v1334_v62 = vadd.f32 %v1051_v60, %v965_v48 }
 0x181   : > { %1058 = vst [vmem:[#allocation2] sm:$0xff] %v1054_v57  ;;  %v1056_v63 = vadd.f32 %v1333_v58, %v311_v55 }
 0x182   : > { %1059 = vst [vmem:[#allocation2 + $0x8] sm:$0xff] %v1055_v61  ;;  %v1057_v0 = vadd.f32 %v1334_v62, %v312_v59 }
 0x183   : > { %1060 = vst [vmem:[#allocation2 + $0x10] sm:$0xff] %v1056_v63 }
 0x184   : > { %1061 = vst [vmem:[#allocation2 + $0x18] sm:$0xff] %v1057_v0 }
 0x188   : > { %v1066_v4 = vld [vmem:[#allocation2] sm:$0xff] }
 0x189   : > { %v1067_v7 = vld [vmem:[#allocation2 + $0x8] sm:$0xff]  ;;  %v1082_v12 = vadd.f32 %v1075_v10, %v1066_v4 }
 0x18a   : > { %v1068_v8 = vld [vmem:[#allocation2 + $0x10] sm:$0xff]  ;;  %v1083_v13 = vadd.f32 %v1079_v11, %v1067_v7 }
 0x18b   : > { %v1069_v9 = vld [vmem:[#allocation2 + $0x18] sm:$0xff]  ;;  %v1084_v14 = vadd.f32 %v1075_v10, %v1068_v8  ;;  %1086 = vst [vmem:[%s1787_s3] sm:$0xff] %v1082_v12 }
 0x18c   : > { %v1085_v15 = vadd.f32 %v1079_v11, %v1069_v9  ;;  %1087 = vst [vmem:[%s1787_s3 + $0x8] sm:$0xff] %v1083_v13 }
 0x18d   : > { %1088 = vst [vmem:[%s1787_s3 + $0x10] sm:$0xff] %v1084_v14 }
 0x18e   : > { %1089 = vst [vmem:[%s1787_s3 + $0x18] sm:$0xff] %v1085_v15 }
 0x18f PF: > { %s13_s16 = sadd.s32 1, %s1573_s16   ;;  %s1788_s12 = smov %s1561_s13 }
 0x190   : > { %p10_p12 = scmp.ge.s32.totalorder %s13_s16, 5   ;;  %s1789_s13 = smov %s1631_s20 }
 0x191   : > { %s1790_s14 = smov %s1569_s15  ;;  %s1791_s15 = smov %s1793_s17 }
 0x192   :  { %12 = sbr.rel (!%p10_p12) target bundleno = 3 (0x3), region = 104 }

// kernel: _lambda_.100
= control target key start
LH: loop header
LB: loop body
LE: loop exit
PB: predicated region body
PF: predicated region fallthrough
CT: control target
= control target key end

     0   :  { %v20_v0 = vlaneseq  ;;  %s116_s1 = inlined_call_operand.vmem [shape: f32[1,256], index: 1, kind: input, shape index: {}]   ;;  %s117_s2 = inlined_call_operand.vmem [shape: f32[1,256], index: 2, kind: input, shape index: {}]   ;;  %s118_s0 = inlined_call_operand.vmem [shape: f32[16,256], index: 0, kind: input, shape index: {}]   ;;  %s119_s3 = inlined_call_operand.vmem [shape: bf16[16,256], index: 3, kind: output, shape index: {}]  }
   0x1   :  { %v18_v2 = vld [vmem:[%s116_s1] sm:$0x3]  ;;  %v15_v7 = vld [vmem:[%s118_s0 + $0x8] sm:$0xff]  ;;  %v16_v8 = vld [vmem:[%s118_s0 + $0x10] sm:$0xff] }
   0x2   :  { %v21_v1 = vshrl.u32 %v20_v0, 7  ;;  %v34_v3 = vld [vmem:[%s117_s2] sm:$0x3]  ;;  %v17_v9 = vld [vmem:[%s118_s0 + $0x18] sm:$0xff] }
   0x3   :  { %v14_v4 = vld [vmem:[%s118_s0] sm:$0xff] }
   0x4   :  { %v22_v5 = vsub.s32 0, %v21_v1  ;;  %v26_v6 = vsub.s32 1, %v21_v1 }
   0x6   :  { %v23_v10 = vrot.slane %v18_v2, %v22_v5  ;;  %v27_v11 = vrot.slane %v18_v2, %v26_v6  ;;  %v39_v12 = vrot.slane %v34_v3, %v22_v5  ;;  %v43_v13 = vrot.slane %v34_v3, %v26_v6 }
   0x8   :  { %v30_v14 = vmul.f32 %v23_v10, %v14_v4  ;;  %v31_v15 = vmul.f32 %v27_v11, %v15_v7  ;;  %v32_v16 = vmul.f32 %v23_v10, %v16_v8  ;;  %v33_v17 = vmul.f32 %v27_v11, %v17_v9 }
   0xa   :  { %v46_v18 = vadd.f32 %v39_v12, %v30_v14  ;;  %v47_v19 = vadd.f32 %v43_v13, %v31_v15  ;;  %v48_v20 = vadd.f32 %v39_v12, %v32_v16  ;;  %v49_v21 = vadd.f32 %v43_v13, %v33_v17 }
   0xc   :  { %v70_v22 = vpack.c.bf16 %v47_v19, %v46_v18  ;;  %v71_v23 = vpack.c.bf16 %v49_v21, %v48_v20 }
   0xe   :  { %62 = vst [vmem:[%s119_s3] sm:$0xff] %v70_v22  ;;  %63 = vst [vmem:[%s119_s3 + $0x8] sm:$0xff] %v71_v23 }

// kernel: _lambda_.102
= control target key start
LH: loop header
LB: loop body
LE: loop exit
PB: predicated region body
PF: predicated region fallthrough
CT: control target
= control target key end

     0   :  { %v23_v0 = vlaneseq  ;;  %s144_s2 = inlined_call_operand.vmem [shape: f32[1,256], index: 2, kind: input, shape index: {}]   ;;  %s145_s3 = inlined_call_operand.vmem [shape: f32[1,256], index: 3, kind: input, shape index: {}]   ;;  %s146_s0 = inlined_call_operand.vmem [shape: f32[16,256], index: 0, kind: input, shape index: {}]   ;;  %s147_s1 = inlined_call_operand.vmem [shape: bf16[16,256], index: 1, kind: input, shape index: {}]   ;;  %s148_s4 = inlined_call_operand.vmem [shape: bf16[16,256], index: 4, kind: output, shape index: {}]  }
   0x1   :  { %v21_v2 = vld [vmem:[%s144_s2] sm:$0x3]  ;;  %v54_v8 = vld [vmem:[%s147_s1 + $0x8] sm:$0xff]  ;;  %v19_v10 = vld [vmem:[%s146_s0 + $0x10] sm:$0xff] }
   0x2   :  { %v24_v1 = vshrl.u32 %v23_v0, 7  ;;  %v37_v3 = vld [vmem:[%s145_s3] sm:$0x3]  ;;  %v18_v9 = vld [vmem:[%s146_s0 + $0x8] sm:$0xff]  ;;  %v20_v11 = vld [vmem:[%s146_s0 + $0x18] sm:$0xff]  ;;  %v57_v18 = vunpack.c.l.bf16 %v54_v8  ;;  %v58_v19 = vunpack.c.h.bf16 %v54_v8 }
   0x3   :  { %v17_v4 = vld [vmem:[%s146_s0] sm:$0xff] }
   0x4   :  { %v25_v5 = vsub.s32 0, %v24_v1  ;;  %v29_v6 = vsub.s32 1, %v24_v1  ;;  %v53_v7 = vld [vmem:[%s147_s1] sm:$0xff] }
   0x5   :  { %v55_v16 = vunpack.c.l.bf16 %v53_v7  ;;  %v56_v17 = vunpack.c.h.bf16 %v53_v7 }
   0x6   :  { %v26_v12 = vrot.slane %v21_v2, %v25_v5  ;;  %v30_v13 = vrot.slane %v21_v2, %v29_v6  ;;  %v42_v14 = vrot.slane %v37_v3, %v25_v5  ;;  %v46_v15 = vrot.slane %v37_v3, %v29_v6 }
   0x8   :  { %v33_v20 = vmul.f32 %v26_v12, %v17_v4  ;;  %v34_v21 = vmul.f32 %v30_v13, %v18_v9  ;;  %v35_v22 = vmul.f32 %v26_v12, %v19_v10  ;;  %v36_v23 = vmul.f32 %v30_v13, %v20_v11 }
   0xa   :  { %v49_v24 = vadd.f32 %v42_v14, %v33_v20  ;;  %v50_v25 = vadd.f32 %v46_v15, %v34_v21  ;;  %v51_v26 = vadd.f32 %v42_v14, %v35_v22  ;;  %v52_v27 = vadd.f32 %v46_v15, %v36_v23 }
   0xc   :  { %v59_v28 = vadd.f32 %v55_v16, %v49_v24  ;;  %v60_v29 = vadd.f32 %v56_v17, %v50_v25  ;;  %v61_v30 = vadd.f32 %v57_v18, %v51_v26  ;;  %v62_v31 = vadd.f32 %v58_v19, %v52_v27 }
   0xe   :  { %v63_v32 = vmax.f32 %v59_v28, 0.0  ;;  %v64_v33 = vmax.f32 %v60_v29, 0.0  ;;  %v65_v34 = vmax.f32 %v61_v30, 0.0  ;;  %v66_v35 = vmax.f32 %v62_v31, 0.0 }
  0x10   :  { %v87_v36 = vpack.c.bf16 %v64_v33, %v63_v32  ;;  %v88_v37 = vpack.c.bf16 %v66_v35, %v65_v34 }
  0x12   :  { %79 = vst [vmem:[%s148_s4] sm:$0xff] %v87_v36  ;;  %80 = vst [vmem:[%s148_s4 + $0x8] sm:$0xff] %v88_v37 }

// kernel: _lambda_.110
= control target key start
LH: loop header
LB: loop body
LE: loop exit
PB: predicated region body
PF: predicated region fallthrough
CT: control target
= control target key end

     0   :  { %v14_v0 = vlaneseq  ;;  %v170_v4 = vmov 1966171168   ;;  %v171_v12 = vmov 0.0   ;;  %s241_s0 = inlined_call_operand.vmem [shape: f32[16,512], index: 0, kind: input, shape index: {}]   ;;  %s242_s1 = inlined_call_operand.vmem [shape: f32[1,512], index: 1, kind: output, shape index: {0}]   ;;  %s243_s2 = inlined_call_operand.vmem [shape: f32[1,512], index: 2, kind: output, shape index: {1}]  }
   0x1   :  { %v20_v1 = vld [vmem:[%s241_s0] sm:$0xff]  ;;  %v21_v2 = vld [vmem:[%s241_s0 + $0x8] sm:$0xff]  ;;  %v22_v3 = vld [vmem:[%s241_s0 + $0x10] sm:$0xff]  ;;  %v64_v5 = vunpack.c.l.s4 %v170_v4 }
   0x2   :  { %vm196_vm0 = vcmp.lt.s32.totalorder %v14_v0, 512  ;;  %v23_v7 = vld [vmem:[%s241_s0 + $0x18] sm:$0xff]  ;;  %v24_v8 = vld [vmem:[%s241_s0 + $0x20] sm:$0xff]  ;;  %v25_v9 = vld [vmem:[%s241_s0 + $0x28] sm:$0xff]  ;;  %v67_v10 = vshrl.u32 %v14_v0, 7  ;;  %v93_v11 = vmul.f32 %v20_v1, %v20_v1  ;;  %v94_v17 = vmul.f32 %v21_v2, %v21_v2 }
   0x3   :  { %18 = vst.msk [vmem:[%s242_s1] sm:$0xf] %vm196_vm0, %v171_v12  ;;  %v26_v13 = vld [vmem:[%s241_s0 + $0x30] sm:$0xff]  ;;  %v27_v14 = vld [vmem:[%s241_s0 + $0x38] sm:$0xff]  ;;  %v29_v15 = vadd.f32 %v24_v8, %v20_v1  ;;  %v36_v16 = vadd.f32 %v25_v9, %v21_v2  ;;  %19 = vst.msk [vmem:[%s243_s2] sm:$0xf] %vm196_vm0, %v171_v12  ;;  %v95_v18 = vmul.f32 %v22_v3, %v22_v3  ;;  %v65_v25 = vunpack.c.0.s8 %v64_v5 }
   0x4   :  { %v43_v19 = vadd.f32 %v26_v13, %v22_v3  ;;  %v50_v20 = vadd.f32 %v27_v14, %v23_v7  ;;  %v96_v21 = vmul.f32 %v23_v7, %v23_v7  ;;  %v97_v22 = vmul.f32 %v24_v8, %v24_v8 }
   0x5   :  { %v30_v23 = vrot.slane %v29_v15, 4  ;;  %v37_v24 = vrot.slane %v36_v16, 4  ;;  %v98_v26 = vmul.f32 %v25_v9, %v25_v9  ;;  %v99_v29 = vmul.f32 %v26_v13, %v26_v13 }
   0x6   :  { %v44_v27 = vrot.slane %v43_v19, 4  ;;  %v51_v28 = vrot.slane %v50_v20, 4  ;;  %v100_v30 = vmul.f32 %v27_v14, %v27_v14  ;;  %v101_v33 = vadd.f32 %v97_v22, %v93_v11 }
   0x7   :  { %v31_v31 = vadd.f32 %v30_v23, %v29_v15  ;;  %v38_v32 = vadd.f32 %v37_v24, %v36_v16  ;;  %v108_v34 = vadd.f32 %v98_v26, %v94_v17  ;;  %v115_v37 = vadd.f32 %v99_v29, %v95_v18 }
   0x8   :  { %v45_v35 = vadd.f32 %v44_v27, %v43_v19  ;;  %v52_v36 = vadd.f32 %v51_v28, %v50_v20  ;;  %v122_v38 = vadd.f32 %v100_v30, %v96_v21  ;;  %v102_v41 = vrot.slane %v101_v33, 4 }
   0x9   :  { %v32_v39 = vrot.slane %v31_v31, 2  ;;  %v39_v40 = vrot.slane %v38_v32, 2  ;;  %v109_v42 = vrot.slane %v108_v34, 4  ;;  %v68_v45 = vsub.s32 %v65_v25, %v67_v10 }
   0xa   :  { %v46_v43 = vrot.slane %v45_v35, 2  ;;  %v53_v44 = vrot.slane %v52_v36, 2  ;;  %v103_v48 = vadd.f32 %v102_v41, %v101_v33  ;;  %v116_v52 = vrot.slane %v115_v37, 4  ;;  %v28_v23 = vld [vmem:[%s242_s1] sm:$0xf] }
   0xb   :  { %v33_v46 = vadd.f32 %v32_v39, %v31_v31  ;;  %v40_v47 = vadd.f32 %v39_v40, %v38_v32  ;;  %v110_v49 = vadd.f32 %v109_v42, %v108_v34  ;;  %v123_v53 = vrot.slane %v122_v38, 4  ;;  %v92_v30 = vld [vmem:[%s243_s2] sm:$0xf] }
   0xc   :  { %v47_v50 = vadd.f32 %v46_v43, %v45_v35  ;;  %v54_v51 = vadd.f32 %v53_v44, %v52_v36  ;;  %v104_v56 = vrot.slane %v103_v48, 2  ;;  %v117_v60 = vadd.f32 %v116_v52, %v115_v37 }
   0xd   :  { %v34_v54 = vrot.slane %v33_v46, 1  ;;  %v41_v55 = vrot.slane %v40_v47, 1  ;;  %v111_v57 = vrot.slane %v110_v49, 2  ;;  %v124_v61 = vadd.f32 %v123_v53, %v122_v38 }
   0xe   :  { %v48_v58 = vrot.slane %v47_v50, 1  ;;  %v55_v59 = vrot.slane %v54_v51, 1  ;;  %v105_v0 = vadd.f32 %v104_v56, %v103_v48  ;;  %v118_v4 = vrot.slane %v117_v60, 2 }
   0xf   :  { %v35_v62 = vadd.f32 %v34_v54, %v33_v46  ;;  %v42_v63 = vadd.f32 %v41_v55, %v40_v47  ;;  %v112_v1 = vadd.f32 %v111_v57, %v110_v49  ;;  %v125_v5 = vrot.slane %v124_v61, 2 }
  0x10   :  { %v49_v2 = vadd.f32 %v48_v58, %v47_v50  ;;  %v56_v3 = vadd.f32 %v55_v59, %v54_v51  ;;  %v106_v8 = vrot.slane %v105_v0, 1  ;;  %v119_v11 = vadd.f32 %v118_v4, %v117_v60 }
  0x11   :  { %v61_v7 = vcombine.low %v35_v62, %v42_v63  ;;  %v113_v9 = vrot.slane %v112_v1, 1  ;;  %v126_v12 = vadd.f32 %v125_v5, %v124_v61 }
  0x12   :  { %v62_v10 = vcombine.low %v49_v2, %v56_v3  ;;  %v107_v14 = vadd.f32 %v106_v8, %v105_v0  ;;  %v120_v17 = vrot.slane %v119_v11, 1 }
  0x13   :  { %v69_v13 = vrot.slane %v61_v7, %v68_v45  ;;  %v114_v15 = vadd.f32 %v113_v9, %v112_v1  ;;  %v127_v18 = vrot.slane %v126_v12, 1 }
  0x14   :  { %v76_v16 = vrot.slane %v62_v10, %v68_v45  ;;  %v121_v21 = vadd.f32 %v120_v17, %v119_v11 }
  0x15   :  { %v133_v19 = vcombine.low %v107_v14, %v114_v15  ;;  %v128_v22 = vadd.f32 %v127_v18, %v126_v12 }
  0x16   :  { %v77_v20 = vcombine.low %v69_v13, %v76_v16 }
  0x17   :  { %v134_v25 = vcombine.low %v121_v21, %v128_v22  ;;  %v141_v26 = vrot.slane %v133_v19, %v68_v45 }
  0x18   :  { %v84_v24 = vrot.slane %v77_v20, %v68_v45 }
  0x19   :  { %v148_v28 = vrot.slane %v134_v25, %v68_v45 }
  0x1a   :  { %v86_v27 = vadd.f32 %v84_v24, %v28_v23 }
  0x1b   :  { %v149_v29 = vcombine.low %v141_v26, %v148_v28 }
  0x1c   :  { %91 = vst.msk [vmem:[%s242_s1] sm:$0xf] %vm196_vm0, %v86_v27 }
  0x1d   :  { %v156_v31 = vrot.slane %v149_v29, %v68_v45 }
  0x1f   :  { %v158_v32 = vadd.f32 %v156_v31, %v92_v30 }
  0x21   :  { %159 = vst.msk [vmem:[%s243_s2] sm:$0xf] %vm196_vm0, %v158_v32 }

// kernel: _lambda_.111
= control target key start
LH: loop header
LB: loop body
LE: loop exit
PB: predicated region body
PF: predicated region fallthrough
CT: control target
= control target key end

     0   :  { %v24_v0 = vlaneseq  ;;  %s192_s1 = inlined_call_operand.vmem [shape: f32[1,512], index: 1, kind: input, shape index: {}]   ;;  %s193_s2 = inlined_call_operand.vmem [shape: f32[1,512], index: 2, kind: input, shape index: {}]   ;;  %s194_s0 = inlined_call_operand.vmem [shape: f32[16,512], index: 0, kind: input, shape index: {}]   ;;  %s195_s3 = inlined_call_operand.vmem [shape: bf16[16,512], index: 3, kind: output, shape index: {}]  }
   0x1   :  { %v22_v2 = vld [vmem:[%s192_s1] sm:$0xf]  ;;  %v15_v5 = vld [vmem:[%s194_s0 + $0x8] sm:$0xff]  ;;  %v16_v10 = vld [vmem:[%s194_s0 + $0x10] sm:$0xff] }
   0x2   :  { %v25_v1 = vshrl.u32 %v24_v0, 7  ;;  %v52_v3 = vld [vmem:[%s193_s2] sm:$0xf]  ;;  %v19_v12 = vld [vmem:[%s194_s0 + $0x28] sm:$0xff]  ;;  %v17_v17 = vld [vmem:[%s194_s0 + $0x18] sm:$0xff] }
   0x3   :  { %v14_v4 = vld [vmem:[%s194_s0] sm:$0xff]  ;;  %v20_v18 = vld [vmem:[%s194_s0 + $0x30] sm:$0xff]  ;;  %v21_v19 = vld [vmem:[%s194_s0 + $0x38] sm:$0xff] }
   0x4   :  { %v26_v6 = vsub.s32 0, %v25_v1  ;;  %v30_v7 = vsub.s32 1, %v25_v1  ;;  %v34_v8 = vsub.s32 2, %v25_v1  ;;  %v38_v9 = vsub.s32 3, %v25_v1  ;;  %v18_v11 = vld [vmem:[%s194_s0 + $0x20] sm:$0xff] }
   0x6   :  { %v27_v13 = vrot.slane %v22_v2, %v26_v6  ;;  %v31_v14 = vrot.slane %v22_v2, %v30_v7  ;;  %v57_v15 = vrot.slane %v52_v3, %v26_v6  ;;  %v61_v16 = vrot.slane %v52_v3, %v30_v7 }
   0x7   :  { %v35_v20 = vrot.slane %v22_v2, %v34_v8  ;;  %v39_v21 = vrot.slane %v22_v2, %v38_v9  ;;  %v65_v22 = vrot.slane %v52_v3, %v34_v8  ;;  %v69_v23 = vrot.slane %v52_v3, %v38_v9 }
   0x8   :  { %v44_v24 = vmul.f32 %v27_v13, %v14_v4  ;;  %v45_v25 = vmul.f32 %v31_v14, %v15_v5  ;;  %v48_v26 = vmul.f32 %v27_v13, %v18_v11  ;;  %v49_v27 = vmul.f32 %v31_v14, %v19_v12 }
   0x9   :  { %v46_v28 = vmul.f32 %v35_v20, %v16_v10  ;;  %v47_v29 = vmul.f32 %v39_v21, %v17_v17  ;;  %v50_v30 = vmul.f32 %v35_v20, %v20_v18  ;;  %v51_v31 = vmul.f32 %v39_v21, %v21_v19 }
   0xa   :  { %v74_v32 = vadd.f32 %v57_v15, %v44_v24  ;;  %v75_v33 = vadd.f32 %v61_v16, %v45_v25  ;;  %v78_v34 = vadd.f32 %v57_v15, %v48_v26  ;;  %v79_v35 = vadd.f32 %v61_v16, %v49_v27 }
   0xb   :  { %v76_v36 = vadd.f32 %v65_v22, %v46_v28  ;;  %v77_v37 = vadd.f32 %v69_v23, %v47_v29  ;;  %v80_v38 = vadd.f32 %v65_v22, %v50_v30  ;;  %v81_v39 = vadd.f32 %v69_v23, %v51_v31 }
   0xc   :  { %v82_v40 = vmax.f32 %v74_v32, 0.0  ;;  %v83_v41 = vmax.f32 %v75_v33, 0.0  ;;  %v86_v42 = vmax.f32 %v78_v34, 0.0  ;;  %v87_v43 = vmax.f32 %v79_v35, 0.0 }
   0xd   :  { %v84_v44 = vmax.f32 %v76_v36, 0.0  ;;  %v85_v45 = vmax.f32 %v77_v37, 0.0  ;;  %v88_v46 = vmax.f32 %v80_v38, 0.0  ;;  %v89_v47 = vmax.f32 %v81_v39, 0.0 }
   0xe   :  { %v126_v48 = vpack.c.bf16 %v83_v41, %v82_v40  ;;  %v128_v49 = vpack.c.bf16 %v87_v43, %v86_v42 }
   0xf   :  { %v127_v50 = vpack.c.bf16 %v85_v45, %v84_v44  ;;  %v129_v51 = vpack.c.bf16 %v89_v47, %v88_v46 }
  0x10   :  { %114 = vst [vmem:[%s195_s3] sm:$0xff] %v126_v48  ;;  %116 = vst [vmem:[%s195_s3 + $0x10] sm:$0xff] %v128_v49 }
  0x11   :  { %115 = vst [vmem:[%s195_s3 + $0x8] sm:$0xff] %v127_v50  ;;  %117 = vst [vmem:[%s195_s3 + $0x18] sm:$0xff] %v129_v51 }

// kernel: _lambda_.109
= control target key start
LH: loop header
LB: loop body
LE: loop exit
PB: predicated region body
PF: predicated region fallthrough
CT: control target
= control target key end

     0   :  { %s2587_s12 = smov 0   ;;  %s2589_s13 = smov 0   ;;  %s2883_s0 = inlined_call_operand.vmem [shape: bf16[16,2304], index: 0, kind: input, shape index: {}]   ;;  %s2884_s1 = inlined_call_operand.vmem [shape: bf16[2304,512], index: 1, kind: input, shape index: {}]   ;;  %s2885_s2 = inlined_call_operand.vmem [shape: f32[1,512], index: 2, kind: input, shape index: {}]   ;;  %s2886_s3 = inlined_call_operand.vmem [shape: f32[16,512], index: 3, kind: output, shape index: {}]  }
   0x1   :  { %s2591_s14 = smov 0   ;;  %s2593_s15 = smov 0  }
   0x2   :  { %s2595_s16 = smov 0  }
   0x3 LB: > { %s25_s17 = sadd.s32 1, %s2560_s15  ;;  %p48_p1 = scmp.ne.s32.totalorder %s2552_s13, %s2548_s12  ;;  %s2564_s16 = sphi %s2595_s16, %s13_s16   ;;  %s2560_s15 = sphi %s2593_s15, %s2890_s15   ;;  %s2556_s14 = sphi %s2591_s14, %s2889_s14   ;;  %s2552_s13 = sphi %s2589_s13, %s2888_s13   ;;  %s2548_s12 = sphi %s2587_s12, %s2887_s12  }
   0x4   : > { %p26_p0 = scmp.ge.s32.totalorder %s25_s17, 3  ;;  %p49_p2 = scmp.eq.s32.totalorder %s2564_s16, 0 }
   0x5   : > { %s41_s19 = sadd.s32 1, %s2552_s13  ;;  %p1959_p5 = scmp.ge.s32.totalorder %s2564_s16, 3 }
   0x6   : > { %s2892_s17 = smov (%p26_p0, %s25_s17), 0  ;;  %p50_p3 = por %p49_p2, %p48_p1 }
   0x7   : > { %s37_s18 = ssub.s32 %s2560_s15, %s2892_s17  ;;  %164 = sbr.rel (%p1959_p5) target bundleno = 22 (0x16), region = 20 }
   0x8   : > { %p39_p4 = scmp.eq.s32.totalorder %s37_s18, 0 }
   0xa   : > { %s2622_s20 = scalar_select %p39_p4, %s2552_s13, %s41_s19  }
   0xe   : > { %167 = sbr.rel (!%p50_p3) target bundleno = 22 (0x16), region = 24  ;;  %s169_s21 = sand.u32 (%p50_p3), 1, %s2552_s13  }
   0xf   : > { %s2168_s22 = smul.u32 (%p50_p3), 24, %s2560_s15 }
  0x10   : > { %s2186_s23 = smul.u32 (%p50_p3), 48, %s169_s21 }
  0x11   : > { %s177_s26 = scalar_lea.vmem (%p50_p3), %s2883_s0, %s2168_s22 }
  0x12   : > { %v190_v0 = vld [vmem:[%s177_s26] sm:$0xff] (%p50_p3)  ;;  %v192_v1 = vld [vmem:[%s177_s26 + $0x8] sm:$0xff] (%p50_p3)  ;;  %v194_v2 = vld [vmem:[%s177_s26 + $0x10] sm:$0xff] (%p50_p3)  ;;  %s171_s27 = scalar_lea.vmem (%p50_p3), [#allocation3], %s2186_s23 }
  0x13   : > { %191 = vst [vmem:[%s171_s27] sm:$0xff] (%p50_p3), %v190_v0  ;;  %193 = vst [vmem:[%s171_s27 + $0x8] sm:$0xff] (%p50_p3), %v192_v1  ;;  %v196_v3 = vld [vmem:[%s177_s26 + $0x48] sm:$0xff] (%p50_p3)  ;;  %v198_v4 = vld [vmem:[%s177_s26 + $0x50] sm:$0xff] (%p50_p3) }
  0x14   : > { %195 = vst [vmem:[%s171_s27 + $0x10] sm:$0xff] (%p50_p3), %v194_v2  ;;  %v200_v5 = vld [vmem:[%s177_s26 + $0x58] sm:$0xff] (%p50_p3)  ;;  %197 = vst [vmem:[%s171_s27 + $0x18] sm:$0xff] (%p50_p3), %v196_v3 }
  0x15   : > { %199 = vst [vmem:[%s171_s27 + $0x20] sm:$0xff] %v198_v4  ;;  %201 = vst [vmem:[%s171_s27 + $0x28] sm:$0xff] %v200_v5 }
  0x16 PF: > { %p1961_p6 = scmp.ge.s32.totalorder %s2564_s16, 1  ;;  %p221_p7 = scmp.lt.s32.totalorder %s2564_s16, 4 }
  0x18   : > { %p222_p8 = pnand %p1961_p6, %p221_p7 }
  0x19   : > { %s228_s28 = sand.u32 (!%p222_p8), 1, %s2548_s12   ;;  %s272_s29 = smul.u32 (!%p222_p8), 96, %s2556_s14 }
  0x1a   : > { %225 = sbr.rel (%p222_p8) target bundleno = 461 (0x1cd), region = 51  ;;  %p1964_p10 = scmp.ne.s32.totalorder (!%p222_p8), %s2556_s14, 0 }
  0x1b   : > { %s2187_s30 = smul.u32 (!%p222_p8), 48, %s228_s28  ;;  %p274_p9 = scmp.lt.s32.totalorder (!%p222_p8), %s272_s29, 287 }
  0x1d   : > { %s2639_s8 = scalar_lea.vmem (!%p222_p8), [#allocation3], %s2187_s30 }
  0x21   : > { %s2894_s29 = smov (!%p274_p9, %s272_s29), 287  ;;  %304 = sbr.rel (%p1964_p10) target bundleno = 40 (0x28), region = 59 }
  0x22   : > { %s2169_s4 = sshll.u32 %s2894_s29, 4  ;;  %v2566_v6 = vmov (!%p1964_p10), 0.0  }
  0x23   : > { %s2637_s7 = scalar_lea.vmem %s2884_s1, %s2169_s4  ;;  %305 = vst [vmem:[#allocation2] sm:$0xff] (!%p1964_p10), %v2566_v6  ;;  %306 = vst [vmem:[#allocation2 + $0x8] sm:$0xff] (!%p1964_p10), %v2566_v6 }
  0x24   : > { %307 = vst [vmem:[#allocation2 + $0x10] sm:$0xff] (!%p1964_p10), %v2566_v6  ;;  %308 = vst [vmem:[#allocation2 + $0x18] sm:$0xff] (!%p1964_p10), %v2566_v6 }
  0x25   : > { %309 = vst [vmem:[#allocation2 + $0x20] sm:$0xff] (!%p1964_p10), %v2566_v6  ;;  %310 = vst [vmem:[#allocation2 + $0x28] sm:$0xff] (!%p1964_p10), %v2566_v6 }
  0x26   : > { %311 = vst [vmem:[#allocation2 + $0x30] sm:$0xff] (!%p1964_p10), %v2566_v6  ;;  %312 = vst [vmem:[#allocation2 + $0x38] sm:$0xff] (!%p1964_p10), %v2566_v6 }
  0x28 PF: > { %v2229_v7 = vld [vmem:[%s2637_s7 + $0x4] ss:$16 sps:$4 sm:$0xff]   ;;  %v2231_v8 = vld [vmem:[%s2637_s7 + $0xc] ss:$16 sps:$4 sm:$0xff]   ;;  %v2233_v9 = vld [vmem:[%s2637_s7] ss:$16 sps:$4 sm:$0xff]  }
  0x29   : > { %1509 = vmatprep.subr.bf16.mxu0 %v2229_v7  ;;  %v2234_v10 = vld [vmem:[%s2637_s7 + $0x8] ss:$16 sps:$4 sm:$0xff]   ;;  %1638 = vmatprep.subr.bf16.mxu1 %v2231_v8  ;;  %v2235_v11 = vld [vmem:[%s2637_s7 + $0x24] ss:$16 sps:$4 sm:$0xff]   ;;  %v2237_v12 = vld [vmem:[%s2637_s7 + $0x2c] ss:$16 sps:$4 sm:$0xff]  }
  0x2a   : > { %1510 = vmatpush1.bf16.msra.mxu0 %v2233_v9  ;;  %1639 = vmatpush1.bf16.msra.mxu1 %v2234_v10  ;;  %v2239_v13 = vld [vmem:[%s2637_s7 + $0x20] ss:$16 sps:$4 sm:$0xff]   ;;  %v2240_v14 = vld [vmem:[%s2637_s7 + $0x28] ss:$16 sps:$4 sm:$0xff]   ;;  %v2241_v15 = vld [vmem:[%s2637_s7 + $0x44] ss:$16 sps:$4 sm:$0xff]  }
  0x2b   : > { %1511 = vmatprep.subr.bf16.mxu0 %v2235_v11  ;;  %1640 = vmatprep.subr.bf16.mxu1 %v2237_v12  ;;  %v2243_v16 = vld [vmem:[%s2637_s7 + $0x4c] ss:$16 sps:$4 sm:$0xff]   ;;  %v2245_v17 = vld [vmem:[%s2637_s7 + $0x40] ss:$16 sps:$4 sm:$0xff]   ;;  %v2246_v18 = vld [vmem:[%s2637_s7 + $0x48] ss:$16 sps:$4 sm:$0xff]  }
  0x2c   : > { %v2247_v19 = vld [vmem:[%s2637_s7 + $0x64] ss:$16 sps:$4 sm:$0xff]   ;;  %v2249_v20 = vld [vmem:[%s2637_s7 + $0x6c] ss:$16 sps:$4 sm:$0xff]   ;;  %v2251_v21 = vld [vmem:[%s2637_s7 + $0x60] ss:$16 sps:$4 sm:$0xff]  }
  0x2d   : > { %v2252_v22 = vld [vmem:[%s2637_s7 + $0x68] ss:$16 sps:$4 sm:$0xff]   ;;  %v2253_v23 = vld [vmem:[%s2637_s7 + $0x84] ss:$16 sps:$4 sm:$0xff]   ;;  %v2255_v24 = vld [vmem:[%s2637_s7 + $0x8c] ss:$16 sps:$4 sm:$0xff]  }
  0x2e   : > { %1512 = vmatpush1.bf16.msra.mxu0 %v2239_v13  ;;  %1641 = vmatpush1.bf16.msra.mxu1 %v2240_v14  ;;  %v2257_v25 = vld [vmem:[%s2637_s7 + $0x80] ss:$16 sps:$4 sm:$0xff]   ;;  %v2258_v26 = vld [vmem:[%s2637_s7 + $0x88] ss:$16 sps:$4 sm:$0xff]   ;;  %v2259_v27 = vld [vmem:[%s2637_s7 + $0xa4] ss:$16 sps:$4 sm:$0xff]  }
  0x2f   : > { %1513 = vmatprep.subr.bf16.mxu0 %v2241_v15  ;;  %1642 = vmatprep.subr.bf16.mxu1 %v2243_v16  ;;  %v2261_v28 = vld [vmem:[%s2637_s7 + $0xac] ss:$16 sps:$4 sm:$0xff]   ;;  %v2263_v29 = vld [vmem:[%s2637_s7 + $0xa0] ss:$16 sps:$4 sm:$0xff]   ;;  %v2264_v30 = vld [vmem:[%s2637_s7 + $0xa8] ss:$16 sps:$4 sm:$0xff]  }
  0x30   : > { %v2265_v31 = vld [vmem:[%s2637_s7 + $0xc4] ss:$16 sps:$4 sm:$0xff]   ;;  %v2267_v32 = vld [vmem:[%s2637_s7 + $0xcc] ss:$16 sps:$4 sm:$0xff]   ;;  %v2269_v33 = vld [vmem:[%s2637_s7 + $0xc0] ss:$16 sps:$4 sm:$0xff]  }
  0x31   : > { %v2270_v34 = vld [vmem:[%s2637_s7 + $0xc8] ss:$16 sps:$4 sm:$0xff]   ;;  %v2271_v35 = vld [vmem:[%s2637_s7 + $0xe4] ss:$16 sps:$4 sm:$0xff]   ;;  %v2273_v36 = vld [vmem:[%s2637_s7 + $0xec] ss:$16 sps:$4 sm:$0xff]  }
  0x32   : > { %1514 = vmatpush1.bf16.msra.mxu0 %v2245_v17  ;;  %1643 = vmatpush1.bf16.msra.mxu1 %v2246_v18  ;;  %v2275_v37 = vld [vmem:[%s2637_s7 + $0xe0] ss:$16 sps:$4 sm:$0xff]   ;;  %v2276_v38 = vld [vmem:[%s2637_s7 + $0xe8] ss:$16 sps:$4 sm:$0xff]   ;;  %v2277_v39 = vld [vmem:[%s2637_s7 + $0x104] ss:$16 sps:$4 sm:$0xff]  }
  0x33   : > { %1515 = vmatprep.subr.bf16.mxu0 %v2247_v19  ;;  %1644 = vmatprep.subr.bf16.mxu1 %v2249_v20  ;;  %v2279_v40 = vld [vmem:[%s2637_s7 + $0x10c] ss:$16 sps:$4 sm:$0xff]   ;;  %v2281_v41 = vld [vmem:[%s2637_s7 + $0x100] ss:$16 sps:$4 sm:$0xff]   ;;  %v2282_v42 = vld [vmem:[%s2637_s7 + $0x108] ss:$16 sps:$4 sm:$0xff]  }
  0x34   : > { %v2283_v43 = vld [vmem:[%s2637_s7 + $0x124] ss:$16 sps:$4 sm:$0xff]   ;;  %v2285_v44 = vld [vmem:[%s2637_s7 + $0x12c] ss:$16 sps:$4 sm:$0xff]   ;;  %v2287_v45 = vld [vmem:[%s2637_s7 + $0x120] ss:$16 sps:$4 sm:$0xff]  }
  0x35   : > { %v2288_v46 = vld [vmem:[%s2637_s7 + $0x128] ss:$16 sps:$4 sm:$0xff]   ;;  %v2289_v47 = vld [vmem:[%s2637_s7 + $0x144] ss:$16 sps:$4 sm:$0xff]   ;;  %v2291_v48 = vld [vmem:[%s2637_s7 + $0x14c] ss:$16 sps:$4 sm:$0xff]  }
  0x36   : > { %1516 = vmatpush1.bf16.msra.mxu0 %v2251_v21  ;;  %1645 = vmatpush1.bf16.msra.mxu1 %v2252_v22  ;;  %v2293_v49 = vld [vmem:[%s2637_s7 + $0x140] ss:$16 sps:$4 sm:$0xff]   ;;  %v2294_v50 = vld [vmem:[%s2637_s7 + $0x148] ss:$16 sps:$4 sm:$0xff]   ;;  %v2295_v51 = vld [vmem:[%s2637_s7 + $0x164] ss:$16 sps:$4 sm:$0xff]  }
  0x37   : > { %1517 = vmatprep.subr.bf16.mxu0 %v2253_v23  ;;  %1646 = vmatprep.subr.bf16.mxu1 %v2255_v24  ;;  %v2297_v52 = vld [vmem:[%s2637_s7 + $0x16c] ss:$16 sps:$4 sm:$0xff]   ;;  %v2299_v53 = vld [vmem:[%s2637_s7 + $0x160] ss:$16 sps:$4 sm:$0xff]   ;;  %v2300_v54 = vld [vmem:[%s2637_s7 + $0x168] ss:$16 sps:$4 sm:$0xff]  }
  0x38   : > { %v2327_v55 = vld [vmem:[%s2639_s8 + $0x4] ss:$24 sps:$4 sm:$0xff]   ;;  %v2305_v58 = vld [vmem:[%s2637_s7 + $0x180] ss:$16 sps:$4 sm:$0xff]   ;;  %v2306_v59 = vld [vmem:[%s2637_s7 + $0x188] ss:$16 sps:$4 sm:$0xff]  }
  0x39   : > { %v2301_v56 = vld [vmem:[%s2637_s7 + $0x184] ss:$16 sps:$4 sm:$0xff]   ;;  %v2303_v57 = vld [vmem:[%s2637_s7 + $0x18c] ss:$16 sps:$4 sm:$0xff]   ;;  %1541 = vmatprep.mubr.bf16.mxu0 %v2327_v55  ;;  %1670 = vmatprep.mubr.bf16.mxu1 %v2327_v55  ;;  %v2311_v62 = vld [vmem:[%s2637_s7 + $0x1a0] ss:$16 sps:$4 sm:$0xff]  }
  0x3a   : > { %1518 = vmatpush1.bf16.msra.mxu0 %v2257_v25  ;;  %1647 = vmatpush1.bf16.msra.mxu1 %v2258_v26  ;;  %v2307_v60 = vld [vmem:[%s2637_s7 + $0x1a4] ss:$16 sps:$4 sm:$0xff]   ;;  %v2309_v61 = vld [vmem:[%s2637_s7 + $0x1ac] ss:$16 sps:$4 sm:$0xff]   ;;  %v2312_v63 = vld [vmem:[%s2637_s7 + $0x1a8] ss:$16 sps:$4 sm:$0xff]  }
  0x3b   : > { %1519 = vmatprep.subr.bf16.mxu0 %v2259_v27  ;;  %1648 = vmatprep.subr.bf16.mxu1 %v2261_v28  ;;  %v2313_v0 = vld [vmem:[%s2637_s7 + $0x1c4] ss:$16 sps:$4 sm:$0xff]   ;;  %v2315_v1 = vld [vmem:[%s2637_s7 + $0x1cc] ss:$16 sps:$4 sm:$0xff]   ;;  %v2317_v2 = vld [vmem:[%s2637_s7 + $0x1c0] ss:$16 sps:$4 sm:$0xff]  }
  0x3c   : > { %v2318_v3 = vld [vmem:[%s2637_s7 + $0x1c8] ss:$16 sps:$4 sm:$0xff]   ;;  %v2319_v4 = vld [vmem:[%s2637_s7 + $0x1e4] ss:$16 sps:$4 sm:$0xff]   ;;  %v2321_v5 = vld [vmem:[%s2637_s7 + $0x1ec] ss:$16 sps:$4 sm:$0xff]  }
  0x3d   : > { %v2323_v6 = vld [vmem:[%s2637_s7 + $0x1e0] ss:$16 sps:$4 sm:$0xff]   ;;  %v2324_v7 = vld [vmem:[%s2637_s7 + $0x1e8] ss:$16 sps:$4 sm:$0xff]   ;;  %v2330_v8 = vld [vmem:[%s2637_s7 + $0x204] ss:$16 sps:$4 sm:$0xff]  }
  0x3e   : > { %1520 = vmatpush1.bf16.msra.mxu0 %v2263_v29  ;;  %1649 = vmatpush1.bf16.msra.mxu1 %v2264_v30  ;;  %v2333_v9 = vld [vmem:[%s2637_s7 + $0x20c] ss:$16 sps:$4 sm:$0xff]   ;;  %v2325_v10 = vld [vmem:[%s2639_s8] ss:$24 sps:$4 sm:$0xff]   ;;  %v2336_v13 = vld [vmem:[%s2637_s7 + $0x224] ss:$16 sps:$4 sm:$0xff]  }
  0x3f   : > { %1521 = vmatprep.subr.bf16.mxu0 %v2265_v31  ;;  %1650 = vmatprep.subr.bf16.mxu1 %v2267_v32  ;;  %v2328_v11 = vld [vmem:[%s2637_s7 + $0x200] ss:$16 sps:$4 sm:$0xff]   ;;  %v2331_v12 = vld [vmem:[%s2637_s7 + $0x208] ss:$16 sps:$4 sm:$0xff]   ;;  %v2339_v14 = vld [vmem:[%s2637_s7 + $0x22c] ss:$16 sps:$4 sm:$0xff]  }
  0x40   : > { %v2334_v15 = vld [vmem:[%s2637_s7 + $0x220] ss:$16 sps:$4 sm:$0xff]   ;;  %v2337_v16 = vld [vmem:[%s2637_s7 + $0x228] ss:$16 sps:$4 sm:$0xff]   ;;  %v2342_v17 = vld [vmem:[%s2637_s7 + $0x244] ss:$16 sps:$4 sm:$0xff]  }
  0x41   : > { %v2345_v18 = vld [vmem:[%s2637_s7 + $0x24c] ss:$16 sps:$4 sm:$0xff]   ;;  %v2340_v19 = vld [vmem:[%s2637_s7 + $0x240] ss:$16 sps:$4 sm:$0xff]   ;;  %v2343_v20 = vld [vmem:[%s2637_s7 + $0x248] ss:$16 sps:$4 sm:$0xff]  }
  0x42   : > { %1522 = vmatpush1.bf16.msra.mxu0 %v2269_v33  ;;  %1651 = vmatpush1.bf16.msra.mxu1 %v2270_v34  ;;  %v2348_v21 = vld [vmem:[%s2637_s7 + $0x264] ss:$16 sps:$4 sm:$0xff]   ;;  %v2351_v22 = vld [vmem:[%s2637_s7 + $0x26c] ss:$16 sps:$4 sm:$0xff]   ;;  %v2346_v23 = vld [vmem:[%s2637_s7 + $0x260] ss:$16 sps:$4 sm:$0xff]  }
  0x43   : > { %1523 = vmatprep.subr.bf16.mxu0 %v2271_v35  ;;  %1652 = vmatprep.subr.bf16.mxu1 %v2273_v36  ;;  %v2349_v24 = vld [vmem:[%s2637_s7 + $0x268] ss:$16 sps:$4 sm:$0xff]   ;;  %v2354_v25 = vld [vmem:[%s2637_s7 + $0x284] ss:$16 sps:$4 sm:$0xff]   ;;  %v2357_v26 = vld [vmem:[%s2637_s7 + $0x28c] ss:$16 sps:$4 sm:$0xff]  }
  0x44   : > { %v2352_v27 = vld [vmem:[%s2637_s7 + $0x280] ss:$16 sps:$4 sm:$0xff]   ;;  %v2355_v28 = vld [vmem:[%s2637_s7 + $0x288] ss:$16 sps:$4 sm:$0xff]   ;;  %v2360_v29 = vld [vmem:[%s2637_s7 + $0x2a4] ss:$16 sps:$4 sm:$0xff]  }
  0x45   : > { %v2363_v30 = vld [vmem:[%s2637_s7 + $0x2ac] ss:$16 sps:$4 sm:$0xff]   ;;  %v2358_v31 = vld [vmem:[%s2637_s7 + $0x2a0] ss:$16 sps:$4 sm:$0xff]   ;;  %v2361_v32 = vld [vmem:[%s2637_s7 + $0x2a8] ss:$16 sps:$4 sm:$0xff]  }
  0x46   : > { %1524 = vmatpush1.bf16.msra.mxu0 %v2275_v37  ;;  %1653 = vmatpush1.bf16.msra.mxu1 %v2276_v38  ;;  %v2366_v33 = vld [vmem:[%s2637_s7 + $0x2c4] ss:$16 sps:$4 sm:$0xff]   ;;  %v2369_v34 = vld [vmem:[%s2637_s7 + $0x2cc] ss:$16 sps:$4 sm:$0xff]   ;;  %v2364_v35 = vld [vmem:[%s2637_s7 + $0x2c0] ss:$16 sps:$4 sm:$0xff]  }
  0x47   : > { %1525 = vmatprep.subr.bf16.mxu0 %v2277_v39  ;;  %1654 = vmatprep.subr.bf16.mxu1 %v2279_v40  ;;  %v2367_v36 = vld [vmem:[%s2637_s7 + $0x2c8] ss:$16 sps:$4 sm:$0xff]   ;;  %v2426_v37 = vld [vmem:[%s2639_s8 + $0xc] ss:$24 sps:$4 sm:$0xff]   ;;  %v2370_v40 = vld [vmem:[%s2637_s7 + $0x2e0] ss:$16 sps:$4 sm:$0xff]  }
  0x48   : > { %v2372_v38 = vld [vmem:[%s2637_s7 + $0x2e4] ss:$16 sps:$4 sm:$0xff]   ;;  %v2375_v39 = vld [vmem:[%s2637_s7 + $0x2ec] ss:$16 sps:$4 sm:$0xff]   ;;  %p2163_p11 = scmp.ne.s32.totalorder %s2556_s14, 2 }
  0x49   : > { %v2399_v55 = vld [vmem:[%s2637_s7 + $0x36c] ss:$16 sps:$4 sm:$0xff]  }
  0x4a   : > { %1526 = vmatpush1.bf16.msra.mxu0 %v2281_v41  ;;  %1655 = vmatpush1.bf16.msra.mxu1 %v2282_v42  ;;  %v2373_v41 = vld [vmem:[%s2637_s7 + $0x2e8] ss:$16 sps:$4 sm:$0xff]   ;;  %v2378_v42 = vld [vmem:[%s2637_s7 + $0x304] ss:$16 sps:$4 sm:$0xff]  }
  0x4b   : > { %1527 = vmatprep.subr.bf16.mxu0 %v2283_v43  ;;  %1656 = vmatprep.subr.bf16.mxu1 %v2285_v44  ;;  %v2381_v43 = vld [vmem:[%s2637_s7 + $0x30c] ss:$16 sps:$4 sm:$0xff]   ;;  %v2376_v44 = vld [vmem:[%s2637_s7 + $0x300] ss:$16 sps:$4 sm:$0xff]  }
  0x4e   : > { %1528 = vmatpush1.bf16.msra.mxu0 %v2287_v45  ;;  %1657 = vmatpush1.bf16.msra.mxu1 %v2288_v46  ;;  %v2379_v45 = vld [vmem:[%s2637_s7 + $0x308] ss:$16 sps:$4 sm:$0xff]   ;;  %v2384_v46 = vld [vmem:[%s2637_s7 + $0x324] ss:$16 sps:$4 sm:$0xff]  }
  0x4f   : > { %1529 = vmatprep.subr.bf16.mxu0 %v2289_v47  ;;  %1658 = vmatprep.subr.bf16.mxu1 %v2291_v48  ;;  %v2387_v47 = vld [vmem:[%s2637_s7 + $0x32c] ss:$16 sps:$4 sm:$0xff]   ;;  %v2382_v48 = vld [vmem:[%s2637_s7 + $0x320] ss:$16 sps:$4 sm:$0xff]  }
  0x52   : > { %1530 = vmatpush1.bf16.msra.mxu0 %v2293_v49  ;;  %1659 = vmatpush1.bf16.msra.mxu1 %v2294_v50  ;;  %v2385_v49 = vld [vmem:[%s2637_s7 + $0x328] ss:$16 sps:$4 sm:$0xff]   ;;  %v2390_v50 = vld [vmem:[%s2637_s7 + $0x344] ss:$16 sps:$4 sm:$0xff]  }
  0x53   : > { %1531 = vmatprep.subr.bf16.mxu0 %v2295_v51  ;;  %1660 = vmatprep.subr.bf16.mxu1 %v2297_v52  ;;  %v2393_v51 = vld [vmem:[%s2637_s7 + $0x34c] ss:$16 sps:$4 sm:$0xff]   ;;  %v2388_v52 = vld [vmem:[%s2637_s7 + $0x340] ss:$16 sps:$4 sm:$0xff]  }
  0x56   : > { %1532 = vmatpush1.bf16.msra.mxu0 %v2299_v53  ;;  %1661 = vmatpush1.bf16.msra.mxu1 %v2300_v54  ;;  %v2391_v53 = vld [vmem:[%s2637_s7 + $0x348] ss:$16 sps:$4 sm:$0xff]   ;;  %v2396_v54 = vld [vmem:[%s2637_s7 + $0x364] ss:$16 sps:$4 sm:$0xff]  }
  0x57   : > { %1533 = vmatprep.subr.bf16.mxu0 %v2301_v56  ;;  %1662 = vmatprep.subr.bf16.mxu1 %v2303_v57  ;;  %v2394_v56 = vld [vmem:[%s2637_s7 + $0x360] ss:$16 sps:$4 sm:$0xff]   ;;  %v2397_v57 = vld [vmem:[%s2637_s7 + $0x368] ss:$16 sps:$4 sm:$0xff]  }
  0x5a   : > { %1534 = vmatpush1.bf16.msra.mxu0 %v2305_v58  ;;  %1663 = vmatpush1.bf16.msra.mxu1 %v2306_v59  ;;  %v2402_v58 = vld [vmem:[%s2637_s7 + $0x384] ss:$16 sps:$4 sm:$0xff]   ;;  %v2405_v59 = vld [vmem:[%s2637_s7 + $0x38c] ss:$16 sps:$4 sm:$0xff]  }
  0x5b   : > { %1535 = vmatprep.subr.bf16.mxu0 %v2307_v60  ;;  %1664 = vmatprep.subr.bf16.mxu1 %v2309_v61  ;;  %v2400_v60 = vld [vmem:[%s2637_s7 + $0x380] ss:$16 sps:$4 sm:$0xff]   ;;  %v2403_v61 = vld [vmem:[%s2637_s7 + $0x388] ss:$16 sps:$4 sm:$0xff]  }
  0x5e   : > { %1536 = vmatpush1.bf16.msra.mxu0 %v2311_v62  ;;  %1665 = vmatpush1.bf16.msra.mxu1 %v2312_v63  ;;  %v2408_v62 = vld [vmem:[%s2637_s7 + $0x3a4] ss:$16 sps:$4 sm:$0xff]   ;;  %v2411_v63 = vld [vmem:[%s2637_s7 + $0x3ac] ss:$16 sps:$4 sm:$0xff]  }
  0x5f   : > { %1537 = vmatprep.subr.bf16.mxu0 %v2313_v0  ;;  %1666 = vmatprep.subr.bf16.mxu1 %v2315_v1  ;;  %v2406_v0 = vld [vmem:[%s2637_s7 + $0x3a0] ss:$16 sps:$4 sm:$0xff]   ;;  %v2409_v1 = vld [vmem:[%s2637_s7 + $0x3a8] ss:$16 sps:$4 sm:$0xff]  }
  0x62   : > { %1538 = vmatpush1.bf16.msra.mxu0 %v2317_v2  ;;  %1667 = vmatpush1.bf16.msra.mxu1 %v2318_v3  ;;  %v2414_v2 = vld [vmem:[%s2637_s7 + $0x3c4] ss:$16 sps:$4 sm:$0xff]   ;;  %v2417_v3 = vld [vmem:[%s2637_s7 + $0x3cc] ss:$16 sps:$4 sm:$0xff]  }
  0x63   : > { %1539 = vmatprep.subr.bf16.mxu0 %v2319_v4  ;;  %1668 = vmatprep.subr.bf16.mxu1 %v2321_v5  ;;  %v2412_v4 = vld [vmem:[%s2637_s7 + $0x3c0] ss:$16 sps:$4 sm:$0xff]   ;;  %v2415_v5 = vld [vmem:[%s2637_s7 + $0x3c8] ss:$16 sps:$4 sm:$0xff]  }
  0x66   : > { %1540 = vmatpush1.bf16.msra.mxu0 %v2323_v6  ;;  %1669 = vmatpush1.bf16.msra.mxu1 %v2324_v7  ;;  %v2420_v6 = vld [vmem:[%s2637_s7 + $0x3e4] ss:$16 sps:$4 sm:$0xff]   ;;  %v2423_v7 = vld [vmem:[%s2637_s7 + $0x3ec] ss:$16 sps:$4 sm:$0xff]  }
  0x67   : > { %1552 = vmatprep.subr.bf16.mxu0 %v2330_v8  ;;  %1681 = vmatprep.subr.bf16.mxu1 %v2333_v9  ;;  %v2418_v8 = vld [vmem:[%s2637_s7 + $0x3e0] ss:$16 sps:$4 sm:$0xff]   ;;  %v2421_v9 = vld [vmem:[%s2637_s7 + $0x3e8] ss:$16 sps:$4 sm:$0xff]  }
  0x69   : > { %1542 = vmatmul.mubr.bf16.vlgmr.msra.gmra.mrb[0].mxu0 %v2325_v10  ;;  %1671 = vmatmul.mubr.bf16.vlgmr.msra.gmra.mrb[0].mxu1 %v2325_v10  ;;  %v2429_v10 = vld [vmem:[%s2637_s7 + $0x404] ss:$16 sps:$4 sm:$0xff]  }
  0x6a   : > { %1553 = vmatpush1.bf16.msra.mxu0 %v2328_v11  ;;  %1682 = vmatpush1.bf16.msra.mxu1 %v2331_v12  ;;  %v2432_v11 = vld [vmem:[%s2637_s7 + $0x40c] ss:$16 sps:$4 sm:$0xff]   ;;  %v2424_v12 = vld [vmem:[%s2639_s8 + $0x8] ss:$24 sps:$4 sm:$0xff]  }
  0x6b   : > { %1554 = vmatprep.subr.bf16.mxu0 %v2336_v13  ;;  %1683 = vmatprep.subr.bf16.mxu1 %v2339_v14  ;;  %v2427_v13 = vld [vmem:[%s2637_s7 + $0x400] ss:$16 sps:$4 sm:$0xff]   ;;  %v2430_v14 = vld [vmem:[%s2637_s7 + $0x408] ss:$16 sps:$4 sm:$0xff]  }
  0x6c   : > { %1584 = vmatprep.mubr.bf16.mxu0 %v2426_v37  ;;  %1713 = vmatprep.mubr.bf16.mxu1 %v2426_v37  ;;  %v2468_v37 = vld [vmem:[%s2637_s7 + $0x4cc] ss:$16 sps:$4 sm:$0xff]  }
  0x6e   : > { %1555 = vmatpush1.bf16.msra.mxu0 %v2334_v15  ;;  %1684 = vmatpush1.bf16.msra.mxu1 %v2337_v16  ;;  %v2435_v15 = vld [vmem:[%s2637_s7 + $0x424] ss:$16 sps:$4 sm:$0xff]   ;;  %v2438_v16 = vld [vmem:[%s2637_s7 + $0x42c] ss:$16 sps:$4 sm:$0xff]  }
  0x6f   : > { %1556 = vmatprep.subr.bf16.mxu0 %v2342_v17  ;;  %1685 = vmatprep.subr.bf16.mxu1 %v2345_v18  ;;  %v2525_v17 = vld [vmem:[%s2639_s8 + $0x14] ss:$24 sps:$4 sm:$0xff]   ;;  %v2433_v18 = vld [vmem:[%s2637_s7 + $0x420] ss:$16 sps:$4 sm:$0xff]  }
  0x72   : > { %1557 = vmatpush1.bf16.msra.mxu0 %v2340_v19  ;;  %1686 = vmatpush1.bf16.msra.mxu1 %v2343_v20  ;;  %v2436_v19 = vld [vmem:[%s2637_s7 + $0x428] ss:$16 sps:$4 sm:$0xff]   ;;  %v2441_v20 = vld [vmem:[%s2637_s7 + $0x444] ss:$16 sps:$4 sm:$0xff]  }
  0x73   : > { %1558 = vmatprep.subr.bf16.mxu0 %v2348_v21  ;;  %1687 = vmatprep.subr.bf16.mxu1 %v2351_v22  ;;  %v2444_v21 = vld [vmem:[%s2637_s7 + $0x44c] ss:$16 sps:$4 sm:$0xff]   ;;  %v2439_v22 = vld [vmem:[%s2637_s7 + $0x440] ss:$16 sps:$4 sm:$0xff]  }
  0x76   : > { %1559 = vmatpush1.bf16.msra.mxu0 %v2346_v23  ;;  %1688 = vmatpush1.bf16.msra.mxu1 %v2349_v24  ;;  %v2442_v23 = vld [vmem:[%s2637_s7 + $0x448] ss:$16 sps:$4 sm:$0xff]   ;;  %v2447_v24 = vld [vmem:[%s2637_s7 + $0x464] ss:$16 sps:$4 sm:$0xff]  }
  0x77   : > { %1560 = vmatprep.subr.bf16.mxu0 %v2354_v25  ;;  %1689 = vmatprep.subr.bf16.mxu1 %v2357_v26  ;;  %v2450_v25 = vld [vmem:[%s2637_s7 + $0x46c] ss:$16 sps:$4 sm:$0xff]   ;;  %v2445_v26 = vld [vmem:[%s2637_s7 + $0x460] ss:$16 sps:$4 sm:$0xff]  }
  0x7a   : > { %1561 = vmatpush1.bf16.msra.mxu0 %v2352_v27  ;;  %1690 = vmatpush1.bf16.msra.mxu1 %v2355_v28  ;;  %v2448_v27 = vld [vmem:[%s2637_s7 + $0x468] ss:$16 sps:$4 sm:$0xff]   ;;  %v2453_v28 = vld [vmem:[%s2637_s7 + $0x484] ss:$16 sps:$4 sm:$0xff]  }
  0x7b   : > { %1562 = vmatprep.subr.bf16.mxu0 %v2360_v29  ;;  %1691 = vmatprep.subr.bf16.mxu1 %v2363_v30  ;;  %v2456_v29 = vld [vmem:[%s2637_s7 + $0x48c] ss:$16 sps:$4 sm:$0xff]   ;;  %v2451_v30 = vld [vmem:[%s2637_s7 + $0x480] ss:$16 sps:$4 sm:$0xff]  }
  0x7e   : > { %1563 = vmatpush1.bf16.msra.mxu0 %v2358_v31  ;;  %1692 = vmatpush1.bf16.msra.mxu1 %v2361_v32  ;;  %v2454_v31 = vld [vmem:[%s2637_s7 + $0x488] ss:$16 sps:$4 sm:$0xff]   ;;  %v2459_v32 = vld [vmem:[%s2637_s7 + $0x4a4] ss:$16 sps:$4 sm:$0xff]  }
  0x7f   : > { %1564 = vmatprep.subr.bf16.mxu0 %v2366_v33  ;;  %1693 = vmatprep.subr.bf16.mxu1 %v2369_v34  ;;  %v2462_v33 = vld [vmem:[%s2637_s7 + $0x4ac] ss:$16 sps:$4 sm:$0xff]   ;;  %v2457_v34 = vld [vmem:[%s2637_s7 + $0x4a0] ss:$16 sps:$4 sm:$0xff]  }
  0x82   : > { %1565 = vmatpush1.bf16.msra.mxu0 %v2364_v35  ;;  %1694 = vmatpush1.bf16.msra.mxu1 %v2367_v36  ;;  %v2460_v35 = vld [vmem:[%s2637_s7 + $0x4a8] ss:$16 sps:$4 sm:$0xff]   ;;  %v2465_v36 = vld [vmem:[%s2637_s7 + $0x4c4] ss:$16 sps:$4 sm:$0xff]  }
  0x83   : > { %1566 = vmatprep.subr.bf16.mxu0 %v2372_v38  ;;  %1695 = vmatprep.subr.bf16.mxu1 %v2375_v39  ;;  %v2463_v38 = vld [vmem:[%s2637_s7 + $0x4c0] ss:$16 sps:$4 sm:$0xff]   ;;  %v2466_v39 = vld [vmem:[%s2637_s7 + $0x4c8] ss:$16 sps:$4 sm:$0xff]  }
  0x86   : > { %1567 = vmatpush1.bf16.msra.mxu0 %v2370_v40  ;;  %1696 = vmatpush1.bf16.msra.mxu1 %v2373_v41  ;;  %v2471_v40 = vld [vmem:[%s2637_s7 + $0x4e4] ss:$16 sps:$4 sm:$0xff]   ;;  %v2474_v41 = vld [vmem:[%s2637_s7 + $0x4ec] ss:$16 sps:$4 sm:$0xff]  }
  0x87   : > { %1568 = vmatprep.subr.bf16.mxu0 %v2378_v42  ;;  %1697 = vmatprep.subr.bf16.mxu1 %v2381_v43  ;;  %v2469_v42 = vld [vmem:[%s2637_s7 + $0x4e0] ss:$16 sps:$4 sm:$0xff]   ;;  %v2472_v43 = vld [vmem:[%s2637_s7 + $0x4e8] ss:$16 sps:$4 sm:$0xff]  }
  0x8a   : > { %1569 = vmatpush1.bf16.msra.mxu0 %v2376_v44  ;;  %1698 = vmatpush1.bf16.msra.mxu1 %v2379_v45  ;;  %v2477_v44 = vld [vmem:[%s2637_s7 + $0x504] ss:$16 sps:$4 sm:$0xff]   ;;  %v2480_v45 = vld [vmem:[%s2637_s7 + $0x50c] ss:$16 sps:$4 sm:$0xff]  }
  0x8b   : > { %1570 = vmatprep.subr.bf16.mxu0 %v2384_v46  ;;  %1699 = vmatprep.subr.bf16.mxu1 %v2387_v47  ;;  %v2475_v46 = vld [vmem:[%s2637_s7 + $0x500] ss:$16 sps:$4 sm:$0xff]   ;;  %v2478_v47 = vld [vmem:[%s2637_s7 + $0x508] ss:$16 sps:$4 sm:$0xff]  }
  0x8e   : > { %1571 = vmatpush1.bf16.msra.mxu0 %v2382_v48  ;;  %1700 = vmatpush1.bf16.msra.mxu1 %v2385_v49  ;;  %v2483_v48 = vld [vmem:[%s2637_s7 + $0x524] ss:$16 sps:$4 sm:$0xff]   ;;  %v2486_v49 = vld [vmem:[%s2637_s7 + $0x52c] ss:$16 sps:$4 sm:$0xff]  }
  0x8f   : > { %1572 = vmatprep.subr.bf16.mxu0 %v2390_v50  ;;  %1701 = vmatprep.subr.bf16.mxu1 %v2393_v51  ;;  %v2481_v50 = vld [vmem:[%s2637_s7 + $0x520] ss:$16 sps:$4 sm:$0xff]   ;;  %v2484_v51 = vld [vmem:[%s2637_s7 + $0x528] ss:$16 sps:$4 sm:$0xff]  }
  0x92   : > { %1573 = vmatpush1.bf16.msra.mxu0 %v2388_v52  ;;  %1702 = vmatpush1.bf16.msra.mxu1 %v2391_v53  ;;  %v2489_v52 = vld [vmem:[%s2637_s7 + $0x544] ss:$16 sps:$4 sm:$0xff]   ;;  %v2492_v53 = vld [vmem:[%s2637_s7 + $0x54c] ss:$16 sps:$4 sm:$0xff]  }
  0x93   : > { %1574 = vmatprep.subr.bf16.mxu0 %v2396_v54  ;;  %1703 = vmatprep.subr.bf16.mxu1 %v2399_v55  ;;  %v2487_v54 = vld [vmem:[%s2637_s7 + $0x540] ss:$16 sps:$4 sm:$0xff]   ;;  %v2490_v55 = vld [vmem:[%s2637_s7 + $0x548] ss:$16 sps:$4 sm:$0xff]  }
  0x96   : > { %1575 = vmatpush1.bf16.msra.mxu0 %v2394_v56  ;;  %1704 = vmatpush1.bf16.msra.mxu1 %v2397_v57  ;;  %v2495_v56 = vld [vmem:[%s2637_s7 + $0x564] ss:$16 sps:$4 sm:$0xff]   ;;  %v2498_v57 = vld [vmem:[%s2637_s7 + $0x56c] ss:$16 sps:$4 sm:$0xff]  }
  0x97   : > { %1576 = vmatprep.subr.bf16.mxu0 %v2402_v58  ;;  %1705 = vmatprep.subr.bf16.mxu1 %v2405_v59  ;;  %v2493_v58 = vld [vmem:[%s2637_s7 + $0x560] ss:$16 sps:$4 sm:$0xff]   ;;  %v2496_v59 = vld [vmem:[%s2637_s7 + $0x568] ss:$16 sps:$4 sm:$0xff]  }
  0x9a   : > { %1577 = vmatpush1.bf16.msra.mxu0 %v2400_v60  ;;  %1706 = vmatpush1.bf16.msra.mxu1 %v2403_v61  ;;  %v2501_v60 = vld [vmem:[%s2637_s7 + $0x584] ss:$16 sps:$4 sm:$0xff]   ;;  %v2504_v61 = vld [vmem:[%s2637_s7 + $0x58c] ss:$16 sps:$4 sm:$0xff]  }
  0x9b   : > { %1578 = vmatprep.subr.bf16.mxu0 %v2408_v62  ;;  %1707 = vmatprep.subr.bf16.mxu1 %v2411_v63  ;;  %v2499_v62 = vld [vmem:[%s2637_s7 + $0x580] ss:$16 sps:$4 sm:$0xff]   ;;  %v2502_v63 = vld [vmem:[%s2637_s7 + $0x588] ss:$16 sps:$4 sm:$0xff]  }
  0x9e   : > { %1579 = vmatpush1.bf16.msra.mxu0 %v2406_v0  ;;  %1708 = vmatpush1.bf16.msra.mxu1 %v2409_v1  ;;  %v2507_v0 = vld [vmem:[%s2637_s7 + $0x5a4] ss:$16 sps:$4 sm:$0xff]   ;;  %v2510_v1 = vld [vmem:[%s2637_s7 + $0x5ac] ss:$16 sps:$4 sm:$0xff]  }
  0x9f   : > { %1580 = vmatprep.subr.bf16.mxu0 %v2414_v2  ;;  %1709 = vmatprep.subr.bf16.mxu1 %v2417_v3  ;;  %v2505_v2 = vld [vmem:[%s2637_s7 + $0x5a0] ss:$16 sps:$4 sm:$0xff]   ;;  %v2508_v3 = vld [vmem:[%s2637_s7 + $0x5a8] ss:$16 sps:$4 sm:$0xff]  }
  0xa2   : > { %1581 = vmatpush1.bf16.msra.mxu0 %v2412_v4  ;;  %1710 = vmatpush1.bf16.msra.mxu1 %v2415_v5  ;;  %v2513_v4 = vld [vmem:[%s2637_s7 + $0x5c4] ss:$16 sps:$4 sm:$0xff]   ;;  %v2516_v5 = vld [vmem:[%s2637_s7 + $0x5cc] ss:$16 sps:$4 sm:$0xff]  }
  0xa3   : > { %1582 = vmatprep.subr.bf16.mxu0 %v2420_v6  ;;  %1711 = vmatprep.subr.bf16.mxu1 %v2423_v7  ;;  %v2511_v6 = vld [vmem:[%s2637_s7 + $0x5c0] ss:$16 sps:$4 sm:$0xff]   ;;  %v2514_v7 = vld [vmem:[%s2637_s7 + $0x5c8] ss:$16 sps:$4 sm:$0xff]  }
  0xa6   : > { %1583 = vmatpush1.bf16.msra.mxu0 %v2418_v8  ;;  %1712 = vmatpush1.bf16.msra.mxu1 %v2421_v9  ;;  %v2519_v8 = vld [vmem:[%s2637_s7 + $0x5e4] ss:$16 sps:$4 sm:$0xff]   ;;  %v2522_v9 = vld [vmem:[%s2637_s7 + $0x5ec] ss:$16 sps:$4 sm:$0xff]  }
  0xa7   : > { %1595 = vmatprep.subr.bf16.mxu0 %v2429_v10  ;;  %1724 = vmatprep.subr.bf16.mxu1 %v2432_v11  ;;  %v2517_v10 = vld [vmem:[%s2637_s7 + $0x5e0] ss:$16 sps:$4 sm:$0xff]   ;;  %v2520_v11 = vld [vmem:[%s2637_s7 + $0x5e8] ss:$16 sps:$4 sm:$0xff]  }
  0xa9   : > { %1585 = vmatmul.mubr.bf16.vlgmr.msra.gmra.mrb[0].mxu0 %v2424_v12  ;;  %1714 = vmatmul.mubr.bf16.vlgmr.msra.gmra.mrb[0].mxu1 %v2424_v12  ;;  %v2523_v12 = vld [vmem:[%s2639_s8 + $0x10] ss:$24 sps:$4 sm:$0xff]  }
  0xaa   : > { %1596 = vmatpush1.bf16.msra.mxu0 %v2427_v13  ;;  %1725 = vmatpush1.bf16.msra.mxu1 %v2430_v14  ;;  %v313_v13 = vld [vmem:[#allocation2] sm:$0xff]  ;;  %v315_v14 = vld [vmem:[#allocation2 + $0x10] sm:$0xff] }
  0xab   : > { %1597 = vmatprep.subr.bf16.mxu0 %v2435_v15  ;;  %1726 = vmatprep.subr.bf16.mxu1 %v2438_v16  ;;  %v314_v15 = vld [vmem:[#allocation2 + $0x8] sm:$0xff]  ;;  %v316_v16 = vld [vmem:[#allocation2 + $0x18] sm:$0xff] }
  0xac   : > { %1627 = vmatprep.mubr.bf16.mxu0 %v2525_v17  ;;  %1756 = vmatprep.mubr.bf16.mxu1 %v2525_v17 }
  0xae   : > { %1598 = vmatpush1.bf16.msra.mxu0 %v2433_v18  ;;  %1727 = vmatpush1.bf16.msra.mxu1 %v2436_v19  ;;  %v317_v19 = vld [vmem:[#allocation2 + $0x20] sm:$0xff] }
  0xaf   : > { %1599 = vmatprep.subr.bf16.mxu0 %v2441_v20  ;;  %1728 = vmatprep.subr.bf16.mxu1 %v2444_v21  ;;  %v319_v20 = vld [vmem:[#allocation2 + $0x30] sm:$0xff] }
  0xb2   : > { %1600 = vmatpush1.bf16.msra.mxu0 %v2439_v22  ;;  %1729 = vmatpush1.bf16.msra.mxu1 %v2442_v23 }
  0xb3   : > { %1601 = vmatprep.subr.bf16.mxu0 %v2447_v24  ;;  %1730 = vmatprep.subr.bf16.mxu1 %v2450_v25  ;;  %v318_v25 = vld [vmem:[#allocation2 + $0x28] sm:$0xff] }
  0xb6   : > { %1602 = vmatpush1.bf16.msra.mxu0 %v2445_v26  ;;  %1731 = vmatpush1.bf16.msra.mxu1 %v2448_v27  ;;  %v320_v26 = vld [vmem:[#allocation2 + $0x38] sm:$0xff] }
  0xb7   : > { %1603 = vmatprep.subr.bf16.mxu0 %v2453_v28  ;;  %1732 = vmatprep.subr.bf16.mxu1 %v2456_v29 }
  0xba   : > { %1604 = vmatpush1.bf16.msra.mxu0 %v2451_v30  ;;  %1733 = vmatpush1.bf16.msra.mxu1 %v2454_v31 }
  0xbb   : > { %1605 = vmatprep.subr.bf16.mxu0 %v2459_v32  ;;  %1734 = vmatprep.subr.bf16.mxu1 %v2462_v33 }
  0xbe   : > { %1606 = vmatpush1.bf16.msra.mxu0 %v2457_v34  ;;  %1735 = vmatpush1.bf16.msra.mxu1 %v2460_v35 }
  0xbf   : > { %1607 = vmatprep.subr.bf16.mxu0 %v2465_v36  ;;  %1736 = vmatprep.subr.bf16.mxu1 %v2468_v37  ;;  %v1797_v37 = vlaneseq (!%p2163_p11) }
  0xc2   : > { %1608 = vmatpush1.bf16.msra.mxu0 %v2463_v38  ;;  %1737 = vmatpush1.bf16.msra.mxu1 %v2466_v39  ;;  %v1798_v38 = vshrl.u32 (!%p2163_p11), %v1797_v37, 7  ;;  %v1795_v39 = vld [vmem:[%s2885_s2] sm:$0xf] (!%p2163_p11) }
  0xc3   : > { %1609 = vmatprep.subr.bf16.mxu0 %v2471_v40  ;;  %1738 = vmatprep.subr.bf16.mxu1 %v2474_v41 }
  0xc4   : > { %v1799_v41 = vsub.s32 (!%p2163_p11), 0, %v1798_v38 }
  0xc6   : > { %1610 = vmatpush1.bf16.msra.mxu0 %v2469_v42  ;;  %1739 = vmatpush1.bf16.msra.mxu1 %v2472_v43  ;;  %v1803_v43 = vsub.s32 (!%p2163_p11), 1, %v1798_v38 }
  0xc7   : > { %1611 = vmatprep.subr.bf16.mxu0 %v2477_v44  ;;  %1740 = vmatprep.subr.bf16.mxu1 %v2480_v45  ;;  %v1807_v44 = vsub.s32 (!%p2163_p11), 2, %v1798_v38  ;;  %v1811_v45 = vsub.s32 (!%p2163_p11), 3, %v1798_v38 }
  0xca   : > { %1612 = vmatpush1.bf16.msra.mxu0 %v2475_v46  ;;  %1741 = vmatpush1.bf16.msra.mxu1 %v2478_v47 }
  0xcb   : > { %1613 = vmatprep.subr.bf16.mxu0 %v2483_v48  ;;  %1742 = vmatprep.subr.bf16.mxu1 %v2486_v49  ;;  %v1800_v49 = vrot.slane (!%p2163_p11), %v1795_v39, %v1799_v41 }
  0xce   : > { %1614 = vmatpush1.bf16.msra.mxu0 %v2481_v50  ;;  %1743 = vmatpush1.bf16.msra.mxu1 %v2484_v51  ;;  %v1804_v50 = vrot.slane (!%p2163_p11), %v1795_v39, %v1803_v43  ;;  %v1808_v51 = vrot.slane (!%p2163_p11), %v1795_v39, %v1807_v44 }
  0xcf   : > { %1615 = vmatprep.subr.bf16.mxu0 %v2489_v52  ;;  %1744 = vmatprep.subr.bf16.mxu1 %v2492_v53  ;;  %v1812_v52 = vrot.slane (!%p2163_p11), %v1795_v39, %v1811_v45 }
  0xd2   : > { %1616 = vmatpush1.bf16.msra.mxu0 %v2487_v54  ;;  %1745 = vmatpush1.bf16.msra.mxu1 %v2490_v55 }
  0xd3   : > { %1617 = vmatprep.subr.bf16.mxu0 %v2495_v56  ;;  %1746 = vmatprep.subr.bf16.mxu1 %v2498_v57 }
  0xd6   : > { %1618 = vmatpush1.bf16.msra.mxu0 %v2493_v58  ;;  %1747 = vmatpush1.bf16.msra.mxu1 %v2496_v59 }
  0xd7   : > { %1619 = vmatprep.subr.bf16.mxu0 %v2501_v60  ;;  %1748 = vmatprep.subr.bf16.mxu1 %v2504_v61 }
  0xda   : > { %1620 = vmatpush1.bf16.msra.mxu0 %v2499_v62  ;;  %1749 = vmatpush1.bf16.msra.mxu1 %v2502_v63 }
  0xdb   : > { %1621 = vmatprep.subr.bf16.mxu0 %v2507_v0  ;;  %1750 = vmatprep.subr.bf16.mxu1 %v2510_v1 }
  0xde   : > { %1622 = vmatpush1.bf16.msra.mxu0 %v2505_v2  ;;  %1751 = vmatpush1.bf16.msra.mxu1 %v2508_v3 }
  0xdf   : > { %1623 = vmatprep.subr.bf16.mxu0 %v2513_v4  ;;  %1752 = vmatprep.subr.bf16.mxu1 %v2516_v5 }
  0xe2   : > { %1624 = vmatpush1.bf16.msra.mxu0 %v2511_v6  ;;  %1753 = vmatpush1.bf16.msra.mxu1 %v2514_v7 }
  0xe3   : > { %1625 = vmatprep.subr.bf16.mxu0 %v2519_v8  ;;  %1754 = vmatprep.subr.bf16.mxu1 %v2522_v9 }
  0xe6   : > { %1626 = vmatpush1.bf16.msra.mxu0 %v2517_v10  ;;  %1755 = vmatpush1.bf16.msra.mxu1 %v2520_v11 }
  0xe9   : > { %1628 = vmatmul.mubr.bf16.vlgmr.msra.gmra.mrb[0].mxu0 %v2523_v12  ;;  %1757 = vmatmul.mubr.bf16.vlgmr.msra.gmra.mrb[0].mxu1 %v2523_v12 }
 0x1bc   : > { %v1629_v17 = vpop.f32.mrb[0].mxu0  ;;  %v1758_v18 = vpop.f32.mrb[0].mxu1  ;;  %1786 = sbr.rel (%p2163_p11) target bundleno = 461 (0x1cd), region = 63 }
 0x1bd   : > { %v1767_v21 = vadd.f32 %v1629_v17, %v313_v13  ;;  %v1769_v22 = vadd.f32 %v1758_v18, %v315_v14  ;;  %v1631_v23 = vpop.f32.mrb[1].mxu0  ;;  %v1760_v24 = vpop.f32.mrb[1].mxu1 }
 0x1be   : > { %v1768_v27 = vadd.f32 %v1631_v23, %v314_v15  ;;  %v1770_v28 = vadd.f32 %v1760_v24, %v316_v16  ;;  %v1633_v29 = vpop.f32.mrb[2].mxu0  ;;  %v1762_v30 = vpop.f32.mrb[2].mxu1 }
 0x1bf   : > { %1775 = vst [vmem:[#allocation2] sm:$0xff] %v1767_v21  ;;  %1777 = vst [vmem:[#allocation2 + $0x10] sm:$0xff] %v1769_v22  ;;  %v1771_v31 = vadd.f32 %v1633_v29, %v317_v19  ;;  %v1773_v32 = vadd.f32 %v1762_v30, %v319_v20  ;;  %v1635_v33 = vpop.f32.mrb[3].mxu0  ;;  %v1764_v34 = vpop.f32.mrb[3].mxu1 }
 0x1c0   : > { %1776 = vst [vmem:[#allocation2 + $0x8] sm:$0xff] %v1768_v27  ;;  %1778 = vst [vmem:[#allocation2 + $0x18] sm:$0xff] %v1770_v28  ;;  %v1772_v35 = vadd.f32 %v1635_v33, %v318_v25  ;;  %v1774_v36 = vadd.f32 %v1764_v34, %v320_v26 }
 0x1c1   : > { %1779 = vst [vmem:[#allocation2 + $0x20] sm:$0xff] %v1771_v31  ;;  %1781 = vst [vmem:[#allocation2 + $0x30] sm:$0xff] %v1773_v32 }
 0x1c2   : > { %1780 = vst [vmem:[#allocation2 + $0x28] sm:$0xff] %v1772_v35  ;;  %1782 = vst [vmem:[#allocation2 + $0x38] sm:$0xff] %v1774_v36 }
 0x1c6   : > { %v1787_v40 = vld [vmem:[#allocation2] sm:$0xff]  ;;  %v1789_v46 = vld [vmem:[#allocation2 + $0x10] sm:$0xff] }
 0x1c7   : > { %v1788_v42 = vld [vmem:[#allocation2 + $0x8] sm:$0xff]  ;;  %v1790_v47 = vld [vmem:[#allocation2 + $0x18] sm:$0xff]  ;;  %v1817_v56 = vadd.f32 %v1800_v49, %v1787_v40  ;;  %v1819_v58 = vadd.f32 %v1808_v51, %v1789_v46 }
 0x1c8   : > { %v1791_v48 = vld [vmem:[#allocation2 + $0x20] sm:$0xff]  ;;  %v1793_v54 = vld [vmem:[#allocation2 + $0x30] sm:$0xff]  ;;  %v1818_v57 = vadd.f32 %v1804_v50, %v1788_v42  ;;  %v1820_v59 = vadd.f32 %v1812_v52, %v1790_v47 }
 0x1c9   : > { %v1792_v53 = vld [vmem:[#allocation2 + $0x28] sm:$0xff]  ;;  %v1794_v55 = vld [vmem:[#allocation2 + $0x38] sm:$0xff]  ;;  %v1821_v60 = vadd.f32 %v1800_v49, %v1791_v48  ;;  %v1823_v62 = vadd.f32 %v1808_v51, %v1793_v54  ;;  %1825 = vst [vmem:[%s2886_s3] sm:$0xff] %v1817_v56  ;;  %1827 = vst [vmem:[%s2886_s3 + $0x10] sm:$0xff] %v1819_v58 }
 0x1ca   : > { %v1822_v61 = vadd.f32 %v1804_v50, %v1792_v53  ;;  %v1824_v63 = vadd.f32 %v1812_v52, %v1794_v55  ;;  %1826 = vst [vmem:[%s2886_s3 + $0x8] sm:$0xff] %v1818_v57  ;;  %1828 = vst [vmem:[%s2886_s3 + $0x18] sm:$0xff] %v1820_v59 }
 0x1cb   : > { %1829 = vst [vmem:[%s2886_s3 + $0x20] sm:$0xff] %v1821_v60  ;;  %1831 = vst [vmem:[%s2886_s3 + $0x30] sm:$0xff] %v1823_v62 }
 0x1cc   : > { %1830 = vst [vmem:[%s2886_s3 + $0x28] sm:$0xff] %v1822_v61  ;;  %1832 = vst [vmem:[%s2886_s3 + $0x38] sm:$0xff] %v1824_v63 }
 0x1cd PF: > { %s13_s16 = sadd.s32 1, %s2564_s16   ;;  %s2887_s12 = smov %s2552_s13 }
 0x1ce   : > { %p10_p12 = scmp.ge.s32.totalorder %s13_s16, 5   ;;  %s2888_s13 = smov %s2622_s20 }
 0x1cf   : > { %s2889_s14 = smov %s2560_s15  ;;  %s2890_s15 = smov %s2892_s17 }
 0x1d0   :  { %12 = sbr.rel (!%p10_p12) target bundleno = 3 (0x3), region = 104 }

// kernel: _lambda_.112
= control target key start
LH: loop header
LB: loop body
LE: loop exit
PB: predicated region body
PF: predicated region fallthrough
CT: control target
= control target key end

     0   :  { %s2587_s12 = smov 0   ;;  %s2589_s13 = smov 0   ;;  %s2883_s0 = inlined_call_operand.vmem [shape: bf16[16,4608], index: 0, kind: input, shape index: {}]   ;;  %s2884_s1 = inlined_call_operand.vmem [shape: bf16[4608,512], index: 1, kind: input, shape index: {}]   ;;  %s2885_s2 = inlined_call_operand.vmem [shape: f32[1,512], index: 2, kind: input, shape index: {}]   ;;  %s2886_s3 = inlined_call_operand.vmem [shape: f32[16,512], index: 3, kind: output, shape index: {}]  }
   0x1   :  { %s2591_s14 = smov 0   ;;  %s2593_s15 = smov 0  }
   0x2   :  { %s2595_s16 = smov 0  }
   0x3 LB: > { %s25_s17 = sadd.s32 1, %s2560_s15  ;;  %p48_p1 = scmp.ne.s32.totalorder %s2552_s13, %s2548_s12  ;;  %s2564_s16 = sphi %s2595_s16, %s13_s16   ;;  %s2560_s15 = sphi %s2593_s15, %s2890_s15   ;;  %s2556_s14 = sphi %s2591_s14, %s2889_s14   ;;  %s2552_s13 = sphi %s2589_s13, %s2888_s13   ;;  %s2548_s12 = sphi %s2587_s12, %s2887_s12  }
   0x4   : > { %p26_p0 = scmp.ge.s32.totalorder %s25_s17, 6  ;;  %p49_p2 = scmp.eq.s32.totalorder %s2564_s16, 0 }
   0x5   : > { %s41_s19 = sadd.s32 1, %s2552_s13  ;;  %p1959_p5 = scmp.ge.s32.totalorder %s2564_s16, 6 }
   0x6   : > { %s2892_s17 = smov (%p26_p0, %s25_s17), 0  ;;  %p50_p3 = por %p49_p2, %p48_p1 }
   0x7   : > { %s37_s18 = ssub.s32 %s2560_s15, %s2892_s17  ;;  %164 = sbr.rel (%p1959_p5) target bundleno = 22 (0x16), region = 20 }
   0x8   : > { %p39_p4 = scmp.eq.s32.totalorder %s37_s18, 0 }
   0xa   : > { %s2622_s20 = scalar_select %p39_p4, %s2552_s13, %s41_s19  }
   0xe   : > { %167 = sbr.rel (!%p50_p3) target bundleno = 22 (0x16), region = 24  ;;  %s169_s21 = sand.u32 (%p50_p3), 1, %s2552_s13  }
   0xf   : > { %s2168_s22 = smul.u32 (%p50_p3), 24, %s2560_s15 }
  0x10   : > { %s2186_s23 = smul.u32 (%p50_p3), 48, %s169_s21 }
  0x11   : > { %s177_s26 = scalar_lea.vmem (%p50_p3), %s2883_s0, %s2168_s22 }
  0x12   : > { %v190_v0 = vld [vmem:[%s177_s26] sm:$0xff] (%p50_p3)  ;;  %v192_v1 = vld [vmem:[%s177_s26 + $0x8] sm:$0xff] (%p50_p3)  ;;  %v194_v2 = vld [vmem:[%s177_s26 + $0x10] sm:$0xff] (%p50_p3)  ;;  %s171_s27 = scalar_lea.vmem (%p50_p3), [#allocation3], %s2186_s23 }
  0x13   : > { %191 = vst [vmem:[%s171_s27] sm:$0xff] (%p50_p3), %v190_v0  ;;  %193 = vst [vmem:[%s171_s27 + $0x8] sm:$0xff] (%p50_p3), %v192_v1  ;;  %v196_v3 = vld [vmem:[%s177_s26 + $0x90] sm:$0xff] (%p50_p3)  ;;  %v198_v4 = vld [vmem:[%s177_s26 + $0x98] sm:$0xff] (%p50_p3) }
  0x14   : > { %195 = vst [vmem:[%s171_s27 + $0x10] sm:$0xff] (%p50_p3), %v194_v2  ;;  %v200_v5 = vld [vmem:[%s177_s26 + $0xa0] sm:$0xff] (%p50_p3)  ;;  %197 = vst [vmem:[%s171_s27 + $0x18] sm:$0xff] (%p50_p3), %v196_v3 }
  0x15   : > { %199 = vst [vmem:[%s171_s27 + $0x20] sm:$0xff] %v198_v4  ;;  %201 = vst [vmem:[%s171_s27 + $0x28] sm:$0xff] %v200_v5 }
  0x16 PF: > { %p1961_p6 = scmp.ge.s32.totalorder %s2564_s16, 1  ;;  %p221_p7 = scmp.lt.s32.totalorder %s2564_s16, 7 }
  0x18   : > { %p222_p8 = pnand %p1961_p6, %p221_p7 }
  0x19   : > { %s228_s28 = sand.u32 (!%p222_p8), 1, %s2548_s12   ;;  %s272_s29 = smul.u32 (!%p222_p8), 96, %s2556_s14 }
  0x1a   : > { %225 = sbr.rel (%p222_p8) target bundleno = 461 (0x1cd), region = 51  ;;  %p1964_p10 = scmp.ne.s32.totalorder (!%p222_p8), %s2556_s14, 0 }
  0x1b   : > { %s2187_s30 = smul.u32 (!%p222_p8), 48, %s228_s28  ;;  %p274_p9 = scmp.lt.s32.totalorder (!%p222_p8), %s272_s29, 575 }
  0x1d   : > { %s2639_s8 = scalar_lea.vmem (!%p222_p8), [#allocation3], %s2187_s30 }
  0x21   : > { %s2894_s29 = smov (!%p274_p9, %s272_s29), 575  ;;  %304 = sbr.rel (%p1964_p10) target bundleno = 40 (0x28), region = 59 }
  0x22   : > { %s2169_s4 = sshll.u32 %s2894_s29, 4  ;;  %v2566_v6 = vmov (!%p1964_p10), 0.0  }
  0x23   : > { %s2637_s7 = scalar_lea.vmem %s2884_s1, %s2169_s4  ;;  %305 = vst [vmem:[#allocation2] sm:$0xff] (!%p1964_p10), %v2566_v6  ;;  %306 = vst [vmem:[#allocation2 + $0x8] sm:$0xff] (!%p1964_p10), %v2566_v6 }
  0x24   : > { %307 = vst [vmem:[#allocation2 + $0x10] sm:$0xff] (!%p1964_p10), %v2566_v6  ;;  %308 = vst [vmem:[#allocation2 + $0x18] sm:$0xff] (!%p1964_p10), %v2566_v6 }
  0x25   : > { %309 = vst [vmem:[#allocation2 + $0x20] sm:$0xff] (!%p1964_p10), %v2566_v6  ;;  %310 = vst [vmem:[#allocation2 + $0x28] sm:$0xff] (!%p1964_p10), %v2566_v6 }
  0x26   : > { %311 = vst [vmem:[#allocation2 + $0x30] sm:$0xff] (!%p1964_p10), %v2566_v6  ;;  %312 = vst [vmem:[#allocation2 + $0x38] sm:$0xff] (!%p1964_p10), %v2566_v6 }
  0x28 PF: > { %v2229_v7 = vld [vmem:[%s2637_s7 + $0x4] ss:$16 sps:$4 sm:$0xff]   ;;  %v2231_v8 = vld [vmem:[%s2637_s7 + $0xc] ss:$16 sps:$4 sm:$0xff]   ;;  %v2233_v9 = vld [vmem:[%s2637_s7] ss:$16 sps:$4 sm:$0xff]  }
  0x29   : > { %1509 = vmatprep.subr.bf16.mxu0 %v2229_v7  ;;  %v2234_v10 = vld [vmem:[%s2637_s7 + $0x8] ss:$16 sps:$4 sm:$0xff]   ;;  %1638 = vmatprep.subr.bf16.mxu1 %v2231_v8  ;;  %v2235_v11 = vld [vmem:[%s2637_s7 + $0x24] ss:$16 sps:$4 sm:$0xff]   ;;  %v2237_v12 = vld [vmem:[%s2637_s7 + $0x2c] ss:$16 sps:$4 sm:$0xff]  }
  0x2a   : > { %1510 = vmatpush1.bf16.msra.mxu0 %v2233_v9  ;;  %1639 = vmatpush1.bf16.msra.mxu1 %v2234_v10  ;;  %v2239_v13 = vld [vmem:[%s2637_s7 + $0x20] ss:$16 sps:$4 sm:$0xff]   ;;  %v2240_v14 = vld [vmem:[%s2637_s7 + $0x28] ss:$16 sps:$4 sm:$0xff]   ;;  %v2241_v15 = vld [vmem:[%s2637_s7 + $0x44] ss:$16 sps:$4 sm:$0xff]  }
  0x2b   : > { %1511 = vmatprep.subr.bf16.mxu0 %v2235_v11  ;;  %1640 = vmatprep.subr.bf16.mxu1 %v2237_v12  ;;  %v2243_v16 = vld [vmem:[%s2637_s7 + $0x4c] ss:$16 sps:$4 sm:$0xff]   ;;  %v2245_v17 = vld [vmem:[%s2637_s7 + $0x40] ss:$16 sps:$4 sm:$0xff]   ;;  %v2246_v18 = vld [vmem:[%s2637_s7 + $0x48] ss:$16 sps:$4 sm:$0xff]  }
  0x2c   : > { %v2247_v19 = vld [vmem:[%s2637_s7 + $0x64] ss:$16 sps:$4 sm:$0xff]   ;;  %v2249_v20 = vld [vmem:[%s2637_s7 + $0x6c] ss:$16 sps:$4 sm:$0xff]   ;;  %v2251_v21 = vld [vmem:[%s2637_s7 + $0x60] ss:$16 sps:$4 sm:$0xff]  }
  0x2d   : > { %v2252_v22 = vld [vmem:[%s2637_s7 + $0x68] ss:$16 sps:$4 sm:$0xff]   ;;  %v2253_v23 = vld [vmem:[%s2637_s7 + $0x84] ss:$16 sps:$4 sm:$0xff]   ;;  %v2255_v24 = vld [vmem:[%s2637_s7 + $0x8c] ss:$16 sps:$4 sm:$0xff]  }
  0x2e   : > { %1512 = vmatpush1.bf16.msra.mxu0 %v2239_v13  ;;  %1641 = vmatpush1.bf16.msra.mxu1 %v2240_v14  ;;  %v2257_v25 = vld [vmem:[%s2637_s7 + $0x80] ss:$16 sps:$4 sm:$0xff]   ;;  %v2258_v26 = vld [vmem:[%s2637_s7 + $0x88] ss:$16 sps:$4 sm:$0xff]   ;;  %v2259_v27 = vld [vmem:[%s2637_s7 + $0xa4] ss:$16 sps:$4 sm:$0xff]  }
  0x2f   : > { %1513 = vmatprep.subr.bf16.mxu0 %v2241_v15  ;;  %1642 = vmatprep.subr.bf16.mxu1 %v2243_v16  ;;  %v2261_v28 = vld [vmem:[%s2637_s7 + $0xac] ss:$16 sps:$4 sm:$0xff]   ;;  %v2263_v29 = vld [vmem:[%s2637_s7 + $0xa0] ss:$16 sps:$4 sm:$0xff]   ;;  %v2264_v30 = vld [vmem:[%s2637_s7 + $0xa8] ss:$16 sps:$4 sm:$0xff]  }
  0x30   : > { %v2265_v31 = vld [vmem:[%s2637_s7 + $0xc4] ss:$16 sps:$4 sm:$0xff]   ;;  %v2267_v32 = vld [vmem:[%s2637_s7 + $0xcc] ss:$16 sps:$4 sm:$0xff]   ;;  %v2269_v33 = vld [vmem:[%s2637_s7 + $0xc0] ss:$16 sps:$4 sm:$0xff]  }
  0x31   : > { %v2270_v34 = vld [vmem:[%s2637_s7 + $0xc8] ss:$16 sps:$4 sm:$0xff]   ;;  %v2271_v35 = vld [vmem:[%s2637_s7 + $0xe4] ss:$16 sps:$4 sm:$0xff]   ;;  %v2273_v36 = vld [vmem:[%s2637_s7 + $0xec] ss:$16 sps:$4 sm:$0xff]  }
  0x32   : > { %1514 = vmatpush1.bf16.msra.mxu0 %v2245_v17  ;;  %1643 = vmatpush1.bf16.msra.mxu1 %v2246_v18  ;;  %v2275_v37 = vld [vmem:[%s2637_s7 + $0xe0] ss:$16 sps:$4 sm:$0xff]   ;;  %v2276_v38 = vld [vmem:[%s2637_s7 + $0xe8] ss:$16 sps:$4 sm:$0xff]   ;;  %v2277_v39 = vld [vmem:[%s2637_s7 + $0x104] ss:$16 sps:$4 sm:$0xff]  }
  0x33   : > { %1515 = vmatprep.subr.bf16.mxu0 %v2247_v19  ;;  %1644 = vmatprep.subr.bf16.mxu1 %v2249_v20  ;;  %v2279_v40 = vld [vmem:[%s2637_s7 + $0x10c] ss:$16 sps:$4 sm:$0xff]   ;;  %v2281_v41 = vld [vmem:[%s2637_s7 + $0x100] ss:$16 sps:$4 sm:$0xff]   ;;  %v2282_v42 = vld [vmem:[%s2637_s7 + $0x108] ss:$16 sps:$4 sm:$0xff]  }
  0x34   : > { %v2283_v43 = vld [vmem:[%s2637_s7 + $0x124] ss:$16 sps:$4 sm:$0xff]   ;;  %v2285_v44 = vld [vmem:[%s2637_s7 + $0x12c] ss:$16 sps:$4 sm:$0xff]   ;;  %v2287_v45 = vld [vmem:[%s2637_s7 + $0x120] ss:$16 sps:$4 sm:$0xff]  }
  0x35   : > { %v2288_v46 = vld [vmem:[%s2637_s7 + $0x128] ss:$16 sps:$4 sm:$0xff]   ;;  %v2289_v47 = vld [vmem:[%s2637_s7 + $0x144] ss:$16 sps:$4 sm:$0xff]   ;;  %v2291_v48 = vld [vmem:[%s2637_s7 + $0x14c] ss:$16 sps:$4 sm:$0xff]  }
  0x36   : > { %1516 = vmatpush1.bf16.msra.mxu0 %v2251_v21  ;;  %1645 = vmatpush1.bf16.msra.mxu1 %v2252_v22  ;;  %v2293_v49 = vld [vmem:[%s2637_s7 + $0x140] ss:$16 sps:$4 sm:$0xff]   ;;  %v2294_v50 = vld [vmem:[%s2637_s7 + $0x148] ss:$16 sps:$4 sm:$0xff]   ;;  %v2295_v51 = vld [vmem:[%s2637_s7 + $0x164] ss:$16 sps:$4 sm:$0xff]  }
  0x37   : > { %1517 = vmatprep.subr.bf16.mxu0 %v2253_v23  ;;  %1646 = vmatprep.subr.bf16.mxu1 %v2255_v24  ;;  %v2297_v52 = vld [vmem:[%s2637_s7 + $0x16c] ss:$16 sps:$4 sm:$0xff]   ;;  %v2299_v53 = vld [vmem:[%s2637_s7 + $0x160] ss:$16 sps:$4 sm:$0xff]   ;;  %v2300_v54 = vld [vmem:[%s2637_s7 + $0x168] ss:$16 sps:$4 sm:$0xff]  }
  0x38   : > { %v2327_v55 = vld [vmem:[%s2639_s8 + $0x4] ss:$24 sps:$4 sm:$0xff]   ;;  %v2305_v58 = vld [vmem:[%s2637_s7 + $0x180] ss:$16 sps:$4 sm:$0xff]   ;;  %v2306_v59 = vld [vmem:[%s2637_s7 + $0x188] ss:$16 sps:$4 sm:$0xff]  }
  0x39   : > { %v2301_v56 = vld [vmem:[%s2637_s7 + $0x184] ss:$16 sps:$4 sm:$0xff]   ;;  %v2303_v57 = vld [vmem:[%s2637_s7 + $0x18c] ss:$16 sps:$4 sm:$0xff]   ;;  %1541 = vmatprep.mubr.bf16.mxu0 %v2327_v55  ;;  %1670 = vmatprep.mubr.bf16.mxu1 %v2327_v55  ;;  %v2311_v62 = vld [vmem:[%s2637_s7 + $0x1a0] ss:$16 sps:$4 sm:$0xff]  }
  0x3a   : > { %1518 = vmatpush1.bf16.msra.mxu0 %v2257_v25  ;;  %1647 = vmatpush1.bf16.msra.mxu1 %v2258_v26  ;;  %v2307_v60 = vld [vmem:[%s2637_s7 + $0x1a4] ss:$16 sps:$4 sm:$0xff]   ;;  %v2309_v61 = vld [vmem:[%s2637_s7 + $0x1ac] ss:$16 sps:$4 sm:$0xff]   ;;  %v2312_v63 = vld [vmem:[%s2637_s7 + $0x1a8] ss:$16 sps:$4 sm:$0xff]  }
  0x3b   : > { %1519 = vmatprep.subr.bf16.mxu0 %v2259_v27  ;;  %1648 = vmatprep.subr.bf16.mxu1 %v2261_v28  ;;  %v2313_v0 = vld [vmem:[%s2637_s7 + $0x1c4] ss:$16 sps:$4 sm:$0xff]   ;;  %v2315_v1 = vld [vmem:[%s2637_s7 + $0x1cc] ss:$16 sps:$4 sm:$0xff]   ;;  %v2317_v2 = vld [vmem:[%s2637_s7 + $0x1c0] ss:$16 sps:$4 sm:$0xff]  }
  0x3c   : > { %v2318_v3 = vld [vmem:[%s2637_s7 + $0x1c8] ss:$16 sps:$4 sm:$0xff]   ;;  %v2319_v4 = vld [vmem:[%s2637_s7 + $0x1e4] ss:$16 sps:$4 sm:$0xff]   ;;  %v2321_v5 = vld [vmem:[%s2637_s7 + $0x1ec] ss:$16 sps:$4 sm:$0xff]  }
  0x3d   : > { %v2323_v6 = vld [vmem:[%s2637_s7 + $0x1e0] ss:$16 sps:$4 sm:$0xff]   ;;  %v2324_v7 = vld [vmem:[%s2637_s7 + $0x1e8] ss:$16 sps:$4 sm:$0xff]   ;;  %v2330_v8 = vld [vmem:[%s2637_s7 + $0x204] ss:$16 sps:$4 sm:$0xff]  }
  0x3e   : > { %1520 = vmatpush1.bf16.msra.mxu0 %v2263_v29  ;;  %1649 = vmatpush1.bf16.msra.mxu1 %v2264_v30  ;;  %v2333_v9 = vld [vmem:[%s2637_s7 + $0x20c] ss:$16 sps:$4 sm:$0xff]   ;;  %v2325_v10 = vld [vmem:[%s2639_s8] ss:$24 sps:$4 sm:$0xff]   ;;  %v2336_v13 = vld [vmem:[%s2637_s7 + $0x224] ss:$16 sps:$4 sm:$0xff]  }
  0x3f   : > { %1521 = vmatprep.subr.bf16.mxu0 %v2265_v31  ;;  %1650 = vmatprep.subr.bf16.mxu1 %v2267_v32  ;;  %v2328_v11 = vld [vmem:[%s2637_s7 + $0x200] ss:$16 sps:$4 sm:$0xff]   ;;  %v2331_v12 = vld [vmem:[%s2637_s7 + $0x208] ss:$16 sps:$4 sm:$0xff]   ;;  %v2339_v14 = vld [vmem:[%s2637_s7 + $0x22c] ss:$16 sps:$4 sm:$0xff]  }
  0x40   : > { %v2334_v15 = vld [vmem:[%s2637_s7 + $0x220] ss:$16 sps:$4 sm:$0xff]   ;;  %v2337_v16 = vld [vmem:[%s2637_s7 + $0x228] ss:$16 sps:$4 sm:$0xff]   ;;  %v2342_v17 = vld [vmem:[%s2637_s7 + $0x244] ss:$16 sps:$4 sm:$0xff]  }
  0x41   : > { %v2345_v18 = vld [vmem:[%s2637_s7 + $0x24c] ss:$16 sps:$4 sm:$0xff]   ;;  %v2340_v19 = vld [vmem:[%s2637_s7 + $0x240] ss:$16 sps:$4 sm:$0xff]   ;;  %v2343_v20 = vld [vmem:[%s2637_s7 + $0x248] ss:$16 sps:$4 sm:$0xff]  }
  0x42   : > { %1522 = vmatpush1.bf16.msra.mxu0 %v2269_v33  ;;  %1651 = vmatpush1.bf16.msra.mxu1 %v2270_v34  ;;  %v2348_v21 = vld [vmem:[%s2637_s7 + $0x264] ss:$16 sps:$4 sm:$0xff]   ;;  %v2351_v22 = vld [vmem:[%s2637_s7 + $0x26c] ss:$16 sps:$4 sm:$0xff]   ;;  %v2346_v23 = vld [vmem:[%s2637_s7 + $0x260] ss:$16 sps:$4 sm:$0xff]  }
  0x43   : > { %1523 = vmatprep.subr.bf16.mxu0 %v2271_v35  ;;  %1652 = vmatprep.subr.bf16.mxu1 %v2273_v36  ;;  %v2349_v24 = vld [vmem:[%s2637_s7 + $0x268] ss:$16 sps:$4 sm:$0xff]   ;;  %v2354_v25 = vld [vmem:[%s2637_s7 + $0x284] ss:$16 sps:$4 sm:$0xff]   ;;  %v2357_v26 = vld [vmem:[%s2637_s7 + $0x28c] ss:$16 sps:$4 sm:$0xff]  }
  0x44   : > { %v2352_v27 = vld [vmem:[%s2637_s7 + $0x280] ss:$16 sps:$4 sm:$0xff]   ;;  %v2355_v28 = vld [vmem:[%s2637_s7 + $0x288] ss:$16 sps:$4 sm:$0xff]   ;;  %v2360_v29 = vld [vmem:[%s2637_s7 + $0x2a4] ss:$16 sps:$4 sm:$0xff]  }
  0x45   : > { %v2363_v30 = vld [vmem:[%s2637_s7 + $0x2ac] ss:$16 sps:$4 sm:$0xff]   ;;  %v2358_v31 = vld [vmem:[%s2637_s7 + $0x2a0] ss:$16 sps:$4 sm:$0xff]   ;;  %v2361_v32 = vld [vmem:[%s2637_s7 + $0x2a8] ss:$16 sps:$4 sm:$0xff]  }
  0x46   : > { %1524 = vmatpush1.bf16.msra.mxu0 %v2275_v37  ;;  %1653 = vmatpush1.bf16.msra.mxu1 %v2276_v38  ;;  %v2366_v33 = vld [vmem:[%s2637_s7 + $0x2c4] ss:$16 sps:$4 sm:$0xff]   ;;  %v2369_v34 = vld [vmem:[%s2637_s7 + $0x2cc] ss:$16 sps:$4 sm:$0xff]   ;;  %v2364_v35 = vld [vmem:[%s2637_s7 + $0x2c0] ss:$16 sps:$4 sm:$0xff]  }
  0x47   : > { %1525 = vmatprep.subr.bf16.mxu0 %v2277_v39  ;;  %1654 = vmatprep.subr.bf16.mxu1 %v2279_v40  ;;  %v2367_v36 = vld [vmem:[%s2637_s7 + $0x2c8] ss:$16 sps:$4 sm:$0xff]   ;;  %v2426_v37 = vld [vmem:[%s2639_s8 + $0xc] ss:$24 sps:$4 sm:$0xff]   ;;  %v2370_v40 = vld [vmem:[%s2637_s7 + $0x2e0] ss:$16 sps:$4 sm:$0xff]  }
  0x48   : > { %v2372_v38 = vld [vmem:[%s2637_s7 + $0x2e4] ss:$16 sps:$4 sm:$0xff]   ;;  %v2375_v39 = vld [vmem:[%s2637_s7 + $0x2ec] ss:$16 sps:$4 sm:$0xff]   ;;  %p2163_p11 = scmp.ne.s32.totalorder %s2556_s14, 5 }
  0x49   : > { %v2399_v55 = vld [vmem:[%s2637_s7 + $0x36c] ss:$16 sps:$4 sm:$0xff]  }
  0x4a   : > { %1526 = vmatpush1.bf16.msra.mxu0 %v2281_v41  ;;  %1655 = vmatpush1.bf16.msra.mxu1 %v2282_v42  ;;  %v2373_v41 = vld [vmem:[%s2637_s7 + $0x2e8] ss:$16 sps:$4 sm:$0xff]   ;;  %v2378_v42 = vld [vmem:[%s2637_s7 + $0x304] ss:$16 sps:$4 sm:$0xff]  }
  0x4b   : > { %1527 = vmatprep.subr.bf16.mxu0 %v2283_v43  ;;  %1656 = vmatprep.subr.bf16.mxu1 %v2285_v44  ;;  %v2381_v43 = vld [vmem:[%s2637_s7 + $0x30c] ss:$16 sps:$4 sm:$0xff]   ;;  %v2376_v44 = vld [vmem:[%s2637_s7 + $0x300] ss:$16 sps:$4 sm:$0xff]  }
  0x4e   : > { %1528 = vmatpush1.bf16.msra.mxu0 %v2287_v45  ;;  %1657 = vmatpush1.bf16.msra.mxu1 %v2288_v46  ;;  %v2379_v45 = vld [vmem:[%s2637_s7 + $0x308] ss:$16 sps:$4 sm:$0xff]   ;;  %v2384_v46 = vld [vmem:[%s2637_s7 + $0x324] ss:$16 sps:$4 sm:$0xff]  }
  0x4f   : > { %1529 = vmatprep.subr.bf16.mxu0 %v2289_v47  ;;  %1658 = vmatprep.subr.bf16.mxu1 %v2291_v48  ;;  %v2387_v47 = vld [vmem:[%s2637_s7 + $0x32c] ss:$16 sps:$4 sm:$0xff]   ;;  %v2382_v48 = vld [vmem:[%s2637_s7 + $0x320] ss:$16 sps:$4 sm:$0xff]  }
  0x52   : > { %1530 = vmatpush1.bf16.msra.mxu0 %v2293_v49  ;;  %1659 = vmatpush1.bf16.msra.mxu1 %v2294_v50  ;;  %v2385_v49 = vld [vmem:[%s2637_s7 + $0x328] ss:$16 sps:$4 sm:$0xff]   ;;  %v2390_v50 = vld [vmem:[%s2637_s7 + $0x344] ss:$16 sps:$4 sm:$0xff]  }
  0x53   : > { %1531 = vmatprep.subr.bf16.mxu0 %v2295_v51  ;;  %1660 = vmatprep.subr.bf16.mxu1 %v2297_v52  ;;  %v2393_v51 = vld [vmem:[%s2637_s7 + $0x34c] ss:$16 sps:$4 sm:$0xff]   ;;  %v2388_v52 = vld [vmem:[%s2637_s7 + $0x340] ss:$16 sps:$4 sm:$0xff]  }
  0x56   : > { %1532 = vmatpush1.bf16.msra.mxu0 %v2299_v53  ;;  %1661 = vmatpush1.bf16.msra.mxu1 %v2300_v54  ;;  %v2391_v53 = vld [vmem:[%s2637_s7 + $0x348] ss:$16 sps:$4 sm:$0xff]   ;;  %v2396_v54 = vld [vmem:[%s2637_s7 + $0x364] ss:$16 sps:$4 sm:$0xff]  }
  0x57   : > { %1533 = vmatprep.subr.bf16.mxu0 %v2301_v56  ;;  %1662 = vmatprep.subr.bf16.mxu1 %v2303_v57  ;;  %v2394_v56 = vld [vmem:[%s2637_s7 + $0x360] ss:$16 sps:$4 sm:$0xff]   ;;  %v2397_v57 = vld [vmem:[%s2637_s7 + $0x368] ss:$16 sps:$4 sm:$0xff]  }
  0x5a   : > { %1534 = vmatpush1.bf16.msra.mxu0 %v2305_v58  ;;  %1663 = vmatpush1.bf16.msra.mxu1 %v2306_v59  ;;  %v2402_v58 = vld [vmem:[%s2637_s7 + $0x384] ss:$16 sps:$4 sm:$0xff]   ;;  %v2405_v59 = vld [vmem:[%s2637_s7 + $0x38c] ss:$16 sps:$4 sm:$0xff]  }
  0x5b   : > { %1535 = vmatprep.subr.bf16.mxu0 %v2307_v60  ;;  %1664 = vmatprep.subr.bf16.mxu1 %v2309_v61  ;;  %v2400_v60 = vld [vmem:[%s2637_s7 + $0x380] ss:$16 sps:$4 sm:$0xff]   ;;  %v2403_v61 = vld [vmem:[%s2637_s7 + $0x388] ss:$16 sps:$4 sm:$0xff]  }
  0x5e   : > { %1536 = vmatpush1.bf16.msra.mxu0 %v2311_v62  ;;  %1665 = vmatpush1.bf16.msra.mxu1 %v2312_v63  ;;  %v2408_v62 = vld [vmem:[%s2637_s7 + $0x3a4] ss:$16 sps:$4 sm:$0xff]   ;;  %v2411_v63 = vld [vmem:[%s2637_s7 + $0x3ac] ss:$16 sps:$4 sm:$0xff]  }
  0x5f   : > { %1537 = vmatprep.subr.bf16.mxu0 %v2313_v0  ;;  %1666 = vmatprep.subr.bf16.mxu1 %v2315_v1  ;;  %v2406_v0 = vld [vmem:[%s2637_s7 + $0x3a0] ss:$16 sps:$4 sm:$0xff]   ;;  %v2409_v1 = vld [vmem:[%s2637_s7 + $0x3a8] ss:$16 sps:$4 sm:$0xff]  }
  0x62   : > { %1538 = vmatpush1.bf16.msra.mxu0 %v2317_v2  ;;  %1667 = vmatpush1.bf16.msra.mxu1 %v2318_v3  ;;  %v2414_v2 = vld [vmem:[%s2637_s7 + $0x3c4] ss:$16 sps:$4 sm:$0xff]   ;;  %v2417_v3 = vld [vmem:[%s2637_s7 + $0x3cc] ss:$16 sps:$4 sm:$0xff]  }
  0x63   : > { %1539 = vmatprep.subr.bf16.mxu0 %v2319_v4  ;;  %1668 = vmatprep.subr.bf16.mxu1 %v2321_v5  ;;  %v2412_v4 = vld [vmem:[%s2637_s7 + $0x3c0] ss:$16 sps:$4 sm:$0xff]   ;;  %v2415_v5 = vld [vmem:[%s2637_s7 + $0x3c8] ss:$16 sps:$4 sm:$0xff]  }
  0x66   : > { %1540 = vmatpush1.bf16.msra.mxu0 %v2323_v6  ;;  %1669 = vmatpush1.bf16.msra.mxu1 %v2324_v7  ;;  %v2420_v6 = vld [vmem:[%s2637_s7 + $0x3e4] ss:$16 sps:$4 sm:$0xff]   ;;  %v2423_v7 = vld [vmem:[%s2637_s7 + $0x3ec] ss:$16 sps:$4 sm:$0xff]  }
  0x67   : > { %1552 = vmatprep.subr.bf16.mxu0 %v2330_v8  ;;  %1681 = vmatprep.subr.bf16.mxu1 %v2333_v9  ;;  %v2418_v8 = vld [vmem:[%s2637_s7 + $0x3e0] ss:$16 sps:$4 sm:$0xff]   ;;  %v2421_v9 = vld [vmem:[%s2637_s7 + $0x3e8] ss:$16 sps:$4 sm:$0xff]  }
  0x69   : > { %1542 = vmatmul.mubr.bf16.vlgmr.msra.gmra.mrb[0].mxu0 %v2325_v10  ;;  %1671 = vmatmul.mubr.bf16.vlgmr.msra.gmra.mrb[0].mxu1 %v2325_v10  ;;  %v2429_v10 = vld [vmem:[%s2637_s7 + $0x404] ss:$16 sps:$4 sm:$0xff]  }
  0x6a   : > { %1553 = vmatpush1.bf16.msra.mxu0 %v2328_v11  ;;  %1682 = vmatpush1.bf16.msra.mxu1 %v2331_v12  ;;  %v2432_v11 = vld [vmem:[%s2637_s7 + $0x40c] ss:$16 sps:$4 sm:$0xff]   ;;  %v2424_v12 = vld [vmem:[%s2639_s8 + $0x8] ss:$24 sps:$4 sm:$0xff]  }
  0x6b   : > { %1554 = vmatprep.subr.bf16.mxu0 %v2336_v13  ;;  %1683 = vmatprep.subr.bf16.mxu1 %v2339_v14  ;;  %v2427_v13 = vld [vmem:[%s2637_s7 + $0x400] ss:$16 sps:$4 sm:$0xff]   ;;  %v2430_v14 = vld [vmem:[%s2637_s7 + $0x408] ss:$16 sps:$4 sm:$0xff]  }
  0x6c   : > { %1584 = vmatprep.mubr.bf16.mxu0 %v2426_v37  ;;  %1713 = vmatprep.mubr.bf16.mxu1 %v2426_v37  ;;  %v2468_v37 = vld [vmem:[%s2637_s7 + $0x4cc] ss:$16 sps:$4 sm:$0xff]  }
  0x6e   : > { %1555 = vmatpush1.bf16.msra.mxu0 %v2334_v15  ;;  %1684 = vmatpush1.bf16.msra.mxu1 %v2337_v16  ;;  %v2435_v15 = vld [vmem:[%s2637_s7 + $0x424] ss:$16 sps:$4 sm:$0xff]   ;;  %v2438_v16 = vld [vmem:[%s2637_s7 + $0x42c] ss:$16 sps:$4 sm:$0xff]  }
  0x6f   : > { %1556 = vmatprep.subr.bf16.mxu0 %v2342_v17  ;;  %1685 = vmatprep.subr.bf16.mxu1 %v2345_v18  ;;  %v2525_v17 = vld [vmem:[%s2639_s8 + $0x14] ss:$24 sps:$4 sm:$0xff]   ;;  %v2433_v18 = vld [vmem:[%s2637_s7 + $0x420] ss:$16 sps:$4 sm:$0xff]  }
  0x72   : > { %1557 = vmatpush1.bf16.msra.mxu0 %v2340_v19  ;;  %1686 = vmatpush1.bf16.msra.mxu1 %v2343_v20  ;;  %v2436_v19 = vld [vmem:[%s2637_s7 + $0x428] ss:$16 sps:$4 sm:$0xff]   ;;  %v2441_v20 = vld [vmem:[%s2637_s7 + $0x444] ss:$16 sps:$4 sm:$0xff]  }
  0x73   : > { %1558 = vmatprep.subr.bf16.mxu0 %v2348_v21  ;;  %1687 = vmatprep.subr.bf16.mxu1 %v2351_v22  ;;  %v2444_v21 = vld [vmem:[%s2637_s7 + $0x44c] ss:$16 sps:$4 sm:$0xff]   ;;  %v2439_v22 = vld [vmem:[%s2637_s7 + $0x440] ss:$16 sps:$4 sm:$0xff]  }
  0x76   : > { %1559 = vmatpush1.bf16.msra.mxu0 %v2346_v23  ;;  %1688 = vmatpush1.bf16.msra.mxu1 %v2349_v24  ;;  %v2442_v23 = vld [vmem:[%s2637_s7 + $0x448] ss:$16 sps:$4 sm:$0xff]   ;;  %v2447_v24 = vld [vmem:[%s2637_s7 + $0x464] ss:$16 sps:$4 sm:$0xff]  }
  0x77   : > { %1560 = vmatprep.subr.bf16.mxu0 %v2354_v25  ;;  %1689 = vmatprep.subr.bf16.mxu1 %v2357_v26  ;;  %v2450_v25 = vld [vmem:[%s2637_s7 + $0x46c] ss:$16 sps:$4 sm:$0xff]   ;;  %v2445_v26 = vld [vmem:[%s2637_s7 + $0x460] ss:$16 sps:$4 sm:$0xff]  }
  0x7a   : > { %1561 = vmatpush1.bf16.msra.mxu0 %v2352_v27  ;;  %1690 = vmatpush1.bf16.msra.mxu1 %v2355_v28  ;;  %v2448_v27 = vld [vmem:[%s2637_s7 + $0x468] ss:$16 sps:$4 sm:$0xff]   ;;  %v2453_v28 = vld [vmem:[%s2637_s7 + $0x484] ss:$16 sps:$4 sm:$0xff]  }
  0x7b   : > { %1562 = vmatprep.subr.bf16.mxu0 %v2360_v29  ;;  %1691 = vmatprep.subr.bf16.mxu1 %v2363_v30  ;;  %v2456_v29 = vld [vmem:[%s2637_s7 + $0x48c] ss:$16 sps:$4 sm:$0xff]   ;;  %v2451_v30 = vld [vmem:[%s2637_s7 + $0x480] ss:$16 sps:$4 sm:$0xff]  }
  0x7e   : > { %1563 = vmatpush1.bf16.msra.mxu0 %v2358_v31  ;;  %1692 = vmatpush1.bf16.msra.mxu1 %v2361_v32  ;;  %v2454_v31 = vld [vmem:[%s2637_s7 + $0x488] ss:$16 sps:$4 sm:$0xff]   ;;  %v2459_v32 = vld [vmem:[%s2637_s7 + $0x4a4] ss:$16 sps:$4 sm:$0xff]  }
  0x7f   : > { %1564 = vmatprep.subr.bf16.mxu0 %v2366_v33  ;;  %1693 = vmatprep.subr.bf16.mxu1 %v2369_v34  ;;  %v2462_v33 = vld [vmem:[%s2637_s7 + $0x4ac] ss:$16 sps:$4 sm:$0xff]   ;;  %v2457_v34 = vld [vmem:[%s2637_s7 + $0x4a0] ss:$16 sps:$4 sm:$0xff]  }
  0x82   : > { %1565 = vmatpush1.bf16.msra.mxu0 %v2364_v35  ;;  %1694 = vmatpush1.bf16.msra.mxu1 %v2367_v36  ;;  %v2460_v35 = vld [vmem:[%s2637_s7 + $0x4a8] ss:$16 sps:$4 sm:$0xff]   ;;  %v2465_v36 = vld [vmem:[%s2637_s7 + $0x4c4] ss:$16 sps:$4 sm:$0xff]  }
  0x83   : > { %1566 = vmatprep.subr.bf16.mxu0 %v2372_v38  ;;  %1695 = vmatprep.subr.bf16.mxu1 %v2375_v39  ;;  %v2463_v38 = vld [vmem:[%s2637_s7 + $0x4c0] ss:$16 sps:$4 sm:$0xff]   ;;  %v2466_v39 = vld [vmem:[%s2637_s7 + $0x4c8] ss:$16 sps:$4 sm:$0xff]  }
  0x86   : > { %1567 = vmatpush1.bf16.msra.mxu0 %v2370_v40  ;;  %1696 = vmatpush1.bf16.msra.mxu1 %v2373_v41  ;;  %v2471_v40 = vld [vmem:[%s2637_s7 + $0x4e4] ss:$16 sps:$4 sm:$0xff]   ;;  %v2474_v41 = vld [vmem:[%s2637_s7 + $0x4ec] ss:$16 sps:$4 sm:$0xff]  }
  0x87   : > { %1568 = vmatprep.subr.bf16.mxu0 %v2378_v42  ;;  %1697 = vmatprep.subr.bf16.mxu1 %v2381_v43  ;;  %v2469_v42 = vld [vmem:[%s2637_s7 + $0x4e0] ss:$16 sps:$4 sm:$0xff]   ;;  %v2472_v43 = vld [vmem:[%s2637_s7 + $0x4e8] ss:$16 sps:$4 sm:$0xff]  }
  0x8a   : > { %1569 = vmatpush1.bf16.msra.mxu0 %v2376_v44  ;;  %1698 = vmatpush1.bf16.msra.mxu1 %v2379_v45  ;;  %v2477_v44 = vld [vmem:[%s2637_s7 + $0x504] ss:$16 sps:$4 sm:$0xff]   ;;  %v2480_v45 = vld [vmem:[%s2637_s7 + $0x50c] ss:$16 sps:$4 sm:$0xff]  }
  0x8b   : > { %1570 = vmatprep.subr.bf16.mxu0 %v2384_v46  ;;  %1699 = vmatprep.subr.bf16.mxu1 %v2387_v47  ;;  %v2475_v46 = vld [vmem:[%s2637_s7 + $0x500] ss:$16 sps:$4 sm:$0xff]   ;;  %v2478_v47 = vld [vmem:[%s2637_s7 + $0x508] ss:$16 sps:$4 sm:$0xff]  }
  0x8e   : > { %1571 = vmatpush1.bf16.msra.mxu0 %v2382_v48  ;;  %1700 = vmatpush1.bf16.msra.mxu1 %v2385_v49  ;;  %v2483_v48 = vld [vmem:[%s2637_s7 + $0x524] ss:$16 sps:$4 sm:$0xff]   ;;  %v2486_v49 = vld [vmem:[%s2637_s7 + $0x52c] ss:$16 sps:$4 sm:$0xff]  }
  0x8f   : > { %1572 = vmatprep.subr.bf16.mxu0 %v2390_v50  ;;  %1701 = vmatprep.subr.bf16.mxu1 %v2393_v51  ;;  %v2481_v50 = vld [vmem:[%s2637_s7 + $0x520] ss:$16 sps:$4 sm:$0xff]   ;;  %v2484_v51 = vld [vmem:[%s2637_s7 + $0x528] ss:$16 sps:$4 sm:$0xff]  }
  0x92   : > { %1573 = vmatpush1.bf16.msra.mxu0 %v2388_v52  ;;  %1702 = vmatpush1.bf16.msra.mxu1 %v2391_v53  ;;  %v2489_v52 = vld [vmem:[%s2637_s7 + $0x544] ss:$16 sps:$4 sm:$0xff]   ;;  %v2492_v53 = vld [vmem:[%s2637_s7 + $0x54c] ss:$16 sps:$4 sm:$0xff]  }
  0x93   : > { %1574 = vmatprep.subr.bf16.mxu0 %v2396_v54  ;;  %1703 = vmatprep.subr.bf16.mxu1 %v2399_v55  ;;  %v2487_v54 = vld [vmem:[%s2637_s7 + $0x540] ss:$16 sps:$4 sm:$0xff]   ;;  %v2490_v55 = vld [vmem:[%s2637_s7 + $0x548] ss:$16 sps:$4 sm:$0xff]  }
  0x96   : > { %1575 = vmatpush1.bf16.msra.mxu0 %v2394_v56  ;;  %1704 = vmatpush1.bf16.msra.mxu1 %v2397_v57  ;;  %v2495_v56 = vld [vmem:[%s2637_s7 + $0x564] ss:$16 sps:$4 sm:$0xff]   ;;  %v2498_v57 = vld [vmem:[%s2637_s7 + $0x56c] ss:$16 sps:$4 sm:$0xff]  }
  0x97   : > { %1576 = vmatprep.subr.bf16.mxu0 %v2402_v58  ;;  %1705 = vmatprep.subr.bf16.mxu1 %v2405_v59  ;;  %v2493_v58 = vld [vmem:[%s2637_s7 + $0x560] ss:$16 sps:$4 sm:$0xff]   ;;  %v2496_v59 = vld [vmem:[%s2637_s7 + $0x568] ss:$16 sps:$4 sm:$0xff]  }
  0x9a   : > { %1577 = vmatpush1.bf16.msra.mxu0 %v2400_v60  ;;  %1706 = vmatpush1.bf16.msra.mxu1 %v2403_v61  ;;  %v2501_v60 = vld [vmem:[%s2637_s7 + $0x584] ss:$16 sps:$4 sm:$0xff]   ;;  %v2504_v61 = vld [vmem:[%s2637_s7 + $0x58c] ss:$16 sps:$4 sm:$0xff]  }
  0x9b   : > { %1578 = vmatprep.subr.bf16.mxu0 %v2408_v62  ;;  %1707 = vmatprep.subr.bf16.mxu1 %v2411_v63  ;;  %v2499_v62 = vld [vmem:[%s2637_s7 + $0x580] ss:$16 sps:$4 sm:$0xff]   ;;  %v2502_v63 = vld [vmem:[%s2637_s7 + $0x588] ss:$16 sps:$4 sm:$0xff]  }
  0x9e   : > { %1579 = vmatpush1.bf16.msra.mxu0 %v2406_v0  ;;  %1708 = vmatpush1.bf16.msra.mxu1 %v2409_v1  ;;  %v2507_v0 = vld [vmem:[%s2637_s7 + $0x5a4] ss:$16 sps:$4 sm:$0xff]   ;;  %v2510_v1 = vld [vmem:[%s2637_s7 + $0x5ac] ss:$16 sps:$4 sm:$0xff]  }
  0x9f   : > { %1580 = vmatprep.subr.bf16.mxu0 %v2414_v2  ;;  %1709 = vmatprep.subr.bf16.mxu1 %v2417_v3  ;;  %v2505_v2 = vld [vmem:[%s2637_s7 + $0x5a0] ss:$16 sps:$4 sm:$0xff]   ;;  %v2508_v3 = vld [vmem:[%s2637_s7 + $0x5a8] ss:$16 sps:$4 sm:$0xff]  }
  0xa2   : > { %1581 = vmatpush1.bf16.msra.mxu0 %v2412_v4  ;;  %1710 = vmatpush1.bf16.msra.mxu1 %v2415_v5  ;;  %v2513_v4 = vld [vmem:[%s2637_s7 + $0x5c4] ss:$16 sps:$4 sm:$0xff]   ;;  %v2516_v5 = vld [vmem:[%s2637_s7 + $0x5cc] ss:$16 sps:$4 sm:$0xff]  }
  0xa3   : > { %1582 = vmatprep.subr.bf16.mxu0 %v2420_v6  ;;  %1711 = vmatprep.subr.bf16.mxu1 %v2423_v7  ;;  %v2511_v6 = vld [vmem:[%s2637_s7 + $0x5c0] ss:$16 sps:$4 sm:$0xff]   ;;  %v2514_v7 = vld [vmem:[%s2637_s7 + $0x5c8] ss:$16 sps:$4 sm:$0xff]  }
  0xa6   : > { %1583 = vmatpush1.bf16.msra.mxu0 %v2418_v8  ;;  %1712 = vmatpush1.bf16.msra.mxu1 %v2421_v9  ;;  %v2519_v8 = vld [vmem:[%s2637_s7 + $0x5e4] ss:$16 sps:$4 sm:$0xff]   ;;  %v2522_v9 = vld [vmem:[%s2637_s7 + $0x5ec] ss:$16 sps:$4 sm:$0xff]  }
  0xa7   : > { %1595 = vmatprep.subr.bf16.mxu0 %v2429_v10  ;;  %1724 = vmatprep.subr.bf16.mxu1 %v2432_v11  ;;  %v2517_v10 = vld [vmem:[%s2637_s7 + $0x5e0] ss:$16 sps:$4 sm:$0xff]   ;;  %v2520_v11 = vld [vmem:[%s2637_s7 + $0x5e8] ss:$16 sps:$4 sm:$0xff]  }
  0xa9   : > { %1585 = vmatmul.mubr.bf16.vlgmr.msra.gmra.mrb[0].mxu0 %v2424_v12  ;;  %1714 = vmatmul.mubr.bf16.vlgmr.msra.gmra.mrb[0].mxu1 %v2424_v12  ;;  %v2523_v12 = vld [vmem:[%s2639_s8 + $0x10] ss:$24 sps:$4 sm:$0xff]  }
  0xaa   : > { %1596 = vmatpush1.bf16.msra.mxu0 %v2427_v13  ;;  %1725 = vmatpush1.bf16.msra.mxu1 %v2430_v14  ;;  %v313_v13 = vld [vmem:[#allocation2] sm:$0xff]  ;;  %v315_v14 = vld [vmem:[#allocation2 + $0x10] sm:$0xff] }
  0xab   : > { %1597 = vmatprep.subr.bf16.mxu0 %v2435_v15  ;;  %1726 = vmatprep.subr.bf16.mxu1 %v2438_v16  ;;  %v314_v15 = vld [vmem:[#allocation2 + $0x8] sm:$0xff]  ;;  %v316_v16 = vld [vmem:[#allocation2 + $0x18] sm:$0xff] }
  0xac   : > { %1627 = vmatprep.mubr.bf16.mxu0 %v2525_v17  ;;  %1756 = vmatprep.mubr.bf16.mxu1 %v2525_v17 }
  0xae   : > { %1598 = vmatpush1.bf16.msra.mxu0 %v2433_v18  ;;  %1727 = vmatpush1.bf16.msra.mxu1 %v2436_v19  ;;  %v317_v19 = vld [vmem:[#allocation2 + $0x20] sm:$0xff] }
  0xaf   : > { %1599 = vmatprep.subr.bf16.mxu0 %v2441_v20  ;;  %1728 = vmatprep.subr.bf16.mxu1 %v2444_v21  ;;  %v319_v20 = vld [vmem:[#allocation2 + $0x30] sm:$0xff] }
  0xb2   : > { %1600 = vmatpush1.bf16.msra.mxu0 %v2439_v22  ;;  %1729 = vmatpush1.bf16.msra.mxu1 %v2442_v23 }
  0xb3   : > { %1601 = vmatprep.subr.bf16.mxu0 %v2447_v24  ;;  %1730 = vmatprep.subr.bf16.mxu1 %v2450_v25  ;;  %v318_v25 = vld [vmem:[#allocation2 + $0x28] sm:$0xff] }
  0xb6   : > { %1602 = vmatpush1.bf16.msra.mxu0 %v2445_v26  ;;  %1731 = vmatpush1.bf16.msra.mxu1 %v2448_v27  ;;  %v320_v26 = vld [vmem:[#allocation2 + $0x38] sm:$0xff] }
  0xb7   : > { %1603 = vmatprep.subr.bf16.mxu0 %v2453_v28  ;;  %1732 = vmatprep.subr.bf16.mxu1 %v2456_v29 }
  0xba   : > { %1604 = vmatpush1.bf16.msra.mxu0 %v2451_v30  ;;  %1733 = vmatpush1.bf16.msra.mxu1 %v2454_v31 }
  0xbb   : > { %1605 = vmatprep.subr.bf16.mxu0 %v2459_v32  ;;  %1734 = vmatprep.subr.bf16.mxu1 %v2462_v33 }
  0xbe   : > { %1606 = vmatpush1.bf16.msra.mxu0 %v2457_v34  ;;  %1735 = vmatpush1.bf16.msra.mxu1 %v2460_v35 }
  0xbf   : > { %1607 = vmatprep.subr.bf16.mxu0 %v2465_v36  ;;  %1736 = vmatprep.subr.bf16.mxu1 %v2468_v37  ;;  %v1797_v37 = vlaneseq (!%p2163_p11) }
  0xc2   : > { %1608 = vmatpush1.bf16.msra.mxu0 %v2463_v38  ;;  %1737 = vmatpush1.bf16.msra.mxu1 %v2466_v39  ;;  %v1798_v38 = vshrl.u32 (!%p2163_p11), %v1797_v37, 7  ;;  %v1795_v39 = vld [vmem:[%s2885_s2] sm:$0xf] (!%p2163_p11) }
  0xc3   : > { %1609 = vmatprep.subr.bf16.mxu0 %v2471_v40  ;;  %1738 = vmatprep.subr.bf16.mxu1 %v2474_v41 }
  0xc4   : > { %v1799_v41 = vsub.s32 (!%p2163_p11), 0, %v1798_v38 }
  0xc6   : > { %1610 = vmatpush1.bf16.msra.mxu0 %v2469_v42  ;;  %1739 = vmatpush1.bf16.msra.mxu1 %v2472_v43  ;;  %v1803_v43 = vsub.s32 (!%p2163_p11), 1, %v1798_v38 }
  0xc7   : > { %1611 = vmatprep.subr.bf16.mxu0 %v2477_v44  ;;  %1740 = vmatprep.subr.bf16.mxu1 %v2480_v45  ;;  %v1807_v44 = vsub.s32 (!%p2163_p11), 2, %v1798_v38  ;;  %v1811_v45 = vsub.s32 (!%p2163_p11), 3, %v1798_v38 }
  0xca   : > { %1612 = vmatpush1.bf16.msra.mxu0 %v2475_v46  ;;  %1741 = vmatpush1.bf16.msra.mxu1 %v2478_v47 }
  0xcb   : > { %1613 = vmatprep.subr.bf16.mxu0 %v2483_v48  ;;  %1742 = vmatprep.subr.bf16.mxu1 %v2486_v49  ;;  %v1800_v49 = vrot.slane (!%p2163_p11), %v1795_v39, %v1799_v41 }
  0xce   : > { %1614 = vmatpush1.bf16.msra.mxu0 %v2481_v50  ;;  %1743 = vmatpush1.bf16.msra.mxu1 %v2484_v51  ;;  %v1804_v50 = vrot.slane (!%p2163_p11), %v1795_v39, %v1803_v43  ;;  %v1808_v51 = vrot.slane (!%p2163_p11), %v1795_v39, %v1807_v44 }
  0xcf   : > { %1615 = vmatprep.subr.bf16.mxu0 %v2489_v52  ;;  %1744 = vmatprep.subr.bf16.mxu1 %v2492_v53  ;;  %v1812_v52 = vrot.slane (!%p2163_p11), %v1795_v39, %v1811_v45 }
  0xd2   : > { %1616 = vmatpush1.bf16.msra.mxu0 %v2487_v54  ;;  %1745 = vmatpush1.bf16.msra.mxu1 %v2490_v55 }
  0xd3   : > { %1617 = vmatprep.subr.bf16.mxu0 %v2495_v56  ;;  %1746 = vmatprep.subr.bf16.mxu1 %v2498_v57 }
  0xd6   : > { %1618 = vmatpush1.bf16.msra.mxu0 %v2493_v58  ;;  %1747 = vmatpush1.bf16.msra.mxu1 %v2496_v59 }
  0xd7   : > { %1619 = vmatprep.subr.bf16.mxu0 %v2501_v60  ;;  %1748 = vmatprep.subr.bf16.mxu1 %v2504_v61 }
  0xda   : > { %1620 = vmatpush1.bf16.msra.mxu0 %v2499_v62  ;;  %1749 = vmatpush1.bf16.msra.mxu1 %v2502_v63 }
  0xdb   : > { %1621 = vmatprep.subr.bf16.mxu0 %v2507_v0  ;;  %1750 = vmatprep.subr.bf16.mxu1 %v2510_v1 }
  0xde   : > { %1622 = vmatpush1.bf16.msra.mxu0 %v2505_v2  ;;  %1751 = vmatpush1.bf16.msra.mxu1 %v2508_v3 }
  0xdf   : > { %1623 = vmatprep.subr.bf16.mxu0 %v2513_v4  ;;  %1752 = vmatprep.subr.bf16.mxu1 %v2516_v5 }
  0xe2   : > { %1624 = vmatpush1.bf16.msra.mxu0 %v2511_v6  ;;  %1753 = vmatpush1.bf16.msra.mxu1 %v2514_v7 }
  0xe3   : > { %1625 = vmatprep.subr.bf16.mxu0 %v2519_v8  ;;  %1754 = vmatprep.subr.bf16.mxu1 %v2522_v9 }
  0xe6   : > { %1626 = vmatpush1.bf16.msra.mxu0 %v2517_v10  ;;  %1755 = vmatpush1.bf16.msra.mxu1 %v2520_v11 }
  0xe9   : > { %1628 = vmatmul.mubr.bf16.vlgmr.msra.gmra.mrb[0].mxu0 %v2523_v12  ;;  %1757 = vmatmul.mubr.bf16.vlgmr.msra.gmra.mrb[0].mxu1 %v2523_v12 }
 0x1bc   : > { %v1629_v17 = vpop.f32.mrb[0].mxu0  ;;  %v1758_v18 = vpop.f32.mrb[0].mxu1  ;;  %1786 = sbr.rel (%p2163_p11) target bundleno = 461 (0x1cd), region = 63 }
 0x1bd   : > { %v1767_v21 = vadd.f32 %v1629_v17, %v313_v13  ;;  %v1769_v22 = vadd.f32 %v1758_v18, %v315_v14  ;;  %v1631_v23 = vpop.f32.mrb[1].mxu0  ;;  %v1760_v24 = vpop.f32.mrb[1].mxu1 }
 0x1be   : > { %v1768_v27 = vadd.f32 %v1631_v23, %v314_v15  ;;  %v1770_v28 = vadd.f32 %v1760_v24, %v316_v16  ;;  %v1633_v29 = vpop.f32.mrb[2].mxu0  ;;  %v1762_v30 = vpop.f32.mrb[2].mxu1 }
 0x1bf   : > { %1775 = vst [vmem:[#allocation2] sm:$0xff] %v1767_v21  ;;  %1777 = vst [vmem:[#allocation2 + $0x10] sm:$0xff] %v1769_v22  ;;  %v1771_v31 = vadd.f32 %v1633_v29, %v317_v19  ;;  %v1773_v32 = vadd.f32 %v1762_v30, %v319_v20  ;;  %v1635_v33 = vpop.f32.mrb[3].mxu0  ;;  %v1764_v34 = vpop.f32.mrb[3].mxu1 }
 0x1c0   : > { %1776 = vst [vmem:[#allocation2 + $0x8] sm:$0xff] %v1768_v27  ;;  %1778 = vst [vmem:[#allocation2 + $0x18] sm:$0xff] %v1770_v28  ;;  %v1772_v35 = vadd.f32 %v1635_v33, %v318_v25  ;;  %v1774_v36 = vadd.f32 %v1764_v34, %v320_v26 }
 0x1c1   : > { %1779 = vst [vmem:[#allocation2 + $0x20] sm:$0xff] %v1771_v31  ;;  %1781 = vst [vmem:[#allocation2 + $0x30] sm:$0xff] %v1773_v32 }
 0x1c2   : > { %1780 = vst [vmem:[#allocation2 + $0x28] sm:$0xff] %v1772_v35  ;;  %1782 = vst [vmem:[#allocation2 + $0x38] sm:$0xff] %v1774_v36 }
 0x1c6   : > { %v1787_v40 = vld [vmem:[#allocation2] sm:$0xff]  ;;  %v1789_v46 = vld [vmem:[#allocation2 + $0x10] sm:$0xff] }
 0x1c7   : > { %v1788_v42 = vld [vmem:[#allocation2 + $0x8] sm:$0xff]  ;;  %v1790_v47 = vld [vmem:[#allocation2 + $0x18] sm:$0xff]  ;;  %v1817_v56 = vadd.f32 %v1800_v49, %v1787_v40  ;;  %v1819_v58 = vadd.f32 %v1808_v51, %v1789_v46 }
 0x1c8   : > { %v1791_v48 = vld [vmem:[#allocation2 + $0x20] sm:$0xff]  ;;  %v1793_v54 = vld [vmem:[#allocation2 + $0x30] sm:$0xff]  ;;  %v1818_v57 = vadd.f32 %v1804_v50, %v1788_v42  ;;  %v1820_v59 = vadd.f32 %v1812_v52, %v1790_v47 }
 0x1c9   : > { %v1792_v53 = vld [vmem:[#allocation2 + $0x28] sm:$0xff]  ;;  %v1794_v55 = vld [vmem:[#allocation2 + $0x38] sm:$0xff]  ;;  %v1821_v60 = vadd.f32 %v1800_v49, %v1791_v48  ;;  %v1823_v62 = vadd.f32 %v1808_v51, %v1793_v54  ;;  %1825 = vst [vmem:[%s2886_s3] sm:$0xff] %v1817_v56  ;;  %1827 = vst [vmem:[%s2886_s3 + $0x10] sm:$0xff] %v1819_v58 }
 0x1ca   : > { %v1822_v61 = vadd.f32 %v1804_v50, %v1792_v53  ;;  %v1824_v63 = vadd.f32 %v1812_v52, %v1794_v55  ;;  %1826 = vst [vmem:[%s2886_s3 + $0x8] sm:$0xff] %v1818_v57  ;;  %1828 = vst [vmem:[%s2886_s3 + $0x18] sm:$0xff] %v1820_v59 }
 0x1cb   : > { %1829 = vst [vmem:[%s2886_s3 + $0x20] sm:$0xff] %v1821_v60  ;;  %1831 = vst [vmem:[%s2886_s3 + $0x30] sm:$0xff] %v1823_v62 }
 0x1cc   : > { %1830 = vst [vmem:[%s2886_s3 + $0x28] sm:$0xff] %v1822_v61  ;;  %1832 = vst [vmem:[%s2886_s3 + $0x38] sm:$0xff] %v1824_v63 }
 0x1cd PF: > { %s13_s16 = sadd.s32 1, %s2564_s16   ;;  %s2887_s12 = smov %s2552_s13 }
 0x1ce   : > { %p10_p12 = scmp.ge.s32.totalorder %s13_s16, 8   ;;  %s2888_s13 = smov %s2622_s20 }
 0x1cf   : > { %s2889_s14 = smov %s2560_s15  ;;  %s2890_s15 = smov %s2892_s17 }
 0x1d0   :  { %12 = sbr.rel (!%p10_p12) target bundleno = 3 (0x3), region = 104 }

// kernel: _lambda_.113
= control target key start
LH: loop header
LB: loop body
LE: loop exit
PB: predicated region body
PF: predicated region fallthrough
CT: control target
= control target key end

     0   :  { %s995_s1 = inlined_call_operand.vmem [shape: bf16[256,512], index: 1, kind: input, shape index: {}]   ;;  %s996_s0 = inlined_call_operand.vmem [shape: bf16[16,256], index: 0, kind: input, shape index: {}]   ;;  %s997_s2 = inlined_call_operand.vmem [shape: f32[1,512], index: 2, kind: input, shape index: {}]   ;;  %s998_s3 = inlined_call_operand.vmem [shape: f32[16,512], index: 3, kind: output, shape index: {}]  }
   0x1   :  { %v651_v0 = vld [vmem:[%s995_s1 + $0x4] ss:$16 sps:$4 sm:$0xff]   ;;  %v653_v1 = vld [vmem:[%s995_s1 + $0xc] ss:$16 sps:$4 sm:$0xff]   ;;  %v655_v2 = vld [vmem:[%s995_s1] ss:$16 sps:$4 sm:$0xff]  }
   0x2   :  { %430 = vmatprep.subr.bf16.mxu0 %v651_v0  ;;  %v656_v3 = vld [vmem:[%s995_s1 + $0x8] ss:$16 sps:$4 sm:$0xff]   ;;  %473 = vmatprep.subr.bf16.mxu1 %v653_v1  ;;  %v657_v4 = vld [vmem:[%s995_s1 + $0x24] ss:$16 sps:$4 sm:$0xff]   ;;  %v659_v5 = vld [vmem:[%s995_s1 + $0x2c] ss:$16 sps:$4 sm:$0xff]  }
   0x3   :  { %431 = vmatpush1.bf16.msra.mxu0 %v655_v2  ;;  %474 = vmatpush1.bf16.msra.mxu1 %v656_v3  ;;  %v661_v6 = vld [vmem:[%s995_s1 + $0x20] ss:$16 sps:$4 sm:$0xff]   ;;  %v662_v7 = vld [vmem:[%s995_s1 + $0x28] ss:$16 sps:$4 sm:$0xff]   ;;  %v663_v8 = vld [vmem:[%s995_s1 + $0x44] ss:$16 sps:$4 sm:$0xff]   ;;  %v545_v2 = vlaneseq }
   0x4   :  { %432 = vmatprep.subr.bf16.mxu0 %v657_v4  ;;  %475 = vmatprep.subr.bf16.mxu1 %v659_v5  ;;  %v665_v9 = vld [vmem:[%s995_s1 + $0x4c] ss:$16 sps:$4 sm:$0xff]   ;;  %v667_v10 = vld [vmem:[%s995_s1 + $0x40] ss:$16 sps:$4 sm:$0xff]   ;;  %v668_v11 = vld [vmem:[%s995_s1 + $0x48] ss:$16 sps:$4 sm:$0xff]  }
   0x5   :  { %v669_v12 = vld [vmem:[%s995_s1 + $0x64] ss:$16 sps:$4 sm:$0xff]   ;;  %v671_v13 = vld [vmem:[%s995_s1 + $0x6c] ss:$16 sps:$4 sm:$0xff]   ;;  %v673_v14 = vld [vmem:[%s995_s1 + $0x60] ss:$16 sps:$4 sm:$0xff]  }
   0x6   :  { %v674_v15 = vld [vmem:[%s995_s1 + $0x68] ss:$16 sps:$4 sm:$0xff]   ;;  %v675_v16 = vld [vmem:[%s995_s1 + $0x84] ss:$16 sps:$4 sm:$0xff]   ;;  %v677_v17 = vld [vmem:[%s995_s1 + $0x8c] ss:$16 sps:$4 sm:$0xff]  }
   0x7   :  { %433 = vmatpush1.bf16.msra.mxu0 %v661_v6  ;;  %476 = vmatpush1.bf16.msra.mxu1 %v662_v7  ;;  %v679_v18 = vld [vmem:[%s995_s1 + $0x80] ss:$16 sps:$4 sm:$0xff]   ;;  %v680_v19 = vld [vmem:[%s995_s1 + $0x88] ss:$16 sps:$4 sm:$0xff]   ;;  %v681_v20 = vld [vmem:[%s995_s1 + $0xa4] ss:$16 sps:$4 sm:$0xff]  }
   0x8   :  { %434 = vmatprep.subr.bf16.mxu0 %v663_v8  ;;  %477 = vmatprep.subr.bf16.mxu1 %v665_v9  ;;  %v683_v21 = vld [vmem:[%s995_s1 + $0xac] ss:$16 sps:$4 sm:$0xff]   ;;  %v685_v22 = vld [vmem:[%s995_s1 + $0xa0] ss:$16 sps:$4 sm:$0xff]   ;;  %v686_v23 = vld [vmem:[%s995_s1 + $0xa8] ss:$16 sps:$4 sm:$0xff]  }
   0x9   :  { %v687_v24 = vld [vmem:[%s995_s1 + $0xc4] ss:$16 sps:$4 sm:$0xff]   ;;  %v689_v25 = vld [vmem:[%s995_s1 + $0xcc] ss:$16 sps:$4 sm:$0xff]   ;;  %v691_v26 = vld [vmem:[%s995_s1 + $0xc0] ss:$16 sps:$4 sm:$0xff]  }
   0xa   :  { %v692_v27 = vld [vmem:[%s995_s1 + $0xc8] ss:$16 sps:$4 sm:$0xff]   ;;  %v693_v28 = vld [vmem:[%s995_s1 + $0xe4] ss:$16 sps:$4 sm:$0xff]   ;;  %v695_v29 = vld [vmem:[%s995_s1 + $0xec] ss:$16 sps:$4 sm:$0xff]  }
   0xb   :  { %435 = vmatpush1.bf16.msra.mxu0 %v667_v10  ;;  %478 = vmatpush1.bf16.msra.mxu1 %v668_v11  ;;  %v697_v30 = vld [vmem:[%s995_s1 + $0xe0] ss:$16 sps:$4 sm:$0xff]   ;;  %v698_v31 = vld [vmem:[%s995_s1 + $0xe8] ss:$16 sps:$4 sm:$0xff]   ;;  %v699_v32 = vld [vmem:[%s995_s1 + $0x104] ss:$16 sps:$4 sm:$0xff]  }
   0xc   :  { %436 = vmatprep.subr.bf16.mxu0 %v669_v12  ;;  %479 = vmatprep.subr.bf16.mxu1 %v671_v13  ;;  %v701_v33 = vld [vmem:[%s995_s1 + $0x10c] ss:$16 sps:$4 sm:$0xff]   ;;  %v703_v34 = vld [vmem:[%s995_s1 + $0x100] ss:$16 sps:$4 sm:$0xff]   ;;  %v704_v35 = vld [vmem:[%s995_s1 + $0x108] ss:$16 sps:$4 sm:$0xff]  }
   0xd   :  { %v705_v36 = vld [vmem:[%s995_s1 + $0x124] ss:$16 sps:$4 sm:$0xff]   ;;  %v707_v37 = vld [vmem:[%s995_s1 + $0x12c] ss:$16 sps:$4 sm:$0xff]   ;;  %v709_v38 = vld [vmem:[%s995_s1 + $0x120] ss:$16 sps:$4 sm:$0xff]  }
   0xe   :  { %v710_v39 = vld [vmem:[%s995_s1 + $0x128] ss:$16 sps:$4 sm:$0xff]   ;;  %v711_v40 = vld [vmem:[%s995_s1 + $0x144] ss:$16 sps:$4 sm:$0xff]   ;;  %v713_v41 = vld [vmem:[%s995_s1 + $0x14c] ss:$16 sps:$4 sm:$0xff]  }
   0xf   :  { %437 = vmatpush1.bf16.msra.mxu0 %v673_v14  ;;  %480 = vmatpush1.bf16.msra.mxu1 %v674_v15  ;;  %v715_v42 = vld [vmem:[%s995_s1 + $0x140] ss:$16 sps:$4 sm:$0xff]   ;;  %v716_v43 = vld [vmem:[%s995_s1 + $0x148] ss:$16 sps:$4 sm:$0xff]   ;;  %v717_v44 = vld [vmem:[%s995_s1 + $0x164] ss:$16 sps:$4 sm:$0xff]  }
  0x10   :  { %438 = vmatprep.subr.bf16.mxu0 %v675_v16  ;;  %481 = vmatprep.subr.bf16.mxu1 %v677_v17  ;;  %v719_v45 = vld [vmem:[%s995_s1 + $0x16c] ss:$16 sps:$4 sm:$0xff]   ;;  %v721_v47 = vld [vmem:[%s995_s1 + $0x160] ss:$16 sps:$4 sm:$0xff]   ;;  %v722_v48 = vld [vmem:[%s995_s1 + $0x168] ss:$16 sps:$4 sm:$0xff]  }
  0x11   :  { %v749_v46 = vld [vmem:[%s996_s0 + $0x4] ss:$8 sps:$4 sm:$0xff]   ;;  %v727_v51 = vld [vmem:[%s995_s1 + $0x180] ss:$16 sps:$4 sm:$0xff]   ;;  %v728_v52 = vld [vmem:[%s995_s1 + $0x188] ss:$16 sps:$4 sm:$0xff]  }
  0x12   :  { %v723_v49 = vld [vmem:[%s995_s1 + $0x184] ss:$16 sps:$4 sm:$0xff]   ;;  %v725_v50 = vld [vmem:[%s995_s1 + $0x18c] ss:$16 sps:$4 sm:$0xff]   ;;  %462 = vmatprep.mubr.bf16.mxu0 %v749_v46  ;;  %505 = vmatprep.mubr.bf16.mxu1 %v749_v46  ;;  %v733_v55 = vld [vmem:[%s995_s1 + $0x1a0] ss:$16 sps:$4 sm:$0xff]  }
  0x13   :  { %439 = vmatpush1.bf16.msra.mxu0 %v679_v18  ;;  %482 = vmatpush1.bf16.msra.mxu1 %v680_v19  ;;  %v729_v53 = vld [vmem:[%s995_s1 + $0x1a4] ss:$16 sps:$4 sm:$0xff]   ;;  %v731_v54 = vld [vmem:[%s995_s1 + $0x1ac] ss:$16 sps:$4 sm:$0xff]   ;;  %v734_v56 = vld [vmem:[%s995_s1 + $0x1a8] ss:$16 sps:$4 sm:$0xff]  }
  0x14   :  { %440 = vmatprep.subr.bf16.mxu0 %v681_v20  ;;  %483 = vmatprep.subr.bf16.mxu1 %v683_v21  ;;  %v735_v57 = vld [vmem:[%s995_s1 + $0x1c4] ss:$16 sps:$4 sm:$0xff]   ;;  %v737_v58 = vld [vmem:[%s995_s1 + $0x1cc] ss:$16 sps:$4 sm:$0xff]   ;;  %v739_v59 = vld [vmem:[%s995_s1 + $0x1c0] ss:$16 sps:$4 sm:$0xff]  }
  0x15   :  { %v740_v60 = vld [vmem:[%s995_s1 + $0x1c8] ss:$16 sps:$4 sm:$0xff]   ;;  %v741_v61 = vld [vmem:[%s995_s1 + $0x1e4] ss:$16 sps:$4 sm:$0xff]   ;;  %v743_v62 = vld [vmem:[%s995_s1 + $0x1ec] ss:$16 sps:$4 sm:$0xff]  }
  0x16   :  { %v745_v63 = vld [vmem:[%s995_s1 + $0x1e0] ss:$16 sps:$4 sm:$0xff]   ;;  %v746_v0 = vld [vmem:[%s995_s1 + $0x1e8] ss:$16 sps:$4 sm:$0xff]   ;;  %v546_v3 = vshrl.u32 %v545_v2, 7 }
  0x17   :  { %441 = vmatpush1.bf16.msra.mxu0 %v685_v22  ;;  %484 = vmatpush1.bf16.msra.mxu1 %v686_v23  ;;  %v747_v1 = vld [vmem:[%s996_s0] ss:$8 sps:$4 sm:$0xff]  }
  0x18   :  { %442 = vmatprep.subr.bf16.mxu0 %v687_v24  ;;  %485 = vmatprep.subr.bf16.mxu1 %v689_v25  ;;  %v547_v4 = vsub.s32 0, %v546_v3  ;;  %v555_v5 = vsub.s32 2, %v546_v3  ;;  %v543_v6 = vld [vmem:[%s997_s2] sm:$0xf]  ;;  %v551_v7 = vsub.s32 1, %v546_v3  ;;  %v559_v8 = vsub.s32 3, %v546_v3 }
  0x1a   :  { %v548_v9 = vrot.slane %v543_v6, %v547_v4  ;;  %v556_v10 = vrot.slane %v543_v6, %v555_v5  ;;  %v552_v11 = vrot.slane %v543_v6, %v551_v7  ;;  %v560_v12 = vrot.slane %v543_v6, %v559_v8 }
  0x1b   :  { %443 = vmatpush1.bf16.msra.mxu0 %v691_v26  ;;  %486 = vmatpush1.bf16.msra.mxu1 %v692_v27 }
  0x1c   :  { %444 = vmatprep.subr.bf16.mxu0 %v693_v28  ;;  %487 = vmatprep.subr.bf16.mxu1 %v695_v29 }
  0x1f   :  { %445 = vmatpush1.bf16.msra.mxu0 %v697_v30  ;;  %488 = vmatpush1.bf16.msra.mxu1 %v698_v31 }
  0x20   :  { %446 = vmatprep.subr.bf16.mxu0 %v699_v32  ;;  %489 = vmatprep.subr.bf16.mxu1 %v701_v33 }
  0x23   :  { %447 = vmatpush1.bf16.msra.mxu0 %v703_v34  ;;  %490 = vmatpush1.bf16.msra.mxu1 %v704_v35 }
  0x24   :  { %448 = vmatprep.subr.bf16.mxu0 %v705_v36  ;;  %491 = vmatprep.subr.bf16.mxu1 %v707_v37 }
  0x27   :  { %449 = vmatpush1.bf16.msra.mxu0 %v709_v38  ;;  %492 = vmatpush1.bf16.msra.mxu1 %v710_v39 }
  0x28   :  { %450 = vmatprep.subr.bf16.mxu0 %v711_v40  ;;  %493 = vmatprep.subr.bf16.mxu1 %v713_v41 }
  0x2b   :  { %451 = vmatpush1.bf16.msra.mxu0 %v715_v42  ;;  %494 = vmatpush1.bf16.msra.mxu1 %v716_v43 }
  0x2c   :  { %452 = vmatprep.subr.bf16.mxu0 %v717_v44  ;;  %495 = vmatprep.subr.bf16.mxu1 %v719_v45 }
  0x2f   :  { %453 = vmatpush1.bf16.msra.mxu0 %v721_v47  ;;  %496 = vmatpush1.bf16.msra.mxu1 %v722_v48 }
  0x30   :  { %454 = vmatprep.subr.bf16.mxu0 %v723_v49  ;;  %497 = vmatprep.subr.bf16.mxu1 %v725_v50 }
  0x33   :  { %455 = vmatpush1.bf16.msra.mxu0 %v727_v51  ;;  %498 = vmatpush1.bf16.msra.mxu1 %v728_v52 }
  0x34   :  { %456 = vmatprep.subr.bf16.mxu0 %v729_v53  ;;  %499 = vmatprep.subr.bf16.mxu1 %v731_v54 }
  0x37   :  { %457 = vmatpush1.bf16.msra.mxu0 %v733_v55  ;;  %500 = vmatpush1.bf16.msra.mxu1 %v734_v56 }
  0x38   :  { %458 = vmatprep.subr.bf16.mxu0 %v735_v57  ;;  %501 = vmatprep.subr.bf16.mxu1 %v737_v58 }
  0x3b   :  { %459 = vmatpush1.bf16.msra.mxu0 %v739_v59  ;;  %502 = vmatpush1.bf16.msra.mxu1 %v740_v60 }
  0x3c   :  { %460 = vmatprep.subr.bf16.mxu0 %v741_v61  ;;  %503 = vmatprep.subr.bf16.mxu1 %v743_v62 }
  0x3f   :  { %461 = vmatpush1.bf16.msra.mxu0 %v745_v63  ;;  %504 = vmatpush1.bf16.msra.mxu1 %v746_v0 }
  0x42   :  { %463 = vmatmul.mubr.bf16.vlgmr.msra.gmra.mrb[0].mxu0 %v747_v1  ;;  %506 = vmatmul.mubr.bf16.vlgmr.msra.gmra.mrb[0].mxu1 %v747_v1 }
 0x115   :  { %v464_v13 = vpop.f32.mrb[0].mxu0  ;;  %v507_v14 = vpop.f32.mrb[0].mxu1 }
 0x116   :  { %v565_v15 = vadd.f32 %v548_v9, %v464_v13  ;;  %v567_v16 = vadd.f32 %v556_v10, %v507_v14  ;;  %v466_v17 = vpop.f32.mrb[1].mxu0  ;;  %v509_v18 = vpop.f32.mrb[1].mxu1 }
 0x117   :  { %v566_v19 = vadd.f32 %v552_v11, %v466_v17  ;;  %v568_v20 = vadd.f32 %v560_v12, %v509_v18  ;;  %v468_v21 = vpop.f32.mrb[2].mxu0  ;;  %v511_v22 = vpop.f32.mrb[2].mxu1 }
 0x118   :  { %573 = vst [vmem:[%s998_s3] sm:$0xff] %v565_v15  ;;  %575 = vst [vmem:[%s998_s3 + $0x10] sm:$0xff] %v567_v16  ;;  %v569_v23 = vadd.f32 %v548_v9, %v468_v21  ;;  %v571_v24 = vadd.f32 %v556_v10, %v511_v22  ;;  %v470_v25 = vpop.f32.mrb[3].mxu0  ;;  %v513_v26 = vpop.f32.mrb[3].mxu1 }
 0x119   :  { %574 = vst [vmem:[%s998_s3 + $0x8] sm:$0xff] %v566_v19  ;;  %576 = vst [vmem:[%s998_s3 + $0x18] sm:$0xff] %v568_v20  ;;  %v570_v27 = vadd.f32 %v552_v11, %v470_v25  ;;  %v572_v28 = vadd.f32 %v560_v12, %v513_v26 }
 0x11a   :  { %577 = vst [vmem:[%s998_s3 + $0x20] sm:$0xff] %v569_v23  ;;  %579 = vst [vmem:[%s998_s3 + $0x30] sm:$0xff] %v571_v24 }
 0x11b   :  { %578 = vst [vmem:[%s998_s3 + $0x28] sm:$0xff] %v570_v27  ;;  %580 = vst [vmem:[%s998_s3 + $0x38] sm:$0xff] %v572_v28 }

// kernel: _lambda_.115
= control target key start
LH: loop header
LB: loop body
LE: loop exit
PB: predicated region body
PF: predicated region fallthrough
CT: control target
= control target key end

     0   :  { %v24_v0 = vlaneseq  ;;  %s184_s1 = inlined_call_operand.vmem [shape: f32[1,512], index: 1, kind: input, shape index: {}]   ;;  %s185_s2 = inlined_call_operand.vmem [shape: f32[1,512], index: 2, kind: input, shape index: {}]   ;;  %s186_s0 = inlined_call_operand.vmem [shape: f32[16,512], index: 0, kind: input, shape index: {}]   ;;  %s187_s3 = inlined_call_operand.vmem [shape: bf16[16,512], index: 3, kind: output, shape index: {}]  }
   0x1   :  { %v22_v2 = vld [vmem:[%s184_s1] sm:$0xf]  ;;  %v15_v5 = vld [vmem:[%s186_s0 + $0x8] sm:$0xff]  ;;  %v16_v10 = vld [vmem:[%s186_s0 + $0x10] sm:$0xff] }
   0x2   :  { %v25_v1 = vshrl.u32 %v24_v0, 7  ;;  %v52_v3 = vld [vmem:[%s185_s2] sm:$0xf]  ;;  %v19_v12 = vld [vmem:[%s186_s0 + $0x28] sm:$0xff]  ;;  %v17_v17 = vld [vmem:[%s186_s0 + $0x18] sm:$0xff] }
   0x3   :  { %v14_v4 = vld [vmem:[%s186_s0] sm:$0xff]  ;;  %v20_v18 = vld [vmem:[%s186_s0 + $0x30] sm:$0xff]  ;;  %v21_v19 = vld [vmem:[%s186_s0 + $0x38] sm:$0xff] }
   0x4   :  { %v26_v6 = vsub.s32 0, %v25_v1  ;;  %v30_v7 = vsub.s32 1, %v25_v1  ;;  %v34_v8 = vsub.s32 2, %v25_v1  ;;  %v38_v9 = vsub.s32 3, %v25_v1  ;;  %v18_v11 = vld [vmem:[%s186_s0 + $0x20] sm:$0xff] }
   0x6   :  { %v27_v13 = vrot.slane %v22_v2, %v26_v6  ;;  %v31_v14 = vrot.slane %v22_v2, %v30_v7  ;;  %v57_v15 = vrot.slane %v52_v3, %v26_v6  ;;  %v61_v16 = vrot.slane %v52_v3, %v30_v7 }
   0x7   :  { %v35_v20 = vrot.slane %v22_v2, %v34_v8  ;;  %v39_v21 = vrot.slane %v22_v2, %v38_v9  ;;  %v65_v22 = vrot.slane %v52_v3, %v34_v8  ;;  %v69_v23 = vrot.slane %v52_v3, %v38_v9 }
   0x8   :  { %v44_v24 = vmul.f32 %v27_v13, %v14_v4  ;;  %v45_v25 = vmul.f32 %v31_v14, %v15_v5  ;;  %v48_v26 = vmul.f32 %v27_v13, %v18_v11  ;;  %v49_v27 = vmul.f32 %v31_v14, %v19_v12 }
   0x9   :  { %v46_v28 = vmul.f32 %v35_v20, %v16_v10  ;;  %v47_v29 = vmul.f32 %v39_v21, %v17_v17  ;;  %v50_v30 = vmul.f32 %v35_v20, %v20_v18  ;;  %v51_v31 = vmul.f32 %v39_v21, %v21_v19 }
   0xa   :  { %v74_v32 = vadd.f32 %v57_v15, %v44_v24  ;;  %v75_v33 = vadd.f32 %v61_v16, %v45_v25  ;;  %v78_v34 = vadd.f32 %v57_v15, %v48_v26  ;;  %v79_v35 = vadd.f32 %v61_v16, %v49_v27 }
   0xb   :  { %v76_v36 = vadd.f32 %v65_v22, %v46_v28  ;;  %v77_v37 = vadd.f32 %v69_v23, %v47_v29  ;;  %v80_v38 = vadd.f32 %v65_v22, %v50_v30  ;;  %v81_v39 = vadd.f32 %v69_v23, %v51_v31 }
   0xc   :  { %v118_v40 = vpack.c.bf16 %v75_v33, %v74_v32  ;;  %v120_v41 = vpack.c.bf16 %v79_v35, %v78_v34 }
   0xd   :  { %v119_v42 = vpack.c.bf16 %v77_v37, %v76_v36  ;;  %v121_v43 = vpack.c.bf16 %v81_v39, %v80_v38 }
   0xe   :  { %106 = vst [vmem:[%s187_s3] sm:$0xff] %v118_v40  ;;  %108 = vst [vmem:[%s187_s3 + $0x10] sm:$0xff] %v120_v41 }
   0xf   :  { %107 = vst [vmem:[%s187_s3 + $0x8] sm:$0xff] %v119_v42  ;;  %109 = vst [vmem:[%s187_s3 + $0x18] sm:$0xff] %v121_v43 }

// kernel: _lambda_.117
= control target key start
LH: loop header
LB: loop body
LE: loop exit
PB: predicated region body
PF: predicated region fallthrough
CT: control target
= control target key end

     0   :  { %v27_v0 = vlaneseq  ;;  %s232_s0 = inlined_call_operand.vmem [shape: f32[16,512], index: 0, kind: input, shape index: {}]   ;;  %s233_s1 = inlined_call_operand.vmem [shape: bf16[16,512], index: 1, kind: input, shape index: {}]   ;;  %s234_s2 = inlined_call_operand.vmem [shape: f32[1,512], index: 2, kind: input, shape index: {}]   ;;  %s235_s3 = inlined_call_operand.vmem [shape: f32[1,512], index: 3, kind: input, shape index: {}]   ;;  %s236_s4 = inlined_call_operand.vmem [shape: bf16[16,512], index: 4, kind: output, shape index: {}]  }
   0x1   :  { %v85_v2 = vld [vmem:[%s233_s1] sm:$0xff]  ;;  %v86_v8 = vld [vmem:[%s233_s1 + $0x8] sm:$0xff]  ;;  %v87_v14 = vld [vmem:[%s233_s1 + $0x10] sm:$0xff] }
   0x2   :  { %v28_v1 = vshrl.u32 %v27_v0, 7  ;;  %v17_v3 = vld [vmem:[%s232_s0] sm:$0xff]  ;;  %v89_v6 = vunpack.c.l.bf16 %v85_v2  ;;  %v90_v7 = vunpack.c.h.bf16 %v85_v2  ;;  %v18_v9 = vld [vmem:[%s232_s0 + $0x8] sm:$0xff]  ;;  %v19_v15 = vld [vmem:[%s232_s0 + $0x10] sm:$0xff]  ;;  %v91_v16 = vunpack.c.l.bf16 %v86_v8 }
   0x3   :  { %v25_v4 = vld [vmem:[%s234_s2] sm:$0xf]  ;;  %v92_v17 = vunpack.c.h.bf16 %v86_v8  ;;  %v22_v19 = vld [vmem:[%s232_s0 + $0x28] sm:$0xff]  ;;  %v93_v20 = vunpack.c.l.bf16 %v87_v14  ;;  %v94_v21 = vunpack.c.h.bf16 %v87_v14  ;;  %v20_v26 = vld [vmem:[%s232_s0 + $0x18] sm:$0xff] }
   0x4   :  { %v55_v5 = vld [vmem:[%s235_s3] sm:$0xf]  ;;  %v29_v10 = vsub.s32 0, %v28_v1  ;;  %v33_v11 = vsub.s32 1, %v28_v1  ;;  %v37_v12 = vsub.s32 2, %v28_v1  ;;  %v41_v13 = vsub.s32 3, %v28_v1 }
   0x5   :  { %v21_v18 = vld [vmem:[%s232_s0 + $0x20] sm:$0xff]  ;;  %v23_v27 = vld [vmem:[%s232_s0 + $0x30] sm:$0xff]  ;;  %v24_v28 = vld [vmem:[%s232_s0 + $0x38] sm:$0xff] }
   0x6   :  { %v30_v22 = vrot.slane %v25_v4, %v29_v10  ;;  %v34_v23 = vrot.slane %v25_v4, %v33_v11  ;;  %v60_v24 = vrot.slane %v55_v5, %v29_v10  ;;  %v64_v25 = vrot.slane %v55_v5, %v33_v11  ;;  %v88_v45 = vld [vmem:[%s233_s1 + $0x18] sm:$0xff] }
   0x7   :  { %v38_v29 = vrot.slane %v25_v4, %v37_v12  ;;  %v42_v30 = vrot.slane %v25_v4, %v41_v13  ;;  %v68_v31 = vrot.slane %v55_v5, %v37_v12  ;;  %v72_v32 = vrot.slane %v55_v5, %v41_v13 }
   0x8   :  { %v47_v33 = vmul.f32 %v30_v22, %v17_v3  ;;  %v48_v34 = vmul.f32 %v34_v23, %v18_v9  ;;  %v51_v35 = vmul.f32 %v30_v22, %v21_v18  ;;  %v52_v36 = vmul.f32 %v34_v23, %v22_v19 }
   0x9   :  { %v49_v37 = vmul.f32 %v38_v29, %v19_v15  ;;  %v50_v38 = vmul.f32 %v42_v30, %v20_v26  ;;  %v53_v39 = vmul.f32 %v38_v29, %v23_v27  ;;  %v54_v40 = vmul.f32 %v42_v30, %v24_v28 }
   0xa   :  { %v77_v41 = vadd.f32 %v60_v24, %v47_v33  ;;  %v78_v42 = vadd.f32 %v64_v25, %v48_v34  ;;  %v81_v43 = vadd.f32 %v60_v24, %v51_v35  ;;  %v82_v44 = vadd.f32 %v64_v25, %v52_v36 }
   0xb   :  { %v79_v46 = vadd.f32 %v68_v31, %v49_v37  ;;  %v80_v47 = vadd.f32 %v72_v32, %v50_v38  ;;  %v83_v48 = vadd.f32 %v68_v31, %v53_v39  ;;  %v84_v49 = vadd.f32 %v72_v32, %v54_v40 }
   0xc   :  { %v97_v50 = vadd.f32 %v89_v6, %v77_v41  ;;  %v98_v51 = vadd.f32 %v90_v7, %v78_v42  ;;  %v101_v52 = vadd.f32 %v93_v20, %v81_v43  ;;  %v102_v53 = vadd.f32 %v94_v21, %v82_v44 }
   0xd   :  { %v99_v54 = vadd.f32 %v91_v16, %v79_v46  ;;  %v100_v55 = vadd.f32 %v92_v17, %v80_v47  ;;  %v95_v56 = vunpack.c.l.bf16 %v88_v45  ;;  %v96_v57 = vunpack.c.h.bf16 %v88_v45 }
   0xe   :  { %v105_v58 = vmax.f32 %v97_v50, 0.0  ;;  %v106_v59 = vmax.f32 %v98_v51, 0.0  ;;  %v109_v60 = vmax.f32 %v101_v52, 0.0  ;;  %v110_v61 = vmax.f32 %v102_v53, 0.0 }
   0xf   :  { %v107_v62 = vmax.f32 %v99_v54, 0.0  ;;  %v108_v63 = vmax.f32 %v100_v55, 0.0  ;;  %v103_v0 = vadd.f32 %v95_v56, %v83_v48  ;;  %v104_v1 = vadd.f32 %v96_v57, %v84_v49 }
  0x10   :  { %v149_v2 = vpack.c.bf16 %v106_v59, %v105_v58  ;;  %v151_v3 = vpack.c.bf16 %v110_v61, %v109_v60 }
  0x11   :  { %v150_v4 = vpack.c.bf16 %v108_v63, %v107_v62  ;;  %v111_v5 = vmax.f32 %v103_v0, 0.0  ;;  %v112_v6 = vmax.f32 %v104_v1, 0.0 }
  0x12   :  { %137 = vst [vmem:[%s236_s4] sm:$0xff] %v149_v2  ;;  %139 = vst [vmem:[%s236_s4 + $0x10] sm:$0xff] %v151_v3 }
  0x13   :  { %138 = vst [vmem:[%s236_s4 + $0x8] sm:$0xff] %v150_v4  ;;  %v152_v7 = vpack.c.bf16 %v112_v6, %v111_v5 }
  0x15   :  { %140 = vst [vmem:[%s236_s4 + $0x18] sm:$0xff] %v152_v7 }

// kernel: _lambda_.124
= control target key start
LH: loop header
LB: loop body
LE: loop exit
PB: predicated region body
PF: predicated region fallthrough
CT: control target
= control target key end

     0   :  { %s204_s6 = smov 0   ;;  %s225_s0 = inlined_call_operand.vmem [shape: bf16[2,1,512], index: 0, kind: input, shape index: {}]   ;;  %s226_s1 = inlined_call_operand.vmem [shape: f32[2,1,512], index: 1, kind: output, shape index: {}]  }
   0x1 LB: > { %s182_s7 = sadd.s32 4294967295, %s206_s6   ;;  %p186_p0 = scmp.ge.s32.totalorder %s206_s6, 1  ;;  %s206_s6 = sphi %s204_s6, %s11_s6  }
   0x2   : > { %p86_p1 = scmp.lt.s32.totalorder %s206_s6, 3 }
   0x4   : > { %p87_p2 = pnand %p186_p0, %p86_p1 }
   0x5   : > { %p104_p3 = scmp.lt.s32.totalorder (!%p87_p2), %s182_s7, 1  ;;  %v119_v0 = vlaneseq (!%p87_p2)  ;;  %v208_v1 = vmov (!%p87_p2), 1966171168  }
   0x6   : > { %90 = sbr.rel (%p87_p2) target bundleno = 22 (0x16), region = 24  ;;  %v117_v2 = vunpack.c.l.s4 (!%p87_p2), %v208_v1 }
   0x7   : > { %v120_v3 = vshrl.u32 (!%p87_p2), %v119_v0, 7  ;;  %vm126_vm0 = vcmp.lt.s32.totalorder (!%p87_p2), %v119_v0, 512 }
   0x8   : > { %v118_v4 = vunpack.c.0.s8 (!%p87_p2), %v117_v2 }
   0xa   : > { %v121_v5 = vsub.s32 (!%p87_p2), %v118_v4, %v120_v3 }
   0xd   : > { %s228_s7 = smov (!%p104_p3, %s182_s7), 1 }
   0xe   : > { %s187_s8 = sshll.u32 %s228_s7, 2 }
   0xf   : > { %s107_s11 = scalar_lea.vmem %s225_s0, %s187_s8  ;;  %s111_s14 = scalar_lea.vmem %s226_s1, %s187_s8 }
  0x10   : > { %v112_v6 = vld [vmem:[%s107_s11] sm:$0xf] }
  0x11   : > { %v113_v7 = vunpack.c.l.bf16 %v112_v6 }
  0x13   : > { %v122_v8 = vrot.slane %v113_v7, %v121_v5 }
  0x15   : > { %128 = vst.msk [vmem:[%s111_s14] sm:$0xf] %vm126_vm0, %v122_v8 }
  0x16 PF: > { %s11_s6 = sadd.s32 1, %s206_s6  }
  0x17   : > { %p8_p4 = scmp.ge.s32.totalorder %s11_s6, 4  }
  0x19   :  { %10 = sbr.rel (!%p8_p4) target bundleno = 1 (0x1), region = 54 }

// kernel: _lambda_.125
= control target key start
LH: loop header
LB: loop body
LE: loop exit
PB: predicated region body
PF: predicated region fallthrough
CT: control target
= control target key end

     0   :  { %s665_s1 = inlined_call_operand.vmem [shape: bf16[512,128], index: 1, kind: input, shape index: {}]   ;;  %s666_s0 = inlined_call_operand.vmem [shape: bf16[16,512], index: 0, kind: input, shape index: {}]   ;;  %s667_s2 = inlined_call_operand.vmem [shape: f32[1,128], index: 2, kind: input, shape index: {}]   ;;  %s668_s3 = inlined_call_operand.vmem [shape: f32[16,128], index: 3, kind: output, shape index: {}]  }
   0x1   :  { %v490_v0 = vld [vmem:[%s665_s1 + $0x40] sm:$0xff]   ;;  %v494_v4 = vld [vmem:[%s665_s1 + $0x48] sm:$0xff]   ;;  %v498_v8 = vld [vmem:[%s665_s1 + $0x50] sm:$0xff]  }
   0x2   :  { %v491_v1 = vld [vmem:[%s665_s1 + $0xc0] sm:$0xff]   ;;  %446 = vmatprep.subr.bf16.mxu0 %v490_v0  ;;  %v495_v5 = vld [vmem:[%s665_s1 + $0xc8] sm:$0xff]   ;;  %v499_v9 = vld [vmem:[%s665_s1 + $0xd0] sm:$0xff]  }
   0x3   :  { %v492_v2 = vld [vmem:[%s665_s1] sm:$0xff]   ;;  %468 = vmatprep.subr.bf16.mxu1 %v491_v1  ;;  %v496_v6 = vld [vmem:[%s665_s1 + $0x8] sm:$0xff]   ;;  %v500_v10 = vld [vmem:[%s665_s1 + $0x10] sm:$0xff]  }
   0x4   :  { %v493_v3 = vld [vmem:[%s665_s1 + $0x80] sm:$0xff]   ;;  %447 = vmatpush3.bf16.msra.mxu0 %v492_v2  ;;  %v497_v7 = vld [vmem:[%s665_s1 + $0x88] sm:$0xff]   ;;  %v501_v11 = vld [vmem:[%s665_s1 + $0x90] sm:$0xff]  }
   0x5   :  { %469 = vmatpush3.bf16.msra.mxu1 %v493_v3  ;;  %448 = vmatprep.subr.bf16.mxu0 %v494_v4  ;;  %v502_v12 = vld [vmem:[%s665_s1 + $0x58] sm:$0xff]   ;;  %v506_v16 = vld [vmem:[%s665_s1 + $0x60] sm:$0xff]   ;;  %v510_v20 = vld [vmem:[%s665_s1 + $0x68] sm:$0xff]  }
   0x6   :  { %470 = vmatprep.subr.bf16.mxu1 %v495_v5  ;;  %v503_v13 = vld [vmem:[%s665_s1 + $0xd8] sm:$0xff]   ;;  %v507_v17 = vld [vmem:[%s665_s1 + $0xe0] sm:$0xff]   ;;  %v511_v21 = vld [vmem:[%s665_s1 + $0xe8] sm:$0xff]  }
   0x7   :  { %v504_v14 = vld [vmem:[%s665_s1 + $0x18] sm:$0xff]   ;;  %v508_v18 = vld [vmem:[%s665_s1 + $0x20] sm:$0xff]   ;;  %v512_v22 = vld [vmem:[%s665_s1 + $0x28] sm:$0xff]  }
   0x8   :  { %449 = vmatpush3.bf16.msra.mxu0 %v496_v6  ;;  %v505_v15 = vld [vmem:[%s665_s1 + $0x98] sm:$0xff]   ;;  %v509_v19 = vld [vmem:[%s665_s1 + $0xa0] sm:$0xff]   ;;  %v513_v23 = vld [vmem:[%s665_s1 + $0xa8] sm:$0xff]  }
   0x9   :  { %471 = vmatpush3.bf16.msra.mxu1 %v497_v7  ;;  %450 = vmatprep.subr.bf16.mxu0 %v498_v8  ;;  %v514_v24 = vld [vmem:[%s665_s1 + $0x70] sm:$0xff]   ;;  %v518_v28 = vld [vmem:[%s665_s1 + $0x78] sm:$0xff]   ;;  %v445_v45 = vld [vmem:[%s667_s2] ss:$0 sm:$0xff] }
   0xa   :  { %472 = vmatprep.subr.bf16.mxu1 %v499_v9  ;;  %v515_v25 = vld [vmem:[%s665_s1 + $0xf0] sm:$0xff]   ;;  %v519_v29 = vld [vmem:[%s665_s1 + $0xf8] sm:$0xff]  }
   0xb   :  { %v516_v26 = vld [vmem:[%s665_s1 + $0x30] sm:$0xff]   ;;  %v520_v30 = vld [vmem:[%s665_s1 + $0x38] sm:$0xff]  }
   0xc   :  { %451 = vmatpush3.bf16.msra.mxu0 %v500_v10  ;;  %v517_v27 = vld [vmem:[%s665_s1 + $0xb0] sm:$0xff]   ;;  %v521_v31 = vld [vmem:[%s665_s1 + $0xb8] sm:$0xff]  }
   0xd   :  { %473 = vmatpush3.bf16.msra.mxu1 %v501_v11  ;;  %452 = vmatprep.subr.bf16.mxu0 %v502_v12  ;;  %v522_v32 = vld [vmem:[%s666_s0] ss:$16 sps:$4 sm:$0xff]   ;;  %v524_v33 = vld [vmem:[%s666_s0 + $0x4] ss:$16 sps:$4 sm:$0xff]   ;;  %v525_v34 = vld [vmem:[%s666_s0 + $0x8] ss:$16 sps:$4 sm:$0xff]  }
   0xe   :  { %474 = vmatprep.subr.bf16.mxu1 %v503_v13  ;;  %v527_v35 = vld [vmem:[%s666_s0 + $0xc] ss:$16 sps:$4 sm:$0xff]   ;;  %335 = vmatprep.mubr.bf16.mxu0 %v524_v33 }
   0xf   :  { %376 = vmatprep.mubr.bf16.mxu1 %v527_v35 }
  0x10   :  { %453 = vmatpush3.bf16.msra.mxu0 %v504_v14 }
  0x11   :  { %475 = vmatpush3.bf16.msra.mxu1 %v505_v15  ;;  %454 = vmatprep.subr.bf16.mxu0 %v506_v16 }
  0x12   :  { %476 = vmatprep.subr.bf16.mxu1 %v507_v17 }
  0x14   :  { %455 = vmatpush3.bf16.msra.mxu0 %v508_v18 }
  0x15   :  { %477 = vmatpush3.bf16.msra.mxu1 %v509_v19  ;;  %456 = vmatprep.subr.bf16.mxu0 %v510_v20 }
  0x16   :  { %478 = vmatprep.subr.bf16.mxu1 %v511_v21 }
  0x18   :  { %457 = vmatpush3.bf16.msra.mxu0 %v512_v22 }
  0x19   :  { %479 = vmatpush3.bf16.msra.mxu1 %v513_v23  ;;  %458 = vmatprep.subr.bf16.mxu0 %v514_v24 }
  0x1a   :  { %480 = vmatprep.subr.bf16.mxu1 %v515_v25 }
  0x1c   :  { %459 = vmatpush3.bf16.msra.mxu0 %v516_v26 }
  0x1d   :  { %481 = vmatpush3.bf16.msra.mxu1 %v517_v27  ;;  %460 = vmatprep.subr.bf16.mxu0 %v518_v28 }
  0x1e   :  { %482 = vmatprep.subr.bf16.mxu1 %v519_v29 }
  0x20   :  { %461 = vmatpush3.bf16.msra.mxu0 %v520_v30 }
  0x21   :  { %483 = vmatpush3.bf16.msra.mxu1 %v521_v31 }
  0x23   :  { %336 = vmatmul.mubr.bf16.vlgmr.msra.gmra.mrb[0].mxu0 %v522_v32 }
  0x24   :  { %377 = vmatmul.mubr.bf16.vlgmr.msra.gmra.mrb[0].mxu1 %v525_v34 }
  0xf6   :  { %v462_v36 = vpop.f32.mrb[0].mxu0 }
  0xf7   :  { %v484_v37 = vpop.f32.mrb[0].mxu1  ;;  %v463_v38 = vpop.f32.mrb[1].mxu0 }
  0xf8   :  { %v464_v39 = vadd.f32 %v463_v38, %v462_v36  ;;  %v485_v40 = vpop.f32.mrb[1].mxu1  ;;  %v465_v41 = vpop.f32.mrb[2].mxu0 }
  0xf9   :  { %v486_v42 = vadd.f32 %v485_v40, %v484_v37  ;;  %v487_v43 = vpop.f32.mrb[2].mxu1  ;;  %v466_v44 = vpop.f32.mrb[3].mxu0 }
  0xfa   :  { %v467_v46 = vadd.f32 %v466_v44, %v465_v41  ;;  %v488_v47 = vpop.f32.mrb[3].mxu1 }
  0xfb   :  { %v379_v48 = vadd.f32 %v486_v42, %v464_v39  ;;  %v489_v49 = vadd.f32 %v488_v47, %v487_v43 }
  0xfd   :  { %v401_v50 = vadd.f32 %v445_v45, %v379_v48  ;;  %v382_v51 = vadd.f32 %v489_v49, %v467_v46 }
  0xff   :  { %403 = vst [vmem:[%s668_s3] sm:$0xff] %v401_v50  ;;  %v402_v52 = vadd.f32 %v445_v45, %v382_v51 }
 0x101   :  { %404 = vst [vmem:[%s668_s3 + $0x8] sm:$0xff] %v402_v52 }

</bundles_post_ra>
